<compile_context>
chip_gen: v5e
topology: v5e:2x2
jax: 0.10.0
libtpu: 0.0.40
codegen_flags: <defaults>
</compile_context>

<pallas_src>
import functools

import jax
import jax.numpy as jnp
from jax import lax
from jax.experimental import pallas as pl
from jax.experimental.pallas import tpu as pltpu

LANE = 128          # Cout padded to the lane width: lane-dense stores + BN math
SUBLANE = 8
ROW_TARGET = 2048   # target conv-output rows per grid step


def _round_up(x, m):
    return (x + m - 1) // m * m


def _conv_tile(x_ref, w_ref, t, *, th, ow, cin, kh_size, kw_size, stride, cout_pad):
    """Conv for one tile of `th` output rows x `ow` output cols of one image.

    x_ref: (1, Hp, Wp, cin) bf16 VMEM-resident padded image (fused im2col: no
           patch matrix ever touches HBM).
    w_ref: (kh*kw, cin, cout_pad) bf16 taps.
    Returns f32 (th*ow, cout_pad).
    """
    rows = th * ow
    ih0 = t * th * stride                       # first padded-input row of tile
    acc = jnp.zeros((rows, cout_pad), jnp.float32)
    for kh in range(kh_size):
        for kw in range(kw_size):
            if stride == 1:
                xs = x_ref[0, pl.ds(ih0 + kh, th), pl.ds(kw, ow), :]
            else:
                xs = x_ref[0, pl.ds(ih0 + kh, th, stride), pl.ds(kw, ow, stride), :]
            acc = acc + jnp.dot(xs.reshape(rows, cin), w_ref[kh * kw_size + kw],
                                preferred_element_type=jnp.float32)
    return acc


def _stats_kernel(x_ref, w_ref, psum_ref, psq_ref, *, th, ow, cin, kh_size,
                  kw_size, stride, cout_pad):
    t = pl.program_id(1)
    conv = _conv_tile(x_ref, w_ref, t, th=th, ow=ow, cin=cin, kh_size=kh_size,
                      kw_size=kw_size, stride=stride, cout_pad=cout_pad)
    # Keep (8, Cout_pad) sublane partials: cross-vreg adds only, no XLU reduce.
    c3 = conv.reshape(-1, SUBLANE, cout_pad)
    psum_ref[...] = jnp.sum(c3, axis=0)[None]
    psq_ref[...] = jnp.sum(c3 * c3, axis=0)[None]


def _apply_kernel(x_ref, w_ref, scale_ref, bias_ref, out_ref, *, th, ow, cin,
                  kh_size, kw_size, stride, cout_pad):
    t = pl.program_id(1)
    conv = _conv_tile(x_ref, w_ref, t, th=th, ow=ow, cin=cin, kh_size=kh_size,
                      kw_size=kw_size, stride=stride, cout_pad=cout_pad)
    y = conv * scale_ref[...] + bias_ref[...]   # BN folded to one FMA / element
    out_ref[...] = jnp.maximum(y, 0.0).astype(out_ref.dtype)


def conv_block_forward(x, weight, gamma, beta, *, stride, padding, eps=1e-5):
    """x: (N, Cin, H, W) NCHW f32; weight: (Cout, Cin, KH, KW). Returns NCHW f32."""
    N, Cin, H, W = x.shape
    Cout, Cin_w, KH, KW = weight.shape
    assert Cin_w == Cin
    OH = (H + 2 * padding - KH) // stride + 1
    OW = (W + 2 * padding - KW) // stride + 1
    Hp, Wp = H + 2 * padding, W + 2 * padding

    Cin_p = _round_up(Cin, SUBLANE)        # contraction dim multiple of sublanes
    Cout_pad = _round_up(Cout, LANE)       # lane-dense output channels

    # Row tile: largest divisor of OH with tiles under ROW_TARGET rows and rows a
    # multiple of the sublane count (for the sublane-partial stats reshape).
    cands = [d for d in range(1, OH + 1) if OH % d == 0 and d * OW <= ROW_TARGET]
    if not cands:
        cands = [1]
    aligned = [d for d in cands if (d * OW) % SUBLANE == 0]
    TH = max(aligned) if aligned else max(cands)
    rows = TH * OW
    assert rows % SUBLANE == 0, "TODO(synk): pad ragged row tiles (rows % 8 != 0)"
    n_oh = OH // TH
    M = N * OH * OW

    # bf16 BEFORE padding / layout (review): precision-neutral, halves traffic.
    x_nhwc = jnp.transpose(x, (0, 2, 3, 1)).astype(jnp.bfloat16)
    x_pad = jnp.pad(x_nhwc, ((0, 0), (padding, padding), (padding, padding),
                             (0, Cin_p - Cin)))

    # Weight taps: (KH*KW, Cin_p, Cout_pad) so tap (kh,kw) is w_ref[kh*KW+kw].
    w_taps = jnp.transpose(weight.astype(jnp.float32), (2, 3, 1, 0))  # (KH,KW,Cin,Cout)
    w_taps = w_taps.reshape(KH * KW, Cin, Cout)
    w_taps = jnp.pad(w_taps, ((0, 0), (0, Cin_p - Cin), (0, Cout_pad - Cout)))
    w_taps = w_taps.astype(jnp.bfloat16)

    kern_kw = dict(th=TH, ow=OW, cin=Cin_p, kh_size=KH, kw_size=KW,
                   stride=stride, cout_pad=Cout_pad)

    # Image block pinned across row tiles (DMA'd once per image); weights pinned
    # forever.  NOTE: for large-Cout layers add pipeline_mode=pl.Buffered(1) on
    # the constant-index specs to drop their second VMEM buffer.
    x_spec = pl.BlockSpec((1, Hp, Wp, Cin_p), lambda n, t: (n, 0, 0, 0))
    w_spec = pl.BlockSpec((KH * KW, Cin_p, Cout_pad), lambda n, t: (0, 0, 0))

    # Explicit VMEM budget sized from the per-step (double-buffered) working set.
    step_bytes = (2 * Hp * Wp * Cin_p * 2
                  + 2 * KH * KW * Cin_p * Cout_pad * 2
                  + 2 * rows * Cout_pad * 4
                  + 4 * SUBLANE * Cout_pad * 4)
    vmem_limit = int(min(max(4 * step_bytes, 32 * 1024 * 1024), 48 * 1024 * 1024))
    cparams = pltpu.CompilerParams(
        dimension_semantics=("parallel", "parallel"),   # v7x: both TCs usable
        vmem_limit_bytes=vmem_limit)

    flops = 2 * M * (Cin_p * KH * KW) * Cout_pad
    x_bytes = int(x_pad.size) * 2
    w_bytes = int(w_taps.size) * 2

    # ---- pass 1: per-tile partial batch statistics (fully parallel) -----------
    psum, psq = pl.pallas_call(
        functools.partial(_stats_kernel, **kern_kw),
        out_shape=(jax.ShapeDtypeStruct((N * n_oh, SUBLANE, Cout_pad), jnp.float32),
                   jax.ShapeDtypeStruct((N * n_oh, SUBLANE, Cout_pad), jnp.float32)),
        grid_spec=pltpu.PrefetchScalarGridSpec(
            num_scalar_prefetch=0,
            grid=(N, n_oh),
            in_specs=[x_spec, w_spec],
            out_specs=[
                pl.BlockSpec((1, SUBLANE, Cout_pad), lambda n, t: (n * n_oh + t, 0, 0)),
                pl.BlockSpec((1, SUBLANE, Cout_pad), lambda n, t: (n * n_oh + t, 0, 0)),
            ]),
        compiler_params=cparams,
        cost_estimate=pl.CostEstimate(
            flops=flops, transcendentals=0,
            bytes_accessed=x_bytes + w_bytes + 2 * N * n_oh * SUBLANE * Cout_pad * 4),
    )(x_pad, w_taps)

    # ---- fold BN into one per-channel scale/bias (tiny, plain JAX) ------------
    count = float(M)
    s1 = jnp.sum(psum, axis=(0, 1))
    s2 = jnp.sum(psq, axis=(0, 1))
    mean = s1 / count
    var = jnp.maximum(s2 / count - mean * mean, 0.0)
    inv_std = lax.rsqrt(var + eps)
    gamma_p = jnp.pad(gamma.astype(jnp.float32), (0, Cout_pad - Cout))
    beta_p = jnp.pad(beta.astype(jnp.float32), (0, Cout_pad - Cout))
    scale = (gamma_p * inv_std).reshape(1, Cout_pad)
    bias = (beta_p - mean * gamma_p * inv_std).reshape(1, Cout_pad)

    # ---- pass 2: recompute conv tile, normalize + ReLU, lane-dense store ------
    out_flat = pl.pallas_call(
        functools.partial(_apply_kernel, **kern_kw),
        out_shape=jax.ShapeDtypeStruct((M, Cout_pad), jnp.float32),
        grid_spec=pltpu.PrefetchScalarGridSpec(
            num_scalar_prefetch=0,
            grid=(N, n_oh),
            in_specs=[
                x_spec, w_spec,
                pl.BlockSpec((1, Cout_pad), lambda n, t: (0, 0)),
                pl.BlockSpec((1, Cout_pad), lambda n, t: (0, 0)),
            ],
            out_specs=pl.BlockSpec((rows, Cout_pad), lambda n, t: (n * n_oh + t, 0))),
        compiler_params=cparams,
        cost_estimate=pl.CostEstimate(
            flops=flops, transcendentals=0,
            bytes_accessed=x_bytes + w_bytes + M * Cout_pad * 4),
    )(x_pad, w_taps, scale, bias)

    # Drop channel padding and restore the module's NCHW/f32 interface.
    # TODO(synk): keep NHWC (and/or bf16) output when the consumer allows it to
    # skip this extra HBM round trip of the activations.
    out = out_flat[:, :Cout].reshape(N, OH, OW, Cout)
    return jnp.transpose(out, (0, 3, 1, 2))


def _reference(x, weight, gamma, beta, *, stride, padding, eps=1e-5,
               conv_dtype=jnp.float32):
    """Pure-JAX reference: conv -> train-mode BN -> ReLU."""
    conv = lax.conv_general_dilated(
        x.astype(conv_dtype), weight.astype(conv_dtype),
        window_strides=(stride, stride),
        padding=[(padding, padding), (padding, padding)],
        dimension_numbers=("NCHW", "OIHW", "NCHW"),
        preferred_element_type=jnp.float32)
    mean = jnp.mean(conv, axis=(0, 2, 3), keepdims=True)
    var = jnp.mean((conv - mean) ** 2, axis=(0, 2, 3), keepdims=True)
    y = (conv - mean) * lax.rsqrt(var + eps) \
        * gamma.reshape(1, -1, 1, 1) + beta.reshape(1, -1, 1, 1)
    return jnp.maximum(y, 0.0)


if __name__ == "__main__":
    # batch=2, in_channels=4, out_channels=8, spatial 16x16, k=3, stride=1, pad=1
    N, Cin, H, W = 2, 4, 16, 16
    Cout, ksize, stride, padding = 8, 3, 1, 1

    key = jax.random.PRNGKey(0)
    kx, kw, kg, kb = jax.random.split(key, 4)
    x = jax.random.normal(kx, (N, Cin, H, W), dtype=jnp.float32)
    weight = jax.random.normal(kw, (Cout, Cin, ksize, ksize), dtype=jnp.float32) * 0.1
    gamma = 1.0 + 0.1 * jax.random.normal(kg, (Cout,), dtype=jnp.float32)
    beta = 0.1 * jax.random.normal(kb, (Cout,), dtype=jnp.float32)

    fwd = jax.jit(functools.partial(conv_block_forward, stride=stride, padding=padding))
    out = jax.block_until_ready(fwd(x, weight, gamma, beta))
    assert out.shape == (N, Cout, H, W)

    # Precision-matched reference (bf16 MXU inputs, f32 accumulation & BN math).
    ref_bf16 = _reference(x, weight, gamma, beta, stride=stride, padding=padding,
                          conv_dtype=jnp.bfloat16)
    max_err = jnp.max(jnp.abs(out - ref_bf16))
    assert jnp.allclose(out, ref_bf16, atol=1e-3, rtol=1e-3), \
        f"max abs err vs precision-matched ref = {max_err}"

    # Coarse check vs the full-f32 (PyTorch-equivalent) path; bf16 MXU inputs
    # introduce ~1e-3-level differences, this only guards gross mistakes.
    ref_f32 = _reference(x, weight, gamma, beta, stride=stride, padding=padding,
                         conv_dtype=jnp.float32)
    assert jnp.allclose(out, ref_f32, atol=1e-1, rtol=1e-1), \
        f"max abs err vs f32 ref = {jnp.max(jnp.abs(out - ref_f32))}"

    print("KERNEL_OK")
</pallas_src>

<mosaic_0001>
module attributes {stable_mosaic.version = 11 : i64} {
  func.func @_stats_kernel(%arg0: i32, %arg1: i32, %arg2: memref<1x18x18x8xbf16, #tpu.memory_space<vmem>>, %arg3: memref<9x8x128xbf16, #tpu.memory_space<vmem>>, %arg4: memref<1x8x128xf32, #tpu.memory_space<vmem>>, %arg5: memref<1x8x128xf32, #tpu.memory_space<vmem>>) attributes {dimension_semantics = [#tpu.dimension_semantics<parallel>, #tpu.dimension_semantics<parallel>], iteration_bounds = array<i64: 2, 1>, scalar_prefetch = 0 : i64, scratch_operands = 0 : i64, tpu.core_type = #tpu.core_type<tc>, window_params = [{transform_indices = @transform_0, window_bounds = array<i64: 1, 18, 18, 8>}, {pipeline_mode = #tpu.pipeline_mode<synchronous>, transform_indices = @transform_1, window_bounds = array<i64: 9, 8, 128>}, {transform_indices = @transform_2, window_bounds = array<i64: 1, 8, 128>}, {transform_indices = @transform_3, window_bounds = array<i64: 1, 8, 128>}]} {
    %c16_i32 = arith.constant 16 : i32
    %0 = arith.muli %arg1, %c16_i32 : i32
    %c1_i32 = arith.constant 1 : i32
    %1 = arith.muli %0, %c1_i32 : i32
    %cst = arith.constant 0.000000e+00 : f32
    %2 = vector.broadcast %cst : f32 to vector<256x128xf32>
    %c0_i32 = arith.constant 0 : i32
    %3 = arith.addi %1, %c0_i32 : i32
    %c0 = arith.constant 0 : index
    %4 = arith.index_cast %3 : i32 to index
    %c0_0 = arith.constant 0 : index
    %c0_1 = arith.constant 0 : index
    %5 = vector.load %arg2[%c0, %4, %c0_0, %c0_1] : memref<1x18x18x8xbf16, #tpu.memory_space<vmem>>, vector<1x16x16x8xbf16>
    %6 = vector.shape_cast %5 : vector<1x16x16x8xbf16> to vector<16x16x8xbf16>
    %7 = vector.shape_cast %6 : vector<16x16x8xbf16> to vector<256x8xbf16>
    %c0_2 = arith.constant 0 : index
    %c0_3 = arith.constant 0 : index
    %c0_4 = arith.constant 0 : index
    %8 = vector.load %arg3[%c0_2, %c0_3, %c0_4] : memref<9x8x128xbf16, #tpu.memory_space<vmem>>, vector<1x8x128xbf16>
    %9 = vector.shape_cast %8 : vector<1x8x128xbf16> to vector<8x128xbf16>
    %cst_5 = arith.constant dense<0.000000e+00> : vector<256x128xf32>
    %10 = tpu.matmul %7, %9, %cst_5 {dimension_numbers = #tpu.dot_dimension_numbers<[1], [0], [0], [1], [0, 0, 1, 1], [], []>} : vector<256x8xbf16>, vector<8x128xbf16>, vector<256x128xf32> -> vector<256x128xf32>
    %11 = arith.addf %2, %10 : vector<256x128xf32>
    %c0_i32_6 = arith.constant 0 : i32
    %12 = arith.addi %1, %c0_i32_6 : i32
    %c0_7 = arith.constant 0 : index
    %13 = arith.index_cast %12 : i32 to index
    %c1 = arith.constant 1 : index
    %c0_8 = arith.constant 0 : index
    %14 = vector.load %arg2[%c0_7, %13, %c1, %c0_8] : memref<1x18x18x8xbf16, #tpu.memory_space<vmem>>, vector<1x16x16x8xbf16>
    %15 = vector.shape_cast %14 : vector<1x16x16x8xbf16> to vector<16x16x8xbf16>
    %16 = vector.shape_cast %15 : vector<16x16x8xbf16> to vector<256x8xbf16>
    %c1_9 = arith.constant 1 : index
    %c0_10 = arith.constant 0 : index
    %c0_11 = arith.constant 0 : index
    %17 = vector.load %arg3[%c1_9, %c0_10, %c0_11] : memref<9x8x128xbf16, #tpu.memory_space<vmem>>, vector<1x8x128xbf16>
    %18 = vector.shape_cast %17 : vector<1x8x128xbf16> to vector<8x128xbf16>
    %cst_12 = arith.constant dense<0.000000e+00> : vector<256x128xf32>
    %19 = tpu.matmul %16, %18, %cst_12 {dimension_numbers = #tpu.dot_dimension_numbers<[1], [0], [0], [1], [0, 0, 1, 1], [], []>} : vector<256x8xbf16>, vector<8x128xbf16>, vector<256x128xf32> -> vector<256x128xf32>
    %20 = arith.addf %11, %19 : vector<256x128xf32>
    %c0_i32_13 = arith.constant 0 : i32
    %21 = arith.addi %1, %c0_i32_13 : i32
    %c0_14 = arith.constant 0 : index
    %22 = arith.index_cast %21 : i32 to index
    %c2 = arith.constant 2 : index
    %c0_15 = arith.constant 0 : index
    %23 = vector.load %arg2[%c0_14, %22, %c2, %c0_15] : memref<1x18x18x8xbf16, #tpu.memory_space<vmem>>, vector<1x16x16x8xbf16>
    %24 = vector.shape_cast %23 : vector<1x16x16x8xbf16> to vector<16x16x8xbf16>
    %25 = vector.shape_cast %24 : vector<16x16x8xbf16> to vector<256x8xbf16>
    %c2_16 = arith.constant 2 : index
    %c0_17 = arith.constant 0 : index
    %c0_18 = arith.constant 0 : index
    %26 = vector.load %arg3[%c2_16, %c0_17, %c0_18] : memref<9x8x128xbf16, #tpu.memory_space<vmem>>, vector<1x8x128xbf16>
    %27 = vector.shape_cast %26 : vector<1x8x128xbf16> to vector<8x128xbf16>
    %cst_19 = arith.constant dense<0.000000e+00> : vector<256x128xf32>
    %28 = tpu.matmul %25, %27, %cst_19 {dimension_numbers = #tpu.dot_dimension_numbers<[1], [0], [0], [1], [0, 0, 1, 1], [], []>} : vector<256x8xbf16>, vector<8x128xbf16>, vector<256x128xf32> -> vector<256x128xf32>
    %29 = arith.addf %20, %28 : vector<256x128xf32>
    %c1_i32_20 = arith.constant 1 : i32
    %30 = arith.addi %1, %c1_i32_20 : i32
    %c0_21 = arith.constant 0 : index
    %31 = arith.index_cast %30 : i32 to index
    %c0_22 = arith.constant 0 : index
    %c0_23 = arith.constant 0 : index
    %32 = vector.load %arg2[%c0_21, %31, %c0_22, %c0_23] : memref<1x18x18x8xbf16, #tpu.memory_space<vmem>>, vector<1x16x16x8xbf16>
    %33 = vector.shape_cast %32 : vector<1x16x16x8xbf16> to vector<16x16x8xbf16>
    %34 = vector.shape_cast %33 : vector<16x16x8xbf16> to vector<256x8xbf16>
    %c3 = arith.constant 3 : index
    %c0_24 = arith.constant 0 : index
    %c0_25 = arith.constant 0 : index
    %35 = vector.load %arg3[%c3, %c0_24, %c0_25] : memref<9x8x128xbf16, #tpu.memory_space<vmem>>, vector<1x8x128xbf16>
    %36 = vector.shape_cast %35 : vector<1x8x128xbf16> to vector<8x128xbf16>
    %cst_26 = arith.constant dense<0.000000e+00> : vector<256x128xf32>
    %37 = tpu.matmul %34, %36, %cst_26 {dimension_numbers = #tpu.dot_dimension_numbers<[1], [0], [0], [1], [0, 0, 1, 1], [], []>} : vector<256x8xbf16>, vector<8x128xbf16>, vector<256x128xf32> -> vector<256x128xf32>
    %38 = arith.addf %29, %37 : vector<256x128xf32>
    %c1_i32_27 = arith.constant 1 : i32
    %39 = arith.addi %1, %c1_i32_27 : i32
    %c0_28 = arith.constant 0 : index
    %40 = arith.index_cast %39 : i32 to index
    %c1_29 = arith.constant 1 : index
    %c0_30 = arith.constant 0 : index
    %41 = vector.load %arg2[%c0_28, %40, %c1_29, %c0_30] : memref<1x18x18x8xbf16, #tpu.memory_space<vmem>>, vector<1x16x16x8xbf16>
    %42 = vector.shape_cast %41 : vector<1x16x16x8xbf16> to vector<16x16x8xbf16>
    %43 = vector.shape_cast %42 : vector<16x16x8xbf16> to vector<256x8xbf16>
    %c4 = arith.constant 4 : index
    %c0_31 = arith.constant 0 : index
    %c0_32 = arith.constant 0 : index
    %44 = vector.load %arg3[%c4, %c0_31, %c0_32] : memref<9x8x128xbf16, #tpu.memory_space<vmem>>, vector<1x8x128xbf16>
    %45 = vector.shape_cast %44 : vector<1x8x128xbf16> to vector<8x128xbf16>
    %cst_33 = arith.constant dense<0.000000e+00> : vector<256x128xf32>
    %46 = tpu.matmul %43, %45, %cst_33 {dimension_numbers = #tpu.dot_dimension_numbers<[1], [0], [0], [1], [0, 0, 1, 1], [], []>} : vector<256x8xbf16>, vector<8x128xbf16>, vector<256x128xf32> -> vector<256x128xf32>
    %47 = arith.addf %38, %46 : vector<256x128xf32>
    %c1_i32_34 = arith.constant 1 : i32
    %48 = arith.addi %1, %c1_i32_34 : i32
    %c0_35 = arith.constant 0 : index
    %49 = arith.index_cast %48 : i32 to index
    %c2_36 = arith.constant 2 : index
    %c0_37 = arith.constant 0 : index
    %50 = vector.load %arg2[%c0_35, %49, %c2_36, %c0_37] : memref<1x18x18x8xbf16, #tpu.memory_space<vmem>>, vector<1x16x16x8xbf16>
    %51 = vector.shape_cast %50 : vector<1x16x16x8xbf16> to vector<16x16x8xbf16>
    %52 = vector.shape_cast %51 : vector<16x16x8xbf16> to vector<256x8xbf16>
    %c5 = arith.constant 5 : index
    %c0_38 = arith.constant 0 : index
    %c0_39 = arith.constant 0 : index
    %53 = vector.load %arg3[%c5, %c0_38, %c0_39] : memref<9x8x128xbf16, #tpu.memory_space<vmem>>, vector<1x8x128xbf16>
    %54 = vector.shape_cast %53 : vector<1x8x128xbf16> to vector<8x128xbf16>
    %cst_40 = arith.constant dense<0.000000e+00> : vector<256x128xf32>
    %55 = tpu.matmul %52, %54, %cst_40 {dimension_numbers = #tpu.dot_dimension_numbers<[1], [0], [0], [1], [0, 0, 1, 1], [], []>} : vector<256x8xbf16>, vector<8x128xbf16>, vector<256x128xf32> -> vector<256x128xf32>
    %56 = arith.addf %47, %55 : vector<256x128xf32>
    %c2_i32 = arith.constant 2 : i32
    %57 = arith.addi %1, %c2_i32 : i32
    %c0_41 = arith.constant 0 : index
    %58 = arith.index_cast %57 : i32 to index
    %c0_42 = arith.constant 0 : index
    %c0_43 = arith.constant 0 : index
    %59 = vector.load %arg2[%c0_41, %58, %c0_42, %c0_43] : memref<1x18x18x8xbf16, #tpu.memory_space<vmem>>, vector<1x16x16x8xbf16>
    %60 = vector.shape_cast %59 : vector<1x16x16x8xbf16> to vector<16x16x8xbf16>
    %61 = vector.shape_cast %60 : vector<16x16x8xbf16> to vector<256x8xbf16>
    %c6 = arith.constant 6 : index
    %c0_44 = arith.constant 0 : index
    %c0_45 = arith.constant 0 : index
    %62 = vector.load %arg3[%c6, %c0_44, %c0_45] : memref<9x8x128xbf16, #tpu.memory_space<vmem>>, vector<1x8x128xbf16>
    %63 = vector.shape_cast %62 : vector<1x8x128xbf16> to vector<8x128xbf16>
    %cst_46 = arith.constant dense<0.000000e+00> : vector<256x128xf32>
    %64 = tpu.matmul %61, %63, %cst_46 {dimension_numbers = #tpu.dot_dimension_numbers<[1], [0], [0], [1], [0, 0, 1, 1], [], []>} : vector<256x8xbf16>, vector<8x128xbf16>, vector<256x128xf32> -> vector<256x128xf32>
    %65 = arith.addf %56, %64 : vector<256x128xf32>
    %c2_i32_47 = arith.constant 2 : i32
    %66 = arith.addi %1, %c2_i32_47 : i32
    %c0_48 = arith.constant 0 : index
    %67 = arith.index_cast %66 : i32 to index
    %c1_49 = arith.constant 1 : index
    %c0_50 = arith.constant 0 : index
    %68 = vector.load %arg2[%c0_48, %67, %c1_49, %c0_50] : memref<1x18x18x8xbf16, #tpu.memory_space<vmem>>, vector<1x16x16x8xbf16>
    %69 = vector.shape_cast %68 : vector<1x16x16x8xbf16> to vector<16x16x8xbf16>
    %70 = vector.shape_cast %69 : vector<16x16x8xbf16> to vector<256x8xbf16>
    %c7 = arith.constant 7 : index
    %c0_51 = arith.constant 0 : index
    %c0_52 = arith.constant 0 : index
    %71 = vector.load %arg3[%c7, %c0_51, %c0_52] : memref<9x8x128xbf16, #tpu.memory_space<vmem>>, vector<1x8x128xbf16>
    %72 = vector.shape_cast %71 : vector<1x8x128xbf16> to vector<8x128xbf16>
    %cst_53 = arith.constant dense<0.000000e+00> : vector<256x128xf32>
    %73 = tpu.matmul %70, %72, %cst_53 {dimension_numbers = #tpu.dot_dimension_numbers<[1], [0], [0], [1], [0, 0, 1, 1], [], []>} : vector<256x8xbf16>, vector<8x128xbf16>, vector<256x128xf32> -> vector<256x128xf32>
    %74 = arith.addf %65, %73 : vector<256x128xf32>
    %c2_i32_54 = arith.constant 2 : i32
    %75 = arith.addi %1, %c2_i32_54 : i32
    %c0_55 = arith.constant 0 : index
    %76 = arith.index_cast %75 : i32 to index
    %c2_56 = arith.constant 2 : index
    %c0_57 = arith.constant 0 : index
    %77 = vector.load %arg2[%c0_55, %76, %c2_56, %c0_57] : memref<1x18x18x8xbf16, #tpu.memory_space<vmem>>, vector<1x16x16x8xbf16>
    %78 = vector.shape_cast %77 : vector<1x16x16x8xbf16> to vector<16x16x8xbf16>
    %79 = vector.shape_cast %78 : vector<16x16x8xbf16> to vector<256x8xbf16>
    %c8 = arith.constant 8 : index
    %c0_58 = arith.constant 0 : index
    %c0_59 = arith.constant 0 : index
    %80 = vector.load %arg3[%c8, %c0_58, %c0_59] : memref<9x8x128xbf16, #tpu.memory_space<vmem>>, vector<1x8x128xbf16>
    %81 = vector.shape_cast %80 : vector<1x8x128xbf16> to vector<8x128xbf16>
    %cst_60 = arith.constant dense<0.000000e+00> : vector<256x128xf32>
    %82 = tpu.matmul %79, %81, %cst_60 {dimension_numbers = #tpu.dot_dimension_numbers<[1], [0], [0], [1], [0, 0, 1, 1], [], []>} : vector<256x8xbf16>, vector<8x128xbf16>, vector<256x128xf32> -> vector<256x128xf32>
    %83 = arith.addf %74, %82 : vector<256x128xf32>
    %84 = vector.shape_cast %83 : vector<256x128xf32> to vector<32x8x128xf32>
    %cst_61 = arith.constant dense<0.000000e+00> : vector<8x128xf32>
    %85 = vector.multi_reduction <add>, %84, %cst_61 [0] : vector<32x8x128xf32> to vector<8x128xf32>
    %86 = vector.shape_cast %85 : vector<8x128xf32> to vector<1x8x128xf32>
    %c0_62 = arith.constant 0 : index
    %c0_63 = arith.constant 0 : index
    %c0_64 = arith.constant 0 : index
    %87 = vector.load %arg4[%c0_62, %c0_63, %c0_64] : memref<1x8x128xf32, #tpu.memory_space<vmem>>, vector<1x8x128xf32>
    tpu.vector_store %arg4[%c0_62, %c0_63, %c0_64], %86 {strides = array<i32>} : memref<1x8x128xf32, #tpu.memory_space<vmem>>, vector<1x8x128xf32>,
    %88 = arith.mulf %84, %84 : vector<32x8x128xf32>
    %cst_65 = arith.constant dense<0.000000e+00> : vector<8x128xf32>
    %89 = vector.multi_reduction <add>, %88, %cst_65 [0] : vector<32x8x128xf32> to vector<8x128xf32>
    %90 = vector.shape_cast %89 : vector<8x128xf32> to vector<1x8x128xf32>
    %c0_66 = arith.constant 0 : index
    %c0_67 = arith.constant 0 : index
    %c0_68 = arith.constant 0 : index
    %91 = vector.load %arg5[%c0_66, %c0_67, %c0_68] : memref<1x8x128xf32, #tpu.memory_space<vmem>>, vector<1x8x128xf32>
    tpu.vector_store %arg5[%c0_66, %c0_67, %c0_68], %90 {strides = array<i32>} : memref<1x8x128xf32, #tpu.memory_space<vmem>>, vector<1x8x128xf32>,
    return
  }
  func.func @transform_0(%arg0: i32, %arg1: i32) -> (i32, i32, i32, i32) {
    %c0_i32 = arith.constant 0 : i32
    %c0_i32_0 = arith.constant 0 : i32
    %c0_i32_1 = arith.constant 0 : i32
    %c0_i32_2 = arith.constant 0 : i32
    return %arg0, %c0_i32, %c0_i32_0, %c0_i32_1 : i32, i32, i32, i32
  }
  func.func @transform_1(%arg0: i32, %arg1: i32) -> (i32, i32, i32) {
    %c0_i32 = arith.constant 0 : i32
    %c0_i32_0 = arith.constant 0 : i32
    %c0_i32_1 = arith.constant 0 : i32
    %c0_i32_2 = arith.constant 0 : i32
    return %c0_i32, %c0_i32_0, %c0_i32_1 : i32, i32, i32
  }
  func.func @transform_2(%arg0: i32, %arg1: i32) -> (i32, i32, i32) {
    %c1_i32 = arith.constant 1 : i32
    %0 = arith.muli %arg0, %c1_i32 : i32
    %1 = arith.addi %0, %arg1 : i32
    %c0_i32 = arith.constant 0 : i32
    %c0_i32_0 = arith.constant 0 : i32
    %c0_i32_1 = arith.constant 0 : i32
    return %1, %c0_i32, %c0_i32_0 : i32, i32, i32
  }
  func.func @transform_3(%arg0: i32, %arg1: i32) -> (i32, i32, i32) {
    %c1_i32 = arith.constant 1 : i32
    %0 = arith.muli %arg0, %c1_i32 : i32
    %1 = arith.addi %0, %arg1 : i32
    %c0_i32 = arith.constant 0 : i32
    %c0_i32_0 = arith.constant 0 : i32
    %c0_i32_1 = arith.constant 0 : i32
    return %1, %c0_i32, %c0_i32_0 : i32, i32, i32
  }
}

module attributes {stable_mosaic.version = 11 : i64} {
  func.func @_apply_kernel(%arg0: i32, %arg1: i32, %arg2: memref<1x18x18x8xbf16, #tpu.memory_space<vmem>>, %arg3: memref<9x8x128xbf16, #tpu.memory_space<vmem>>, %arg4: memref<1x128xf32, #tpu.memory_space<vmem>>, %arg5: memref<1x128xf32, #tpu.memory_space<vmem>>, %arg6: memref<256x128xf32, #tpu.memory_space<vmem>>) attributes {dimension_semantics = [#tpu.dimension_semantics<parallel>, #tpu.dimension_semantics<parallel>], iteration_bounds = array<i64: 2, 1>, scalar_prefetch = 0 : i64, scratch_operands = 0 : i64, tpu.core_type = #tpu.core_type<tc>, window_params = [{transform_indices = @transform_0, window_bounds = array<i64: 1, 18, 18, 8>}, {pipeline_mode = #tpu.pipeline_mode<synchronous>, transform_indices = @transform_1, window_bounds = array<i64: 9, 8, 128>}, {pipeline_mode = #tpu.pipeline_mode<synchronous>, transform_indices = @transform_2, window_bounds = array<i64: 1, 128>}, {pipeline_mode = #tpu.pipeline_mode<synchronous>, transform_indices = @transform_3, window_bounds = array<i64: 1, 128>}, {transform_indices = @transform_4, window_bounds = array<i64: 256, 128>}]} {
    %c16_i32 = arith.constant 16 : i32
    %0 = arith.muli %arg1, %c16_i32 : i32
    %c1_i32 = arith.constant 1 : i32
    %1 = arith.muli %0, %c1_i32 : i32
    %cst = arith.constant 0.000000e+00 : f32
    %2 = vector.broadcast %cst : f32 to vector<256x128xf32>
    %c0_i32 = arith.constant 0 : i32
    %3 = arith.addi %1, %c0_i32 : i32
    %c0 = arith.constant 0 : index
    %4 = arith.index_cast %3 : i32 to index
    %c0_0 = arith.constant 0 : index
    %c0_1 = arith.constant 0 : index
    %5 = vector.load %arg2[%c0, %4, %c0_0, %c0_1] : memref<1x18x18x8xbf16, #tpu.memory_space<vmem>>, vector<1x16x16x8xbf16>
    %6 = vector.shape_cast %5 : vector<1x16x16x8xbf16> to vector<16x16x8xbf16>
    %7 = vector.shape_cast %6 : vector<16x16x8xbf16> to vector<256x8xbf16>
    %c0_2 = arith.constant 0 : index
    %c0_3 = arith.constant 0 : index
    %c0_4 = arith.constant 0 : index
    %8 = vector.load %arg3[%c0_2, %c0_3, %c0_4] : memref<9x8x128xbf16, #tpu.memory_space<vmem>>, vector<1x8x128xbf16>
    %9 = vector.shape_cast %8 : vector<1x8x128xbf16> to vector<8x128xbf16>
    %cst_5 = arith.constant dense<0.000000e+00> : vector<256x128xf32>
    %10 = tpu.matmul %7, %9, %cst_5 {dimension_numbers = #tpu.dot_dimension_numbers<[1], [0], [0], [1], [0, 0, 1, 1], [], []>} : vector<256x8xbf16>, vector<8x128xbf16>, vector<256x128xf32> -> vector<256x128xf32>
    %11 = arith.addf %2, %10 : vector<256x128xf32>
    %c0_i32_6 = arith.constant 0 : i32
    %12 = arith.addi %1, %c0_i32_6 : i32
    %c0_7 = arith.constant 0 : index
    %13 = arith.index_cast %12 : i32 to index
    %c1 = arith.constant 1 : index
    %c0_8 = arith.constant 0 : index
    %14 = vector.load %arg2[%c0_7, %13, %c1, %c0_8] : memref<1x18x18x8xbf16, #tpu.memory_space<vmem>>, vector<1x16x16x8xbf16>
    %15 = vector.shape_cast %14 : vector<1x16x16x8xbf16> to vector<16x16x8xbf16>
    %16 = vector.shape_cast %15 : vector<16x16x8xbf16> to vector<256x8xbf16>
    %c1_9 = arith.constant 1 : index
    %c0_10 = arith.constant 0 : index
    %c0_11 = arith.constant 0 : index
    %17 = vector.load %arg3[%c1_9, %c0_10, %c0_11] : memref<9x8x128xbf16, #tpu.memory_space<vmem>>, vector<1x8x128xbf16>
    %18 = vector.shape_cast %17 : vector<1x8x128xbf16> to vector<8x128xbf16>
    %cst_12 = arith.constant dense<0.000000e+00> : vector<256x128xf32>
    %19 = tpu.matmul %16, %18, %cst_12 {dimension_numbers = #tpu.dot_dimension_numbers<[1], [0], [0], [1], [0, 0, 1, 1], [], []>} : vector<256x8xbf16>, vector<8x128xbf16>, vector<256x128xf32> -> vector<256x128xf32>
    %20 = arith.addf %11, %19 : vector<256x128xf32>
    %c0_i32_13 = arith.constant 0 : i32
    %21 = arith.addi %1, %c0_i32_13 : i32
    %c0_14 = arith.constant 0 : index
    %22 = arith.index_cast %21 : i32 to index
    %c2 = arith.constant 2 : index
    %c0_15 = arith.constant 0 : index
    %23 = vector.load %arg2[%c0_14, %22, %c2, %c0_15] : memref<1x18x18x8xbf16, #tpu.memory_space<vmem>>, vector<1x16x16x8xbf16>
    %24 = vector.shape_cast %23 : vector<1x16x16x8xbf16> to vector<16x16x8xbf16>
    %25 = vector.shape_cast %24 : vector<16x16x8xbf16> to vector<256x8xbf16>
    %c2_16 = arith.constant 2 : index
    %c0_17 = arith.constant 0 : index
    %c0_18 = arith.constant 0 : index
    %26 = vector.load %arg3[%c2_16, %c0_17, %c0_18] : memref<9x8x128xbf16, #tpu.memory_space<vmem>>, vector<1x8x128xbf16>
    %27 = vector.shape_cast %26 : vector<1x8x128xbf16> to vector<8x128xbf16>
    %cst_19 = arith.constant dense<0.000000e+00> : vector<256x128xf32>
    %28 = tpu.matmul %25, %27, %cst_19 {dimension_numbers = #tpu.dot_dimension_numbers<[1], [0], [0], [1], [0, 0, 1, 1], [], []>} : vector<256x8xbf16>, vector<8x128xbf16>, vector<256x128xf32> -> vector<256x128xf32>
    %29 = arith.addf %20, %28 : vector<256x128xf32>
    %c1_i32_20 = arith.constant 1 : i32
    %30 = arith.addi %1, %c1_i32_20 : i32
    %c0_21 = arith.constant 0 : index
    %31 = arith.index_cast %30 : i32 to index
    %c0_22 = arith.constant 0 : index
    %c0_23 = arith.constant 0 : index
    %32 = vector.load %arg2[%c0_21, %31, %c0_22, %c0_23] : memref<1x18x18x8xbf16, #tpu.memory_space<vmem>>, vector<1x16x16x8xbf16>
    %33 = vector.shape_cast %32 : vector<1x16x16x8xbf16> to vector<16x16x8xbf16>
    %34 = vector.shape_cast %33 : vector<16x16x8xbf16> to vector<256x8xbf16>
    %c3 = arith.constant 3 : index
    %c0_24 = arith.constant 0 : index
    %c0_25 = arith.constant 0 : index
    %35 = vector.load %arg3[%c3, %c0_24, %c0_25] : memref<9x8x128xbf16, #tpu.memory_space<vmem>>, vector<1x8x128xbf16>
    %36 = vector.shape_cast %35 : vector<1x8x128xbf16> to vector<8x128xbf16>
    %cst_26 = arith.constant dense<0.000000e+00> : vector<256x128xf32>
    %37 = tpu.matmul %34, %36, %cst_26 {dimension_numbers = #tpu.dot_dimension_numbers<[1], [0], [0], [1], [0, 0, 1, 1], [], []>} : vector<256x8xbf16>, vector<8x128xbf16>, vector<256x128xf32> -> vector<256x128xf32>
    %38 = arith.addf %29, %37 : vector<256x128xf32>
    %c1_i32_27 = arith.constant 1 : i32
    %39 = arith.addi %1, %c1_i32_27 : i32
    %c0_28 = arith.constant 0 : index
    %40 = arith.index_cast %39 : i32 to index
    %c1_29 = arith.constant 1 : index
    %c0_30 = arith.constant 0 : index
    %41 = vector.load %arg2[%c0_28, %40, %c1_29, %c0_30] : memref<1x18x18x8xbf16, #tpu.memory_space<vmem>>, vector<1x16x16x8xbf16>
    %42 = vector.shape_cast %41 : vector<1x16x16x8xbf16> to vector<16x16x8xbf16>
    %43 = vector.shape_cast %42 : vector<16x16x8xbf16> to vector<256x8xbf16>
    %c4 = arith.constant 4 : index
    %c0_31 = arith.constant 0 : index
    %c0_32 = arith.constant 0 : index
    %44 = vector.load %arg3[%c4, %c0_31, %c0_32] : memref<9x8x128xbf16, #tpu.memory_space<vmem>>, vector<1x8x128xbf16>
    %45 = vector.shape_cast %44 : vector<1x8x128xbf16> to vector<8x128xbf16>
    %cst_33 = arith.constant dense<0.000000e+00> : vector<256x128xf32>
    %46 = tpu.matmul %43, %45, %cst_33 {dimension_numbers = #tpu.dot_dimension_numbers<[1], [0], [0], [1], [0, 0, 1, 1], [], []>} : vector<256x8xbf16>, vector<8x128xbf16>, vector<256x128xf32> -> vector<256x128xf32>
    %47 = arith.addf %38, %46 : vector<256x128xf32>
    %c1_i32_34 = arith.constant 1 : i32
    %48 = arith.addi %1, %c1_i32_34 : i32
    %c0_35 = arith.constant 0 : index
    %49 = arith.index_cast %48 : i32 to index
    %c2_36 = arith.constant 2 : index
    %c0_37 = arith.constant 0 : index
    %50 = vector.load %arg2[%c0_35, %49, %c2_36, %c0_37] : memref<1x18x18x8xbf16, #tpu.memory_space<vmem>>, vector<1x16x16x8xbf16>
    %51 = vector.shape_cast %50 : vector<1x16x16x8xbf16> to vector<16x16x8xbf16>
    %52 = vector.shape_cast %51 : vector<16x16x8xbf16> to vector<256x8xbf16>
    %c5 = arith.constant 5 : index
    %c0_38 = arith.constant 0 : index
    %c0_39 = arith.constant 0 : index
    %53 = vector.load %arg3[%c5, %c0_38, %c0_39] : memref<9x8x128xbf16, #tpu.memory_space<vmem>>, vector<1x8x128xbf16>
    %54 = vector.shape_cast %53 : vector<1x8x128xbf16> to vector<8x128xbf16>
    %cst_40 = arith.constant dense<0.000000e+00> : vector<256x128xf32>
    %55 = tpu.matmul %52, %54, %cst_40 {dimension_numbers = #tpu.dot_dimension_numbers<[1], [0], [0], [1], [0, 0, 1, 1], [], []>} : vector<256x8xbf16>, vector<8x128xbf16>, vector<256x128xf32> -> vector<256x128xf32>
    %56 = arith.addf %47, %55 : vector<256x128xf32>
    %c2_i32 = arith.constant 2 : i32
    %57 = arith.addi %1, %c2_i32 : i32
    %c0_41 = arith.constant 0 : index
    %58 = arith.index_cast %57 : i32 to index
    %c0_42 = arith.constant 0 : index
    %c0_43 = arith.constant 0 : index
    %59 = vector.load %arg2[%c0_41, %58, %c0_42, %c0_43] : memref<1x18x18x8xbf16, #tpu.memory_space<vmem>>, vector<1x16x16x8xbf16>
    %60 = vector.shape_cast %59 : vector<1x16x16x8xbf16> to vector<16x16x8xbf16>
    %61 = vector.shape_cast %60 : vector<16x16x8xbf16> to vector<256x8xbf16>
    %c6 = arith.constant 6 : index
    %c0_44 = arith.constant 0 : index
    %c0_45 = arith.constant 0 : index
    %62 = vector.load %arg3[%c6, %c0_44, %c0_45] : memref<9x8x128xbf16, #tpu.memory_space<vmem>>, vector<1x8x128xbf16>
    %63 = vector.shape_cast %62 : vector<1x8x128xbf16> to vector<8x128xbf16>
    %cst_46 = arith.constant dense<0.000000e+00> : vector<256x128xf32>
    %64 = tpu.matmul %61, %63, %cst_46 {dimension_numbers = #tpu.dot_dimension_numbers<[1], [0], [0], [1], [0, 0, 1, 1], [], []>} : vector<256x8xbf16>, vector<8x128xbf16>, vector<256x128xf32> -> vector<256x128xf32>
    %65 = arith.addf %56, %64 : vector<256x128xf32>
    %c2_i32_47 = arith.constant 2 : i32
    %66 = arith.addi %1, %c2_i32_47 : i32
    %c0_48 = arith.constant 0 : index
    %67 = arith.index_cast %66 : i32 to index
    %c1_49 = arith.constant 1 : index
    %c0_50 = arith.constant 0 : index
    %68 = vector.load %arg2[%c0_48, %67, %c1_49, %c0_50] : memref<1x18x18x8xbf16, #tpu.memory_space<vmem>>, vector<1x16x16x8xbf16>
    %69 = vector.shape_cast %68 : vector<1x16x16x8xbf16> to vector<16x16x8xbf16>
    %70 = vector.shape_cast %69 : vector<16x16x8xbf16> to vector<256x8xbf16>
    %c7 = arith.constant 7 : index
    %c0_51 = arith.constant 0 : index
    %c0_52 = arith.constant 0 : index
    %71 = vector.load %arg3[%c7, %c0_51, %c0_52] : memref<9x8x128xbf16, #tpu.memory_space<vmem>>, vector<1x8x128xbf16>
    %72 = vector.shape_cast %71 : vector<1x8x128xbf16> to vector<8x128xbf16>
    %cst_53 = arith.constant dense<0.000000e+00> : vector<256x128xf32>
    %73 = tpu.matmul %70, %72, %cst_53 {dimension_numbers = #tpu.dot_dimension_numbers<[1], [0], [0], [1], [0, 0, 1, 1], [], []>} : vector<256x8xbf16>, vector<8x128xbf16>, vector<256x128xf32> -> vector<256x128xf32>
    %74 = arith.addf %65, %73 : vector<256x128xf32>
    %c2_i32_54 = arith.constant 2 : i32
    %75 = arith.addi %1, %c2_i32_54 : i32
    %c0_55 = arith.constant 0 : index
    %76 = arith.index_cast %75 : i32 to index
    %c2_56 = arith.constant 2 : index
    %c0_57 = arith.constant 0 : index
    %77 = vector.load %arg2[%c0_55, %76, %c2_56, %c0_57] : memref<1x18x18x8xbf16, #tpu.memory_space<vmem>>, vector<1x16x16x8xbf16>
    %78 = vector.shape_cast %77 : vector<1x16x16x8xbf16> to vector<16x16x8xbf16>
    %79 = vector.shape_cast %78 : vector<16x16x8xbf16> to vector<256x8xbf16>
    %c8 = arith.constant 8 : index
    %c0_58 = arith.constant 0 : index
    %c0_59 = arith.constant 0 : index
    %80 = vector.load %arg3[%c8, %c0_58, %c0_59] : memref<9x8x128xbf16, #tpu.memory_space<vmem>>, vector<1x8x128xbf16>
    %81 = vector.shape_cast %80 : vector<1x8x128xbf16> to vector<8x128xbf16>
    %cst_60 = arith.constant dense<0.000000e+00> : vector<256x128xf32>
    %82 = tpu.matmul %79, %81, %cst_60 {dimension_numbers = #tpu.dot_dimension_numbers<[1], [0], [0], [1], [0, 0, 1, 1], [], []>} : vector<256x8xbf16>, vector<8x128xbf16>, vector<256x128xf32> -> vector<256x128xf32>
    %83 = arith.addf %74, %82 : vector<256x128xf32>
    %c0_61 = arith.constant 0 : index
    %c0_62 = arith.constant 0 : index
    %84 = vector.load %arg4[%c0_61, %c0_62] : memref<1x128xf32, #tpu.memory_space<vmem>>, vector<1x128xf32>
    %85 = vector.broadcast %84 : vector<1x128xf32> to vector<256x128xf32>
    %86 = arith.mulf %83, %85 : vector<256x128xf32>
    %c0_63 = arith.constant 0 : index
    %c0_64 = arith.constant 0 : index
    %87 = vector.load %arg5[%c0_63, %c0_64] : memref<1x128xf32, #tpu.memory_space<vmem>>, vector<1x128xf32>
    %88 = vector.broadcast %87 : vector<1x128xf32> to vector<256x128xf32>
    %89 = arith.addf %86, %88 : vector<256x128xf32>
    %cst_65 = arith.constant 0.000000e+00 : f32
    %90 = vector.broadcast %cst_65 : f32 to vector<256x128xf32>
    %91 = arith.maximumf %89, %90 : vector<256x128xf32>
    %c0_66 = arith.constant 0 : index
    %c0_67 = arith.constant 0 : index
    %92 = vector.load %arg6[%c0_66, %c0_67] : memref<256x128xf32, #tpu.memory_space<vmem>>, vector<256x128xf32>
    tpu.vector_store %arg6[%c0_66, %c0_67], %91 {strides = array<i32>} : memref<256x128xf32, #tpu.memory_space<vmem>>, vector<256x128xf32>,
    return
  }
  func.func @transform_0(%arg0: i32, %arg1: i32) -> (i32, i32, i32, i32) {
    %c0_i32 = arith.constant 0 : i32
    %c0_i32_0 = arith.constant 0 : i32
    %c0_i32_1 = arith.constant 0 : i32
    %c0_i32_2 = arith.constant 0 : i32
    return %arg0, %c0_i32, %c0_i32_0, %c0_i32_1 : i32, i32, i32, i32
  }
  func.func @transform_1(%arg0: i32, %arg1: i32) -> (i32, i32, i32) {
    %c0_i32 = arith.constant 0 : i32
    %c0_i32_0 = arith.constant 0 : i32
    %c0_i32_1 = arith.constant 0 : i32
    %c0_i32_2 = arith.constant 0 : i32
    return %c0_i32, %c0_i32_0, %c0_i32_1 : i32, i32, i32
  }
  func.func @transform_2(%arg0: i32, %arg1: i32) -> (i32, i32) {
    %c0_i32 = arith.constant 0 : i32
    %c0_i32_0 = arith.constant 0 : i32
    %c0_i32_1 = arith.constant 0 : i32
    return %c0_i32, %c0_i32_0 : i32, i32
  }
  func.func @transform_3(%arg0: i32, %arg1: i32) -> (i32, i32) {
    %c0_i32 = arith.constant 0 : i32
    %c0_i32_0 = arith.constant 0 : i32
    %c0_i32_1 = arith.constant 0 : i32
    return %c0_i32, %c0_i32_0 : i32, i32
  }
  func.func @transform_4(%arg0: i32, %arg1: i32) -> (i32, i32) {
    %c1_i32 = arith.constant 1 : i32
    %0 = arith.muli %arg0, %c1_i32 : i32
    %1 = arith.addi %0, %arg1 : i32
    %c0_i32 = arith.constant 0 : i32
    %c0_i32_0 = arith.constant 0 : i32
    return %1, %c0_i32 : i32, i32
  }
}

</mosaic_0001>

<bundles_post_ra>
// kernel: conv_block_forward.2
= control target key start
LH: loop header
LB: loop body
LE: loop exit
PB: predicated region body
PF: predicated region fallthrough
CT: control target
= control target key end

     0   :  { %s5093_s12 = smov 0   ;;  %s5095_s13 = smov 0   ;;  %s6445_s0 = inlined_call_operand.vmem [shape: bf16[2,18,18,8], index: 0, kind: input, shape index: {}]   ;;  %s6446_s1 = inlined_call_operand.vmem [shape: bf16[9,8,128], index: 1, kind: input, shape index: {}]   ;;  %s6447_s2 = inlined_call_operand.vmem [shape: f32[2,8,128], index: 2, kind: output, shape index: {0}]   ;;  %s6448_s3 = inlined_call_operand.vmem [shape: f32[2,8,128], index: 3, kind: output, shape index: {1}]  }
   0x1   :  { %s5097_s14 = smov 0  }
   0x2 LB: > { %s26_s15 = sadd.s32 1, %s5067_s13  ;;  %p4333_p0 = scmp.ge.s32.totalorder %s5071_s14, 1  ;;  %s5071_s14 = sphi %s5097_s14, %s14_s14   ;;  %s5067_s13 = sphi %s5095_s13, %s6460_s13   ;;  %s5063_s12 = sphi %s5093_s12, %s6459_s12  }
   0x3   : > { %p28_p1 = scmp.ge.s32.totalorder %s26_s15, 2  ;;  %p156_p2 = scmp.lt.s32.totalorder %s5071_s14, 3 }
   0x5   : > { %s6462_s15 = smov (%p28_p1, %s26_s15), 0  ;;  %p157_p3 = pnand %p4333_p0, %p156_p2 }
   0x7   : > { %160 = sbr.rel (%p157_p3) target bundleno = 759 (0x2f7), region = 28 }
   0xc   : > { %v4337_v0 = vld [vmem:[%s6446_s1 + $0x4] sm:$0xf]  ;;  %vm742_vm0 = vcmask 1043456   ;;  %p185_p4 = scmp.lt.s32.totalorder %s5063_s12, 1  ;;  %v4450_v2 = vld [vmem:[%s6446_s1 + $0x8] sm:$0xf] }
   0xd   : > { %v744_v1 = vsel %vm742_vm0, %v4337_v0, 0  ;;  %v1317_v3 = vsel %vm742_vm0, %v4450_v2, 0  ;;  %v4499_v4 = vld [vmem:[%s6446_s1 + $0xc] sm:$0xf]  ;;  %v239_v5 = vld [vmem:[%s6446_s1] sm:$0xf] }
   0xe   : > { %4971 = vmatpush.bf16.msra.mxu1 %v744_v1  ;;  %4972 = vmatpush.bf16.msra.mxu2 %v744_v1  ;;  %s6464_s12 = smov (!%p185_p4, %s5063_s12), 1  ;;  %v4628_v6 = vld [vmem:[%s6446_s1 + $0x10] sm:$0xf]  ;;  %v1607_v7 = vsel %vm742_vm0, %v4499_v4, 0  ;;  %v964_v8 = vsel %vm742_vm0, %v239_v5, 0  ;;  %vm693_vm4 = vcmask 64512  }
   0xf   : > { %4973 = vmatpush.bf16.msra.mxu3 %v744_v1  ;;  %753 = vmatpush.bf16.msra.mxu0 %v744_v1  ;;  %s4974_s26 = smul.u32 216, %s6464_s12  ;;  %v2261_v9 = vsel %vm742_vm0, %v4628_v6, 0  ;;  %vm256_vm1 = vsmask.f32 3328  ;;  %vm257_vm2 = vsmask.f32 7440 }
  0x10   : > { %vm5149_vm3 = vmor %vm256_vm1, %vm257_vm2  ;;  %vm1103_vm5 = vcmask 1042432   ;;  %vm1104_vm6 = vcmask 1046532   ;;  %s4335_s11 = sshll.u32 %s6464_s12, 3 }
  0x11   : > { %s5137_s29 = scalar_lea.vmem %s6445_s0, %s4974_s26  ;;  %vm5323_vm7 = vmor %vm1103_vm5, %vm1104_vm6  ;;  %s194_s18 = scalar_lea.vmem %s6447_s2, %s4335_s11 }
  0x12   : > { %1326 = vmatpush.bf16.msrb.mxu2 %v1317_v3  ;;  %973 = vmatpush.bf16.msrb.mxu1 %v964_v8  ;;  %v215_v10 = vld [vmem:[%s5137_s29 + $0x30] sm:$0xf]  ;;  %v216_v11 = vld [vmem:[%s5137_s29 + $0x34] sm:$0xf]  ;;  %v244_v12 = vld [vmem:[%s5137_s29 + $0x38] sm:$0x1]  ;;  %s200_s21 = scalar_lea.vmem %s6448_s3, %s4335_s11 }
  0x13   : > { %1616 = vmatpush.bf16.msrb.mxu3 %v1607_v7  ;;  %2270 = vmatpush.bf16.msrb.mxu0 %v2261_v9  ;;  %v356_v13 = vshrl.u32 %v215_v10, 16  ;;  %v359_v14 = vshll.u32 %v215_v10, 16  ;;  %v365_v15 = vshll.u32 %v216_v11, 16  ;;  %v369_v16 = vshrl.u32 %v216_v11, 16  ;;  %v223_v17 = vld [vmem:[%s5137_s29 + $0x60] sm:$0xf] }
  0x14   : > { %v375_v18 = vshll.u32 %v244_v12, 16  ;;  %v224_v19 = vld [vmem:[%s5137_s29 + $0x64] sm:$0xf]  ;;  %v248_v20 = vld [vmem:[%s5137_s29 + $0x68] sm:$0x1]  ;;  %v452_v21 = vshrl.u32 %v223_v17, 16 }
  0x15   : > { %v358_v22 = vrot.slane %v356_v13, 4  ;;  %v361_v23 = vrot.slane %v359_v14, 5  ;;  %v367_v24 = vrot.slane %v365_v15, 5  ;;  %v371_v25 = vrot.slane %v369_v16, 4  ;;  %v231_v26 = vld [vmem:[%s5137_s29 + $0x90] sm:$0xf] }
  0x16   : > { %v377_v27 = vrot.slane %v375_v18, 5  ;;  %v454_v28 = vrot.slane %v452_v21, 4  ;;  %v455_v29 = vshll.u32 %v223_v17, 16  ;;  %v461_v30 = vshll.u32 %v224_v19, 16  ;;  %v232_v35 = vld [vmem:[%s5137_s29 + $0x94] sm:$0xf] }
  0x17   : > { %v362_v31 = vor.u32 %v361_v23, %v358_v22  ;;  %v372_v32 = vor.u32 %v371_v25, %v367_v24  ;;  %v465_v33 = vshrl.u32 %v224_v19, 16  ;;  %v471_v34 = vshll.u32 %v248_v20, 16  ;;  %v252_v45 = vld [vmem:[%s5137_s29 + $0x98] sm:$0x1]  ;;  %v207_v61 = vld [vmem:[%s5137_s29] sm:$0xf] }
  0x18   : > { %v457_v37 = vrot.slane %v455_v29, 5  ;;  %v463_v38 = vrot.slane %v461_v30, 5  ;;  %v548_v39 = vshrl.u32 %v231_v26, 16  ;;  %v551_v47 = vshll.u32 %v231_v26, 16  ;;  %v5162_v1 = vld [vmem:[%s5137_s29 + $0x4] sm:$0xf] }
  0x19   : > { %v363_v40 = vrot.slane %v362_v31, 4  ;;  %v373_v41 = vrot.slane %v372_v32, 4  ;;  %v467_v42 = vrot.slane %v465_v33, 4  ;;  %v473_v43 = vrot.slane %v471_v34, 5  ;;  %v5165_v2 = vld [vmem:[%s5137_s29 + $0x8] sm:$0x1] }
  0x1a   : > { %v458_v44 = vor.u32 %v457_v37, %v454_v28  ;;  %v550_v46 = vrot.slane %v548_v39, 4  ;;  %v557_v48 = vshll.u32 %v232_v35, 16  ;;  %v561_v52 = vshrl.u32 %v232_v35, 16  ;;  %v217_v19 = vld [vmem:[%s5137_s29 + $0x3c] sm:$0xf] }
  0x1b   : > { %v368_v49 = vsel %vm5149_vm3, %v363_v40, %v367_v24  ;;  %v378_v50 = vsel %vm5149_vm3, %v373_v41, %v377_v27  ;;  %v468_v51 = vor.u32 %v467_v42, %v463_v38  ;;  %v553_v56 = vrot.slane %v551_v47, 5  ;;  %v5177_v20 = vld [vmem:[%s5137_s29 + $0x40] sm:$0xf]  ;;  %v5182_v25 = vld [vmem:[%s5137_s29 + $0x44] sm:$0x1] }
  0x1c   : > { %v653_v53 = vunpack.c.l.b16 %v368_v49  ;;  %v654_v54 = vunpack.c.l.b16 %v378_v50  ;;  %v459_v55 = vrot.slane %v458_v44, 4  ;;  %v559_v58 = vrot.slane %v557_v48, 5  ;;  %v225_v33 = vld [vmem:[%s5137_s29 + $0x6c] sm:$0xf]  ;;  %v249_v47 = vld [vmem:[%s5137_s29 + $0x74] sm:$0x1] }
  0x1d   : > { %v469_v57 = vrot.slane %v468_v51, 4  ;;  %v563_v59 = vrot.slane %v561_v52, 4  ;;  %v567_v60 = vshll.u32 %v252_v45, 16  ;;  %v554_v0 = vor.u32 %v553_v56, %v550_v46 }
  0x1e   : > { %v681_v62 = vpack.c.b16 %v654_v54, %v653_v53  ;;  %v464_v63 = vsel %vm5149_vm3, %v459_v55, %v463_v38  ;;  %v260_v9 = vshrl.u32 %v207_v61, 16  ;;  %v263_v10 = vshll.u32 %v207_v61, 16  ;;  %v233_v61 = vld [vmem:[%s5137_s29 + $0x9c] sm:$0xf] }
  0x1f   : > { %v474_v3 = vsel %vm5149_vm3, %v469_v57, %v473_v43  ;;  %v661_v4 = vunpack.c.l.b16 %v464_v63  ;;  %v564_v5 = vor.u32 %v563_v59, %v559_v58  ;;  %v569_v6 = vrot.slane %v567_v60, 5  ;;  %v226_v43 = vld [vmem:[%s5137_s29 + $0x70] sm:$0xf] }
  0x20   : > { %4342 = vmatmul.msk.bf16.vlgmr.msra.gmra.mxu1 %vm693_vm4, %v681_v62  ;;  %v662_v7 = vunpack.c.l.b16 %v474_v3  ;;  %v555_v8 = vrot.slane %v554_v0, 4  ;;  %v269_v12 = vshll.u32 %v5162_v1, 16  ;;  %v273_v13 = vshrl.u32 %v5162_v1, 16  ;;  %v234_v3 = vld [vmem:[%s5137_s29 + $0xa0] sm:$0xf] }
  0x21   : > { %v565_v11 = vrot.slane %v564_v5, 4  ;;  %v279_v14 = vshll.u32 %v5165_v2, 16  ;;  %v262_v17 = vrot.slane %v260_v9, 4  ;;  %v265_v18 = vrot.slane %v263_v10, 5 }
  0x22   : > { %v685_v15 = vpack.c.b16 %v662_v7, %v661_v4  ;;  %v560_v16 = vsel %vm5149_vm3, %v555_v8, %v559_v58  ;;  %v271_v23 = vrot.slane %v269_v12, 5  ;;  %v275_v24 = vrot.slane %v273_v13, 4  ;;  %v253_v8 = vld [vmem:[%s5137_s29 + $0xa4] sm:$0x1] }
  0x23   : > { %v570_v21 = vsel %vm5149_vm3, %v565_v11, %v569_v6  ;;  %v669_v22 = vunpack.c.l.b16 %v560_v16  ;;  %v266_v27 = vor.u32 %v265_v18, %v262_v17  ;;  %v281_v28 = vrot.slane %v279_v14, 5 }
  0x24   : > { %4346 = vmatmul.msk.bf16.vlgmr.msra.gmra.mxu2 %vm693_vm4, %v685_v15  ;;  %v670_v26 = vunpack.c.l.b16 %v570_v21  ;;  %v276_v29 = vor.u32 %v275_v24, %v271_v23  ;;  %v380_v30 = vshrl.u32 %v217_v19, 16  ;;  %v383_v31 = vshll.u32 %v217_v19, 16 }
  0x25   : > { %v389_v32 = vshll.u32 %v5177_v20, 16  ;;  %v267_v35 = vrot.slane %v266_v27, 4  ;;  %v393_v37 = vshrl.u32 %v5177_v20, 16  ;;  %v399_v38 = vshll.u32 %v5182_v25, 16 }
  0x26   : > { %v689_v34 = vpack.c.b16 %v670_v26, %v669_v22  ;;  %v277_v39 = vrot.slane %v276_v29, 4  ;;  %v382_v40 = vrot.slane %v380_v30, 4  ;;  %v385_v41 = vrot.slane %v383_v31, 5  ;;  %v209_v22 = vld [vmem:[%s5137_s29 + $0xc] sm:$0xf] }
  0x27   : > { %v391_v42 = vrot.slane %v389_v32, 5  ;;  %v272_v44 = vsel %vm5149_vm3, %v267_v35, %v271_v23  ;;  %v395_v45 = vrot.slane %v393_v37, 4  ;;  %v401_v46 = vrot.slane %v399_v38, 5  ;;  %v5211_v32 = vld [vmem:[%s5137_s29 + $0x14] sm:$0x1] }
  0x28   : > { %4350 = vmatmul.msk.bf16.vlgmr.msra.gmra.mxu3 %vm693_vm4, %v689_v34  ;;  %v476_v48 = vshrl.u32 %v225_v33, 16  ;;  %v282_v49 = vsel %vm5149_vm3, %v277_v39, %v281_v28  ;;  %v645_v50 = vunpack.c.l.b16 %v272_v44  ;;  %v386_v51 = vor.u32 %v385_v41, %v382_v40  ;;  %v5208_v28 = vld [vmem:[%s5137_s29 + $0x10] sm:$0xf] }
  0x29   : > { %v479_v52 = vshll.u32 %v225_v33, 16  ;;  %v646_v53 = vunpack.c.l.b16 %v282_v49  ;;  %v396_v54 = vor.u32 %v395_v45, %v391_v42  ;;  %v485_v56 = vshll.u32 %v226_v43, 16 }
  0x2a   : > { %v478_v55 = vrot.slane %v476_v48, 4  ;;  %v387_v57 = vrot.slane %v386_v51, 4  ;;  %v489_v59 = vshrl.u32 %v226_v43, 16  ;;  %v495_v60 = vshll.u32 %v249_v47, 16  ;;  %v5221_v47 = vld [vmem:[%s5137_s29 + $0x4c] sm:$0xf] }
  0x2b   : > { %v481_v58 = vrot.slane %v479_v52, 5  ;;  %v677_v62 = vpack.c.b16 %v646_v53, %v645_v50  ;;  %v397_v63 = vrot.slane %v396_v54, 4  ;;  %v487_v0 = vrot.slane %v485_v56, 5  ;;  %v5226_v56 = vld [vmem:[%s5137_s29 + $0x50] sm:$0x1] }
  0x2c   : > { %v392_v4 = vsel %vm5149_vm3, %v387_v57, %v391_v42  ;;  %v491_v6 = vrot.slane %v489_v59, 4  ;;  %v497_v7 = vrot.slane %v495_v60, 5  ;;  %v572_v11 = vshrl.u32 %v233_v61, 16  ;;  %v219_v42 = vld [vmem:[%s5137_s29 + $0x48] sm:$0xf] }
  0x2d   : > { %v482_v5 = vor.u32 %v481_v58, %v478_v55  ;;  %4338 = vmatmul.msk.bf16.vlgmr.msra.gmra.mxu0 %vm693_vm4, %v677_v62  ;;  %v402_v9 = vsel %vm5149_vm3, %v397_v63, %v401_v46  ;;  %v655_v10 = vunpack.c.l.b16 %v392_v4  ;;  %v575_v12 = vshll.u32 %v233_v61, 16 }
  0x2e   : > { %v656_v13 = vunpack.c.l.b16 %v402_v9  ;;  %v492_v15 = vor.u32 %v491_v6, %v487_v0  ;;  %v581_v16 = vshll.u32 %v234_v3, 16  ;;  %v574_v17 = vrot.slane %v572_v11, 4 }
  0x2f   : > { %v483_v14 = vrot.slane %v482_v5, 4  ;;  %v577_v18 = vrot.slane %v575_v12, 5  ;;  %v585_v19 = vshrl.u32 %v234_v3, 16  ;;  %v591_v21 = vshll.u32 %v253_v8, 16  ;;  %v227_v3 = vld [vmem:[%s5137_s29 + $0x78] sm:$0xf] }
  0x30   : > { %v682_v23 = vpack.c.b16 %v656_v13, %v655_v10  ;;  %v493_v26 = vrot.slane %v492_v15, 4  ;;  %v583_v27 = vrot.slane %v581_v16, 5  ;;  %v284_v35 = vshrl.u32 %v209_v22, 16  ;;  %v228_v8 = vld [vmem:[%s5137_s29 + $0x7c] sm:$0xf] }
  0x31   : > { %v488_v24 = vsel %vm5149_vm3, %v483_v14, %v487_v0  ;;  %v578_v30 = vor.u32 %v577_v18, %v574_v17  ;;  %v587_v31 = vrot.slane %v585_v19, 4  ;;  %v593_v34 = vrot.slane %v591_v21, 5  ;;  %v250_v16 = vld [vmem:[%s5137_s29 + $0x80] sm:$0x1] }
  0x32   : > { %v663_v29 = vunpack.c.l.b16 %v488_v24  ;;  %4343 = vmatmul.msk.bf16.gmra.mxu1 %vm693_vm4, %v682_v23  ;;  %v498_v33 = vsel %vm5149_vm3, %v493_v26, %v497_v7  ;;  %v287_v37 = vshll.u32 %v209_v22, 16  ;;  %v293_v41 = vshll.u32 %v5208_v28, 16 }
  0x33   : > { %v664_v38 = vunpack.c.l.b16 %v498_v33  ;;  %v579_v39 = vrot.slane %v578_v30, 4  ;;  %v588_v40 = vor.u32 %v587_v31, %v583_v27  ;;  %v286_v43 = vrot.slane %v284_v35, 4 }
  0x34   : > { %v289_v44 = vrot.slane %v287_v37, 5  ;;  %v297_v45 = vshrl.u32 %v5208_v28, 16  ;;  %v303_v46 = vshll.u32 %v5211_v32, 16  ;;  %v295_v51 = vrot.slane %v293_v41, 5 }
  0x35   : > { %v686_v48 = vpack.c.b16 %v664_v38, %v663_v29  ;;  %v584_v49 = vsel %vm5149_vm3, %v579_v39, %v583_v27  ;;  %v589_v50 = vrot.slane %v588_v40, 4  ;;  %v404_v58 = vshrl.u32 %v219_v42, 16  ;;  %v236_v39 = vld [vmem:[%s5137_s29 + $0xac] sm:$0xf]  ;;  %v254_v40 = vld [vmem:[%s5137_s29 + $0xb0] sm:$0x1] }
  0x36   : > { %v671_v52 = vunpack.c.l.b16 %v584_v49  ;;  %v290_v53 = vor.u32 %v289_v44, %v286_v43  ;;  %v299_v54 = vrot.slane %v297_v45, 4  ;;  %v305_v55 = vrot.slane %v303_v46, 5 }
  0x37   : > { %4347 = vmatmul.msk.bf16.gmra.mxu2 %vm693_vm4, %v686_v48  ;;  %v594_v57 = vsel %vm5149_vm3, %v589_v50, %v593_v34  ;;  %v407_v59 = vshll.u32 %v219_v42, 16  ;;  %v413_v60 = vshll.u32 %v5221_v47, 16  ;;  %v417_v0 = vshrl.u32 %v5221_v47, 16  ;;  %v235_v34 = vld [vmem:[%s5137_s29 + $0xa8] sm:$0xf] }
  0x38   : > { %v672_v61 = vunpack.c.l.b16 %v594_v57  ;;  %v291_v62 = vrot.slane %v290_v53, 4  ;;  %v300_v63 = vor.u32 %v299_v54, %v295_v51  ;;  %v406_v4 = vrot.slane %v404_v58, 4 }
  0x39   : > { %v409_v5 = vrot.slane %v407_v59, 5  ;;  %v415_v6 = vrot.slane %v413_v60, 5  ;;  %v423_v7 = vshll.u32 %v5226_v56, 16  ;;  %v419_v12 = vrot.slane %v417_v0, 4  ;;  %v211_v59 = vld [vmem:[%s5137_s29 + $0x18] sm:$0xf] }
  0x3a   : > { %v690_v9 = vpack.c.b16 %v672_v61, %v671_v52  ;;  %v296_v10 = vsel %vm5149_vm3, %v291_v62, %v295_v51  ;;  %v301_v11 = vrot.slane %v300_v63, 4  ;;  %v500_v17 = vshrl.u32 %v227_v3, 16  ;;  %v5254_v63 = vld [vmem:[%s5137_s29 + $0x1c] sm:$0xf]  ;;  %v5257_v0 = vld [vmem:[%s5137_s29 + $0x20] sm:$0x1] }
  0x3b   : > { %v647_v13 = vunpack.c.l.b16 %v296_v10  ;;  %v410_v14 = vor.u32 %v409_v5, %v406_v4  ;;  %v425_v15 = vrot.slane %v423_v7, 5  ;;  %v420_v19 = vor.u32 %v419_v12, %v415_v6 }
  0x3c   : > { %4351 = vmatmul.msk.bf16.gmra.mxu3 %vm693_vm4, %v690_v9  ;;  %v306_v18 = vsel %vm5149_vm3, %v301_v11, %v305_v55  ;;  %v503_v21 = vshll.u32 %v227_v3, 16  ;;  %v509_v22 = vshll.u32 %v228_v8, 16  ;;  %v502_v26 = vrot.slane %v500_v17, 4 }
  0x3d   : > { %v648_v23 = vunpack.c.l.b16 %v306_v18  ;;  %v411_v24 = vrot.slane %v410_v14, 4  ;;  %v513_v27 = vshrl.u32 %v228_v8, 16  ;;  %v421_v29 = vrot.slane %v420_v19, 4 }
  0x3e   : > { %v505_v30 = vrot.slane %v503_v21, 5  ;;  %v511_v31 = vrot.slane %v509_v22, 5  ;;  %v519_v33 = vshll.u32 %v250_v16, 16  ;;  %v596_v48 = vshrl.u32 %v235_v34, 16  ;;  %v5267_v21 = vld [vmem:[%s5137_s29 + $0x58] sm:$0xf] }
  0x3f   : > { %v678_v35 = vpack.c.b16 %v648_v23, %v647_v13  ;;  %v416_v37 = vsel %vm5149_vm3, %v411_v24, %v415_v6  ;;  %v515_v38 = vrot.slane %v513_v27, 4  ;;  %v426_v41 = vsel %vm5149_vm3, %v421_v29, %v425_v15  ;;  %v221_v15 = vld [vmem:[%s5137_s29 + $0x54] sm:$0xf]  ;;  %v5272_v27 = vld [vmem:[%s5137_s29 + $0x5c] sm:$0x1] }
  0x40   : > { %v657_v42 = vunpack.c.l.b16 %v416_v37  ;;  %v506_v43 = vor.u32 %v505_v30, %v502_v26  ;;  %v521_v44 = vrot.slane %v519_v33, 5  ;;  %v658_v45 = vunpack.c.l.b16 %v426_v41 }
  0x41   : > { %4339 = vmatmul.msk.bf16.gmra.mxu0 %vm693_vm4, %v678_v35  ;;  %v516_v46 = vor.u32 %v515_v38, %v511_v31  ;;  %v599_v49 = vshll.u32 %v235_v34, 16  ;;  %v605_v51 = vshll.u32 %v236_v39, 16  ;;  %v609_v52 = vshrl.u32 %v236_v39, 16  ;;  %v229_v39 = vld [vmem:[%s5137_s29 + $0x84] sm:$0xf] }
  0x42   : > { %v507_v50 = vrot.slane %v506_v43, 4  ;;  %v615_v53 = vshll.u32 %v254_v40, 16  ;;  %v683_v54 = vpack.c.b16 %v658_v45, %v657_v42  ;;  %v598_v57 = vrot.slane %v596_v48, 4 }
  0x43   : > { %v517_v55 = vrot.slane %v516_v46, 4  ;;  %v601_v58 = vrot.slane %v599_v49, 5  ;;  %v607_v61 = vrot.slane %v605_v51, 5  ;;  %v611_v62 = vrot.slane %v609_v52, 4  ;;  %v230_v49 = vld [vmem:[%s5137_s29 + $0x88] sm:$0xf] }
  0x44   : > { %v512_v60 = vsel %vm5149_vm3, %v507_v50, %v511_v31  ;;  %4344 = vmatmul.msk.bf16.gmra.mxu1 %vm693_vm4, %v683_v54  ;;  %v617_v6 = vrot.slane %v615_v53, 5  ;;  %v308_v9 = vshrl.u32 %v211_v59, 16  ;;  %v311_v10 = vshll.u32 %v211_v59, 16  ;;  %v251_v53 = vld [vmem:[%s5137_s29 + $0x8c] sm:$0x1] }
  0x45   : > { %v522_v3 = vsel %vm5149_vm3, %v517_v55, %v521_v44  ;;  %v665_v4 = vunpack.c.l.b16 %v512_v60  ;;  %v602_v5 = vor.u32 %v601_v58, %v598_v57  ;;  %v612_v8 = vor.u32 %v611_v62, %v607_v61 }
  0x46   : > { %v666_v7 = vunpack.c.l.b16 %v522_v3  ;;  %v317_v12 = vshll.u32 %v5254_v63, 16  ;;  %v321_v13 = vshrl.u32 %v5254_v63, 16  ;;  %v327_v14 = vshll.u32 %v5257_v0, 16 }
  0x47   : > { %v603_v11 = vrot.slane %v602_v5, 4  ;;  %v613_v17 = vrot.slane %v612_v8, 4  ;;  %v310_v18 = vrot.slane %v308_v9, 4  ;;  %v313_v19 = vrot.slane %v311_v10, 5  ;;  %v237_v8 = vld [vmem:[%s5137_s29 + $0xb4] sm:$0xf] }
  0x48   : > { %v687_v16 = vpack.c.b16 %v666_v7, %v665_v4  ;;  %v319_v23 = vrot.slane %v317_v12, 5  ;;  %v323_v24 = vrot.slane %v321_v13, 4  ;;  %v329_v26 = vrot.slane %v327_v14, 5  ;;  %v238_v12 = vld [vmem:[%s5137_s29 + $0xb8] sm:$0xf] }
  0x49   : > { %v608_v22 = vsel %vm5149_vm3, %v603_v11, %v607_v61  ;;  %v618_v29 = vsel %vm5149_vm3, %v613_v17, %v617_v6  ;;  %v314_v31 = vor.u32 %v313_v19, %v310_v18  ;;  %v428_v33 = vshrl.u32 %v221_v15, 16  ;;  %v255_v17 = vld [vmem:[%s5137_s29 + $0xbc] sm:$0x1] }
  0x4a   : > { %4348 = vmatmul.msk.bf16.gmra.mxu2 %vm693_vm4, %v687_v16  ;;  %v673_v30 = vunpack.c.l.b16 %v608_v22  ;;  %v674_v34 = vunpack.c.l.b16 %v618_v29  ;;  %v324_v35 = vor.u32 %v323_v24, %v319_v23  ;;  %v431_v37 = vshll.u32 %v221_v15, 16 }
  0x4b   : > { %v437_v38 = vshll.u32 %v5267_v21, 16  ;;  %v315_v40 = vrot.slane %v314_v31, 4  ;;  %v430_v41 = vrot.slane %v428_v33, 4  ;;  %v441_v42 = vshrl.u32 %v5267_v21, 16 }
  0x4c   : > { %v447_v43 = vshll.u32 %v5272_v27, 16  ;;  %v691_v44 = vpack.c.b16 %v674_v34, %v673_v30  ;;  %v325_v45 = vrot.slane %v324_v35, 4  ;;  %v433_v46 = vrot.slane %v431_v37, 5  ;;  %v213_v37 = vld [vmem:[%s5137_s29 + $0x24] sm:$0xf] }
  0x4d   : > { %v439_v48 = vrot.slane %v437_v38, 5  ;;  %v320_v50 = vsel %vm5149_vm3, %v315_v40, %v319_v23  ;;  %v443_v51 = vrot.slane %v441_v42, 4  ;;  %v524_v54 = vshrl.u32 %v229_v39, 16  ;;  %v5300_v42 = vld [vmem:[%s5137_s29 + $0x28] sm:$0xf] }
  0x4e   : > { %v449_v52 = vrot.slane %v447_v43, 5  ;;  %4352 = vmatmul.msk.bf16.gmra.mxu3 %vm693_vm4, %v691_v44  ;;  %v330_v55 = vsel %vm5149_vm3, %v325_v45, %v329_v26  ;;  %v649_v57 = vunpack.c.l.b16 %v320_v50  ;;  %v434_v58 = vor.u32 %v433_v46, %v430_v41 }
  0x4f   : > { %v527_v59 = vshll.u32 %v229_v39, 16  ;;  %v650_v60 = vunpack.c.l.b16 %v330_v55  ;;  %v444_v61 = vor.u32 %v443_v51, %v439_v48  ;;  %v526_v62 = vrot.slane %v524_v54, 4 }
  0x50   : > { %v533_v3 = vshll.u32 %v230_v49, 16  ;;  %v435_v4 = vrot.slane %v434_v58, 4  ;;  %v537_v6 = vshrl.u32 %v230_v49, 16  ;;  %v543_v7 = vshll.u32 %v251_v53, 16 }
  0x51   : > { %v529_v5 = vrot.slane %v527_v59, 5  ;;  %v679_v9 = vpack.c.b16 %v650_v60, %v649_v57  ;;  %v445_v10 = vrot.slane %v444_v61, 4  ;;  %v620_v22 = vshrl.u32 %v237_v8, 16  ;;  %v1055_v61 = vld [vmem:[%s5137_s29] sm:$0xe] }
  0x52   : > { %v535_v11 = vrot.slane %v533_v3, 5  ;;  %v440_v13 = vsel %vm5149_vm3, %v435_v4, %v439_v48  ;;  %v539_v15 = vrot.slane %v537_v6, 4  ;;  %v545_v16 = vrot.slane %v543_v7, 5  ;;  %v5304_v48 = vld [vmem:[%s5137_s29 + $0x2c] sm:$0x1] }
  0x53   : > { %v530_v14 = vor.u32 %v529_v5, %v526_v62  ;;  %4340 = vmatmul.msk.bf16.gmra.mxu0 %vm693_vm4, %v679_v9  ;;  %v450_v18 = vsel %vm5149_vm3, %v445_v10, %v449_v52  ;;  %v659_v19 = vunpack.c.l.b16 %v440_v13  ;;  %v623_v23 = vshll.u32 %v237_v8, 16  ;;  %v4580_v6 = vld [vmem:[%s5137_s29 + $0xc] sm:$0xf] }
  0x54   : > { %v660_v24 = vunpack.c.l.b16 %v450_v18  ;;  %v540_v29 = vor.u32 %v539_v15, %v535_v11  ;;  %v629_v30 = vshll.u32 %v238_v12, 16  ;;  %v622_v31 = vrot.slane %v620_v22, 4 }
  0x55   : > { %v531_v26 = vrot.slane %v530_v14, 4  ;;  %v625_v33 = vrot.slane %v623_v23, 5  ;;  %v633_v34 = vshrl.u32 %v238_v12, 16  ;;  %v639_v35 = vshll.u32 %v255_v17, 16  ;;  %v4581_v12 = vld [vmem:[%s5137_s29 + $0x10] sm:$0xf] }
  0x56   : > { %v684_v38 = vpack.c.b16 %v660_v24, %v659_v19  ;;  %v541_v40 = vrot.slane %v540_v29, 4  ;;  %v631_v41 = vrot.slane %v629_v30, 5  ;;  %v1111_v43 = vrot.slane %v5165_v2, 5 }
  0x57   : > { %v536_v39 = vsel %vm5149_vm3, %v531_v26, %v535_v11  ;;  %v626_v45 = vor.u32 %v625_v33, %v622_v31  ;;  %v635_v46 = vrot.slane %v633_v34, 4  ;;  %v641_v50 = vrot.slane %v639_v35, 5  ;;  %v4726_v11 = vld [vmem:[%s6446_s1 + $0x18] sm:$0xf] }
  0x58   : > { %v667_v44 = vunpack.c.l.b16 %v536_v39  ;;  %4345 = vmatmul.msk.bf16.gmra.mxu1 %vm693_vm4, %v684_v38  ;;  %v546_v49 = vsel %vm5149_vm3, %v541_v40, %v545_v16  ;;  %v332_v51 = vshrl.u32 %v213_v37, 16  ;;  %v335_v52 = vshll.u32 %v213_v37, 16  ;;  %v4582_v38 = vld [vmem:[%s5137_s29 + $0x14] sm:$0x1] }
  0x59   : > { %v668_v53 = vunpack.c.l.b16 %v546_v49  ;;  %v627_v54 = vrot.slane %v626_v45, 4  ;;  %v636_v55 = vor.u32 %v635_v46, %v631_v41  ;;  %v341_v2 = vshll.u32 %v5300_v42, 16  ;;  %v4855_v45 = vld [vmem:[%s6446_s1 + $0x1c] sm:$0xf] }
  0x5a   : > { %v334_v57 = vrot.slane %v332_v51, 4  ;;  %v337_v58 = vrot.slane %v335_v52, 5  ;;  %v345_v59 = vshrl.u32 %v5300_v42, 16  ;;  %v351_v60 = vshll.u32 %v5304_v48, 16  ;;  %v4923_v51 = vld [vmem:[%s5137_s29] sm:$0xff] }
  0x5b   : > { %v688_v62 = vpack.c.b16 %v668_v53, %v667_v44  ;;  %v632_v3 = vsel %vm5149_vm3, %v627_v54, %v631_v41  ;;  %v637_v4 = vrot.slane %v636_v55, 4  ;;  %v343_v5 = vrot.slane %v341_v2, 5  ;;  %v4904_v2 = vld [vmem:[%s6446_s1 + $0x20] sm:$0xf] }
  0x5c   : > { %v675_v7 = vunpack.c.l.b16 %v632_v3  ;;  %v338_v8 = vor.u32 %v337_v58, %v334_v57  ;;  %v347_v9 = vrot.slane %v345_v59, 4  ;;  %v353_v10 = vrot.slane %v351_v60, 5 }
  0x5d   : > { %4349 = vmatmul.msk.bf16.gmra.mxu2 %vm693_vm4, %v688_v62  ;;  %v642_v13 = vsel %vm5149_vm3, %v637_v4, %v641_v50  ;;  %v4434_v14 = vrot.slane %v1055_v61, 9  ;;  %v1108_v19 = vrot.slane %v5162_v1, 5  ;;  %v2949_v22 = vsel %vm742_vm0, %v4726_v11, 0  ;;  %v4677_v50 = vld [vmem:[%s6446_s1 + $0x14] sm:$0xf] }
  0x5e   : > { %v676_v15 = vunpack.c.l.b16 %v642_v13  ;;  %v339_v16 = vrot.slane %v338_v8, 4  ;;  %v348_v17 = vor.u32 %v347_v9, %v343_v5  ;;  %v1779_v23 = vshrl.u32 %v4580_v6, 16  ;;  %2958 = vmatpush.bf16.msra.mxu2 %v2949_v22  ;;  %v1056_v8 = vld [vmem:[%s5137_s29 + $0xc] sm:$0xe] }
  0x5f   : > { %v1782_v24 = vshll.u32 %v4580_v6, 16  ;;  %v1788_v26 = vshll.u32 %v4581_v12, 16  ;;  %v1109_v33 = vsel %vm5323_vm7, %v4434_v14, %v1108_v19  ;;  %v1110_v35 = vrot.slane %v1108_v19, 4  ;;  %v4584_v6 = vld [vmem:[%s5137_s29 + $0x1c] sm:$0xf] }
  0x60   : > { %v692_v29 = vpack.c.b16 %v676_v15, %v675_v7  ;;  %v344_v30 = vsel %vm5149_vm3, %v339_v16, %v343_v5  ;;  %v349_v31 = vrot.slane %v348_v17, 4  ;;  %v1220_v37 = vunpack.c.l.b16 %v1109_v33  ;;  %v4583_v5 = vld [vmem:[%s5137_s29 + $0x18] sm:$0xf]  ;;  %v4939_v15 = vld [vmem:[%s5137_s29 + $0xc] sm:$0xff] }
  0x61   : > { %v651_v34 = vunpack.c.l.b16 %v344_v30  ;;  %v1781_v1 = vrot.slane %v1779_v23, 4  ;;  %v1784_v40 = vrot.slane %v1782_v24, 5  ;;  %v1790_v41 = vrot.slane %v1788_v26, 5  ;;  %v4585_v30 = vld [vmem:[%s5137_s29 + $0x20] sm:$0x1] }
  0x62   : > { %4353 = vmatmul.msk.bf16.gmra.mxu3 %vm693_vm4, %v692_v29  ;;  %v354_v39 = vsel %vm5149_vm3, %v349_v31, %v353_v10  ;;  %v1792_v44 = vshrl.u32 %v4581_v12, 16  ;;  %v1112_v49 = vsel %vm5323_vm7, %v1110_v35, %v1111_v43  ;;  %v1798_v55 = vshll.u32 %v4582_v38, 16  ;;  %v4924_v35 = vld [vmem:[%s5137_s29 + $0xc] sm:$0xff] }
  0x63   : > { %v652_v46 = vunpack.c.l.b16 %v354_v39  ;;  %v1221_v52 = vunpack.c.l.b16 %v1112_v49  ;;  %v1785_v53 = vor.u32 %v1784_v40, %v1781_v1  ;;  %v3603_v58 = vsel %vm742_vm0, %v4855_v45, 0 }
  0x64   : > { %v1794_v54 = vrot.slane %v1792_v44, 4  ;;  %3612 = vmatpush.bf16.msra.mxu3 %v3603_v58  ;;  %v2659_v60 = vsel %vm742_vm0, %v4677_v50, 0  ;;  %v4001_v61 = vsel %vm742_vm0, %v4904_v2, 0  ;;  %v1800_v4 = vrot.slane %v1798_v55, 5  ;;  %v1057_v50 = vld [vmem:[%s5137_s29 + $0x18] sm:$0xe] }
  0x65   : > { %v680_v57 = vpack.c.b16 %v652_v46, %v651_v34  ;;  %v1252_v43 = vpack.c.b16 %v1221_v52, %v1220_v37  ;;  %2668 = vmatpush.bf16.msra.mxu1 %v2659_v60  ;;  %v1786_v62 = vrot.slane %v1785_v53, 4  ;;  %4010 = vmatpush.bf16.msra.mxu0 %v4001_v61  ;;  %v1115_v7 = vrot.slane %v5208_v28, 5  ;;  %v4587_v46 = vld [vmem:[%s5137_s29 + $0x28] sm:$0xf] }
  0x66   : > { %v1795_v59 = vor.u32 %v1794_v54, %v1790_v41  ;;  %v1803_v9 = vshrl.u32 %v4583_v5, 16  ;;  %v1806_v10 = vshll.u32 %v4583_v5, 16  ;;  %v1812_v13 = vshll.u32 %v4584_v6, 16 }
  0x67   : > { %4341 = vmatmul.msk.bf16.gmra.mxu0 %vm693_vm4, %v680_v57  ;;  %v1791_v11 = vsel %vm5149_vm3, %v1786_v62, %v1790_v41  ;;  %v1816_v14 = vshrl.u32 %v4584_v6, 16  ;;  %v4435_v16 = vrot.slane %v1056_v8, 9  ;;  %v1117_v17 = vrot.slane %v1115_v7, 4  ;;  %v4586_v41 = vld [vmem:[%s5137_s29 + $0x24] sm:$0xf] }
  0x68   : > { %4418 = vmatmul.msk.bf16.vlgmr.msrb.gmra.mxu1 %vm693_vm4, %v4923_v51  ;;  %v1796_v3 = vrot.slane %v1795_v59, 4  ;;  %v1118_v28 = vrot.slane %v5211_v32, 5  ;;  %v2164_v19 = vunpack.c.l.b16 %v1791_v11  ;;  %v1805_v23 = vrot.slane %v1803_v9, 4  ;;  %v4588_v6 = vld [vmem:[%s5137_s29 + $0x2c] sm:$0x1] }
  0x69   : > { %v1808_v24 = vrot.slane %v1806_v10, 5  ;;  %v1814_v26 = vrot.slane %v1812_v13, 5  ;;  %v1818_v29 = vrot.slane %v1816_v14, 4  ;;  %v1116_v31 = vsel %vm5323_vm7, %v4435_v16, %v1115_v7 }
  0x6a   : > { %v1801_v12 = vsel %vm5149_vm3, %v1796_v3, %v1800_v4  ;;  %v1119_v33 = vsel %vm5323_vm7, %v1117_v17, %v1118_v28  ;;  %v1822_v38 = vshll.u32 %v4585_v30, 16  ;;  %v1222_v1 = vunpack.c.l.b16 %v1116_v31 }
  0x6b   : > { %v2165_v22 = vunpack.c.l.b16 %v1801_v12  ;;  %v1809_v32 = vor.u32 %v1808_v24, %v1805_v23  ;;  %v1819_v37 = vor.u32 %v1818_v29, %v1814_v26  ;;  %v1223_v39 = vunpack.c.l.b16 %v1119_v33  ;;  %v4925_v12 = vld [vmem:[%s5137_s29 + $0x18] sm:$0xff]  ;;  %v1058_v29 = vld [vmem:[%s5137_s29 + $0x24] sm:$0xe] }
  0x6c   : > { %v1824_v45 = vrot.slane %v1822_v38, 5  ;;  %v1122_v51 = vrot.slane %v5254_v63, 5  ;;  %v1827_v52 = vshrl.u32 %v4586_v41, 16  ;;  %v1830_v54 = vshll.u32 %v4586_v41, 16 }
  0x6d   : > { %4451 = vmatmul.msk.bf16.vlgmr.msrb.gmra.mxu2 %vm693_vm4, %v1252_v43  ;;  %v2196_v34 = vpack.c.b16 %v2165_v22, %v2164_v19  ;;  %v1810_v40 = vrot.slane %v1809_v32, 4  ;;  %v1820_v44 = vrot.slane %v1819_v37, 4  ;;  %v1253_v49 = vpack.c.b16 %v1223_v39, %v1222_v1  ;;  %v4940_v43 = vld [vmem:[%s5137_s29 + $0x18] sm:$0xff]  ;;  %v4589_v19 = vld [vmem:[%s5137_s29 + $0x30] sm:$0xf]  ;;  %v4941_v32 = vld [vmem:[%s5137_s29 + $0x24] sm:$0xff] }
  0x6e   : > { %v1836_v55 = vshll.u32 %v4587_v46, 16  ;;  %v1840_v2 = vshrl.u32 %v4587_v46, 16  ;;  %v4436_v58 = vrot.slane %v1057_v50, 9  ;;  %v1124_v60 = vrot.slane %v1122_v51, 4  ;;  %v4590_v22 = vld [vmem:[%s5137_s29 + $0x34] sm:$0xf] }
  0x6f   : > { %v1815_v53 = vsel %vm5149_vm3, %v1810_v40, %v1814_v26  ;;  %v1825_v57 = vsel %vm5149_vm3, %v1820_v44, %v1824_v45  ;;  %v1125_v63 = vrot.slane %v5257_v0, 5  ;;  %v1829_v61 = vrot.slane %v1827_v52, 4  ;;  %v4591_v45 = vld [vmem:[%s5137_s29 + $0x38] sm:$0x1] }
  0x70   : > { %v2166_v59 = vunpack.c.l.b16 %v1815_v53  ;;  %v2167_v62 = vunpack.c.l.b16 %v1825_v57  ;;  %v1832_v3 = vrot.slane %v1830_v54, 5  ;;  %v1838_v4 = vrot.slane %v1836_v55, 5  ;;  %v4593_v57 = vld [vmem:[%s5137_s29 + $0x40] sm:$0xf] }
  0x71   : > { %v1842_v5 = vrot.slane %v1840_v2, 4  ;;  %v1123_v7 = vsel %vm5323_vm7, %v4436_v58, %v1122_v51  ;;  %v1126_v8 = vsel %vm5323_vm7, %v1124_v60, %v1125_v63  ;;  %v1846_v0 = vshll.u32 %v4588_v6, 16  ;;  %v4592_v2 = vld [vmem:[%s5137_s29 + $0x3c] sm:$0xf]  ;;  %v4999_v63 = vld [vmem:[%s5137_s29 + $0x34] sm:$0xf] }
  0x72   : > { %4564 = vmatmul.msk.bf16.vlgmr.msrb.gmra.mxu3 %vm693_vm4, %v4939_v15  ;;  %v2197_v9 = vpack.c.b16 %v2167_v62, %v2166_v59  ;;  %v1833_v10 = vor.u32 %v1832_v3, %v1829_v61  ;;  %v1224_v13 = vunpack.c.l.b16 %v1123_v7  ;;  %v1225_v14 = vunpack.c.l.b16 %v1126_v8  ;;  %v1059_v62 = vld [vmem:[%s5137_s29 + $0x30] sm:$0xe] }
  0x73   : > { %v1843_v11 = vor.u32 %v1842_v5, %v1838_v4  ;;  %v1848_v17 = vrot.slane %v1846_v0, 5  ;;  %v1129_v23 = vrot.slane %v5300_v42, 5  ;;  %v1851_v30 = vshrl.u32 %v4589_v19, 16  ;;  %v5000_v0 = vld [vmem:[%s5137_s29 + $0x38] sm:$0x1] }
  0x74   : > { %v1834_v15 = vrot.slane %v1833_v10, 4  ;;  %v1254_v28 = vpack.c.b16 %v1225_v14, %v1224_v13  ;;  %v1854_v31 = vshll.u32 %v4589_v19, 16  ;;  %v1860_v33 = vshll.u32 %v4590_v22, 16  ;;  %v4942_v13 = vld [vmem:[%s5137_s29 + $0x30] sm:$0xff] }
  0x75   : > { %v1844_v16 = vrot.slane %v1843_v11, 4  ;;  %v1131_v37 = vrot.slane %v1129_v23, 4  ;;  %v1132_v42 = vrot.slane %v5304_v48, 5  ;;  %v1853_v39 = vrot.slane %v1851_v30, 4  ;;  %v4926_v48 = vld [vmem:[%s5137_s29 + $0x24] sm:$0xff] }
  0x76   : > { %v1839_v24 = vsel %vm5149_vm3, %v1834_v15, %v1838_v4  ;;  %v1856_v40 = vrot.slane %v1854_v31, 5  ;;  %v1862_v41 = vrot.slane %v1860_v33, 5  ;;  %v1870_v53 = vshll.u32 %v4591_v45, 16  ;;  %v4927_v33 = vld [vmem:[%s5137_s29 + $0x30] sm:$0xff] }
  0x77   : > { %4629 = vmatmul.msk.bf16.vlgmr.msrb.gmra.mxu0 %vm693_vm4, %v2196_v34  ;;  %v1849_v26 = vsel %vm5149_vm3, %v1844_v16, %v1848_v17  ;;  %v1864_v34 = vshrl.u32 %v4590_v22, 16  ;;  %v2168_v38 = vunpack.c.l.b16 %v1839_v24  ;;  %v1136_v61 = vrot.slane %v4999_v63, 5  ;;  %v4594_v22 = vld [vmem:[%s5137_s29 + $0x44] sm:$0x1] }
  0x78   : > { %4419 = vmatmul.msk.bf16.gmra.mxu1 %vm693_vm4, %v4924_v35  ;;  %v4437_v35 = vrot.slane %v1058_v29, 9  ;;  %v2169_v1 = vunpack.c.l.b16 %v1849_v26  ;;  %v1857_v51 = vor.u32 %v1856_v40, %v1853_v39  ;;  %v1872_v59 = vrot.slane %v1870_v53, 5  ;;  %v4595_v39 = vld [vmem:[%s5137_s29 + $0x48] sm:$0xf]  ;;  %v4596_v40 = vld [vmem:[%s5137_s29 + $0x4c] sm:$0xf] }
  0x79   : > { %v1866_v44 = vrot.slane %v1864_v34, 4  ;;  %v1875_v3 = vshrl.u32 %v4592_v2, 16  ;;  %v1878_v4 = vshll.u32 %v4592_v2, 16  ;;  %v1884_v5 = vshll.u32 %v4593_v57, 16  ;;  %v4943_v2 = vld [vmem:[%s5137_s29 + $0x3c] sm:$0xff] }
  0x7a   : > { %v1130_v46 = vsel %vm5323_vm7, %v4437_v35, %v1129_v23  ;;  %v2198_v50 = vpack.c.b16 %v2169_v1, %v2168_v38  ;;  %v1858_v58 = vrot.slane %v1857_v51, 4  ;;  %v1888_v6 = vshrl.u32 %v4593_v57, 16 }
  0x7b   : > { %v1867_v52 = vor.u32 %v1866_v44, %v1862_v41  ;;  %v1226_v54 = vunpack.c.l.b16 %v1130_v46  ;;  %v4438_v10 = vrot.slane %v1059_v62, 9  ;;  %v1138_v11 = vrot.slane %v1136_v61, 4 }
  0x7c   : > { %v1863_v8 = vsel %vm5149_vm3, %v1858_v58, %v1862_v41  ;;  %v1877_v14 = vrot.slane %v1875_v3, 4  ;;  %v1880_v15 = vrot.slane %v1878_v4, 5  ;;  %v1886_v16 = vrot.slane %v1884_v5, 5  ;;  %v4597_v4 = vld [vmem:[%s5137_s29 + $0x50] sm:$0x1] }
  0x7d   : > { %4452 = vmatmul.msk.bf16.gmra.mxu2 %vm693_vm4, %v1253_v49  ;;  %v1133_v49 = vsel %vm5323_vm7, %v1131_v37, %v1132_v42  ;;  %v1890_v17 = vrot.slane %v1888_v6, 4  ;;  %v1137_v23 = vsel %vm5323_vm7, %v4438_v10, %v1136_v61  ;;  %v1894_v30 = vshll.u32 %v4594_v22, 16 }
  0x7e   : > { %v1227_v55 = vunpack.c.l.b16 %v1133_v49  ;;  %v1881_v26 = vor.u32 %v1880_v15, %v1877_v14  ;;  %v1899_v51 = vshrl.u32 %v4595_v39, 16  ;;  %v1908_v53 = vshll.u32 %v4596_v40, 16 }
  0x7f   : > { %v1891_v29 = vor.u32 %v1890_v17, %v1886_v16  ;;  %v1896_v1 = vrot.slane %v1894_v30, 5 }
  0x80   : > { %v1255_v60 = vpack.c.b16 %v1227_v55, %v1226_v54  ;;  %v1882_v42 = vrot.slane %v1881_v26, 4  ;;  %v1912_v54 = vshrl.u32 %v4596_v40, 16  ;;  %v1910_v62 = vrot.slane %v1908_v53, 5 }
  0x81   : > { %v1892_v38 = vrot.slane %v1891_v29, 4  ;;  %v1150_v26 = vrot.slane %v5221_v47, 5 }
  0x82   : > { %4565 = vmatmul.msk.bf16.gmra.mxu3 %vm693_vm4, %v4940_v43  ;;  %v1868_v43 = vrot.slane %v1867_v52, 4  ;;  %v1887_v45 = vsel %vm5149_vm3, %v1882_v42, %v1886_v16  ;;  %v1902_v52 = vshll.u32 %v4595_v39, 16  ;;  %v1914_v3 = vrot.slane %v1912_v54, 4  ;;  %v4600_v54 = vld [vmem:[%s5137_s29 + $0x5c] sm:$0x1] }
  0x83   : > { %v1897_v46 = vsel %vm5149_vm3, %v1892_v38, %v1896_v1  ;;  %v2172_v55 = vunpack.c.l.b16 %v1887_v45  ;;  %v4944_v1 = vld [vmem:[%s5137_s29 + $0x48] sm:$0xff]  ;;  %v1152_v40 = vrot.slane %v1150_v26, 4 }
  0x84   : > { %v2173_v57 = vunpack.c.l.b16 %v1897_v46  ;;  %v1904_v61 = vrot.slane %v1902_v52, 5  ;;  %v1915_v10 = vor.u32 %v1914_v3, %v1910_v62 }
  0x86   : > { %v1916_v16 = vrot.slane %v1915_v10, 4 }
  0x87   : > { %4630 = vmatmul.msk.bf16.gmra.mxu0 %vm693_vm4, %v2197_v9  ;;  %v1873_v9 = vsel %vm5149_vm3, %v1868_v43, %v1872_v59 }
  0x88   : > { %4420 = vmatmul.msk.bf16.gmra.mxu1 %vm693_vm4, %v4925_v12  ;;  %v1139_v12 = vrot.slane %v5000_v0, 5  ;;  %v2171_v19 = vunpack.c.l.b16 %v1873_v9 }
  0x8a   : > { %v1140_v24 = vsel %vm5323_vm7, %v1138_v11, %v1139_v12  ;;  %v1918_v11 = vshll.u32 %v4597_v4, 16  ;;  %v4928_v12 = vld [vmem:[%s5137_s29 + $0x3c] sm:$0xff] }
  0x8b   : > { %v1229_v35 = vunpack.c.l.b16 %v1140_v24  ;;  %v4599_v24 = vld [vmem:[%s5137_s29 + $0x58] sm:$0xf]  ;;  %v4601_v4 = vld [vmem:[%s5137_s29 + $0x60] sm:$0xf] }
  0x8c   : > { %v1920_v17 = vrot.slane %v1918_v11, 5  ;;  %v1936_v42 = vshrl.u32 %v4599_v24, 16 }
  0x8d   : > { %4453 = vmatmul.msk.bf16.gmra.mxu2 %vm693_vm4, %v1254_v28  ;;  %v2170_v28 = vunpack.c.l.b16 %v1863_v8  ;;  %v2200_v8 = vpack.c.b16 %v2173_v57, %v2172_v55 }
  0x8e   : > { %v1921_v30 = vsel %vm5149_vm3, %v1916_v16, %v1920_v17  ;;  %v1938_v52 = vrot.slane %v1936_v42, 4 }
  0x8f   : > { %v2199_v31 = vpack.c.b16 %v2171_v19, %v2170_v28  ;;  %v2175_v46 = vunpack.c.l.b16 %v1921_v30 }
  0x92   : > { %4566 = vmatmul.msk.bf16.gmra.mxu3 %vm693_vm4, %v4941_v32  ;;  %v1228_v32 = vunpack.c.l.b16 %v1137_v23  ;;  %v4598_v23 = vld [vmem:[%s5137_s29 + $0x54] sm:$0xf] }
  0x94   : > { %v1256_v44 = vpack.c.b16 %v1229_v35, %v1228_v32  ;;  %v1926_v32 = vshll.u32 %v4598_v23, 16  ;;  %v1932_v35 = vshll.u32 %v4599_v24, 16 }
  0x97   : > { %4631 = vmatmul.msk.bf16.gmra.mxu0 %vm693_vm4, %v2198_v50  ;;  %v1143_v50 = vrot.slane %v5177_v20, 5  ;;  %v1901_v20 = vrot.slane %v1899_v51, 4  ;;  %v1934_v51 = vrot.slane %v1932_v35, 5  ;;  %v1160_v35 = vrot.slane %v5272_v27, 5 }
  0x98   : > { %4421 = vmatmul.msk.bf16.gmra.mxu1 %vm693_vm4, %v4926_v48  ;;  %v1060_v48 = vld [vmem:[%s5137_s29 + $0x3c] sm:$0xe] }
  0x99   : > { %v4439_v43 = vrot.slane %v1060_v48, 9  ;;  %v1145_v59 = vrot.slane %v1143_v50, 4  ;;  %v1928_v48 = vrot.slane %v1926_v32, 5 }
  0x9b   : > { %v1144_v5 = vsel %vm5323_vm7, %v4439_v43, %v1143_v50  ;;  %v4929_v43 = vld [vmem:[%s5137_s29 + $0x48] sm:$0xff] }
  0x9d   : > { %v5418_v7 = vpop.f32.mrf.mxu1  ;;  %4454 = vmatmul.msk.bf16.gmra.mxu2 %vm693_vm4, %v1255_v60  ;;  %v1146_v60 = vrot.slane %v5182_v25, 5  ;;  %v1905_v25 = vor.u32 %v1904_v61, %v1901_v20  ;;  %v1942_v20 = vshll.u32 %v4600_v54, 16  ;;  %v4930_v54 = vld [vmem:[%s5137_s29 + $0x54] sm:$0xff] }
  0x9f   : > { %v1147_v6 = vsel %vm5323_vm7, %v1145_v59, %v1146_v60  ;;  %v1906_v15 = vrot.slane %v1905_v25, 4  ;;  %v1939_v60 = vor.u32 %v1938_v52, %v1934_v51  ;;  %v1944_v10 = vrot.slane %v1942_v20, 5 }
  0xa0   : > { %v1231_v14 = vunpack.c.l.b16 %v1147_v6 }
  0xa1   : > { %v1911_v29 = vsel %vm5149_vm3, %v1906_v15, %v1910_v62  ;;  %v1940_v25 = vrot.slane %v1939_v60, 4  ;;  %v1157_v15 = vrot.slane %v5267_v21, 5 }
  0xa2   : > { %4567 = vmatmul.msk.bf16.gmra.mxu3 %vm693_vm4, %v4942_v13  ;;  %v1230_v13 = vunpack.c.l.b16 %v1144_v5  ;;  %v2174_v45 = vunpack.c.l.b16 %v1911_v29  ;;  %v4602_v5 = vld [vmem:[%s5137_s29 + $0x64] sm:$0xf] }
  0xa3   : > { %v1960_v16 = vshrl.u32 %v4602_v5, 16  ;;  %v1945_v24 = vsel %vm5149_vm3, %v1940_v25, %v1944_v10  ;;  %v1159_v32 = vrot.slane %v1157_v15, 4  ;;  %v5001_v10 = vld [vmem:[%s5137_s29 + $0x64] sm:$0xf] }
  0xa4   : > { %v1257_v19 = vpack.c.b16 %v1231_v14, %v1230_v13  ;;  %v2201_v57 = vpack.c.b16 %v2175_v46, %v2174_v45  ;;  %v1950_v13 = vshll.u32 %v4601_v4, 16  ;;  %v1956_v14 = vshll.u32 %v4602_v5, 16 }
  0xa5   : > { %v5434_v34 = vpop.f32.mrf.mxu1  ;;  %v1962_v42 = vrot.slane %v1960_v16, 4 }
  0xa6   : > { %v1952_v30 = vrot.slane %v1950_v13, 5  ;;  %v1063_v13 = vld [vmem:[%s5137_s29 + $0x60] sm:$0xe] }
  0xa7   : > { %v5436_v37 = vpop.f32.mrf.mxu2  ;;  %4632 = vmatmul.msk.bf16.gmra.mxu0 %vm693_vm4, %v2199_v31  ;;  %v1061_v31 = vld [vmem:[%s5137_s29 + $0x48] sm:$0xe] }
  0xa8   : > { %4422 = vmatmul.msk.bf16.gmra.mxu1 %vm693_vm4, %v4927_v33  ;;  %v1923_v33 = vshrl.u32 %v4598_v23, 16  ;;  %v4440_v47 = vrot.slane %v1061_v31, 9  ;;  %v1958_v31 = vrot.slane %v1956_v14, 5 }
  0xaa   : > { %v5442_v41 = vpop.f32.mrf.mxu0  ;;  %v1925_v50 = vrot.slane %v1923_v33, 4  ;;  %v4945_v33 = vld [vmem:[%s5137_s29 + $0x54] sm:$0xff]  ;;  %v1963_v27 = vor.u32 %v1962_v42, %v1958_v31 }
  0xab   : > { %v5448_v49 = vpop.f32.mrf.mxu3 }
  0xac   : > { %v1929_v59 = vor.u32 %v1928_v48, %v1925_v50  ;;  %v1161_v48 = vsel %vm5323_vm7, %v1159_v32, %v1160_v35  ;;  %v1964_v60 = vrot.slane %v1963_v27, 4 }
  0xad   : > { %4455 = vmatmul.msk.bf16.gmra.mxu2 %vm693_vm4, %v1256_v44  ;;  %v1153_v44 = vrot.slane %v5226_v56, 5 }
  0xaf   : > { %v5454_v58 = vpop.f32.mrf.mxu1  ;;  %v5457_v63 = vpop.f32.mrf.mxu2  ;;  %v1154_v56 = vsel %vm5323_vm7, %v1152_v40, %v1153_v44  ;;  %v4603_v40 = vld [vmem:[%s5137_s29 + $0x68] sm:$0x1] }
  0xb0   : > { %v1233_v62 = vunpack.c.l.b16 %v1154_v56 }
  0xb2   : > { %4568 = vmatmul.msk.bf16.gmra.mxu3 %vm693_vm4, %v4943_v2  ;;  %v5465_v9 = vpop.f32.mrf.mxu0  ;;  %v1151_v2 = vsel %vm5323_vm7, %v4440_v47, %v1150_v26  ;;  %v2177_v47 = vunpack.c.l.b16 %v1945_v24 }
  0xb3   : > { %v5467_v0 = vpop.f32.mrf.mxu3  ;;  %v1232_v61 = vunpack.c.l.b16 %v1151_v2 }
  0xb5   : > { %v1258_v11 = vpack.c.b16 %v1233_v62, %v1232_v61  ;;  %v4604_v61 = vld [vmem:[%s5137_s29 + $0x6c] sm:$0xf]  ;;  %v4605_v62 = vld [vmem:[%s5137_s29 + $0x70] sm:$0xf] }
  0xb6   : > { %v1971_v14 = vshrl.u32 %v4604_v61, 16  ;;  %v1980_v16 = vshll.u32 %v4605_v62, 16 }
  0xb7   : > { %4633 = vmatmul.msk.bf16.gmra.mxu0 %vm693_vm4, %v2200_v8  ;;  %v5471_v28 = vpop.f32.mrf.mxu1  ;;  %v1930_v8 = vrot.slane %v1929_v59, 4 }
  0xb8   : > { %4423 = vmatmul.msk.bf16.gmra.mxu1 %vm693_vm4, %v4928_v12  ;;  %v1947_v12 = vshrl.u32 %v4601_v4, 16  ;;  %v1973_v35 = vrot.slane %v1971_v14, 4  ;;  %v4608_v14 = vld [vmem:[%s5137_s29 + $0x7c] sm:$0xf] }
  0xb9   : > { %v1935_v23 = vsel %vm5149_vm3, %v1930_v8, %v1934_v51  ;;  %v1966_v51 = vshll.u32 %v4603_v40, 16 }
  0xba   : > { %v5474_v22 = vpop.f32.mrf.mxu2  ;;  %v1949_v29 = vrot.slane %v1947_v12, 4 }
  0xbb   : > { %v1968_v20 = vrot.slane %v1966_v51, 5 }
  0xbc   : > { %v1953_v46 = vor.u32 %v1952_v30, %v1949_v29  ;;  %v4946_v30 = vld [vmem:[%s5137_s29 + $0x60] sm:$0xff] }
  0xbd   : > { %4456 = vmatmul.msk.bf16.gmra.mxu2 %vm693_vm4, %v1257_v19  ;;  %v1062_v19 = vld [vmem:[%s5137_s29 + $0x54] sm:$0xe]  ;;  %v1969_v25 = vsel %vm5149_vm3, %v1964_v60, %v1968_v20 }
  0xbe   : > { %v5484_v38 = vpop.f32.mrf.mxu0  ;;  %v4441_v21 = vrot.slane %v1062_v19, 9  ;;  %v1954_v59 = vrot.slane %v1953_v46, 4  ;;  %v1984_v19 = vshrl.u32 %v4605_v62, 16  ;;  %v4606_v46 = vld [vmem:[%s5137_s29 + $0x74] sm:$0x1] }
  0xbf   : > { %v5488_v39 = vpop.f32.mrf.mxu3 }
  0xc0   : > { %v1158_v50 = vsel %vm5323_vm7, %v4441_v21, %v1157_v15  ;;  %v1959_v8 = vsel %vm5149_vm3, %v1954_v59, %v1958_v31  ;;  %v1974_v15 = vshll.u32 %v4604_v61, 16  ;;  %v4442_v21 = vrot.slane %v1063_v13, 9  ;;  %v4607_v13 = vld [vmem:[%s5137_s29 + $0x78] sm:$0xf] }
  0xc1   : > { %v5491_v53 = vpop.f32.mrf.mxu1  ;;  %v1234_v56 = vunpack.c.l.b16 %v1158_v50  ;;  %v2178_v31 = vunpack.c.l.b16 %v1959_v8 }
  0xc2   : > { %4569 = vmatmul.msk.bf16.gmra.mxu3 %vm693_vm4, %v4944_v1  ;;  %v5495_v55 = vpop.f32.mrf.mxu2  ;;  %v2176_v1 = vunpack.c.l.b16 %v1935_v23  ;;  %v5002_v23 = vld [vmem:[%s5137_s29 + $0x68] sm:$0x1]  ;;  %v1976_v42 = vrot.slane %v1974_v15, 5  ;;  %v5003_v15 = vld [vmem:[%s5137_s29 + $0x70] sm:$0xf] }
  0xc3   : > { %v1167_v24 = vrot.slane %v5002_v23, 5  ;;  %v1064_v23 = vld [vmem:[%s5137_s29 + $0x6c] sm:$0xe] }
  0xc4   : > { %v2202_v52 = vpack.c.b16 %v2177_v47, %v2176_v1  ;;  %v1982_v1 = vrot.slane %v1980_v16, 5  ;;  %v1986_v47 = vrot.slane %v1984_v19, 4  ;;  %v1977_v51 = vor.u32 %v1976_v42, %v1973_v35  ;;  %v5004_v42 = vld [vmem:[%s5137_s29 + $0x74] sm:$0x1] }
  0xc5   : > { %v1171_v16 = vrot.slane %v5003_v15, 5 }
  0xc6   : > { %v5502_v3 = vpop.f32.mrf.mxu0 }
  0xc7   : > { %4634 = vmatmul.msk.bf16.gmra.mxu0 %vm693_vm4, %v2201_v57  ;;  %v5507_v6 = vpop.f32.mrf.mxu3  ;;  %v1235_v57 = vunpack.c.l.b16 %v1161_v48 }
  0xc8   : > { %4424 = vmatmul.msk.bf16.gmra.mxu1 %vm693_vm4, %v4929_v43 }
  0xc9   : > { %v5511_v17 = vpop.f32.mrf.mxu1  ;;  %v1259_v4 = vpack.c.b16 %v1235_v57, %v1234_v56  ;;  %v4931_v57 = vld [vmem:[%s5137_s29 + $0x60] sm:$0xff] }
  0xcd   : > { %v5518_v26 = vpop.f32.mrf.mxu2  ;;  %4457 = vmatmul.msk.bf16.gmra.mxu2 %vm693_vm4, %v1258_v11  ;;  %v1164_v11 = vrot.slane %v5001_v10, 5 }
  0xcf   : > { %v1166_v32 = vrot.slane %v1164_v11, 4  ;;  %v1165_v50 = vsel %vm5323_vm7, %v4442_v21, %v1164_v11  ;;  %v2008_v21 = vshrl.u32 %v4608_v14, 16 }
  0xd0   : > { %v5524_v44 = vpop.f32.mrf.mxu0  ;;  %v1236_v20 = vunpack.c.l.b16 %v1165_v50  ;;  %v4443_v50 = vrot.slane %v1064_v23, 9 }
  0xd1   : > { %v5526_v45 = vpop.f32.mrf.mxu3  ;;  %v1168_v48 = vsel %vm5323_vm7, %v1166_v32, %v1167_v24 }
  0xd2   : > { %4570 = vmatmul.msk.bf16.gmra.mxu3 %vm693_vm4, %v4945_v33  ;;  %v2179_v33 = vunpack.c.l.b16 %v1969_v25  ;;  %v1237_v61 = vunpack.c.l.b16 %v1168_v48  ;;  %v1173_v48 = vrot.slane %v1171_v16, 4 }
  0xd4   : > { %v2203_v27 = vpack.c.b16 %v2179_v33, %v2178_v31  ;;  %v1260_v11 = vpack.c.b16 %v1237_v61, %v1236_v20  ;;  %v1998_v31 = vshll.u32 %v4607_v13, 16  ;;  %v2004_v33 = vshll.u32 %v4608_v14, 16 }
  0xd5   : > { %v5534_v2 = vpop.f32.mrf.mxu1  ;;  %v5536_v43 = vpop.f32.mrf.mxu2  ;;  %v2010_v20 = vrot.slane %v2008_v21, 4 }
  0xd7   : > { %4635 = vmatmul.msk.bf16.gmra.mxu0 %vm693_vm4, %v2202_v52  ;;  %v1987_v52 = vor.u32 %v1986_v47, %v1982_v1  ;;  %v1174_v47 = vrot.slane %v5004_v42, 5 }
  0xd8   : > { %4425 = vmatmul.msk.bf16.gmra.mxu1 %vm693_vm4, %v4930_v54  ;;  %v5542_v5 = vpop.f32.mrf.mxu0  ;;  %v1990_v54 = vshll.u32 %v4606_v46, 16  ;;  %v4947_v46 = vld [vmem:[%s5137_s29 + $0x6c] sm:$0xff] }
  0xd9   : > { %v5549_v12 = vpop.f32.mrf.mxu3  ;;  %v1988_v8 = vrot.slane %v1987_v52, 4 }
  0xda   : > { %v1992_v25 = vrot.slane %v1990_v54, 5 }
  0xdd   : > { %4458 = vmatmul.msk.bf16.gmra.mxu2 %vm693_vm4, %v1259_v4  ;;  %v5554_v29 = vpop.f32.mrf.mxu1  ;;  %v1978_v4 = vrot.slane %v1977_v51, 4 }
  0xdf   : > { %v1983_v19 = vsel %vm5149_vm3, %v1978_v4, %v1982_v1  ;;  %v4609_v4 = vld [vmem:[%s5137_s29 + $0x80] sm:$0x1] }
  0xe0   : > { %v5557_v40 = vpop.f32.mrf.mxu2 }
  0xe2   : > { %4571 = vmatmul.msk.bf16.gmra.mxu3 %vm693_vm4, %v4946_v30  ;;  %v1995_v30 = vshrl.u32 %v4607_v13, 16  ;;  %v4932_v13 = vld [vmem:[%s5137_s29 + $0x6c] sm:$0xff] }
  0xe4   : > { %v5565_v56 = vpop.f32.mrf.mxu0  ;;  %v1997_v54 = vrot.slane %v1995_v30, 4 }
  0xe5   : > { %v5568_v59 = vpop.f32.mrf.mxu3  ;;  %v975_v60 = vpop.f32.mrf.mxu1 }
  0xe6   : > { %v976_v62 = vadd.f32 %v975_v60, %v5442_v41  ;;  %v1993_v41 = vsel %vm5149_vm3, %v1988_v8, %v1992_v25  ;;  %v2006_v60 = vrot.slane %v2004_v33, 5  ;;  %v1172_v8 = vsel %vm5323_vm7, %v4443_v50, %v1171_v16 }
  0xe7   : > { %4636 = vmatmul.msk.bf16.gmra.mxu0 %vm693_vm4, %v2203_v27  ;;  %v2180_v27 = vunpack.c.l.b16 %v1983_v19  ;;  %v2181_v51 = vunpack.c.l.b16 %v1993_v41  ;;  %v2014_v19 = vshll.u32 %v4609_v4, 16 }
  0xe8   : > { %v5572_v10 = vpop.f32.mrf.mxu2  ;;  %4426 = vmatmul.msk.bf16.gmra.mxu1 %vm693_vm4, %v4931_v57  ;;  %v2000_v57 = vrot.slane %v1998_v31, 5  ;;  %v2011_v15 = vor.u32 %v2010_v20, %v2006_v60 }
  0xe9   : > { %v2204_v25 = vpack.c.b16 %v2181_v51, %v2180_v27  ;;  %v2016_v42 = vrot.slane %v2014_v19, 5  ;;  %v4611_v27 = vld [vmem:[%s5137_s29 + $0x88] sm:$0xf]  ;;  %v5005_v51 = vld [vmem:[%s5137_s29 + $0x7c] sm:$0xf] }
  0xea   : > { %v2001_v14 = vor.u32 %v2000_v57, %v1997_v54  ;;  %v1065_v54 = vld [vmem:[%s5137_s29 + $0x78] sm:$0xe] }
  0xec   : > { %v5583_v24 = vpop.f32.mrf.mxu0  ;;  %v2002_v21 = vrot.slane %v2001_v14, 4 }
  0xed   : > { %v5585_v32 = vpop.f32.mrf.mxu3  ;;  %4459 = vmatmul.msk.bf16.gmra.mxu2 %vm693_vm4, %v1260_v11  ;;  %v977_v35 = vpop.f32.mrf.mxu1 }
  0xee   : > { %v978_v1 = vadd.f32 %v977_v35, %v5465_v9  ;;  %v1175_v9 = vsel %vm5323_vm7, %v1173_v48, %v1174_v47  ;;  %v2012_v35 = vrot.slane %v2011_v15, 4  ;;  %v4610_v47 = vld [vmem:[%s5137_s29 + $0x84] sm:$0xf]  ;;  %v4948_v15 = vld [vmem:[%s5137_s29 + $0x78] sm:$0xff] }
  0xef   : > { %v1239_v30 = vunpack.c.l.b16 %v1175_v9  ;;  %v2022_v57 = vshll.u32 %v4610_v47, 16  ;;  %v2032_v9 = vshrl.u32 %v4611_v27, 16 }
  0xf0   : > { %v1328_v52 = vpop.f32.mrf.mxu2  ;;  %v2017_v4 = vsel %vm5149_vm3, %v2012_v35, %v2016_v42 }
  0xf1   : > { %v1408_v61 = vadd.f32 %v1328_v52, %v976_v62  ;;  %v1238_v62 = vunpack.c.l.b16 %v1172_v8  ;;  %v1178_v52 = vrot.slane %v5005_v51, 5  ;;  %v2028_v8 = vshll.u32 %v4611_v27, 16 }
  0xf2   : > { %4572 = vmatmul.msk.bf16.gmra.mxu3 %vm693_vm4, %v4947_v46  ;;  %v2034_v35 = vrot.slane %v2032_v9, 4 }
  0xf3   : > { %v1261_v48 = vpack.c.b16 %v1239_v30, %v1238_v62 }
  0xf4   : > { %v2272_v11 = vpop.f32.mrf.mxu0 }
  0xf5   : > { %v1618_v41 = vpop.f32.mrf.mxu3  ;;  %v980_v23 = vpop.f32.mrf.mxu1 }
  0xf6   : > { %v1698_v31 = vadd.f32 %v1618_v41, %v1408_v61  ;;  %v981_v16 = vadd.f32 %v980_v23, %v5484_v38  ;;  %v2019_v38 = vshrl.u32 %v4610_v47, 16  ;;  %v2007_v61 = vsel %vm5149_vm3, %v2002_v21, %v2006_v60 }
  0xf7   : > { %4637 = vmatmul.msk.bf16.gmra.mxu0 %vm693_vm4, %v2204_v25  ;;  %v5006_v25 = vld [vmem:[%s5137_s29 + $0x80] sm:$0x1]  ;;  %v4444_v41 = vrot.slane %v1065_v54, 9  ;;  %v1180_v23 = vrot.slane %v1178_v52, 4  ;;  %v2182_v62 = vunpack.c.l.b16 %v2007_v61  ;;  %v2183_v60 = vunpack.c.l.b16 %v2017_v4 }
  0xf8   : > { %v1330_v33 = vpop.f32.mrf.mxu2  ;;  %4427 = vmatmul.msk.bf16.gmra.mxu1 %vm693_vm4, %v4932_v13  ;;  %v5602_v46 = vadd.f32 %v2272_v11, %v1698_v31  ;;  %v1181_v11 = vrot.slane %v5006_v25, 5  ;;  %v2021_v30 = vrot.slane %v2019_v38, 4  ;;  %v2024_v31 = vrot.slane %v2022_v57, 5  ;;  %v4933_v38 = vld [vmem:[%s5137_s29 + $0x78] sm:$0xff] }
  0xf9   : > { %v1409_v50 = vadd.f32 %v1330_v33, %v978_v1  ;;  %v2030_v21 = vrot.slane %v2028_v8, 5  ;;  %v2205_v27 = vpack.c.b16 %v2183_v60, %v2182_v62  ;;  %v4614_v62 = vld [vmem:[%s5137_s29 + $0x94] sm:$0xf]  ;;  %v5007_v60 = vld [vmem:[%s5137_s29 + $0x88] sm:$0xf] }
  0xfa   : > { %v2025_v51 = vor.u32 %v2024_v31, %v2021_v30  ;;  %v1185_v30 = vrot.slane %v5007_v60, 5  ;;  %v1066_v31 = vld [vmem:[%s5137_s29 + $0x84] sm:$0xe] }
  0xfb   : > { %v2035_v57 = vor.u32 %v2034_v35, %v2030_v21 }
  0xfc   : > { %v2274_v20 = vpop.f32.mrf.mxu0  ;;  %v2026_v25 = vrot.slane %v2025_v51, 4 }
  0xfd   : > { %v1620_v1 = vpop.f32.mrf.mxu3  ;;  %4460 = vmatmul.msk.bf16.gmra.mxu2 %vm693_vm4, %v1261_v48  ;;  %v982_v13 = vpop.f32.mrf.mxu1  ;;  %v4612_v48 = vld [vmem:[%s5137_s29 + $0x8c] sm:$0x1] }
  0xfe   : > { %v1699_v14 = vadd.f32 %v1620_v1, %v1409_v50  ;;  %v983_v19 = vadd.f32 %v982_v13, %v5502_v3  ;;  %v1179_v50 = vsel %vm5323_vm7, %v4444_v41, %v1178_v52  ;;  %v1182_v3 = vsel %vm5323_vm7, %v1180_v23, %v1181_v11 }
  0xff   : > { %v2038_v61 = vshll.u32 %v4612_v48, 16  ;;  %v1241_v8 = vunpack.c.l.b16 %v1182_v3  ;;  %v2036_v1 = vrot.slane %v2035_v57, 4  ;;  %v2056_v3 = vshrl.u32 %v4614_v62, 16  ;;  %v4949_v57 = vld [vmem:[%s5137_s29 + $0x84] sm:$0xff] }
 0x100   : > { %v1333_v33 = vpop.f32.mrf.mxu2  ;;  %v5615_v42 = vadd.f32 %v2274_v20, %v1699_v14  ;;  %v4613_v14 = vld [vmem:[%s5137_s29 + $0x90] sm:$0xf] }
 0x101   : > { %v1410_v47 = vadd.f32 %v1333_v33, %v981_v16  ;;  %v1240_v16 = vunpack.c.l.b16 %v1179_v50  ;;  %v2040_v13 = vrot.slane %v2038_v61, 5  ;;  %v2043_v33 = vshrl.u32 %v4613_v14, 16 }
 0x102   : > { %4573 = vmatmul.msk.bf16.gmra.mxu3 %vm693_vm4, %v4948_v15  ;;  %v2046_v48 = vshll.u32 %v4613_v14, 16  ;;  %v2052_v50 = vshll.u32 %v4614_v62, 16  ;;  %v4445_v61 = vrot.slane %v1066_v31, 9 }
 0x103   : > { %v1262_v23 = vpack.c.b16 %v1241_v8, %v1240_v16  ;;  %v2045_v8 = vrot.slane %v2043_v33, 4 }
 0x104   : > { %v2277_v54 = vpop.f32.mrf.mxu0 }
 0x105   : > { %v1623_v4 = vpop.f32.mrf.mxu3  ;;  %v985_v20 = vpop.f32.mrf.mxu1 }
 0x106   : > { %v1700_v9 = vadd.f32 %v1623_v4, %v1410_v47  ;;  %v986_v52 = vadd.f32 %v985_v20, %v5524_v44  ;;  %v2031_v44 = vsel %vm5149_vm3, %v2026_v25, %v2030_v21  ;;  %v2041_v47 = vsel %vm5149_vm3, %v2036_v1, %v2040_v13 }
 0x107   : > { %4638 = vmatmul.msk.bf16.gmra.mxu0 %vm693_vm4, %v2205_v27  ;;  %v5008_v27 = vld [vmem:[%s5137_s29 + $0x8c] sm:$0x1]  ;;  %v1187_v4 = vrot.slane %v1185_v30, 4  ;;  %v2184_v20 = vunpack.c.l.b16 %v2031_v44  ;;  %v2185_v16 = vunpack.c.l.b16 %v2041_v47  ;;  %v2048_v25 = vrot.slane %v2046_v48, 5  ;;  %v4934_v44 = vld [vmem:[%s5137_s29 + $0x84] sm:$0xff] }
 0x108   : > { %v1335_v11 = vpop.f32.mrf.mxu2  ;;  %4428 = vmatmul.msk.bf16.gmra.mxu1 %vm693_vm4, %v4933_v38  ;;  %v5628_v15 = vadd.f32 %v2277_v54, %v1700_v9  ;;  %v1188_v51 = vrot.slane %v5008_v27, 5  ;;  %v2058_v1 = vrot.slane %v2056_v3, 4 }
 0x109   : > { %v1411_v41 = vadd.f32 %v1335_v11, %v983_v19  ;;  %v2054_v11 = vrot.slane %v2052_v50, 5  ;;  %v2206_v62 = vpack.c.b16 %v2185_v16, %v2184_v20  ;;  %v2049_v31 = vor.u32 %v2048_v25, %v2045_v8  ;;  %v4617_v20 = vld [vmem:[%s5137_s29 + $0xa0] sm:$0xf]  ;;  %v5009_v16 = vld [vmem:[%s5137_s29 + $0x94] sm:$0xf] }
 0x10a   : > { %v1192_v8 = vrot.slane %v5009_v16, 5 }
 0x10b   : > { %v2059_v33 = vor.u32 %v2058_v1, %v2054_v11 }
 0x10c   : > { %v2279_v35 = vpop.f32.mrf.mxu0 }
 0x10d   : > { %v1625_v19 = vpop.f32.mrf.mxu3  ;;  %4461 = vmatmul.msk.bf16.gmra.mxu2 %vm693_vm4, %v1262_v23  ;;  %v987_v54 = vpop.f32.mrf.mxu1  ;;  %v4615_v23 = vld [vmem:[%s5137_s29 + $0x98] sm:$0x1] }
 0x10e   : > { %v1701_v38 = vadd.f32 %v1625_v19, %v1411_v41  ;;  %v988_v21 = vadd.f32 %v987_v54, %v5542_v5  ;;  %v1186_v41 = vsel %vm5323_vm7, %v4445_v61, %v1185_v30  ;;  %v1189_v5 = vsel %vm5323_vm7, %v1187_v4, %v1188_v51 }
 0x10f   : > { %v2062_v47 = vshll.u32 %v4615_v23, 16  ;;  %v1243_v50 = vunpack.c.l.b16 %v1189_v5  ;;  %v2050_v51 = vrot.slane %v2049_v31, 4  ;;  %v2060_v19 = vrot.slane %v2059_v33, 4  ;;  %v4950_v33 = vld [vmem:[%s5137_s29 + $0x90] sm:$0xff] }
 0x110   : > { %v1338_v9 = vpop.f32.mrf.mxu2  ;;  %v5641_v13 = vadd.f32 %v2279_v35, %v1701_v38  ;;  %v4616_v38 = vld [vmem:[%s5137_s29 + $0x9c] sm:$0xf]  ;;  %v2080_v5 = vshrl.u32 %v4617_v20, 16 }
 0x111   : > { %v1412_v14 = vadd.f32 %v1338_v9, %v986_v52  ;;  %v1242_v52 = vunpack.c.l.b16 %v1186_v41  ;;  %v2064_v54 = vrot.slane %v2062_v47, 5  ;;  %v1067_v9 = vld [vmem:[%s5137_s29 + $0x90] sm:$0xe]  ;;  %v2070_v25 = vshll.u32 %v4616_v38, 16 }
 0x112   : > { %4574 = vmatmul.msk.bf16.gmra.mxu3 %vm693_vm4, %v4949_v57  ;;  %v2076_v41 = vshll.u32 %v4617_v20, 16 }
 0x113   : > { %v1263_v4 = vpack.c.b16 %v1243_v50, %v1242_v52  ;;  %v2065_v23 = vsel %vm5149_vm3, %v2060_v19, %v2064_v54  ;;  %v2082_v19 = vrot.slane %v2080_v5, 4 }
 0x114   : > { %v2282_v60 = vpop.f32.mrf.mxu0 }
 0x115   : > { %v1628_v48 = vpop.f32.mrf.mxu3  ;;  %v990_v35 = vpop.f32.mrf.mxu1 }
 0x116   : > { %v1702_v3 = vadd.f32 %v1628_v48, %v1412_v14  ;;  %v991_v30 = vadd.f32 %v990_v35, %v5565_v56  ;;  %v2067_v56 = vshrl.u32 %v4616_v38, 16  ;;  %v2055_v14 = vsel %vm5149_vm3, %v2050_v51, %v2054_v11 }
 0x117   : > { %4639 = vmatmul.msk.bf16.gmra.mxu0 %vm693_vm4, %v2206_v62  ;;  %v5010_v62 = vld [vmem:[%s5137_s29 + $0x98] sm:$0x1]  ;;  %v4446_v48 = vrot.slane %v1067_v9, 9  ;;  %v1194_v35 = vrot.slane %v1192_v8, 4  ;;  %v2186_v52 = vunpack.c.l.b16 %v2055_v14  ;;  %v2187_v11 = vunpack.c.l.b16 %v2065_v23 }
 0x118   : > { %v1340_v27 = vpop.f32.mrf.mxu2  ;;  %4429 = vmatmul.msk.bf16.gmra.mxu1 %vm693_vm4, %v4934_v44  ;;  %v5654_v57 = vadd.f32 %v2282_v60, %v1702_v3  ;;  %v1195_v60 = vrot.slane %v5010_v62, 5  ;;  %v2069_v50 = vrot.slane %v2067_v56, 4  ;;  %v2072_v3 = vrot.slane %v2070_v25, 5  ;;  %v4935_v56 = vld [vmem:[%s5137_s29 + $0x90] sm:$0xff] }
 0x119   : > { %v1413_v61 = vadd.f32 %v1340_v27, %v988_v21  ;;  %v2078_v51 = vrot.slane %v2076_v41, 5  ;;  %v2207_v20 = vpack.c.b16 %v2187_v11, %v2186_v52  ;;  %v4620_v11 = vld [vmem:[%s5137_s29 + $0xac] sm:$0xf] }
 0x11a   : > { %v2073_v16 = vor.u32 %v2072_v3, %v2069_v50  ;;  %v1068_v50 = vld [vmem:[%s5137_s29 + $0x9c] sm:$0xe] }
 0x11b   : > { %v2083_v25 = vor.u32 %v2082_v19, %v2078_v51 }
 0x11c   : > { %v2284_v1 = vpop.f32.mrf.mxu0 }
 0x11d   : > { %v1630_v21 = vpop.f32.mrf.mxu3  ;;  %4462 = vmatmul.msk.bf16.gmra.mxu2 %vm693_vm4, %v1263_v4  ;;  %v992_v44 = vpop.f32.mrf.mxu1  ;;  %v4618_v4 = vld [vmem:[%s5137_s29 + $0xa4] sm:$0x1] }
 0x11e   : > { %v1703_v31 = vadd.f32 %v1630_v21, %v1413_v61  ;;  %v993_v47 = vadd.f32 %v992_v44, %v5583_v24  ;;  %v1193_v61 = vsel %vm5323_vm7, %v4446_v48, %v1192_v8  ;;  %v1196_v24 = vsel %vm5323_vm7, %v1194_v35, %v1195_v60  ;;  %v4619_v44 = vld [vmem:[%s5137_s29 + $0xa8] sm:$0xf]  ;;  %v5011_v35 = vld [vmem:[%s5137_s29 + $0xa0] sm:$0xf] }
 0x11f   : > { %v2086_v14 = vshll.u32 %v4618_v4, 16  ;;  %v1245_v41 = vunpack.c.l.b16 %v1196_v24  ;;  %v2074_v8 = vrot.slane %v2073_v16, 4  ;;  %v2084_v60 = vrot.slane %v2083_v25, 4 }
 0x120   : > { %v1343_v27 = vpop.f32.mrf.mxu2  ;;  %v5667_v54 = vadd.f32 %v2284_v1, %v1703_v31  ;;  %v1199_v52 = vrot.slane %v5011_v35, 5  ;;  %v2094_v19 = vshll.u32 %v4619_v44, 16  ;;  %v2104_v24 = vshrl.u32 %v4620_v11, 16 }
 0x121   : > { %v1414_v38 = vadd.f32 %v1343_v27, %v991_v30  ;;  %v1244_v30 = vunpack.c.l.b16 %v1193_v61  ;;  %v2088_v21 = vrot.slane %v2086_v14, 5  ;;  %v2079_v3 = vsel %vm5149_vm3, %v2074_v8, %v2078_v51 }
 0x122   : > { %4575 = vmatmul.msk.bf16.gmra.mxu3 %vm693_vm4, %v4950_v33  ;;  %v2091_v27 = vshrl.u32 %v4619_v44, 16  ;;  %v2100_v61 = vshll.u32 %v4620_v11, 16  ;;  %v1201_v25 = vrot.slane %v1199_v52, 4  ;;  %v2188_v51 = vunpack.c.l.b16 %v2079_v3  ;;  %v4621_v11 = vld [vmem:[%s5137_s29 + $0xb0] sm:$0x1]  ;;  %v4936_v3 = vld [vmem:[%s5137_s29 + $0x9c] sm:$0xff] }
 0x123   : > { %v1264_v48 = vpack.c.b16 %v1245_v41, %v1244_v30  ;;  %v2089_v4 = vsel %vm5149_vm3, %v2084_v60, %v2088_v21  ;;  %v2096_v8 = vrot.slane %v2094_v19, 5  ;;  %v2106_v21 = vrot.slane %v2104_v24, 4 }
 0x124   : > { %v2287_v9 = vpop.f32.mrf.mxu0  ;;  %v2189_v41 = vunpack.c.l.b16 %v2089_v4  ;;  %v2102_v60 = vrot.slane %v2100_v61, 5  ;;  %v2110_v4 = vshll.u32 %v4621_v11, 16 }
 0x125   : > { %v1633_v1 = vpop.f32.mrf.mxu3  ;;  %v995_v23 = vpop.f32.mrf.mxu1 }
 0x126   : > { %v1704_v5 = vadd.f32 %v1633_v1, %v1414_v38  ;;  %v4951_v1 = vld [vmem:[%s5137_s29 + $0x9c] sm:$0xff]  ;;  %v996_v30 = vadd.f32 %v995_v23, %v5418_v7  ;;  %v2208_v7 = vpack.c.b16 %v2189_v41, %v2188_v51  ;;  %v2112_v51 = vrot.slane %v2110_v4, 5 }
 0x127   : > { %4640 = vmatmul.msk.bf16.gmra.mxu0 %vm693_vm4, %v2207_v20  ;;  %v5012_v20 = vld [vmem:[%s5137_s29 + $0xa4] sm:$0x1] }
 0x128   : > { %v1345_v62 = vpop.f32.mrf.mxu2  ;;  %4430 = vmatmul.msk.bf16.gmra.mxu1 %vm693_vm4, %v4935_v56  ;;  %v5679_v31 = vadd.f32 %v2287_v9, %v1704_v5  ;;  %v1202_v16 = vrot.slane %v5012_v20, 5  ;;  %v4447_v56 = vrot.slane %v1068_v50, 9  ;;  %v2093_v5 = vrot.slane %v2091_v27, 4 }
 0x129   : > { %v1415_v33 = vadd.f32 %v1345_v62, %v993_v47 }
 0x12a   : > { %v2097_v23 = vor.u32 %v2096_v8, %v2093_v5 }
 0x12c   : > { %v2289_v38 = vpop.f32.mrf.mxu0 }
 0x12d   : > { %v1635_v47 = vpop.f32.mrf.mxu3  ;;  %4463 = vmatmul.msk.bf16.gmra.mxu2 %vm693_vm4, %v1264_v48  ;;  %v997_v9 = vpop.f32.mrf.mxu1  ;;  %v1200_v48 = vsel %vm5323_vm7, %v4447_v56, %v1199_v52  ;;  %v4622_v52 = vld [vmem:[%s5137_s29 + $0xb4] sm:$0xf]  ;;  %v2098_v56 = vrot.slane %v2097_v23, 4 }
 0x12e   : > { %v1705_v14 = vadd.f32 %v1635_v47, %v1415_v33  ;;  %v1203_v33 = vsel %vm5323_vm7, %v1201_v25, %v1202_v16  ;;  %v1246_v27 = vunpack.c.l.b16 %v1200_v48  ;;  %v4623_v47 = vld [vmem:[%s5137_s29 + $0xb8] sm:$0xf]  ;;  %v998_v16 = vadd.f32 %v997_v9, %v5434_v34 }
 0x12f   : > { %v1247_v19 = vunpack.c.l.b16 %v1203_v33  ;;  %v2115_v5 = vshrl.u32 %v4622_v52, 16  ;;  %v2118_v8 = vshll.u32 %v4622_v52, 16  ;;  %v2128_v48 = vshrl.u32 %v4623_v47, 16  ;;  %v1069_v33 = vld [vmem:[%s5137_s29 + $0xa8] sm:$0xe] }
 0x130   : > { %v1348_v62 = vpop.f32.mrf.mxu2  ;;  %v5692_v44 = vadd.f32 %v2289_v38, %v1705_v14  ;;  %v2107_v38 = vor.u32 %v2106_v21, %v2102_v60  ;;  %v5013_v21 = vld [vmem:[%s5137_s29 + $0xac] sm:$0xf]  ;;  %v2103_v9 = vsel %vm5149_vm3, %v2098_v56, %v2102_v60 }
 0x131   : > { %v1416_v35 = vadd.f32 %v1348_v62, %v996_v30  ;;  %v1265_v14 = vpack.c.b16 %v1247_v19, %v1246_v27  ;;  %v2124_v62 = vshll.u32 %v4623_v47, 16  ;;  %v2117_v27 = vrot.slane %v2115_v5, 4 }
 0x132   : > { %4576 = vmatmul.msk.bf16.gmra.mxu3 %vm693_vm4, %v4951_v1  ;;  %v2108_v1 = vrot.slane %v2107_v38, 4  ;;  %v2120_v19 = vrot.slane %v2118_v8, 5  ;;  %v2130_v47 = vrot.slane %v2128_v48, 4  ;;  %v4937_v48 = vld [vmem:[%s5137_s29 + $0xa8] sm:$0xff] }
 0x133   : > { %v2126_v38 = vrot.slane %v2124_v62, 5 }
 0x134   : > { %v2292_v50 = vpop.f32.mrf.mxu0  ;;  %v2113_v11 = vsel %vm5149_vm3, %v2108_v1, %v2112_v51 }
 0x135   : > { %v1638_v61 = vpop.f32.mrf.mxu3  ;;  %v1000_v24 = vpop.f32.mrf.mxu1  ;;  %v2191_v56 = vunpack.c.l.b16 %v2113_v11  ;;  %v2131_v8 = vor.u32 %v2130_v47, %v2126_v38 }
 0x136   : > { %v1706_v20 = vadd.f32 %v1638_v61, %v1416_v35  ;;  %v1206_v35 = vrot.slane %v5013_v21, 5  ;;  %v4952_v61 = vld [vmem:[%s5137_s29 + $0xa8] sm:$0xff]  ;;  %v1001_v60 = vadd.f32 %v1000_v24, %v5454_v58 }
 0x137   : > { %4641 = vmatmul.msk.bf16.gmra.mxu0 %vm693_vm4, %v2208_v7  ;;  %v5014_v7 = vld [vmem:[%s5137_s29 + $0xb0] sm:$0x1] }
 0x138   : > { %v1350_v25 = vpop.f32.mrf.mxu2  ;;  %4431 = vmatmul.msk.bf16.gmra.mxu1 %vm693_vm4, %v4936_v3  ;;  %v5706_v30 = vadd.f32 %v2292_v50, %v1706_v20  ;;  %v1209_v23 = vrot.slane %v5014_v7, 5  ;;  %v4448_v20 = vrot.slane %v1069_v33, 9  ;;  %v1208_v52 = vrot.slane %v1206_v35, 4 }
 0x139   : > { %v1417_v41 = vadd.f32 %v1350_v25, %v998_v16  ;;  %v2190_v16 = vunpack.c.l.b16 %v2103_v9  ;;  %v4624_v25 = vld [vmem:[%s5137_s29 + $0xbc] sm:$0x1] }
 0x13a   : > { %v1210_v5 = vsel %vm5323_vm7, %v1208_v52, %v1209_v23  ;;  %v2134_v58 = vshll.u32 %v4624_v25, 16  ;;  %v4626_v52 = vld [vmem:[%s5137_s29 + $0xc4] sm:$0xf] }
 0x13b   : > { %v2209_v24 = vpack.c.b16 %v2191_v56, %v2190_v16  ;;  %v1249_v11 = vunpack.c.l.b16 %v1210_v5  ;;  %v1070_v16 = vld [vmem:[%s5137_s29 + $0xb4] sm:$0xe]  ;;  %v5016_v56 = vld [vmem:[%s5137_s29 + $0xb8] sm:$0xf]  ;;  %v2152_v5 = vshrl.u32 %v4626_v52, 16 }
 0x13c   : > { %v2294_v34 = vpop.f32.mrf.mxu0  ;;  %v1213_v25 = vrot.slane %v5016_v56, 5 }
 0x13d   : > { %v1640_v50 = vpop.f32.mrf.mxu3  ;;  %4464 = vmatmul.msk.bf16.gmra.mxu2 %vm693_vm4, %v1265_v14  ;;  %v1002_v3 = vpop.f32.mrf.mxu1  ;;  %v2121_v14 = vor.u32 %v2120_v19, %v2117_v27  ;;  %v2136_v27 = vrot.slane %v2134_v58, 5  ;;  %v4625_v19 = vld [vmem:[%s5137_s29 + $0xc0] sm:$0xf]  ;;  %v5017_v58 = vld [vmem:[%s5137_s29 + $0x14] sm:$0x1] }
 0x13e   : > { %v1707_v4 = vadd.f32 %v1640_v50, %v1417_v41  ;;  %v1207_v41 = vsel %vm5323_vm7, %v4448_v20, %v1206_v35  ;;  %v2132_v35 = vrot.slane %v2131_v8, 4  ;;  %v1003_v23 = vadd.f32 %v1002_v3, %v5471_v28 }
 0x13f   : > { %v1248_v9 = vunpack.c.l.b16 %v1207_v41  ;;  %v2122_v50 = vrot.slane %v2121_v14, 4  ;;  %v2139_v3 = vshrl.u32 %v4625_v19, 16  ;;  %v2142_v14 = vshll.u32 %v4625_v19, 16  ;;  %v4953_v19 = vld [vmem:[%s5137_s29 + $0xb4] sm:$0xff] }
 0x140   : > { %v1353_v1 = vpop.f32.mrf.mxu2  ;;  %v5719_v51 = vadd.f32 %v2294_v34, %v1707_v4  ;;  %v5015_v4 = vld [vmem:[%s5137_s29 + $0x10] sm:$0xf]  ;;  %v2137_v28 = vsel %vm5149_vm3, %v2132_v35, %v2136_v27  ;;  %v2148_v41 = vshll.u32 %v4626_v52, 16  ;;  %v1215_v35 = vrot.slane %v1213_v25, 4  ;;  %v4645_v27 = vld [vmem:[%s5137_s29 + $0xc] sm:$0xe] }
 0x141   : > { %v1418_v21 = vadd.f32 %v1353_v1, %v1001_v60  ;;  %v1266_v60 = vpack.c.b16 %v1249_v11, %v1248_v9  ;;  %v5018_v9 = vld [vmem:[%s5137_s29 + $0xbc] sm:$0x1]  ;;  %v4661_v52 = vrot.slane %v4645_v27, 9 }
 0x142   : > { %4577 = vmatmul.msk.bf16.gmra.mxu3 %vm693_vm4, %v4952_v61  ;;  %v2450_v61 = vrot.slane %v5015_v4, 5  ;;  %v2141_v4 = vrot.slane %v2139_v3, 4 }
 0x144   : > { %v2297_v62 = vpop.f32.mrf.mxu0  ;;  %v2452_v8 = vrot.slane %v2450_v61, 4 }
 0x145   : > { %v1643_v33 = vpop.f32.mrf.mxu3  ;;  %v1005_v34 = vpop.f32.mrf.mxu1 }
 0x146   : > { %v1708_v7 = vadd.f32 %v1643_v33, %v1418_v21  ;;  %v2127_v21 = vsel %vm5149_vm3, %v2122_v50, %v2126_v38  ;;  %v4449_v33 = vrot.slane %v1070_v16, 9  ;;  %v1006_v56 = vadd.f32 %v1005_v34, %v5491_v53 }
 0x147   : > { %4642 = vmatmul.msk.bf16.gmra.mxu0 %vm693_vm4, %v2209_v24  ;;  %v2453_v24 = vrot.slane %v5017_v58, 5  ;;  %v2192_v38 = vunpack.c.l.b16 %v2127_v21  ;;  %v2150_v16 = vrot.slane %v2148_v41, 5  ;;  %v2154_v58 = vrot.slane %v2152_v5, 4  ;;  %v4627_v21 = vld [vmem:[%s5137_s29 + $0xc8] sm:$0x1] }
 0x148   : > { %v1355_v20 = vpop.f32.mrf.mxu2  ;;  %4432 = vmatmul.msk.bf16.gmra.mxu1 %vm693_vm4, %v4937_v48  ;;  %v5735_v1 = vadd.f32 %v2297_v62, %v1708_v7  ;;  %v1216_v62 = vrot.slane %v5018_v9, 5  ;;  %v2193_v7 = vunpack.c.l.b16 %v2137_v28  ;;  %v2451_v28 = vsel %vm5323_vm7, %v4661_v52, %v2450_v61  ;;  %v4807_v41 = vld [vmem:[%s5137_s29 + $0x18] sm:$0xf] }
 0x149   : > { %v1419_v47 = vadd.f32 %v1355_v20, %v1003_v23  ;;  %v2144_v20 = vrot.slane %v2142_v14, 5  ;;  %v2562_v53 = vunpack.c.l.b16 %v2451_v28  ;;  %v2158_v27 = vshll.u32 %v4627_v21, 16 }
 0x14a   : > { %v1217_v14 = vsel %vm5323_vm7, %v1215_v35, %v1216_v62  ;;  %v2210_v5 = vpack.c.b16 %v2193_v7, %v2192_v38  ;;  %v3121_v62 = vshrl.u32 %v4807_v41, 16  ;;  %v3124_v35 = vshll.u32 %v4807_v41, 16 }
 0x14c   : > { %v2299_v48 = vpop.f32.mrf.mxu0  ;;  %v3123_v21 = vrot.slane %v3121_v62, 4 }
 0x14d   : > { %v1645_v11 = vpop.f32.mrf.mxu3  ;;  %4465 = vmatmul.msk.bf16.gmra.mxu2 %vm693_vm4, %v1266_v60  ;;  %v1007_v50 = vpop.f32.mrf.mxu1  ;;  %v1214_v60 = vsel %vm5323_vm7, %v4449_v33, %v1213_v25  ;;  %v5759_v25 = vld [vmem:[%s5137_s29 + $0x1c] sm:$0xf]  ;;  %v2155_v33 = vor.u32 %v2154_v58, %v2150_v16 }
 0x14e   : > { %v1709_v23 = vadd.f32 %v1645_v11, %v1419_v47  ;;  %v2454_v47 = vsel %vm5323_vm7, %v2452_v8, %v2453_v24  ;;  %v2145_v11 = vor.u32 %v2144_v20, %v2141_v4  ;;  %v4938_v24 = vld [vmem:[%s5137_s29 + $0xb4] sm:$0xff]  ;;  %v3134_v38 = vshrl.u32 %v5759_v25, 16 }
 0x14f   : > { %v2563_v34 = vunpack.c.l.b16 %v2454_v47  ;;  %v1008_v4 = vadd.f32 %v1007_v50, %v5511_v17 }
 0x150   : > { %v1358_v9 = vpop.f32.mrf.mxu2  ;;  %v5763_v52 = vadd.f32 %v2299_v48, %v1709_v23  ;;  %v2146_v48 = vrot.slane %v2145_v11, 4  ;;  %v2156_v23 = vrot.slane %v2155_v33, 4  ;;  %v3136_v41 = vrot.slane %v3134_v38, 4 }
 0x151   : > { %v1420_v3 = vadd.f32 %v1358_v9, %v1006_v56  ;;  %v5761_v61 = vpack.c.b16 %v2563_v34, %v2562_v53  ;;  %v1250_v56 = vunpack.c.l.b16 %v1214_v60  ;;  %v1251_v9 = vunpack.c.l.b16 %v1217_v14 }
 0x152   : > { %4578 = vmatmul.msk.bf16.gmra.mxu3 %vm693_vm4, %v4953_v19  ;;  %6453 = vst [vmem:[#allocation2_spill] sm:$0xff] %v5763_v52  ;;  %v3130_v19 = vshll.u32 %v5759_v25, 16  ;;  %v2160_v60 = vrot.slane %v2158_v27, 5  ;;  %v3126_v14 = vrot.slane %v3124_v35, 5  ;;  %v2151_v17 = vsel %vm5149_vm3, %v2146_v48, %v2150_v16  ;;  %v4872_v48 = vld [vmem:[%s5137_s29 + $0x18] sm:$0xe] }
 0x153   : > { %v1267_v58 = vpack.c.b16 %v1251_v9, %v1250_v56  ;;  %v4954_v9 = vld [vmem:[%s5137_s29 + $0xc0] sm:$0xff]  ;;  %v2194_v16 = vunpack.c.l.b16 %v2151_v17 }
 0x154   : > { %v2302_v8 = vpop.f32.mrf.mxu0  ;;  %v3132_v34 = vrot.slane %v3130_v19, 5  ;;  %v2161_v50 = vsel %vm5149_vm3, %v2156_v23, %v2160_v60  ;;  %v3127_v27 = vor.u32 %v3126_v14, %v3123_v21  ;;  %v4810_v23 = vld [vmem:[%s5137_s29 + $0x24] sm:$0xf]  ;;  %v5789_v60 = vld [vmem:[%s5137_s29 + $0x28] sm:$0xf] }
 0x155   : > { %v1648_v28 = vpop.f32.mrf.mxu3  ;;  %v1010_v47 = vpop.f32.mrf.mxu1  ;;  %v2195_v35 = vunpack.c.l.b16 %v2161_v50 }
 0x156   : > { %v1710_v7 = vadd.f32 %v1648_v28, %v1420_v3  ;;  %v5774_v3 = vld [vmem:[%s5137_s29 + $0x20] sm:$0x1]  ;;  %v1011_v62 = vadd.f32 %v1010_v47, %v5534_v2  ;;  %v3128_v38 = vrot.slane %v3127_v27, 4  ;;  %v5019_v47 = vld [vmem:[%s5137_s29 + $0x1c] sm:$0xf] }
 0x157   : > { %4643 = vmatmul.msk.bf16.gmra.mxu0 %vm693_vm4, %v2210_v5  ;;  %v2457_v14 = vrot.slane %v5019_v47, 5  ;;  %v4646_v27 = vld [vmem:[%s5137_s29 + $0x18] sm:$0xe] }
 0x158   : > { %v1360_v20 = vpop.f32.mrf.mxu2  ;;  %4433 = vmatmul.msk.bf16.gmra.mxu1 %vm693_vm4, %v4938_v24  ;;  %v5771_v52 = vadd.f32 %v2302_v8, %v1710_v7  ;;  %v3137_v24 = vor.u32 %v3136_v41, %v3132_v34  ;;  %v3140_v8 = vshll.u32 %v5774_v3, 16  ;;  %v3133_v17 = vsel %vm5149_vm3, %v3128_v38, %v3132_v34 }
 0x159   : > { %v1421_v53 = vadd.f32 %v1360_v20, %v1008_v4  ;;  %v2211_v20 = vpack.c.b16 %v2195_v35, %v2194_v16  ;;  %v3795_v34 = vrot.slane %v5774_v3, 5  ;;  %v5020_v16 = vld [vmem:[%s5137_s29 + $0x20] sm:$0x1]  ;;  %v4662_v38 = vrot.slane %v4646_v27, 9 }
 0x15a   : > { %v3138_v7 = vrot.slane %v3137_v24, 4  ;;  %v3142_v4 = vrot.slane %v3140_v8, 5  ;;  %v3145_v24 = vshrl.u32 %v4810_v23, 16  ;;  %v3148_v8 = vshll.u32 %v4810_v23, 16 }
 0x15b   : > { %v2460_v35 = vrot.slane %v5020_v16, 5  ;;  %v2458_v27 = vsel %vm5323_vm7, %v4662_v38, %v2457_v14  ;;  %v4813_v38 = vld [vmem:[%s5137_s29 + $0x30] sm:$0xf] }
 0x15c   : > { %v2304_v5 = vpop.f32.mrf.mxu0  ;;  %v3143_v50 = vsel %vm5149_vm3, %v3138_v7, %v3142_v4  ;;  %v2459_v7 = vrot.slane %v2457_v14, 4  ;;  %v3150_v3 = vrot.slane %v3148_v8, 5 }
 0x15d   : > { %v1650_v11 = vpop.f32.mrf.mxu3  ;;  %4466 = vmatmul.msk.bf16.gmra.mxu2 %vm693_vm4, %v1267_v58  ;;  %v1012_v33 = vpop.f32.mrf.mxu1  ;;  %v3792_v58 = vrot.slane %v5759_v25, 5  ;;  %v3507_v23 = vunpack.c.l.b16 %v3143_v50 }
 0x15e   : > { %v1711_v56 = vadd.f32 %v1650_v11, %v1421_v53  ;;  %v4888_v11 = vrot.slane %v4872_v48, 9  ;;  %v4955_v48 = vld [vmem:[%s5137_s29 + $0x18] sm:$0xff]  ;;  %v2461_v50 = vsel %vm5323_vm7, %v2459_v7, %v2460_v35  ;;  %v5829_v7 = vld [vmem:[%s5137_s29 + $0x34] sm:$0xf] }
 0x160   : > { %v1363_v28 = vpop.f32.mrf.mxu2  ;;  %v5791_v21 = vadd.f32 %v2304_v5, %v1711_v56  ;;  %v3154_v5 = vshll.u32 %v5789_v60, 16  ;;  %v3158_v56 = vshrl.u32 %v5789_v60, 16 }
 0x161   : > { %v1422_v19 = vadd.f32 %v1363_v28, %v1011_v62  ;;  %v3794_v62 = vrot.slane %v3792_v58, 4 }
 0x162   : > { %4579 = vmatmul.msk.bf16.gmra.mxu3 %vm693_vm4, %v4954_v9  ;;  %v1013_v9 = vadd.f32 %v1012_v33, %v5554_v29  ;;  %v3147_v33 = vrot.slane %v3145_v24, 4  ;;  %v5812_v47 = vrot.slane %v3154_v5, 5 }
 0x164   : > { %v2307_v2 = vpop.f32.mrf.mxu0  ;;  %v3151_v5 = vor.u32 %v3150_v3, %v3147_v33  ;;  %v4873_v33 = vld [vmem:[%s5137_s29 + $0x24] sm:$0xe] }
 0x165   : > { %v1653_v53 = vpop.f32.mrf.mxu3  ;;  %v1015_v41 = vpop.f32.mrf.mxu1 }
 0x166   : > { %v1712_v25 = vadd.f32 %v1653_v53, %v1422_v19  ;;  %v3506_v19 = vunpack.c.l.b16 %v3133_v17  ;;  %v3160_v53 = vrot.slane %v3158_v56, 4  ;;  %v1016_v14 = vadd.f32 %v1015_v41, %v5436_v37 }
 0x167   : > { %4644 = vmatmul.msk.bf16.gmra.mxu0 %vm693_vm4, %v2211_v20  ;;  %v3793_v20 = vsel %vm5323_vm7, %v4888_v11, %v3792_v58  ;;  %v3799_v37 = vrot.slane %v5789_v60, 5 }
 0x168   : > { %v1365_v28 = vpop.f32.mrf.mxu2  ;;  %4678 = vmatmul.msk.bf16.vlgmr.msra.gmra.mxu1 %vm693_vm4, %v5761_v61  ;;  %v5810_v29 = vadd.f32 %v2307_v2, %v1712_v25  ;;  %v3796_v61 = vsel %vm5323_vm7, %v3794_v62, %v3795_v34  ;;  %v3538_v2 = vpack.c.b16 %v3507_v23, %v3506_v19  ;;  %v3904_v11 = vunpack.c.l.b16 %v3793_v20 }
 0x169   : > { %v1423_v4 = vadd.f32 %v1365_v28, %v1013_v9  ;;  %v5821_v9 = vld [vmem:[%s5137_s29 + $0x2c] sm:$0x1]  ;;  %v3905_v8 = vunpack.c.l.b16 %v3796_v61  ;;  %v3161_v56 = vor.u32 %v3160_v53, %v5812_v47  ;;  %v2564_v62 = vunpack.c.l.b16 %v2458_v27 }
 0x16a   : > { %v2565_v34 = vunpack.c.l.b16 %v2461_v50  ;;  %v3164_v16 = vshll.u32 %v5821_v9, 16  ;;  %v3169_v53 = vshrl.u32 %v4813_v38, 16  ;;  %v3172_v61 = vshll.u32 %v4813_v38, 16 }
 0x16b   : > { %v3936_v19 = vpack.c.b16 %v3905_v8, %v3904_v11  ;;  %v3178_v27 = vshll.u32 %v5829_v7, 16  ;;  %v3182_v50 = vshrl.u32 %v5829_v7, 16  ;;  %v5021_v11 = vld [vmem:[%s5137_s29 + $0x28] sm:$0xf]  ;;  %v3802_v60 = vrot.slane %v5821_v9, 5 }
 0x16c   : > { %v2309_v17 = vpop.f32.mrf.mxu0  ;;  %v2595_v23 = vpack.c.b16 %v2565_v34, %v2564_v62  ;;  %v3166_v20 = vrot.slane %v3164_v16, 5  ;;  %v2464_v8 = vrot.slane %v5021_v11, 5  ;;  %v4889_v62 = vrot.slane %v4873_v33, 9  ;;  %v4956_v11 = vld [vmem:[%s5137_s29 + $0x24] sm:$0xff] }
 0x16d   : > { %v1655_v58 = vpop.f32.mrf.mxu3  ;;  %4791 = vmatmul.msk.bf16.vlgmr.msra.gmra.mxu2 %vm693_vm4, %v4955_v48  ;;  %v1017_v24 = vpop.f32.mrf.mxu1  ;;  %v3162_v48 = vrot.slane %v3161_v56, 4  ;;  %v3174_v33 = vrot.slane %v3172_v61, 5  ;;  %v5850_v9 = vrot.slane %v3178_v27, 5 }
 0x16e   : > { %v1713_v25 = vadd.f32 %v1655_v58, %v1423_v4  ;;  %v3152_v4 = vrot.slane %v3151_v5, 4  ;;  %v5022_v5 = vld [vmem:[%s5137_s29 + $0x2c] sm:$0x1] }
 0x16f   : > { %v2467_v56 = vrot.slane %v5022_v5, 5  ;;  %v3167_v16 = vsel %vm5149_vm3, %v3162_v48, %v3166_v20  ;;  %v3800_v20 = vsel %vm5323_vm7, %v4889_v62, %v3799_v37 }
 0x170   : > { %v1368_v35 = vpop.f32.mrf.mxu2  ;;  %v5834_v41 = vadd.f32 %v2309_v17, %v1713_v25  ;;  %v4647_v17 = vld [vmem:[%s5137_s29 + $0x24] sm:$0xe]  ;;  %v1018_v25 = vadd.f32 %v1017_v24, %v5457_v63  ;;  %v3157_v34 = vsel %vm5149_vm3, %v3152_v4, %v5812_v47  ;;  %v2466_v24 = vrot.slane %v2464_v8, 4 }
 0x171   : > { %v1424_v28 = vadd.f32 %v1368_v35, %v1016_v14  ;;  %v3801_v35 = vrot.slane %v3799_v37, 4  ;;  %v4663_v63 = vrot.slane %v4647_v17, 9  ;;  %v3508_v47 = vunpack.c.l.b16 %v3157_v34 }
 0x172   : > { %4856 = vmatmul.msk.bf16.vlgmr.msra.gmra.mxu3 %vm693_vm4, %v3538_v2  ;;  %6454 = vst [vmem:[#allocation3_spill] sm:$0xff] %v5834_v41  ;;  %v3509_v4 = vunpack.c.l.b16 %v3167_v16  ;;  %v5856_v41 = vld [vmem:[%s5137_s29 + $0x38] sm:$0x1] }
 0x173   : > { %v3188_v37 = vshll.u32 %v5856_v41, 16 }
 0x174   : > { %v2312_v3 = vpop.f32.mrf.mxu0  ;;  %v3539_v17 = vpack.c.b16 %v3509_v4, %v3508_v47  ;;  %v5023_v4 = vld [vmem:[%s5137_s29 + $0x34] sm:$0xf] }
 0x175   : > { %v1658_v58 = vpop.f32.mrf.mxu3  ;;  %v1020_v2 = vpop.f32.mrf.mxu1 }
 0x176   : > { %v1714_v14 = vadd.f32 %v1658_v58, %v1424_v28  ;;  %v3171_v28 = vrot.slane %v3169_v53, 4  ;;  %v3184_v58 = vrot.slane %v3182_v50, 4  ;;  %v2468_v50 = vsel %vm5323_vm7, %v2466_v24, %v2467_v56  ;;  %v5875_v24 = vld [vmem:[%s5137_s29 + $0x40] sm:$0xf] }
 0x177   : > { %4905 = vmatmul.msk.bf16.vlgmr.msra.gmra.mxu0 %vm693_vm4, %v3936_v19 }
 0x178   : > { %v1370_v38 = vpop.f32.mrf.mxu2  ;;  %4679 = vmatmul.msk.bf16.gmra.mxu1 %vm693_vm4, %v2595_v23  ;;  %v5853_v5 = vadd.f32 %v2312_v3, %v1714_v14  ;;  %v3803_v23 = vsel %vm5323_vm7, %v3801_v35, %v3802_v60  ;;  %v3175_v53 = vor.u32 %v3174_v33, %v3171_v28  ;;  %v2465_v3 = vsel %vm5323_vm7, %v4663_v63, %v2464_v8 }
 0x179   : > { %v1425_v19 = vadd.f32 %v1370_v38, %v1018_v25  ;;  %v3185_v14 = vor.u32 %v3184_v58, %v5850_v9  ;;  %v1021_v60 = vadd.f32 %v1020_v2, %v5474_v22  ;;  %v3906_v25 = vunpack.c.l.b16 %v3800_v20  ;;  %v4874_v58 = vld [vmem:[%s5137_s29 + $0x30] sm:$0xe] }
 0x17a   : > { %v3907_v34 = vunpack.c.l.b16 %v3803_v23  ;;  %v2566_v35 = vunpack.c.l.b16 %v2465_v3  ;;  %v2567_v8 = vunpack.c.l.b16 %v2468_v50  ;;  %v3176_v28 = vrot.slane %v3175_v53, 4 }
 0x17b   : > { %v3186_v56 = vrot.slane %v3185_v14, 4  ;;  %v3190_v33 = vrot.slane %v3188_v37, 5  ;;  %v3806_v63 = vrot.slane %v5829_v7, 5  ;;  %v2471_v20 = vrot.slane %v5023_v4, 5  ;;  %v4648_v7 = vld [vmem:[%s5137_s29 + $0x30] sm:$0xe] }
 0x17c   : > { %v2314_v48 = vpop.f32.mrf.mxu0  ;;  %v2596_v47 = vpack.c.b16 %v2567_v8, %v2566_v35  ;;  %v4890_v50 = vrot.slane %v4874_v58, 9 }
 0x17d   : > { %v1660_v61 = vpop.f32.mrf.mxu3  ;;  %4792 = vmatmul.msk.bf16.gmra.mxu2 %vm693_vm4, %v4956_v11  ;;  %v1022_v27 = vpop.f32.mrf.mxu1  ;;  %v4816_v11 = vld [vmem:[%s5137_s29 + $0x3c] sm:$0xf]  ;;  %v3191_v3 = vsel %vm5149_vm3, %v3186_v56, %v3190_v33  ;;  %v4957_v33 = vld [vmem:[%s5137_s29 + $0x30] sm:$0xff] }
 0x17e   : > { %v1715_v62 = vadd.f32 %v1660_v61, %v1425_v19  ;;  %v3937_v19 = vpack.c.b16 %v3907_v34, %v3906_v25  ;;  %v3181_v61 = vsel %vm5149_vm3, %v3176_v28, %v5850_v9  ;;  %v3193_v14 = vshrl.u32 %v4816_v11, 16  ;;  %v5024_v34 = vld [vmem:[%s5137_s29 + $0x38] sm:$0x1] }
 0x17f   : > { %v3808_v25 = vrot.slane %v3806_v63, 4  ;;  %v3809_v9 = vrot.slane %v5856_v41, 5  ;;  %v3510_v8 = vunpack.c.l.b16 %v3181_v61  ;;  %v2473_v28 = vrot.slane %v2471_v20, 4 }
 0x180   : > { %v1373_v16 = vpop.f32.mrf.mxu2  ;;  %v5877_v22 = vadd.f32 %v2314_v48, %v1715_v62  ;;  %v3196_v48 = vshll.u32 %v4816_v11, 16  ;;  %v3202_v62 = vshll.u32 %v5875_v24, 16  ;;  %v3511_v58 = vunpack.c.l.b16 %v3191_v3 }
 0x181   : > { %v1426_v38 = vadd.f32 %v1373_v16, %v1021_v60  ;;  %v1023_v60 = vadd.f32 %v1022_v27, %v5495_v55  ;;  %v2474_v16 = vrot.slane %v5024_v34, 5  ;;  %v3807_v11 = vsel %vm5323_vm7, %v4890_v50, %v3806_v63 }
 0x182   : > { %4857 = vmatmul.msk.bf16.gmra.mxu3 %vm693_vm4, %v3539_v17  ;;  %v3206_v17 = vshrl.u32 %v5875_v24, 16  ;;  %v3195_v55 = vrot.slane %v3193_v14, 4  ;;  %v3198_v27 = vrot.slane %v3196_v48, 5  ;;  %v5898_v41 = vrot.slane %v3202_v62, 5 }
 0x183   : > { %v2475_v3 = vsel %vm5323_vm7, %v2473_v28, %v2474_v16  ;;  %v3908_v50 = vunpack.c.l.b16 %v3807_v11  ;;  %v4875_v11 = vld [vmem:[%s5137_s29 + $0x3c] sm:$0xe] }
 0x184   : > { %v2317_v2 = vpop.f32.mrf.mxu0  ;;  %v3208_v4 = vrot.slane %v3206_v17, 4  ;;  %v3199_v62 = vor.u32 %v3198_v27, %v3195_v55 }
 0x185   : > { %v1663_v23 = vpop.f32.mrf.mxu3  ;;  %v1025_v53 = vpop.f32.mrf.mxu1 }
 0x186   : > { %v1716_v37 = vadd.f32 %v1663_v23, %v1426_v38  ;;  %v4664_v38 = vrot.slane %v4648_v7, 9  ;;  %v5907_v7 = vld [vmem:[%s5137_s29 + $0x44] sm:$0x1]  ;;  %v3209_v17 = vor.u32 %v3208_v4, %v5898_v41  ;;  %v3200_v28 = vrot.slane %v3199_v62, 4 }
 0x187   : > { %4906 = vmatmul.msk.bf16.gmra.mxu0 %vm693_vm4, %v3937_v19 }
 0x188   : > { %v1375_v35 = vpop.f32.mrf.mxu2  ;;  %4680 = vmatmul.msk.bf16.gmra.mxu1 %vm693_vm4, %v2596_v47  ;;  %v5896_v19 = vadd.f32 %v2317_v2, %v1716_v37  ;;  %v3810_v47 = vsel %vm5323_vm7, %v3808_v25, %v3809_v9  ;;  %v2472_v61 = vsel %vm5323_vm7, %v4664_v38, %v2471_v20  ;;  %v3540_v2 = vpack.c.b16 %v3511_v58, %v3510_v8  ;;  %v5915_v38 = vld [vmem:[%s5137_s29 + $0x4c] sm:$0xf] }
 0x189   : > { %v1427_v56 = vadd.f32 %v1375_v35, %v1023_v60  ;;  %v3909_v48 = vunpack.c.l.b16 %v3810_v47  ;;  %v1026_v20 = vadd.f32 %v1025_v53, %v5518_v26  ;;  %v2568_v60 = vunpack.c.l.b16 %v2472_v61  ;;  %v4819_v35 = vld [vmem:[%s5137_s29 + $0x48] sm:$0xf] }
 0x18a   : > { %v2569_v25 = vunpack.c.l.b16 %v2475_v3  ;;  %v3212_v9 = vshll.u32 %v5907_v7, 16  ;;  %v3813_v26 = vrot.slane %v5875_v24, 5  ;;  %v3217_v27 = vshrl.u32 %v4819_v35, 16 }
 0x18b   : > { %v3938_v8 = vpack.c.b16 %v3909_v48, %v3908_v50  ;;  %v3220_v4 = vshll.u32 %v4819_v35, 16  ;;  %v3226_v47 = vshll.u32 %v5915_v38, 16  ;;  %v3230_v61 = vshrl.u32 %v5915_v38, 16  ;;  %v5026_v48 = vld [vmem:[%s5137_s29 + $0x44] sm:$0x1] }
 0x18c   : > { %v2319_v23 = vpop.f32.mrf.mxu0  ;;  %v3214_v58 = vrot.slane %v3212_v9, 5  ;;  %v2481_v62 = vrot.slane %v5026_v48, 5  ;;  %v3816_v24 = vrot.slane %v5907_v7, 5  ;;  %v3815_v9 = vrot.slane %v3813_v26, 4  ;;  %v5942_v48 = vld [vmem:[%s5137_s29 + $0x50] sm:$0x1] }
 0x18d   : > { %v1665_v63 = vpop.f32.mrf.mxu3  ;;  %4793 = vmatmul.msk.bf16.gmra.mxu2 %vm693_vm4, %v4957_v33  ;;  %v1027_v14 = vpop.f32.mrf.mxu1  ;;  %v2597_v33 = vpack.c.b16 %v2569_v25, %v2568_v60  ;;  %v3205_v60 = vsel %vm5149_vm3, %v3200_v28, %v5898_v41  ;;  %v3222_v35 = vrot.slane %v3220_v4, 5  ;;  %v5936_v7 = vrot.slane %v3226_v47, 5 }
 0x18e   : > { %v1717_v37 = vadd.f32 %v1665_v63, %v1427_v56  ;;  %v3210_v56 = vrot.slane %v3209_v17, 4  ;;  %v3512_v41 = vunpack.c.l.b16 %v3205_v60 }
 0x190   : > { %v1378_v34 = vpop.f32.mrf.mxu2  ;;  %v5920_v53 = vadd.f32 %v2319_v23, %v1717_v37  ;;  %v4649_v23 = vld [vmem:[%s5137_s29 + $0x3c] sm:$0xe]  ;;  %v1028_v37 = vadd.f32 %v1027_v14, %v5536_v43  ;;  %v3215_v25 = vsel %vm5149_vm3, %v3210_v56, %v3214_v58 }
 0x191   : > { %v1428_v16 = vadd.f32 %v1378_v34, %v1026_v20  ;;  %v4891_v20 = vrot.slane %v4875_v11, 9  ;;  %v3232_v11 = vrot.slane %v3230_v61, 4  ;;  %v4665_v43 = vrot.slane %v4649_v23, 9 }
 0x192   : > { %4858 = vmatmul.msk.bf16.gmra.mxu3 %vm693_vm4, %v3540_v2  ;;  %v5025_v2 = vld [vmem:[%s5137_s29 + $0x40] sm:$0xf]  ;;  %v3513_v28 = vunpack.c.l.b16 %v3215_v25 }
 0x193   : > { %v2478_v50 = vrot.slane %v5025_v2, 5  ;;  %v3814_v58 = vsel %vm5323_vm7, %v4891_v20, %v3813_v26  ;;  %v3236_v26 = vshll.u32 %v5942_v48, 16 }
 0x194   : > { %v2322_v55 = vpop.f32.mrf.mxu0  ;;  %v3541_v23 = vpack.c.b16 %v3513_v28, %v3512_v41  ;;  %v5027_v28 = vld [vmem:[%s5137_s29 + $0x4c] sm:$0xf] }
 0x195   : > { %v1668_v3 = vpop.f32.mrf.mxu3  ;;  %v1030_v63 = vpop.f32.mrf.mxu1  ;;  %v2480_v14 = vrot.slane %v2478_v50, 4 }
 0x196   : > { %v1718_v17 = vadd.f32 %v1668_v3, %v1428_v16  ;;  %v3219_v16 = vrot.slane %v3217_v27, 4  ;;  %v4958_v3 = vld [vmem:[%s5137_s29 + $0x3c] sm:$0xff] }
 0x197   : > { %4907 = vmatmul.msk.bf16.gmra.mxu0 %vm693_vm4, %v3938_v8  ;;  %v2482_v61 = vsel %vm5323_vm7, %v2480_v14, %v2481_v62  ;;  %v5961_v14 = vld [vmem:[%s5137_s29 + $0x58] sm:$0xf] }
 0x198   : > { %v1380_v34 = vpop.f32.mrf.mxu2  ;;  %4681 = vmatmul.msk.bf16.gmra.mxu1 %vm693_vm4, %v2597_v33  ;;  %v5939_v2 = vadd.f32 %v2322_v55, %v1718_v17  ;;  %v3817_v33 = vsel %vm5323_vm7, %v3815_v9, %v3816_v24  ;;  %v3223_v27 = vor.u32 %v3222_v35, %v3219_v16  ;;  %v2479_v55 = vsel %vm5323_vm7, %v4665_v43, %v2478_v50 }
 0x199   : > { %v1429_v8 = vadd.f32 %v1380_v34, %v1028_v37  ;;  %v3233_v17 = vor.u32 %v3232_v11, %v5936_v7  ;;  %v1031_v24 = vadd.f32 %v1030_v63, %v5557_v40  ;;  %v3910_v37 = vunpack.c.l.b16 %v3814_v58  ;;  %v4876_v11 = vld [vmem:[%s5137_s29 + $0x48] sm:$0xe] }
 0x19a   : > { %v3911_v60 = vunpack.c.l.b16 %v3817_v33  ;;  %v2570_v9 = vunpack.c.l.b16 %v2479_v55  ;;  %v2571_v50 = vunpack.c.l.b16 %v2482_v61  ;;  %v3224_v16 = vrot.slane %v3223_v27, 4 }
 0x19b   : > { %v3234_v62 = vrot.slane %v3233_v17, 4  ;;  %v3238_v35 = vrot.slane %v3236_v26, 5  ;;  %v3820_v43 = vrot.slane %v5915_v38, 5  ;;  %v2485_v58 = vrot.slane %v5027_v28, 5  ;;  %v4650_v38 = vld [vmem:[%s5137_s29 + $0x48] sm:$0xe] }
 0x19c   : > { %v2324_v56 = vpop.f32.mrf.mxu0  ;;  %v2598_v41 = vpack.c.b16 %v2571_v50, %v2570_v9  ;;  %v4892_v61 = vrot.slane %v4876_v11, 9 }
 0x19d   : > { %v1670_v4 = vpop.f32.mrf.mxu3  ;;  %4794 = vmatmul.msk.bf16.gmra.mxu2 %vm693_vm4, %v4958_v3  ;;  %v1032_v47 = vpop.f32.mrf.mxu1  ;;  %v4822_v3 = vld [vmem:[%s5137_s29 + $0x54] sm:$0xf]  ;;  %v3239_v55 = vsel %vm5149_vm3, %v3234_v62, %v3238_v35  ;;  %v4959_v35 = vld [vmem:[%s5137_s29 + $0x48] sm:$0xff] }
 0x19e   : > { %v1719_v20 = vadd.f32 %v1670_v4, %v1429_v8  ;;  %v3939_v8 = vpack.c.b16 %v3911_v60, %v3910_v37  ;;  %v3229_v4 = vsel %vm5149_vm3, %v3224_v16, %v5936_v7  ;;  %v3241_v17 = vshrl.u32 %v4822_v3, 16  ;;  %v5028_v60 = vld [vmem:[%s5137_s29 + $0x50] sm:$0x1] }
 0x19f   : > { %v3822_v37 = vrot.slane %v3820_v43, 4  ;;  %v3823_v7 = vrot.slane %v5942_v48, 5  ;;  %v3514_v50 = vunpack.c.l.b16 %v3229_v4  ;;  %v2487_v16 = vrot.slane %v2485_v58, 4 }
 0x1a0   : > { %v1383_v25 = vpop.f32.mrf.mxu2  ;;  %v5963_v40 = vadd.f32 %v2324_v56, %v1719_v20  ;;  %v3244_v56 = vshll.u32 %v4822_v3, 16  ;;  %v3250_v20 = vshll.u32 %v5961_v14, 16  ;;  %v3515_v11 = vunpack.c.l.b16 %v3239_v55 }
 0x1a1   : > { %v1430_v34 = vadd.f32 %v1383_v25, %v1031_v24  ;;  %v1033_v24 = vadd.f32 %v1032_v47, %v5572_v10  ;;  %v2488_v25 = vrot.slane %v5028_v60, 5  ;;  %v3821_v3 = vsel %vm5323_vm7, %v4892_v61, %v3820_v43 }
 0x1a2   : > { %4859 = vmatmul.msk.bf16.gmra.mxu3 %vm693_vm4, %v3541_v23  ;;  %v3254_v23 = vshrl.u32 %v5961_v14, 16  ;;  %v3243_v10 = vrot.slane %v3241_v17, 4  ;;  %v3246_v47 = vrot.slane %v3244_v56, 5  ;;  %v5984_v48 = vrot.slane %v3250_v20, 5 }
 0x1a3   : > { %v2489_v55 = vsel %vm5323_vm7, %v2487_v16, %v2488_v25  ;;  %v3912_v61 = vunpack.c.l.b16 %v3821_v3  ;;  %v4877_v3 = vld [vmem:[%s5137_s29 + $0x54] sm:$0xe] }
 0x1a4   : > { %v2327_v63 = vpop.f32.mrf.mxu0  ;;  %v3256_v28 = vrot.slane %v3254_v23, 4  ;;  %v3247_v20 = vor.u32 %v3246_v47, %v3243_v10 }
 0x1a5   : > { %v1673_v33 = vpop.f32.mrf.mxu3  ;;  %v1035_v27 = vpop.f32.mrf.mxu1 }
 0x1a6   : > { %v1720_v26 = vadd.f32 %v1673_v33, %v1430_v34  ;;  %v4666_v34 = vrot.slane %v4650_v38, 9  ;;  %v5993_v38 = vld [vmem:[%s5137_s29 + $0x5c] sm:$0x1]  ;;  %v3257_v23 = vor.u32 %v3256_v28, %v5984_v48  ;;  %v3248_v16 = vrot.slane %v3247_v20, 4 }
 0x1a7   : > { %4908 = vmatmul.msk.bf16.gmra.mxu0 %vm693_vm4, %v3939_v8 }
 0x1a8   : > { %v1385_v9 = vpop.f32.mrf.mxu2  ;;  %4682 = vmatmul.msk.bf16.gmra.mxu1 %vm693_vm4, %v2598_v41  ;;  %v5982_v8 = vadd.f32 %v2327_v63, %v1720_v26  ;;  %v3824_v41 = vsel %vm5323_vm7, %v3822_v37, %v3823_v7  ;;  %v2486_v4 = vsel %vm5323_vm7, %v4666_v34, %v2485_v58  ;;  %v3542_v63 = vpack.c.b16 %v3515_v11, %v3514_v50  ;;  %v6001_v34 = vld [vmem:[%s5137_s29 + $0x64] sm:$0xf] }
 0x1a9   : > { %v1431_v62 = vadd.f32 %v1385_v9, %v1033_v24  ;;  %v3913_v56 = vunpack.c.l.b16 %v3824_v41  ;;  %v1036_v58 = vadd.f32 %v1035_v27, %v5448_v49  ;;  %v2572_v24 = vunpack.c.l.b16 %v2486_v4  ;;  %v4825_v9 = vld [vmem:[%s5137_s29 + $0x60] sm:$0xf] }
 0x1aa   : > { %v2573_v37 = vunpack.c.l.b16 %v2489_v55  ;;  %v3260_v7 = vshll.u32 %v5993_v38, 16  ;;  %v3827_v49 = vrot.slane %v5961_v14, 5  ;;  %v3265_v47 = vshrl.u32 %v4825_v9, 16 }
 0x1ab   : > { %v3940_v50 = vpack.c.b16 %v3913_v56, %v3912_v61  ;;  %v3268_v28 = vshll.u32 %v4825_v9, 16  ;;  %v3274_v41 = vshll.u32 %v6001_v34, 16  ;;  %v3278_v4 = vshrl.u32 %v6001_v34, 16  ;;  %v5030_v56 = vld [vmem:[%s5137_s29 + $0x5c] sm:$0x1] }
 0x1ac   : > { %v2329_v33 = vpop.f32.mrf.mxu0  ;;  %v3262_v11 = vrot.slane %v3260_v7, 5  ;;  %v2495_v20 = vrot.slane %v5030_v56, 5  ;;  %v3830_v14 = vrot.slane %v5993_v38, 5  ;;  %v3829_v7 = vrot.slane %v3827_v49, 4  ;;  %v6028_v56 = vld [vmem:[%s5137_s29 + $0x68] sm:$0x1] }
 0x1ad   : > { %v1675_v43 = vpop.f32.mrf.mxu3  ;;  %4795 = vmatmul.msk.bf16.gmra.mxu2 %vm693_vm4, %v4959_v35  ;;  %v1037_v17 = vpop.f32.mrf.mxu1  ;;  %v2599_v35 = vpack.c.b16 %v2573_v37, %v2572_v24  ;;  %v3253_v24 = vsel %vm5149_vm3, %v3248_v16, %v5984_v48  ;;  %v3270_v9 = vrot.slane %v3268_v28, 5  ;;  %v6022_v38 = vrot.slane %v3274_v41, 5 }
 0x1ae   : > { %v1721_v26 = vadd.f32 %v1675_v43, %v1431_v62  ;;  %v3258_v62 = vrot.slane %v3257_v23, 4  ;;  %v3516_v48 = vunpack.c.l.b16 %v3253_v24 }
 0x1b0   : > { %v1388_v60 = vpop.f32.mrf.mxu2  ;;  %v6006_v27 = vadd.f32 %v2329_v33, %v1721_v26  ;;  %v4651_v33 = vld [vmem:[%s5137_s29 + $0x54] sm:$0xe]  ;;  %v1038_v26 = vadd.f32 %v1037_v17, %v5467_v0  ;;  %v3263_v37 = vsel %vm5149_vm3, %v3258_v62, %v3262_v11 }
 0x1b1   : > { %v1432_v25 = vadd.f32 %v1388_v60, %v1036_v58  ;;  %v4893_v58 = vrot.slane %v4877_v3, 9  ;;  %v3280_v3 = vrot.slane %v3278_v4, 4  ;;  %v4667_v0 = vrot.slane %v4651_v33, 9 }
 0x1b2   : > { %4860 = vmatmul.msk.bf16.gmra.mxu3 %vm693_vm4, %v3542_v63  ;;  %v5029_v63 = vld [vmem:[%s5137_s29 + $0x58] sm:$0xf]  ;;  %v3517_v16 = vunpack.c.l.b16 %v3263_v37 }
 0x1b3   : > { %v2492_v61 = vrot.slane %v5029_v63, 5  ;;  %v3828_v11 = vsel %vm5323_vm7, %v4893_v58, %v3827_v49  ;;  %v3284_v49 = vshll.u32 %v6028_v56, 16 }
 0x1b4   : > { %v2332_v10 = vpop.f32.mrf.mxu0  ;;  %v3543_v33 = vpack.c.b16 %v3517_v16, %v3516_v48 }
 0x1b5   : > { %v1678_v55 = vpop.f32.mrf.mxu3  ;;  %v1040_v43 = vpop.f32.mrf.mxu1  ;;  %v2494_v17 = vrot.slane %v2492_v61, 4 }
 0x1b6   : > { %v1722_v23 = vadd.f32 %v1678_v55, %v1432_v25  ;;  %v3267_v25 = vrot.slane %v3265_v47, 4  ;;  %v4960_v55 = vld [vmem:[%s5137_s29 + $0x54] sm:$0xff] }
 0x1b7   : > { %4909 = vmatmul.msk.bf16.gmra.mxu0 %vm693_vm4, %v3940_v50  ;;  %v2496_v4 = vsel %vm5323_vm7, %v2494_v17, %v2495_v20  ;;  %v3286_v20 = vrot.slane %v3284_v49, 5  ;;  %v6047_v17 = vld [vmem:[%s5137_s29 + $0x70] sm:$0xf]  ;;  %v4652_v49 = vld [vmem:[%s5137_s29 + $0x60] sm:$0xe] }
 0x1b8   : > { %v1390_v60 = vpop.f32.mrf.mxu2  ;;  %4683 = vmatmul.msk.bf16.gmra.mxu1 %vm693_vm4, %v2599_v35  ;;  %v6025_v63 = vadd.f32 %v2332_v10, %v1722_v23  ;;  %v3831_v35 = vsel %vm5323_vm7, %v3829_v7, %v3830_v14  ;;  %v3271_v47 = vor.u32 %v3270_v9, %v3267_v25  ;;  %v2493_v10 = vsel %vm5323_vm7, %v4667_v0, %v2492_v61 }
 0x1b9   : > { %v1433_v50 = vadd.f32 %v1390_v60, %v1038_v26  ;;  %v3281_v23 = vor.u32 %v3280_v3, %v6022_v38  ;;  %v1041_v14 = vadd.f32 %v1040_v43, %v5488_v39  ;;  %v3914_v26 = vunpack.c.l.b16 %v3828_v11  ;;  %v4828_v3 = vld [vmem:[%s5137_s29 + $0x6c] sm:$0xf] }
 0x1ba   : > { %v3915_v24 = vunpack.c.l.b16 %v3831_v35  ;;  %v2574_v7 = vunpack.c.l.b16 %v2493_v10  ;;  %v2575_v60 = vunpack.c.l.b16 %v2496_v4  ;;  %v3272_v25 = vrot.slane %v3271_v47, 4  ;;  %v5031_v10 = vld [vmem:[%s5137_s29 + $0x64] sm:$0xf] }
 0x1bb   : > { %v3282_v9 = vrot.slane %v3281_v23, 4  ;;  %v3834_v0 = vrot.slane %v6001_v34, 5  ;;  %v2499_v4 = vrot.slane %v5031_v10, 5  ;;  %v3289_v34 = vshrl.u32 %v4828_v3, 16 }
 0x1bc   : > { %v2334_v62 = vpop.f32.mrf.mxu0  ;;  %v2600_v48 = vpack.c.b16 %v2575_v60, %v2574_v7  ;;  %v3277_v47 = vsel %vm5149_vm3, %v3272_v25, %v6022_v38  ;;  %v3837_v38 = vrot.slane %v6028_v56, 5 }
 0x1bd   : > { %v1680_v28 = vpop.f32.mrf.mxu3  ;;  %4796 = vmatmul.msk.bf16.gmra.mxu2 %vm693_vm4, %v4960_v55  ;;  %v1042_v41 = vpop.f32.mrf.mxu1  ;;  %v4878_v55 = vld [vmem:[%s5137_s29 + $0x60] sm:$0xe]  ;;  %v3518_v60 = vunpack.c.l.b16 %v3277_v47  ;;  %v6075_v47 = vld [vmem:[%s5137_s29 + $0x74] sm:$0x1] }
 0x1be   : > { %v1723_v58 = vadd.f32 %v1680_v28, %v1433_v50  ;;  %v3941_v50 = vpack.c.b16 %v3915_v24, %v3914_v26  ;;  %v4894_v16 = vrot.slane %v4878_v55, 9  ;;  %v3287_v28 = vsel %vm5149_vm3, %v3282_v9, %v3286_v20  ;;  %v5032_v24 = vld [vmem:[%s5137_s29 + $0x68] sm:$0x1]  ;;  %v4961_v20 = vld [vmem:[%s5137_s29 + $0x60] sm:$0xff] }
 0x1bf   : > { %v3836_v26 = vrot.slane %v3834_v0, 4  ;;  %v4668_v55 = vrot.slane %v4652_v49, 9 }
 0x1c0   : > { %v1393_v37 = vpop.f32.mrf.mxu2  ;;  %v6049_v39 = vadd.f32 %v2334_v62, %v1723_v58  ;;  %v3292_v62 = vshll.u32 %v4828_v3, 16  ;;  %v3298_v58 = vshll.u32 %v6047_v17, 16  ;;  %v3835_v25 = vsel %vm5323_vm7, %v4894_v16, %v3834_v0 }
 0x1c1   : > { %v1434_v61 = vadd.f32 %v1393_v37, %v1041_v14  ;;  %v1043_v14 = vadd.f32 %v1042_v41, %v5507_v6  ;;  %v2502_v37 = vrot.slane %v5032_v24, 5  ;;  %v2501_v3 = vrot.slane %v2499_v4, 4 }
 0x1c2   : > { %4861 = vmatmul.msk.bf16.gmra.mxu3 %vm693_vm4, %v3543_v33  ;;  %v3302_v33 = vshrl.u32 %v6047_v17, 16  ;;  %v3291_v6 = vrot.slane %v3289_v34, 4  ;;  %v3294_v41 = vrot.slane %v3292_v62, 5  ;;  %v6070_v56 = vrot.slane %v3298_v58, 5 }
 0x1c3   : > { %v3838_v10 = vsel %vm5323_vm7, %v3836_v26, %v3837_v38  ;;  %v3916_v16 = vunpack.c.l.b16 %v3835_v25  ;;  %v2500_v34 = vsel %vm5323_vm7, %v4668_v55, %v2499_v4  ;;  %v3308_v26 = vshll.u32 %v6075_v47, 16  ;;  %v6087_v25 = vld [vmem:[%s5137_s29 + $0x7c] sm:$0xf]  ;;  %v4879_v55 = vld [vmem:[%s5137_s29 + $0x6c] sm:$0xe] }
 0x1c4   : > { %v2337_v43 = vpop.f32.mrf.mxu0  ;;  %v3917_v62 = vunpack.c.l.b16 %v3838_v10  ;;  %v3295_v58 = vor.u32 %v3294_v41, %v3291_v6  ;;  %v2576_v24 = vunpack.c.l.b16 %v2500_v34  ;;  %v3322_v10 = vshll.u32 %v6087_v25, 16 }
 0x1c5   : > { %v1683_v11 = vpop.f32.mrf.mxu3  ;;  %v1045_v35 = vpop.f32.mrf.mxu1 }
 0x1c6   : > { %v1724_v23 = vadd.f32 %v1683_v11, %v1434_v61  ;;  %v3519_v61 = vunpack.c.l.b16 %v3287_v28  ;;  %v3304_v11 = vrot.slane %v3302_v33, 4  ;;  %v3942_v4 = vpack.c.b16 %v3917_v62, %v3916_v16  ;;  %v4653_v16 = vld [vmem:[%s5137_s29 + $0x6c] sm:$0xe] }
 0x1c7   : > { %4910 = vmatmul.msk.bf16.gmra.mxu0 %vm693_vm4, %v3941_v50 }
 0x1c8   : > { %v1395_v7 = vpop.f32.mrf.mxu2  ;;  %4684 = vmatmul.msk.bf16.gmra.mxu1 %vm693_vm4, %v2600_v48  ;;  %v6068_v50 = vadd.f32 %v2337_v43, %v1724_v23  ;;  %v3544_v0 = vpack.c.b16 %v3519_v61, %v3518_v60  ;;  %v2503_v23 = vsel %vm5323_vm7, %v2501_v3, %v2502_v37  ;;  %v3305_v33 = vor.u32 %v3304_v11, %v6070_v56  ;;  %v4831_v60 = vld [vmem:[%s5137_s29 + $0x78] sm:$0xf] }
 0x1c9   : > { %v1435_v9 = vadd.f32 %v1395_v7, %v1043_v14  ;;  %v1046_v14 = vadd.f32 %v1045_v35, %v5526_v45  ;;  %v2577_v7 = vunpack.c.l.b16 %v2503_v23  ;;  %v3296_v37 = vrot.slane %v3295_v58, 4  ;;  %v5033_v23 = vld [vmem:[%s5137_s29 + $0x70] sm:$0xf] }
 0x1ca   : > { %v3841_v45 = vrot.slane %v6047_v17, 5  ;;  %v3313_v35 = vshrl.u32 %v4831_v60, 16  ;;  %v3316_v11 = vshll.u32 %v4831_v60, 16  ;;  %v2506_v62 = vrot.slane %v5033_v23, 5 }
 0x1cb   : > { %v2601_v41 = vpack.c.b16 %v2577_v7, %v2576_v24  ;;  %v3301_v17 = vsel %vm5149_vm3, %v3296_v37, %v6070_v56  ;;  %v4669_v7 = vrot.slane %v4653_v16, 9  ;;  %v3324_v56 = vrot.slane %v3322_v10, 5 }
 0x1cc   : > { %v2339_v48 = vpop.f32.mrf.mxu0  ;;  %v3318_v60 = vrot.slane %v3316_v11, 5 }
 0x1cd   : > { %v1685_v28 = vpop.f32.mrf.mxu3  ;;  %4797 = vmatmul.msk.bf16.gmra.mxu2 %vm693_vm4, %v4961_v20  ;;  %v1047_v43 = vpop.f32.mrf.mxu1  ;;  %v3310_v20 = vrot.slane %v3308_v26, 5  ;;  %v3843_v26 = vrot.slane %v3841_v45, 4 }
 0x1ce   : > { %v1725_v49 = vadd.f32 %v1685_v28, %v1435_v9  ;;  %v3306_v9 = vrot.slane %v3305_v33, 4  ;;  %v3326_v28 = vshrl.u32 %v6087_v25, 16  ;;  %v1048_v33 = vadd.f32 %v1047_v43, %v5549_v12 }
 0x1cf   : > { %v3520_v12 = vunpack.c.l.b16 %v3301_v17 }
 0x1d0   : > { %v1398_v38 = vpop.f32.mrf.mxu2  ;;  %v6092_v3 = vadd.f32 %v2339_v48, %v1725_v49  ;;  %v4895_v48 = vrot.slane %v4879_v55, 9  ;;  %v3844_v49 = vrot.slane %v6075_v47, 5  ;;  %v4962_v55 = vld [vmem:[%s5137_s29 + $0x6c] sm:$0xff]  ;;  %v2508_v47 = vrot.slane %v2506_v62, 4 }
 0x1d1   : > { %v1436_v61 = vadd.f32 %v1398_v38, %v1046_v14  ;;  %v3311_v14 = vsel %vm5149_vm3, %v3306_v9, %v3310_v20  ;;  %v3315_v38 = vrot.slane %v3313_v35, 4  ;;  %v6112_v9 = vld [vmem:[%s5137_s29 + $0x80] sm:$0x1] }
 0x1d2   : > { %4862 = vmatmul.msk.bf16.gmra.mxu3 %vm693_vm4, %v3544_v0  ;;  %v3521_v43 = vunpack.c.l.b16 %v3311_v14  ;;  %v3842_v35 = vsel %vm5323_vm7, %v4895_v48, %v3841_v45  ;;  %v3332_v17 = vshll.u32 %v6112_v9, 16 }
 0x1d3   : > { %v3319_v11 = vor.u32 %v3318_v60, %v3315_v38 }
 0x1d4   : > { %v2342_v6 = vpop.f32.mrf.mxu0  ;;  %v3545_v48 = vpack.c.b16 %v3521_v43, %v3520_v12 }
 0x1d5   : > { %v1688_v0 = vpop.f32.mrf.mxu3  ;;  %v1050_v34 = vpop.f32.mrf.mxu1  ;;  %v3320_v60 = vrot.slane %v3319_v11, 4 }
 0x1d6   : > { %v1726_v58 = vadd.f32 %v1688_v0, %v1436_v61  ;;  %v3328_v61 = vrot.slane %v3326_v28, 4  ;;  %v5034_v0 = vld [vmem:[%s5137_s29 + $0x74] sm:$0x1] }
 0x1d7   : > { %4911 = vmatmul.msk.bf16.gmra.mxu0 %vm693_vm4, %v3942_v4  ;;  %v2509_v4 = vrot.slane %v5034_v0, 5  ;;  %v3334_v0 = vrot.slane %v3332_v17, 5  ;;  %v4654_v17 = vld [vmem:[%s5137_s29 + $0x78] sm:$0xe] }
 0x1d8   : > { %v1400_v24 = vpop.f32.mrf.mxu2  ;;  %4685 = vmatmul.msk.bf16.gmra.mxu1 %vm693_vm4, %v2601_v41  ;;  %v6109_v23 = vadd.f32 %v2342_v6, %v1726_v58  ;;  %v3845_v41 = vsel %vm5323_vm7, %v3843_v26, %v3844_v49  ;;  %v2507_v6 = vsel %vm5323_vm7, %v4669_v7, %v2506_v62  ;;  %v3329_v58 = vor.u32 %v3328_v61, %v3324_v56 }
 0x1d9   : > { %v1437_v37 = vadd.f32 %v1400_v24, %v1048_v33  ;;  %v2510_v16 = vsel %vm5323_vm7, %v2508_v47, %v2509_v4  ;;  %v1051_v49 = vadd.f32 %v1050_v34, %v5568_v59  ;;  %v3918_v33 = vunpack.c.l.b16 %v3842_v35  ;;  %v4834_v47 = vld [vmem:[%s5137_s29 + $0x84] sm:$0xf]  ;;  %v6130_v34 = vld [vmem:[%s5137_s29 + $0x88] sm:$0xf] }
 0x1da   : > { %v3919_v14 = vunpack.c.l.b16 %v3845_v41  ;;  %v2578_v38 = vunpack.c.l.b16 %v2507_v6  ;;  %v2579_v24 = vunpack.c.l.b16 %v2510_v16  ;;  %v3330_v7 = vrot.slane %v3329_v58, 4 }
 0x1db   : > { %v3848_v61 = vrot.slane %v6087_v25, 5  ;;  %v3325_v35 = vsel %vm5149_vm3, %v3320_v60, %v3324_v56  ;;  %v3337_v41 = vshrl.u32 %v4834_v47, 16  ;;  %v3340_v11 = vshll.u32 %v4834_v47, 16  ;;  %v5036_v47 = vld [vmem:[%s5137_s29 + $0x80] sm:$0x1] }
 0x1dc   : > { %v2344_v20 = vpop.f32.mrf.mxu0  ;;  %v2602_v43 = vpack.c.b16 %v2579_v24, %v2578_v38  ;;  %v3335_v6 = vsel %vm5149_vm3, %v3330_v7, %v3334_v0  ;;  %v3851_v58 = vrot.slane %v6112_v9, 5  ;;  %v3346_v56 = vshll.u32 %v6130_v34, 16  ;;  %v4963_v7 = vld [vmem:[%s5137_s29 + $0x78] sm:$0xff] }
 0x1dd   : > { %v1690_v10 = vpop.f32.mrf.mxu3  ;;  %4798 = vmatmul.msk.bf16.gmra.mxu2 %vm693_vm4, %v4962_v55  ;;  %v1052_v28 = vpop.f32.mrf.mxu1  ;;  %v4880_v55 = vld [vmem:[%s5137_s29 + $0x78] sm:$0xe]  ;;  %v3850_v16 = vrot.slane %v3848_v61, 4  ;;  %v3523_v24 = vunpack.c.l.b16 %v3335_v6  ;;  %v4670_v60 = vrot.slane %v4654_v17, 9 }
 0x1de   : > { %v1727_v45 = vadd.f32 %v1690_v10, %v1437_v37  ;;  %v3943_v37 = vpack.c.b16 %v3919_v14, %v3918_v33  ;;  %v4896_v59 = vrot.slane %v4880_v55, 9  ;;  %v3350_v33 = vshrl.u32 %v6130_v34, 16 }
 0x1df   : > { %v1053_v14 = vadd.f32 %v1052_v28, %v5585_v32  ;;  %v3342_v55 = vrot.slane %v3340_v11, 5  ;;  %v3852_v32 = vsel %vm5323_vm7, %v3850_v16, %v3851_v58  ;;  %v6155_v28 = vrot.slane %v3346_v56, 5 }
 0x1e0   : > { %v1403_v26 = vpop.f32.mrf.mxu2  ;;  %v6132_v4 = vadd.f32 %v2344_v20, %v1727_v45  ;;  %v3849_v9 = vsel %vm5323_vm7, %v4896_v59, %v3848_v61  ;;  %v3352_v61 = vrot.slane %v3350_v33, 4  ;;  %v6158_v59 = vld [vmem:[%s5137_s29 + $0x8c] sm:$0x1]  ;;  %v4837_v33 = vld [vmem:[%s5137_s29 + $0x90] sm:$0xf] }
 0x1e1   : > { %v1438_v62 = vadd.f32 %v1403_v26, %v1051_v49  ;;  %v3522_v26 = vunpack.c.l.b16 %v3325_v35  ;;  %v3356_v56 = vshll.u32 %v6158_v59, 16 }
 0x1e2   : > { %4863 = vmatmul.msk.bf16.gmra.mxu3 %vm693_vm4, %v3545_v48  ;;  %v5035_v48 = vld [vmem:[%s5137_s29 + $0x7c] sm:$0xf] }
 0x1e3   : > { %v2513_v49 = vrot.slane %v5035_v48, 5  ;;  %v3546_v35 = vpack.c.b16 %v3523_v24, %v3522_v26 }
 0x1e4   : > { %v2347_v12 = vpop.f32.mrf.mxu0 }
 0x1e5   : > { %v1693_v10 = vpop.f32.mrf.mxu3  ;;  %v2670_v25 = vpop.f32.mrf.mxu1  ;;  %v2515_v0 = vrot.slane %v2513_v49, 4 }
 0x1e6   : > { %v1728_v20 = vadd.f32 %v1693_v10, %v1438_v62  ;;  %v2750_v45 = vadd.f32 %v2670_v25, %v5602_v46  ;;  %v3339_v46 = vrot.slane %v3337_v41, 4  ;;  %v2516_v10 = vrot.slane %v5036_v47, 5 }
 0x1e7   : > { %4912 = vmatmul.msk.bf16.gmra.mxu0 %vm693_vm4, %v3943_v37  ;;  %v3920_v41 = vunpack.c.l.b16 %v3849_v9  ;;  %v3921_v25 = vunpack.c.l.b16 %v3852_v32 }
 0x1e8   : > { %v1405_v38 = vpop.f32.mrf.mxu2  ;;  %4686 = vmatmul.msk.bf16.gmra.mxu1 %vm693_vm4, %v2602_v43  ;;  %v6151_v37 = vadd.f32 %v2347_v12, %v1728_v20  ;;  %v2514_v12 = vsel %vm5323_vm7, %v4670_v60, %v2513_v49  ;;  %v2517_v16 = vsel %vm5323_vm7, %v2515_v0, %v2516_v10  ;;  %v3343_v58 = vor.u32 %v3342_v55, %v3339_v46 }
 0x1e9   : > { %v1439_v62 = vadd.f32 %v1405_v38, %v1053_v14  ;;  %v3353_v20 = vor.u32 %v3352_v61, %v6155_v28  ;;  %v2580_v26 = vunpack.c.l.b16 %v2514_v12  ;;  %v2581_v9 = vunpack.c.l.b16 %v2517_v16  ;;  %v6170_v38 = vld [vmem:[%s5137_s29 + $0x94] sm:$0xf] }
 0x1ea   : > { %v3944_v24 = vpack.c.b16 %v3921_v25, %v3920_v41  ;;  %v3344_v60 = vrot.slane %v3343_v58, 4  ;;  %v3358_v55 = vrot.slane %v3356_v56, 5  ;;  %v3370_v0 = vshll.u32 %v6170_v38, 16  ;;  %v5037_v25 = vld [vmem:[%s5137_s29 + $0x88] sm:$0xf] }
 0x1eb   : > { %v3354_v46 = vrot.slane %v3353_v20, 4  ;;  %v3374_v47 = vshrl.u32 %v6170_v38, 16  ;;  %v2603_v61 = vpack.c.b16 %v2581_v9, %v2580_v26  ;;  %v3858_v9 = vrot.slane %v6158_v59, 5 }
 0x1ec   : > { %v2349_v43 = vpop.f32.mrf.mxu0  ;;  %v3349_v58 = vsel %vm5149_vm3, %v3344_v60, %v6155_v28  ;;  %v6188_v56 = vrot.slane %v3370_v0, 5  ;;  %v6193_v28 = vld [vmem:[%s5137_s29 + $0x98] sm:$0x1]  ;;  %v4964_v60 = vld [vmem:[%s5137_s29 + $0x84] sm:$0xff] }
 0x1ed   : > { %v1695_v11 = vpop.f32.mrf.mxu3  ;;  %4799 = vmatmul.msk.bf16.gmra.mxu2 %vm693_vm4, %v4963_v7  ;;  %v2672_v6 = vpop.f32.mrf.mxu1  ;;  %v3364_v7 = vshll.u32 %v4837_v33, 16  ;;  %v3380_v59 = vshll.u32 %v6193_v28, 16 }
 0x1ee   : > { %v1729_v17 = vadd.f32 %v1695_v11, %v1439_v62  ;;  %v2751_v48 = vadd.f32 %v2672_v6, %v5615_v42  ;;  %v4881_v62 = vld [vmem:[%s5137_s29 + $0x84] sm:$0xe]  ;;  %v3361_v42 = vshrl.u32 %v4837_v33, 16  ;;  %v2520_v6 = vrot.slane %v5037_v25, 5 }
 0x1ef   : > { %v4897_v11 = vrot.slane %v4881_v62, 9  ;;  %v3366_v20 = vrot.slane %v3364_v7, 5  ;;  %v3376_v33 = vrot.slane %v3374_v47, 4  ;;  %v5038_v62 = vld [vmem:[%s5137_s29 + $0x8c] sm:$0x1] }
 0x1f0   : > { %v2960_v14 = vpop.f32.mrf.mxu2  ;;  %v6176_v10 = vadd.f32 %v2349_v43, %v1729_v17  ;;  %v3359_v43 = vsel %vm5149_vm3, %v3354_v46, %v3358_v55  ;;  %v4655_v17 = vld [vmem:[%s5137_s29 + $0x84] sm:$0xe]  ;;  %v2522_v55 = vrot.slane %v2520_v6, 4 }
 0x1f1   : > { %v3040_v49 = vadd.f32 %v2960_v14, %v2750_v45  ;;  %v3855_v45 = vrot.slane %v6130_v34, 5  ;;  %v3363_v34 = vrot.slane %v3361_v42, 4  ;;  %v4671_v46 = vrot.slane %v4655_v17, 9  ;;  %v4840_v17 = vld [vmem:[%s5137_s29 + $0x9c] sm:$0xf] }
 0x1f2   : > { %4864 = vmatmul.msk.bf16.gmra.mxu3 %vm693_vm4, %v3546_v35  ;;  %6455 = vst [vmem:[#allocation4_spill] sm:$0xff] %v6176_v10  ;;  %v3524_v42 = vunpack.c.l.b16 %v3349_v58  ;;  %v3525_v7 = vunpack.c.l.b16 %v3359_v43  ;;  %v3862_v10 = vrot.slane %v6170_v38, 5 }
 0x1f3   : > { %v3856_v0 = vsel %vm5323_vm7, %v4897_v11, %v3855_v45  ;;  %v3367_v47 = vor.u32 %v3366_v20, %v3363_v34  ;;  %v2521_v25 = vsel %vm5323_vm7, %v4671_v46, %v2520_v6  ;;  %v6211_v34 = vld [vmem:[%s5137_s29 + $0xa0] sm:$0xf]  ;;  %v4882_v46 = vld [vmem:[%s5137_s29 + $0x90] sm:$0xe] }
 0x1f4   : > { %v4012_v32 = vpop.f32.mrf.mxu0  ;;  %v3922_v58 = vunpack.c.l.b16 %v3856_v0 }
 0x1f5   : > { %v3614_v41 = vpop.f32.mrf.mxu3  ;;  %v2675_v35 = vpop.f32.mrf.mxu1 }
 0x1f6   : > { %v3694_v12 = vadd.f32 %v3614_v41, %v3040_v49  ;;  %v2752_v16 = vadd.f32 %v2675_v35, %v5628_v15  ;;  %v3857_v15 = vrot.slane %v3855_v45, 4 }
 0x1f7   : > { %4913 = vmatmul.msk.bf16.gmra.mxu0 %vm693_vm4, %v3944_v24  ;;  %v2523_v24 = vrot.slane %v5038_v62, 5  ;;  %v2582_v62 = vunpack.c.l.b16 %v2521_v25 }
 0x1f8   : > { %v4092_v14 = vadd.f32 %v4012_v32, %v3694_v12  ;;  %v2962_v26 = vpop.f32.mrf.mxu2  ;;  %4687 = vmatmul.msk.bf16.gmra.mxu1 %vm693_vm4, %v2603_v61  ;;  %v3377_v32 = vor.u32 %v3376_v33, %v6188_v56  ;;  %v3547_v12 = vpack.c.b16 %v3525_v7, %v3524_v42  ;;  %v3368_v33 = vrot.slane %v3367_v47, 4 }
 0x1f9   : > { %v3041_v49 = vadd.f32 %v2962_v26, %v2751_v48  ;;  %v3859_v48 = vsel %vm5323_vm7, %v3857_v15, %v3858_v9  ;;  %v2524_v45 = vsel %vm5323_vm7, %v2522_v55, %v2523_v24  ;;  %v3382_v15 = vrot.slane %v3380_v59, 5 }
 0x1fa   : > { %v3923_v20 = vunpack.c.l.b16 %v3859_v48  ;;  %v3378_v26 = vrot.slane %v3377_v32, 4  ;;  %v2583_v6 = vunpack.c.l.b16 %v2524_v45  ;;  %v3388_v24 = vshll.u32 %v4840_v17, 16 }
 0x1fb   : > { %v4156_v42 = vmul.f32 %v4092_v14, %v4092_v14  ;;  %v3398_v47 = vshrl.u32 %v6211_v34, 16  ;;  %v4898_v59 = vrot.slane %v4882_v46, 9  ;;  %v5040_v46 = vld [vmem:[%s5137_s29 + $0x98] sm:$0x1] }
 0x1fc   : > { %v4014_v61 = vpop.f32.mrf.mxu0  ;;  %v3945_v32 = vpack.c.b16 %v3923_v20, %v3922_v58  ;;  %v4656_v58 = vld [vmem:[%s5137_s29 + $0x90] sm:$0xe] }
 0x1fd   : > { %v3616_v41 = vpop.f32.mrf.mxu3  ;;  %4800 = vmatmul.msk.bf16.gmra.mxu2 %vm693_vm4, %v4964_v60  ;;  %v2677_v35 = vpop.f32.mrf.mxu1 }
 0x1fe   : > { %v3695_v11 = vadd.f32 %v3616_v41, %v3041_v49  ;;  %v2753_v43 = vadd.f32 %v2677_v35, %v5641_v13  ;;  %v3385_v49 = vshrl.u32 %v4840_v17, 16  ;;  %v3394_v13 = vshll.u32 %v6211_v34, 16  ;;  %v5039_v35 = vld [vmem:[%s5137_s29 + $0x94] sm:$0xf] }
 0x1ff   : > { %v3373_v41 = vsel %vm5149_vm3, %v3368_v33, %v6188_v56  ;;  %v2527_v25 = vrot.slane %v5039_v35, 5  ;;  %v3400_v56 = vrot.slane %v3398_v47, 4 }
 0x200   : > { %v4093_v9 = vadd.f32 %v4014_v61, %v3695_v11  ;;  %v2965_v60 = vpop.f32.mrf.mxu2  ;;  %v3865_v61 = vrot.slane %v6193_v28, 5  ;;  %v3383_v11 = vsel %vm5149_vm3, %v3378_v26, %v3382_v15  ;;  %v3387_v17 = vrot.slane %v3385_v49, 4  ;;  %v6233_v49 = vld [vmem:[%s5137_s29 + $0xa4] sm:$0x1] }
 0x201   : > { %v3042_v55 = vadd.f32 %v2965_v60, %v2752_v16  ;;  %v2604_v16 = vpack.c.b16 %v2583_v6, %v2582_v62  ;;  %v3390_v28 = vrot.slane %v3388_v24, 5  ;;  %v6227_v60 = vrot.slane %v3394_v13, 5 }
 0x202   : > { %v4124_v7 = vadd.f32 %v4093_v9, %v4092_v14  ;;  %v4157_v0 = vmul.f32 %v4093_v9, %v4093_v9  ;;  %4865 = vmatmul.msk.bf16.gmra.mxu3 %vm693_vm4, %v3547_v12  ;;  %v3864_v12 = vrot.slane %v3862_v10, 4  ;;  %v3526_v33 = vunpack.c.l.b16 %v3373_v41 }
 0x203   : > { %v4672_v26 = vrot.slane %v4656_v58, 9  ;;  %v2529_v15 = vrot.slane %v2527_v25, 4  ;;  %v3404_v41 = vshll.u32 %v6233_v49, 16 }
 0x204   : > { %v4188_v48 = vadd.f32 %v4157_v0, %v4156_v42  ;;  %v4017_v38 = vpop.f32.mrf.mxu0  ;;  %v2530_v42 = vrot.slane %v5040_v46, 5  ;;  %v3527_v0 = vunpack.c.l.b16 %v3383_v11  ;;  %v3866_v13 = vsel %vm5323_vm7, %v3864_v12, %v3865_v61 }
 0x205   : > { %v3619_v14 = vpop.f32.mrf.mxu3  ;;  %v2680_v45 = vpop.f32.mrf.mxu1  ;;  %v3925_v61 = vunpack.c.l.b16 %v3866_v13  ;;  %v6258_v13 = vld [vmem:[%s5137_s29 + $0xac] sm:$0xf] }
 0x206   : > { %v3696_v20 = vadd.f32 %v3619_v14, %v3042_v55  ;;  %v2754_v9 = vadd.f32 %v2680_v45, %v5654_v57  ;;  %v4965_v55 = vld [vmem:[%s5137_s29 + $0x90] sm:$0xff]  ;;  %v3863_v57 = vsel %vm5323_vm7, %v4898_v59, %v3862_v10  ;;  %v2531_v45 = vsel %vm5323_vm7, %v2529_v15, %v2530_v42 }
 0x207   : > { %4914 = vmatmul.msk.bf16.gmra.mxu0 %vm693_vm4, %v3945_v32  ;;  %v3548_v59 = vpack.c.b16 %v3527_v0, %v3526_v33  ;;  %v4843_v33 = vld [vmem:[%s5137_s29 + $0xa8] sm:$0xf] }
 0x208   : > { %v4094_v62 = vadd.f32 %v4017_v38, %v3696_v20  ;;  %v2967_v6 = vpop.f32.mrf.mxu2  ;;  %4688 = vmatmul.msk.bf16.gmra.mxu1 %vm693_vm4, %v2604_v16  ;;  %v3391_v38 = vor.u32 %v3390_v28, %v3387_v17  ;;  %v3401_v16 = vor.u32 %v3400_v56, %v6227_v60  ;;  %v2585_v20 = vunpack.c.l.b16 %v2531_v45 }
 0x209   : > { %v3043_v24 = vadd.f32 %v2967_v6, %v2753_v43  ;;  %v2528_v43 = vsel %vm5323_vm7, %v4672_v26, %v2527_v25  ;;  %v3406_v56 = vrot.slane %v3404_v41, 5  ;;  %v4883_v25 = vld [vmem:[%s5137_s29 + $0x9c] sm:$0xe] }
 0x20a   : > { %v4125_v47 = vadd.f32 %v4124_v7, %v4094_v62  ;;  %v4158_v32 = vmul.f32 %v4094_v62, %v4094_v62  ;;  %v3924_v7 = vunpack.c.l.b16 %v3863_v57  ;;  %v3402_v17 = vrot.slane %v3401_v16, 4 }
 0x20b   : > { %v2584_v28 = vunpack.c.l.b16 %v2528_v43  ;;  %v3869_v62 = vrot.slane %v6211_v34, 5  ;;  %v3412_v16 = vshll.u32 %v4843_v33, 16  ;;  %v5041_v43 = vld [vmem:[%s5137_s29 + $0xa0] sm:$0xf] }
 0x20c   : > { %v4189_v35 = vadd.f32 %v4188_v48, %v4158_v32  ;;  %v4019_v14 = vpop.f32.mrf.mxu0  ;;  %v3392_v48 = vrot.slane %v3391_v38, 4  ;;  %v3407_v34 = vsel %vm5149_vm3, %v3402_v17, %v3406_v56  ;;  %v3872_v32 = vrot.slane %v6233_v49, 5  ;;  %v4966_v56 = vld [vmem:[%s5137_s29 + $0x9c] sm:$0xff] }
 0x20d   : > { %v3621_v10 = vpop.f32.mrf.mxu3  ;;  %4801 = vmatmul.msk.bf16.gmra.mxu2 %vm693_vm4, %v4965_v55  ;;  %v2682_v11 = vpop.f32.mrf.mxu1  ;;  %v2605_v55 = vpack.c.b16 %v2585_v20, %v2584_v28  ;;  %v3871_v57 = vrot.slane %v3869_v62, 4  ;;  %v3409_v38 = vshrl.u32 %v4843_v33, 16  ;;  %v2534_v45 = vrot.slane %v5041_v43, 5 }
 0x20e   : > { %v3697_v12 = vadd.f32 %v3621_v10, %v3043_v24  ;;  %v2755_v58 = vadd.f32 %v2682_v11, %v5667_v54  ;;  %v3946_v24 = vpack.c.b16 %v3925_v61, %v3924_v7  ;;  %v4899_v54 = vrot.slane %v4883_v25, 9 }
 0x20f   : > { %v3397_v0 = vsel %vm5149_vm3, %v3392_v48, %v6227_v60  ;;  %v3418_v7 = vshll.u32 %v6258_v13, 16  ;;  %v3422_v61 = vshrl.u32 %v6258_v13, 16  ;;  %v3529_v49 = vunpack.c.l.b16 %v3407_v34 }
 0x210   : > { %v4095_v6 = vadd.f32 %v4019_v14, %v3697_v12  ;;  %v2970_v26 = vpop.f32.mrf.mxu2  ;;  %v3870_v11 = vsel %vm5323_vm7, %v4899_v54, %v3869_v62  ;;  %v3411_v17 = vrot.slane %v3409_v38, 4  ;;  %v3414_v28 = vrot.slane %v3412_v16, 5  ;;  %v6277_v54 = vld [vmem:[%s5137_s29 + $0xb0] sm:$0x1] }
 0x211   : > { %v3044_v15 = vadd.f32 %v2970_v26, %v2754_v9  ;;  %v5042_v26 = vld [vmem:[%s5137_s29 + $0xa4] sm:$0x1]  ;;  %v3424_v62 = vrot.slane %v3422_v61, 4  ;;  %v3428_v43 = vshll.u32 %v6277_v54, 16 }
 0x212   : > { %v4126_v46 = vadd.f32 %v4125_v47, %v4095_v6  ;;  %v4159_v42 = vmul.f32 %v4095_v6, %v4095_v6  ;;  %4866 = vmatmul.msk.bf16.gmra.mxu3 %vm693_vm4, %v3548_v59  ;;  %v4657_v59 = vld [vmem:[%s5137_s29 + $0x9c] sm:$0xe]  ;;  %v2536_v6 = vrot.slane %v2534_v45, 4  ;;  %v3415_v16 = vor.u32 %v3414_v28, %v3411_v17  ;;  %v4884_v28 = vld [vmem:[%s5137_s29 + $0xa8] sm:$0xe] }
 0x213   : > { %v4673_v25 = vrot.slane %v4657_v59, 9  ;;  %v3430_v17 = vrot.slane %v3428_v43, 5 }
 0x214   : > { %v4190_v9 = vadd.f32 %v4189_v35, %v4159_v42  ;;  %v4022_v47 = vpop.f32.mrf.mxu0  ;;  %v3528_v35 = vunpack.c.l.b16 %v3397_v0 }
 0x215   : > { %v3624_v41 = vpop.f32.mrf.mxu3  ;;  %v2685_v14 = vpop.f32.mrf.mxu1 }
 0x216   : > { %v3698_v10 = vadd.f32 %v3624_v41, %v3044_v15  ;;  %v2756_v60 = vadd.f32 %v2685_v14, %v5679_v31  ;;  %v3873_v31 = vsel %vm5323_vm7, %v3871_v57, %v3872_v32  ;;  %v2537_v15 = vrot.slane %v5042_v26, 5 }
 0x217   : > { %4915 = vmatmul.msk.bf16.gmra.mxu0 %vm693_vm4, %v3946_v24  ;;  %v6274_v24 = vrot.slane %v3418_v7, 5  ;;  %v3549_v34 = vpack.c.b16 %v3529_v49, %v3528_v35  ;;  %v4846_v35 = vld [vmem:[%s5137_s29 + $0xb4] sm:$0xf]  ;;  %v6289_v49 = vld [vmem:[%s5137_s29 + $0xb8] sm:$0xf] }
 0x218   : > { %v4096_v12 = vadd.f32 %v4022_v47, %v3698_v10  ;;  %v2972_v48 = vpop.f32.mrf.mxu2  ;;  %4689 = vmatmul.msk.bf16.gmra.mxu1 %vm693_vm4, %v2605_v55  ;;  %v3926_v47 = vunpack.c.l.b16 %v3870_v11  ;;  %v2538_v38 = vsel %vm5323_vm7, %v2536_v6, %v2537_v15  ;;  %v3446_v6 = vshrl.u32 %v6289_v49, 16 }
 0x219   : > { %v3045_v20 = vadd.f32 %v2972_v48, %v2755_v58  ;;  %v3927_v58 = vunpack.c.l.b16 %v3873_v31  ;;  %v3425_v14 = vor.u32 %v3424_v62, %v6274_v24  ;;  %v2587_v61 = vunpack.c.l.b16 %v2538_v38 }
 0x21a   : > { %v4127_v33 = vadd.f32 %v4126_v46, %v4096_v12  ;;  %v4160_v42 = vmul.f32 %v4096_v12, %v4096_v12  ;;  %v2535_v46 = vsel %vm5323_vm7, %v4673_v25, %v2534_v45  ;;  %v3416_v12 = vrot.slane %v3415_v16, 4 }
 0x21b   : > { %v2586_v7 = vunpack.c.l.b16 %v2535_v46  ;;  %v3947_v45 = vpack.c.b16 %v3927_v58, %v3926_v47  ;;  %v3442_v25 = vshll.u32 %v6289_v49, 16  ;;  %v5043_v47 = vld [vmem:[%s5137_s29 + $0xac] sm:$0xf]  ;;  %v4658_v46 = vld [vmem:[%s5137_s29 + $0xa8] sm:$0xe] }
 0x21c   : > { %v4191_v0 = vadd.f32 %v4190_v9, %v4160_v42  ;;  %v4024_v55 = vpop.f32.mrf.mxu0 }
 0x21d   : > { %v3626_v57 = vpop.f32.mrf.mxu3  ;;  %4802 = vmatmul.msk.bf16.gmra.mxu2 %vm693_vm4, %v4966_v56  ;;  %v2687_v32 = vpop.f32.mrf.mxu1  ;;  %v3436_v56 = vshll.u32 %v4846_v35, 16  ;;  %v2606_v42 = vpack.c.b16 %v2587_v61, %v2586_v7  ;;  %v6305_v16 = vrot.slane %v3442_v25, 5  ;;  %v4967_v7 = vld [vmem:[%s5137_s29 + $0xa8] sm:$0xff]  ;;  %v4674_v61 = vrot.slane %v4658_v46, 9 }
 0x21e   : > { %v3699_v41 = vadd.f32 %v3626_v57, %v3045_v20  ;;  %v2757_v9 = vadd.f32 %v2687_v32, %v5692_v44  ;;  %v3426_v44 = vrot.slane %v3425_v14, 4  ;;  %v3433_v20 = vshrl.u32 %v4846_v35, 16 }
 0x21f   : > { %v3421_v32 = vsel %vm5149_vm3, %v3416_v12, %v6274_v24  ;;  %v3438_v38 = vrot.slane %v3436_v56, 5  ;;  %v6310_v24 = vld [vmem:[%s5137_s29 + $0xbc] sm:$0x1] }
 0x220   : > { %v4097_v10 = vadd.f32 %v4024_v55, %v3699_v41  ;;  %v2975_v59 = vpop.f32.mrf.mxu2  ;;  %v4900_v55 = vrot.slane %v4884_v28, 9  ;;  %v3448_v41 = vrot.slane %v3446_v6, 4 }
 0x221   : > { %v3046_v11 = vadd.f32 %v2975_v59, %v2756_v60  ;;  %v3876_v60 = vrot.slane %v6258_v13, 5  ;;  %v3435_v13 = vrot.slane %v3433_v20, 4 }
 0x222   : > { %v4128_v48 = vadd.f32 %v4127_v33, %v4097_v10  ;;  %v4161_v31 = vmul.f32 %v4097_v10, %v4097_v10  ;;  %4867 = vmatmul.msk.bf16.gmra.mxu3 %vm693_vm4, %v3549_v34  ;;  %v2541_v34 = vrot.slane %v5043_v47, 5  ;;  %v3879_v10 = vrot.slane %v6277_v54, 5 }
 0x223   : > { %v3877_v28 = vsel %vm5323_vm7, %v4900_v55, %v3876_v60  ;;  %v3439_v20 = vor.u32 %v3438_v38, %v3435_v13  ;;  %v3449_v56 = vor.u32 %v3448_v41, %v6305_v16  ;;  %v3452_v54 = vshll.u32 %v6310_v24, 16 }
 0x224   : > { %v4192_v26 = vadd.f32 %v4191_v0, %v4161_v31  ;;  %v4027_v15 = vpop.f32.mrf.mxu0  ;;  %v3431_v0 = vsel %vm5149_vm3, %v3426_v44, %v3430_v17  ;;  %v2543_v35 = vrot.slane %v2541_v34, 4  ;;  %v3530_v44 = vunpack.c.l.b16 %v3421_v32 }
 0x225   : > { %v3629_v33 = vpop.f32.mrf.mxu3  ;;  %v2690_v62 = vpop.f32.mrf.mxu1  ;;  %v3531_v17 = vunpack.c.l.b16 %v3431_v0  ;;  %v3928_v55 = vunpack.c.l.b16 %v3877_v28  ;;  %v3450_v32 = vrot.slane %v3449_v56, 4  ;;  %v3454_v0 = vrot.slane %v3452_v54, 5  ;;  %v5045_v28 = vld [vmem:[%s5137_s29 + $0xb8] sm:$0xf]  ;;  %v4659_v54 = vld [vmem:[%s5137_s29 + $0xb4] sm:$0xe] }
 0x226   : > { %v3700_v57 = vadd.f32 %v3629_v33, %v3046_v11  ;;  %v2758_v58 = vadd.f32 %v2690_v62, %v5706_v30  ;;  %v3878_v30 = vrot.slane %v3876_v60, 4  ;;  %v5044_v11 = vld [vmem:[%s5137_s29 + $0xb0] sm:$0x1] }
 0x227   : > { %4916 = vmatmul.msk.bf16.gmra.mxu0 %vm693_vm4, %v3947_v45  ;;  %v2544_v45 = vrot.slane %v5044_v11, 5  ;;  %v3550_v62 = vpack.c.b16 %v3531_v17, %v3530_v44 }
 0x228   : > { %v4098_v14 = vadd.f32 %v4027_v15, %v3700_v57  ;;  %v2977_v43 = vpop.f32.mrf.mxu2  ;;  %4690 = vmatmul.msk.bf16.gmra.mxu1 %vm693_vm4, %v2606_v42  ;;  %v2542_v42 = vsel %vm5323_vm7, %v4674_v61, %v2541_v34  ;;  %v3440_v57 = vrot.slane %v3439_v20, 4  ;;  %v4849_v34 = vld [vmem:[%s5137_s29 + $0xc0] sm:$0xf]  ;;  %v6335_v61 = vld [vmem:[%s5137_s29 + $0xc4] sm:$0xf]  ;;  %v2548_v20 = vrot.slane %v5045_v28, 5 }
 0x229   : > { %v3047_v59 = vadd.f32 %v2977_v43, %v2757_v9  ;;  %v3880_v9 = vsel %vm5323_vm7, %v3878_v30, %v3879_v10  ;;  %v2545_v60 = vsel %vm5323_vm7, %v2543_v35, %v2544_v45  ;;  %v2588_v38 = vunpack.c.l.b16 %v2542_v42  ;;  %v4885_v45 = vld [vmem:[%s5137_s29 + $0xb4] sm:$0xe] }
 0x22a   : > { %v4129_v12 = vadd.f32 %v4128_v48, %v4098_v14  ;;  %v4162_v31 = vmul.f32 %v4098_v14, %v4098_v14  ;;  %v3929_v47 = vunpack.c.l.b16 %v3880_v9  ;;  %v2589_v41 = vunpack.c.l.b16 %v2545_v60 }
 0x22c   : > { %v4193_v25 = vadd.f32 %v4192_v26, %v4162_v31  ;;  %v4029_v6 = vpop.f32.mrf.mxu0  ;;  %v3948_v10 = vpack.c.b16 %v3929_v47, %v3928_v55  ;;  %v2607_v11 = vpack.c.b16 %v2589_v41, %v2588_v38  ;;  %v3460_v31 = vshll.u32 %v4849_v34, 16  ;;  %v4968_v47 = vld [vmem:[%s5137_s29 + $0xb4] sm:$0xff] }
 0x22d   : > { %v3631_v15 = vpop.f32.mrf.mxu3  ;;  %4803 = vmatmul.msk.bf16.gmra.mxu2 %vm693_vm4, %v4967_v7  ;;  %v2692_v48 = vpop.f32.mrf.mxu1  ;;  %v3883_v7 = vrot.slane %v6289_v49, 5  ;;  %v3470_v49 = vshrl.u32 %v6335_v61, 16 }
 0x22e   : > { %v3701_v33 = vadd.f32 %v3631_v15, %v3047_v59  ;;  %v2759_v26 = vadd.f32 %v2692_v48, %v5719_v51  ;;  %v3445_v51 = vsel %vm5149_vm3, %v3440_v57, %v6305_v16  ;;  %v3455_v59 = vsel %vm5149_vm3, %v3450_v32, %v3454_v0  ;;  %v5046_v0 = vld [vmem:[%s5137_s29 + $0xbc] sm:$0x1] }
 0x22f   : > { %v3533_v9 = vunpack.c.l.b16 %v3455_v59  ;;  %v4901_v15 = vrot.slane %v4885_v45, 9  ;;  %v3885_v48 = vrot.slane %v3883_v7, 4  ;;  %v4675_v57 = vrot.slane %v4659_v54, 9 }
 0x230   : > { %v4099_v46 = vadd.f32 %v4029_v6, %v3701_v33  ;;  %v2980_v13 = vpop.f32.mrf.mxu2  ;;  %v3466_v6 = vshll.u32 %v6335_v61, 16  ;;  %v2550_v32 = vrot.slane %v2548_v20, 4 }
 0x231   : > { %v3048_v14 = vadd.f32 %v2980_v13, %v2758_v58 }
 0x232   : > { %v4130_v43 = vadd.f32 %v4129_v12, %v4099_v46  ;;  %v4163_v30 = vmul.f32 %v4099_v46, %v4099_v46  ;;  %4868 = vmatmul.msk.bf16.gmra.mxu3 %vm693_vm4, %v3550_v62  ;;  %v3457_v12 = vshrl.u32 %v4849_v34, 16  ;;  %v3462_v62 = vrot.slane %v3460_v31, 5  ;;  %v6349_v34 = vld [vmem:[%s5137_s29 + $0xc8] sm:$0x1] }
 0x233   : > { %v2551_v46 = vrot.slane %v5046_v0, 5  ;;  %v3468_v41 = vrot.slane %v3466_v6, 5 }
 0x234   : > { %v4194_v58 = vadd.f32 %v4193_v25, %v4163_v30  ;;  %v4032_v35 = vpop.f32.mrf.mxu0  ;;  %v3532_v25 = vunpack.c.l.b16 %v3445_v51  ;;  %v3459_v33 = vrot.slane %v3457_v12, 4  ;;  %v3884_v51 = vsel %vm5323_vm7, %v4901_v15, %v3883_v7  ;;  %v6456_v12 = vld [vmem:[#allocation2_spill] sm:$0xff] }
 0x235   : > { %v3634_v44 = vpop.f32.mrf.mxu3  ;;  %v2695_v17 = vpop.f32.mrf.mxu1  ;;  %v3476_v7 = vshll.u32 %v6349_v34, 16 }
 0x236   : > { %v3702_v56 = vadd.f32 %v3634_v44, %v3048_v14  ;;  %v2760_v16 = vadd.f32 %v2695_v17, %v5735_v1  ;;  %v3886_v1 = vrot.slane %v6310_v24, 5  ;;  %v3472_v14 = vrot.slane %v3470_v49, 4 }
 0x237   : > { %4917 = vmatmul.msk.bf16.gmra.mxu0 %vm693_vm4, %v3948_v10  ;;  %v3551_v59 = vpack.c.b16 %v3533_v9, %v3532_v25  ;;  %v3463_v45 = vor.u32 %v3462_v62, %v3459_v33  ;;  %v3930_v17 = vunpack.c.l.b16 %v3884_v51 }
 0x238   : > { %v4100_v42 = vadd.f32 %v4032_v35, %v3702_v56  ;;  %v2982_v60 = vpop.f32.mrf.mxu2  ;;  %4691 = vmatmul.msk.bf16.gmra.mxu1 %vm693_vm4, %v2607_v11  ;;  %v3887_v24 = vsel %vm5323_vm7, %v3885_v48, %v3886_v1  ;;  %v2552_v11 = vsel %vm5323_vm7, %v2550_v32, %v2551_v46  ;;  %v3473_v44 = vor.u32 %v3472_v14, %v3468_v41  ;;  %v4886_v1 = vld [vmem:[%s5137_s29 + $0xc0] sm:$0xe]  ;;  %v6367_v32 = vld [vmem:[%s5137_s29 + $0xd0] sm:$0xf] }
 0x239   : > { %v3049_v55 = vadd.f32 %v2982_v60, %v2759_v26  ;;  %v3931_v28 = vunpack.c.l.b16 %v3887_v24  ;;  %v2591_v49 = vunpack.c.l.b16 %v2552_v11  ;;  %v3464_v25 = vrot.slane %v3463_v45, 4  ;;  %v4660_v24 = vld [vmem:[%s5137_s29 + $0xc0] sm:$0xe] }
 0x23a   : > { %v4131_v13 = vadd.f32 %v4130_v43, %v4100_v42  ;;  %v4164_v38 = vmul.f32 %v4100_v42, %v4100_v42  ;;  %v2549_v43 = vsel %vm5323_vm7, %v4675_v57, %v2548_v20  ;;  %v3474_v48 = vrot.slane %v3473_v44, 4  ;;  %v4852_v57 = vld [vmem:[%s5137_s29 + $0xcc] sm:$0xf] }
 0x23b   : > { %v2590_v6 = vunpack.c.l.b16 %v2549_v43  ;;  %v3478_v42 = vrot.slane %v3476_v7, 5  ;;  %v3949_v60 = vpack.c.b16 %v3931_v28, %v3930_v17  ;;  %v3469_v46 = vsel %vm5149_vm3, %v3464_v25, %v3468_v41  ;;  %v5048_v17 = vld [vmem:[%s5137_s29 + $0xc8] sm:$0x1] }
 0x23c   : > { %v4195_v30 = vadd.f32 %v4194_v58, %v4164_v38  ;;  %v4034_v10 = vpop.f32.mrf.mxu0  ;;  %v4902_v51 = vrot.slane %v4886_v1, 9  ;;  %v3494_v41 = vshrl.u32 %v6367_v32, 16  ;;  %v3893_v45 = vrot.slane %v6349_v34, 5 }
 0x23d   : > { %v3636_v26 = vpop.f32.mrf.mxu3  ;;  %4804 = vmatmul.msk.bf16.gmra.mxu2 %vm693_vm4, %v4968_v47  ;;  %v2697_v35 = vpop.f32.mrf.mxu1  ;;  %v3890_v47 = vrot.slane %v6335_v61, 5  ;;  %v3481_v61 = vshrl.u32 %v4852_v57, 16  ;;  %v4676_v44 = vrot.slane %v4660_v24, 9  ;;  %v2558_v28 = vrot.slane %v5048_v17, 5 }
 0x23e   : > { %v3703_v58 = vadd.f32 %v3636_v26, %v3049_v55  ;;  %v2761_v31 = vadd.f32 %v2697_v35, %v6456_v12  ;;  %v2608_v55 = vpack.c.b16 %v2591_v49, %v2590_v6  ;;  %v3484_v26 = vshll.u32 %v4852_v57, 16  ;;  %v4969_v12 = vld [vmem:[%s5137_s29 + $0xc0] sm:$0xff] }
 0x23f   : > { %v3892_v11 = vrot.slane %v3890_v47, 4  ;;  %v3891_v49 = vsel %vm5323_vm7, %v4902_v51, %v3890_v47 }
 0x240   : > { %v4101_v56 = vadd.f32 %v4034_v10, %v3703_v58  ;;  %v2985_v54 = vpop.f32.mrf.mxu2  ;;  %v3486_v25 = vrot.slane %v3484_v26, 5 }
 0x241   : > { %v3050_v20 = vadd.f32 %v2985_v54, %v2760_v16  ;;  %v3894_v34 = vsel %vm5323_vm7, %v3892_v11, %v3893_v45 }
 0x242   : > { %v4132_v9 = vadd.f32 %v4131_v13, %v4101_v56  ;;  %v4165_v15 = vmul.f32 %v4101_v56, %v4101_v56  ;;  %4869 = vmatmul.msk.bf16.gmra.mxu3 %vm693_vm4, %v3551_v59  ;;  %v5047_v13 = vld [vmem:[%s5137_s29 + $0xc4] sm:$0xf]  ;;  %v3490_v59 = vshll.u32 %v6367_v32, 16 }
 0x243   : > { %v2555_v38 = vrot.slane %v5047_v13, 5 }
 0x244   : > { %v4196_v33 = vadd.f32 %v4195_v30, %v4165_v15  ;;  %v4037_v62 = vpop.f32.mrf.mxu0  ;;  %v3479_v30 = vsel %vm5149_vm3, %v3474_v48, %v3478_v42  ;;  %v3492_v15 = vrot.slane %v3490_v59, 5  ;;  %v3496_v48 = vrot.slane %v3494_v41, 4 }
 0x245   : > { %v3639_v16 = vpop.f32.mrf.mxu3  ;;  %v2700_v0 = vpop.f32.mrf.mxu1  ;;  %v2557_v7 = vrot.slane %v2555_v38, 4  ;;  %v3535_v6 = vunpack.c.l.b16 %v3479_v30 }
 0x246   : > { %v3704_v14 = vadd.f32 %v3639_v16, %v3050_v20  ;;  %v2762_v10 = vadd.f32 %v2700_v0, %v5771_v52  ;;  %v3534_v52 = vunpack.c.l.b16 %v3469_v46  ;;  %v3483_v20 = vrot.slane %v3481_v61, 4 }
 0x247   : > { %4918 = vmatmul.msk.bf16.gmra.mxu0 %vm693_vm4, %v3949_v60  ;;  %v3932_v16 = vunpack.c.l.b16 %v3891_v49  ;;  %v3933_v0 = vunpack.c.l.b16 %v3894_v34  ;;  %v3497_v13 = vor.u32 %v3496_v48, %v3492_v15  ;;  %v4970_v48 = vld [vmem:[%s5137_s29 + $0xcc] sm:$0xff] }
 0x248   : > { %v4102_v35 = vadd.f32 %v4037_v62, %v3704_v14  ;;  %v2987_v43 = vpop.f32.mrf.mxu2  ;;  %4692 = vmatmul.msk.bf16.gmra.mxu1 %vm693_vm4, %v2608_v55  ;;  %v2559_v55 = vsel %vm5323_vm7, %v2557_v7, %v2558_v28  ;;  %v3552_v57 = vpack.c.b16 %v3535_v6, %v3534_v52  ;;  %v3487_v46 = vor.u32 %v3486_v25, %v3483_v20  ;;  %v4887_v7 = vld [vmem:[%s5137_s29 + $0xcc] sm:$0xe] }
 0x249   : > { %v3051_v58 = vadd.f32 %v2987_v43, %v2761_v31  ;;  %v4854_v31 = vld [vmem:[%s5137_s29 + $0xd4] sm:$0x1]  ;;  %v2593_v61 = vunpack.c.l.b16 %v2559_v55  ;;  %v3950_v41 = vpack.c.b16 %v3933_v0, %v3932_v16  ;;  %v3498_v43 = vrot.slane %v3497_v13, 4 }
 0x24a   : > { %v4133_v56 = vadd.f32 %v4132_v9, %v4102_v35  ;;  %v4166_v54 = vmul.f32 %v4102_v35, %v4102_v35  ;;  %v2556_v9 = vsel %vm5323_vm7, %v4676_v44, %v2555_v38  ;;  %v3500_v14 = vshll.u32 %v4854_v31, 16 }
 0x24b   : > { %v2592_v24 = vunpack.c.l.b16 %v2556_v9  ;;  %v3488_v35 = vrot.slane %v3487_v46, 4  ;;  %v3900_v20 = vrot.slane %v4854_v31, 5 }
 0x24c   : > { %v4197_v42 = vadd.f32 %v4196_v33, %v4166_v54  ;;  %v4039_v60 = vpop.f32.mrf.mxu0  ;;  %v3502_v52 = vrot.slane %v3500_v14, 5 }
 0x24d   : > { %v3641_v1 = vpop.f32.mrf.mxu3  ;;  %4805 = vmatmul.msk.bf16.gmra.mxu2 %vm693_vm4, %v4969_v12  ;;  %v2702_v62 = vpop.f32.mrf.mxu1  ;;  %v2609_v45 = vpack.c.b16 %v2593_v61, %v2592_v24  ;;  %v3493_v28 = vsel %vm5149_vm3, %v3488_v35, %v3492_v15 }
 0x24e   : > { %v3705_v47 = vadd.f32 %v3641_v1, %v3051_v58  ;;  %v2763_v33 = vadd.f32 %v2702_v62, %v5791_v21  ;;  %v3897_v58 = vrot.slane %v6367_v32, 5  ;;  %v4903_v32 = vrot.slane %v4887_v7, 9 }
 0x250   : > { %v4103_v30 = vadd.f32 %v4039_v60, %v3705_v47  ;;  %v2990_v51 = vpop.f32.mrf.mxu2  ;;  %v3899_v49 = vrot.slane %v3897_v58, 4  ;;  %v3898_v15 = vsel %vm5323_vm7, %v4903_v32, %v3897_v58 }
 0x251   : > { %v3052_v26 = vadd.f32 %v2990_v51, %v2762_v10 }
 0x252   : > { %v4134_v59 = vadd.f32 %v4133_v56, %v4103_v30  ;;  %v4167_v38 = vmul.f32 %v4103_v30, %v4103_v30  ;;  %4870 = vmatmul.msk.bf16.gmra.mxu3 %vm693_vm4, %v3552_v57  ;;  %v3503_v56 = vsel %vm5149_vm3, %v3498_v43, %v3502_v52  ;;  %v3901_v36 = vsel %vm5323_vm7, %v3899_v49, %v3900_v20  ;;  %v6457_v57 = vld [vmem:[#allocation3_spill] sm:$0xff] }
 0x253   : > { %v3537_v34 = vunpack.c.l.b16 %v3503_v56  ;;  %v3935_v0 = vunpack.c.l.b16 %v3901_v36 }
 0x254   : > { %v4198_v11 = vadd.f32 %v4197_v42, %v4167_v38  ;;  %v4042_v21 = vpop.f32.mrf.mxu0 }
 0x255   : > { %v3644_v12 = vpop.f32.mrf.mxu3  ;;  %v2705_v44 = vpop.f32.mrf.mxu1 }
 0x256   : > { %v3706_v17 = vadd.f32 %v3644_v12, %v3052_v26  ;;  %v2764_v10 = vadd.f32 %v2705_v44, %v5810_v29  ;;  %v3536_v29 = vunpack.c.l.b16 %v3493_v28 }
 0x257   : > { %4919 = vmatmul.msk.bf16.gmra.mxu0 %vm693_vm4, %v3950_v41 }
 0x258   : > { %v4104_v54 = vadd.f32 %v4042_v21, %v3706_v17  ;;  %v2992_v6 = vpop.f32.mrf.mxu2  ;;  %4693 = vmatmul.msk.bf16.gmra.mxu1 %vm693_vm4, %v2609_v45  ;;  %v3553_v31 = vpack.c.b16 %v3537_v34, %v3536_v29 }
 0x259   : > { %v3053_v25 = vadd.f32 %v2992_v6, %v2763_v33  ;;  %v3934_v33 = vunpack.c.l.b16 %v3898_v15 }
 0x25a   : > { %v4135_v42 = vadd.f32 %v4134_v59, %v4104_v54  ;;  %v4168_v60 = vmul.f32 %v4104_v54, %v4104_v54 }
 0x25b   : > { %v3951_v24 = vpack.c.b16 %v3935_v0, %v3934_v33 }
 0x25c   : > { %v4199_v1 = vadd.f32 %v4198_v11, %v4168_v60  ;;  %v4044_v62 = vpop.f32.mrf.mxu0 }
 0x25d   : > { %v3646_v9 = vpop.f32.mrf.mxu3  ;;  %4806 = vmatmul.msk.bf16.gmra.mxu2 %vm693_vm4, %v4970_v48  ;;  %v2707_v55 = vpop.f32.mrf.mxu1 }
 0x25e   : > { %v3707_v47 = vadd.f32 %v3646_v9, %v3053_v25  ;;  %v2765_v16 = vadd.f32 %v2707_v55, %v6457_v57 }
 0x260   : > { %v4105_v46 = vadd.f32 %v4044_v62, %v3707_v47  ;;  %v2995_v13 = vpop.f32.mrf.mxu2 }
 0x261   : > { %v3054_v14 = vadd.f32 %v2995_v13, %v2764_v10 }
 0x262   : > { %v4136_v30 = vadd.f32 %v4135_v42, %v4105_v46  ;;  %v4169_v51 = vmul.f32 %v4105_v46, %v4105_v46  ;;  %4871 = vmatmul.msk.bf16.gmra.mxu3 %vm693_vm4, %v3553_v31 }
 0x264   : > { %v4200_v18 = vadd.f32 %v4199_v1, %v4169_v51  ;;  %v4047_v61 = vpop.f32.mrf.mxu0 }
 0x265   : > { %v3649_v26 = vpop.f32.mrf.mxu3  ;;  %v2710_v59 = vpop.f32.mrf.mxu1 }
 0x266   : > { %v3708_v38 = vadd.f32 %v3649_v26, %v3054_v14  ;;  %v2766_v41 = vadd.f32 %v2710_v59, %v5853_v5 }
 0x267   : > { %4920 = vmatmul.msk.bf16.gmra.mxu0 %vm693_vm4, %v3951_v24 }
 0x268   : > { %v4106_v35 = vadd.f32 %v4047_v61, %v3708_v38  ;;  %v2997_v43 = vpop.f32.mrf.mxu2 }
 0x269   : > { %v3055_v52 = vadd.f32 %v2997_v43, %v2765_v16 }
 0x26a   : > { %v4137_v11 = vadd.f32 %v4136_v30, %v4106_v35  ;;  %v4170_v21 = vmul.f32 %v4106_v35, %v4106_v35 }
 0x26c   : > { %v4201_v45 = vadd.f32 %v4200_v18, %v4170_v21  ;;  %v4049_v58 = vpop.f32.mrf.mxu0 }
 0x26d   : > { %v3651_v12 = vpop.f32.mrf.mxu3  ;;  %v2712_v44 = vpop.f32.mrf.mxu1 }
 0x26e   : > { %v3709_v7 = vadd.f32 %v3651_v12, %v3055_v52  ;;  %v2767_v17 = vadd.f32 %v2712_v44, %v5877_v22 }
 0x270   : > { %v4107_v10 = vadd.f32 %v4049_v58, %v3709_v7  ;;  %v3000_v28 = vpop.f32.mrf.mxu2 }
 0x271   : > { %v3056_v56 = vadd.f32 %v3000_v28, %v2766_v41 }
 0x272   : > { %v4138_v54 = vadd.f32 %v4137_v11, %v4107_v10  ;;  %v4171_v6 = vmul.f32 %v4107_v10, %v4107_v10 }
 0x274   : > { %v4202_v5 = vadd.f32 %v4201_v45, %v4171_v6  ;;  %v4052_v32 = vpop.f32.mrf.mxu0 }
 0x275   : > { %v3654_v49 = vpop.f32.mrf.mxu3  ;;  %v2715_v20 = vpop.f32.mrf.mxu1 }
 0x276   : > { %v3710_v25 = vadd.f32 %v3654_v49, %v3056_v56  ;;  %v2768_v48 = vadd.f32 %v2715_v20, %v5896_v19 }
 0x278   : > { %v4108_v42 = vadd.f32 %v4052_v32, %v3710_v25  ;;  %v3002_v60 = vpop.f32.mrf.mxu2 }
 0x279   : > { %v3057_v29 = vadd.f32 %v3002_v60, %v2767_v17 }
 0x27a   : > { %v4139_v34 = vadd.f32 %v4138_v54, %v4108_v42  ;;  %v4172_v1 = vmul.f32 %v4108_v42, %v4108_v42 }
 0x27c   : > { %v4203_v62 = vadd.f32 %v4202_v5, %v4172_v1  ;;  %v4054_v15 = vpop.f32.mrf.mxu0 }
 0x27d   : > { %v3656_v22 = vpop.f32.mrf.mxu3  ;;  %v2717_v36 = vpop.f32.mrf.mxu1 }
 0x27e   : > { %v3711_v9 = vadd.f32 %v3656_v22, %v3057_v29  ;;  %v2769_v55 = vadd.f32 %v2717_v36, %v5920_v53 }
 0x280   : > { %v4109_v47 = vadd.f32 %v4054_v15, %v3711_v9  ;;  %v3005_v31 = vpop.f32.mrf.mxu2 }
 0x281   : > { %v3058_v57 = vadd.f32 %v3005_v31, %v2768_v48 }
 0x282   : > { %v4140_v16 = vadd.f32 %v4139_v34, %v4109_v47  ;;  %v4173_v33 = vmul.f32 %v4109_v47, %v4109_v47 }
 0x284   : > { %v4204_v0 = vadd.f32 %v4203_v62, %v4173_v33  ;;  %v4057_v46 = vpop.f32.mrf.mxu0 }
 0x285   : > { %v3659_v19 = vpop.f32.mrf.mxu3  ;;  %v2720_v13 = vpop.f32.mrf.mxu1 }
 0x286   : > { %v3712_v14 = vadd.f32 %v3659_v19, %v3058_v57  ;;  %v2770_v30 = vadd.f32 %v2720_v13, %v5939_v2 }
 0x288   : > { %v4110_v51 = vadd.f32 %v4057_v46, %v3712_v14  ;;  %v3007_v24 = vpop.f32.mrf.mxu2 }
 0x289   : > { %v3059_v18 = vadd.f32 %v3007_v24, %v2769_v55 }
 0x28a   : > { %v4141_v61 = vadd.f32 %v4140_v16, %v4110_v51  ;;  %v4174_v26 = vmul.f32 %v4110_v51, %v4110_v51 }
 0x28c   : > { %v4205_v59 = vadd.f32 %v4204_v0, %v4174_v26  ;;  %v4059_v38 = vpop.f32.mrf.mxu0 }
 0x28d   : > { %v3661_v53 = vpop.f32.mrf.mxu3  ;;  %v2722_v41 = vpop.f32.mrf.mxu1 }
 0x28e   : > { %v3713_v35 = vadd.f32 %v3661_v53, %v3059_v18  ;;  %v2771_v10 = vadd.f32 %v2722_v41, %v5963_v40 }
 0x290   : > { %v4111_v43 = vadd.f32 %v4059_v38, %v3713_v35  ;;  %v3010_v52 = vpop.f32.mrf.mxu2 }
 0x291   : > { %v3060_v11 = vadd.f32 %v3010_v52, %v2770_v30 }
 0x292   : > { %v4142_v21 = vadd.f32 %v4141_v61, %v4111_v43  ;;  %v4175_v45 = vmul.f32 %v4111_v43, %v4111_v43 }
 0x294   : > { %v4206_v58 = vadd.f32 %v4205_v59, %v4175_v45  ;;  %v4062_v12 = vpop.f32.mrf.mxu0 }
 0x295   : > { %v3664_v44 = vpop.f32.mrf.mxu3  ;;  %v2725_v7 = vpop.f32.mrf.mxu1 }
 0x296   : > { %v3714_v2 = vadd.f32 %v3664_v44, %v3060_v11  ;;  %v2772_v42 = vadd.f32 %v2725_v7, %v5982_v8 }
 0x298   : > { %v4112_v17 = vadd.f32 %v4062_v12, %v3714_v2  ;;  %v3012_v28 = vpop.f32.mrf.mxu2 }
 0x299   : > { %v3061_v6 = vadd.f32 %v3012_v28, %v2771_v10 }
 0x29a   : > { %v4143_v56 = vadd.f32 %v4142_v21, %v4112_v17  ;;  %v4176_v54 = vmul.f32 %v4112_v17, %v4112_v17 }
 0x29c   : > { %v4207_v5 = vadd.f32 %v4206_v58, %v4176_v54  ;;  %v4064_v32 = vpop.f32.mrf.mxu0 }
 0x29d   : > { %v3666_v49 = vpop.f32.mrf.mxu3  ;;  %v2727_v20 = vpop.f32.mrf.mxu1 }
 0x29e   : > { %v3715_v25 = vadd.f32 %v3666_v49, %v3061_v6  ;;  %v2773_v55 = vadd.f32 %v2727_v20, %v6006_v27 }
 0x2a0   : > { %v4113_v48 = vadd.f32 %v4064_v32, %v3715_v25  ;;  %v3015_v60 = vpop.f32.mrf.mxu2 }
 0x2a1   : > { %v3062_v1 = vadd.f32 %v3015_v60, %v2772_v42 }
 0x2a2   : > { %v4144_v29 = vadd.f32 %v4143_v56, %v4113_v48  ;;  %v4177_v34 = vmul.f32 %v4113_v48, %v4113_v48 }
 0x2a4   : > { %v4208_v62 = vadd.f32 %v4207_v5, %v4177_v34  ;;  %v4067_v15 = vpop.f32.mrf.mxu0 }
 0x2a5   : > { %v3669_v22 = vpop.f32.mrf.mxu3  ;;  %v2730_v40 = vpop.f32.mrf.mxu1 }
 0x2a6   : > { %v3716_v36 = vadd.f32 %v3669_v22, %v3062_v1  ;;  %v2774_v14 = vadd.f32 %v2730_v40, %v6025_v63 }
 0x2a8   : > { %v4114_v9 = vadd.f32 %v4067_v15, %v3716_v36  ;;  %v3017_v47 = vpop.f32.mrf.mxu2 }
 0x2a9   : > { %v3063_v16 = vadd.f32 %v3017_v47, %v2773_v55 }
 0x2aa   : > { %v4145_v31 = vadd.f32 %v4144_v29, %v4114_v9  ;;  %v4178_v57 = vmul.f32 %v4114_v9, %v4114_v9 }
 0x2ac   : > { %v4209_v33 = vadd.f32 %v4208_v62, %v4178_v57  ;;  %v4069_v0 = vpop.f32.mrf.mxu0 }
 0x2ad   : > { %v3671_v46 = vpop.f32.mrf.mxu3  ;;  %v2732_v8 = vpop.f32.mrf.mxu1 }
 0x2ae   : > { %v3717_v19 = vadd.f32 %v3671_v46, %v3063_v16  ;;  %v2775_v41 = vadd.f32 %v2732_v8, %v6049_v39 }
 0x2b0   : > { %v4115_v13 = vadd.f32 %v4069_v0, %v3717_v19  ;;  %v3020_v30 = vpop.f32.mrf.mxu2 }
 0x2b1   : > { %v3064_v18 = vadd.f32 %v3020_v30, %v2774_v14 }
 0x2b2   : > { %v4146_v51 = vadd.f32 %v4145_v31, %v4115_v13  ;;  %v4179_v24 = vmul.f32 %v4115_v13, %v4115_v13 }
 0x2b4   : > { %v4210_v61 = vadd.f32 %v4209_v33, %v4179_v24  ;;  %v4072_v26 = vpop.f32.mrf.mxu0 }
 0x2b5   : > { %v3674_v59 = vpop.f32.mrf.mxu3  ;;  %v2735_v27 = vpop.f32.mrf.mxu1 }
 0x2b6   : > { %v3718_v38 = vadd.f32 %v3674_v59, %v3064_v18  ;;  %v2776_v7 = vadd.f32 %v2735_v27, %v6068_v50 }
 0x2b8   : > { %v4116_v53 = vadd.f32 %v4072_v26, %v3718_v38  ;;  %v3022_v35 = vpop.f32.mrf.mxu2 }
 0x2b9   : > { %v3065_v11 = vadd.f32 %v3022_v35, %v2775_v41 }
 0x2ba   : > { %v4147_v43 = vadd.f32 %v4146_v51, %v4116_v53  ;;  %v4180_v52 = vmul.f32 %v4116_v53, %v4116_v53 }
 0x2bc   : > { %v4211_v21 = vadd.f32 %v4210_v61, %v4180_v52  ;;  %v4074_v45 = vpop.f32.mrf.mxu0 }
 0x2bd   : > { %v3676_v58 = vpop.f32.mrf.mxu3  ;;  %v2737_v63 = vpop.f32.mrf.mxu1 }
 0x2be   : > { %v3719_v12 = vadd.f32 %v3676_v58, %v3065_v11  ;;  %v2777_v49 = vadd.f32 %v2737_v63, %v6092_v3 }
 0x2c0   : > { %v4117_v44 = vadd.f32 %v4074_v45, %v3719_v12  ;;  %v3025_v2 = vpop.f32.mrf.mxu2 }
 0x2c1   : > { %v3066_v28 = vadd.f32 %v3025_v2, %v2776_v7 }
 0x2c2   : > { %v4148_v17 = vadd.f32 %v4147_v43, %v4117_v44  ;;  %v4181_v10 = vmul.f32 %v4117_v44, %v4117_v44  ;;  %v6458_v43 = vld [vmem:[#allocation4_spill] sm:$0xff] }
 0x2c4   : > { %v4212_v56 = vadd.f32 %v4211_v21, %v4181_v10  ;;  %v4077_v54 = vpop.f32.mrf.mxu0 }
 0x2c5   : > { %v3679_v6 = vpop.f32.mrf.mxu3  ;;  %v2740_v5 = vpop.f32.mrf.mxu1 }
 0x2c6   : > { %v3720_v39 = vadd.f32 %v3679_v6, %v3066_v28  ;;  %v2778_v62 = vadd.f32 %v2740_v5, %v6109_v23 }
 0x2c8   : > { %v4118_v32 = vadd.f32 %v4077_v54, %v3720_v39  ;;  %v3027_v20 = vpop.f32.mrf.mxu2 }
 0x2c9   : > { %v3067_v42 = vadd.f32 %v3027_v20, %v2777_v49 }
 0x2ca   : > { %v4149_v25 = vadd.f32 %v4148_v17, %v4118_v32  ;;  %v4182_v48 = vmul.f32 %v4118_v32, %v4118_v32 }
 0x2cc   : > { %v4213_v60 = vadd.f32 %v4212_v56, %v4182_v48  ;;  %v4079_v29 = vpop.f32.mrf.mxu0 }
 0x2cd   : > { %v3681_v34 = vpop.f32.mrf.mxu3  ;;  %v2742_v22 = vpop.f32.mrf.mxu1 }
 0x2ce   : > { %v3721_v50 = vadd.f32 %v3681_v34, %v3067_v42  ;;  %v2779_v16 = vadd.f32 %v2742_v22, %v6132_v4 }
 0x2d0   : > { %v4119_v1 = vadd.f32 %v4079_v29, %v3721_v50  ;;  %v3030_v15 = vpop.f32.mrf.mxu2 }
 0x2d1   : > { %v3068_v9 = vadd.f32 %v3030_v15, %v2778_v62 }
 0x2d2   : > { %v4150_v40 = vadd.f32 %v4149_v25, %v4119_v1  ;;  %v4183_v36 = vmul.f32 %v4119_v1, %v4119_v1 }
 0x2d4   : > { %v4214_v55 = vadd.f32 %v4213_v60, %v4183_v36  ;;  %v4082_v47 = vpop.f32.mrf.mxu0 }
 0x2d5   : > { %v3684_v31 = vpop.f32.mrf.mxu3  ;;  %v2745_v19 = vpop.f32.mrf.mxu1 }
 0x2d6   : > { %v3722_v3 = vadd.f32 %v3684_v31, %v3068_v9  ;;  %v2780_v24 = vadd.f32 %v2745_v19, %v6151_v37 }
 0x2d8   : > { %v4120_v57 = vadd.f32 %v4082_v47, %v3722_v3  ;;  %v3032_v33 = vpop.f32.mrf.mxu2 }
 0x2d9   : > { %v3069_v8 = vadd.f32 %v3032_v33, %v2779_v16 }
 0x2da   : > { %v4151_v0 = vadd.f32 %v4150_v40, %v4120_v57  ;;  %v4184_v46 = vmul.f32 %v4120_v57, %v4120_v57 }
 0x2dc   : > { %v4215_v13 = vadd.f32 %v4214_v55, %v4184_v46  ;;  %v4084_v14 = vpop.f32.mrf.mxu0 }
 0x2dd   : > { %v3686_v23 = vpop.f32.mrf.mxu3  ;;  %v2747_v38 = vpop.f32.mrf.mxu1 }
 0x2de   : > { %v3723_v30 = vadd.f32 %v3686_v23, %v3069_v8  ;;  %v2781_v52 = vadd.f32 %v2747_v38, %v6458_v43 }
 0x2e0   : > { %v4121_v51 = vadd.f32 %v4084_v14, %v3723_v30  ;;  %v3035_v18 = vpop.f32.mrf.mxu2 }
 0x2e1   : > { %v3070_v59 = vadd.f32 %v3035_v18, %v2780_v24 }
 0x2e2   : > { %v4152_v61 = vadd.f32 %v4151_v0, %v4121_v51  ;;  %v4185_v26 = vmul.f32 %v4121_v51, %v4121_v51 }
 0x2e4   : > { %v4216_v27 = vadd.f32 %v4215_v13, %v4185_v26  ;;  %v4087_v4 = vpop.f32.mrf.mxu0 }
 0x2e5   : > { %v3689_v53 = vpop.f32.mrf.mxu3 }
 0x2e6   : > { %v3724_v41 = vadd.f32 %v3689_v53, %v3070_v59 }
 0x2e8   : > { %v4122_v35 = vadd.f32 %v4087_v4, %v3724_v41  ;;  %v3037_v11 = vpop.f32.mrf.mxu2 }
 0x2e9   : > { %v3071_v58 = vadd.f32 %v3037_v11, %v2781_v52 }
 0x2ea   : > { %v4153_v21 = vadd.f32 %v4152_v61, %v4122_v35  ;;  %v4186_v45 = vmul.f32 %v4122_v35, %v4122_v35 }
 0x2ec   : > { %v4217_v63 = vadd.f32 %v4216_v27, %v4186_v45  ;;  %v4089_v44 = vpop.f32.mrf.mxu0 }
 0x2ed   : > { %v3691_v12 = vpop.f32.mrf.mxu3 }
 0x2ee   : > { %v3725_v37 = vadd.f32 %v3691_v12, %v3071_v58 }
 0x2f0   : > { %v4123_v7 = vadd.f32 %v4089_v44, %v3725_v37 }
 0x2f2   : > { %v4154_v2 = vadd.f32 %v4153_v21, %v4123_v7  ;;  %v4187_v17 = vmul.f32 %v4123_v7, %v4123_v7 }
 0x2f4   : > { %4155 = vst [vmem:[%s194_s18] sm:$0xff] %v4154_v2  ;;  %v4218_v10 = vadd.f32 %v4217_v63, %v4187_v17 }
 0x2f6   : > { %4219 = vst [vmem:[%s200_s21] sm:$0xff] %v4218_v10 }
 0x2f7 PF: > { %s14_s14 = sadd.s32 1, %s5071_s14   ;;  %s6459_s12 = smov %s5067_s13 }
 0x2f8   : > { %p11_p5 = scmp.ge.s32.totalorder %s14_s14, 4   ;;  %s6460_s13 = smov %s6462_s15 }
 0x2fa   :  { %13 = sbr.rel (!%p11_p5) target bundleno = 2 (0x2), region = 81 }

// kernel: conv_block_forward.3
= control target key start
LH: loop header
LB: loop body
LE: loop exit
PB: predicated region body
PF: predicated region fallthrough
CT: control target
= control target key end

     0   :  { %s5125_s15 = smov 0   ;;  %s5127_s16 = smov 0   ;;  %s6602_s0 = inlined_call_operand.vmem [shape: bf16[2,18,18,8], index: 0, kind: input, shape index: {}]   ;;  %s6603_s1 = inlined_call_operand.vmem [shape: bf16[9,8,128], index: 1, kind: input, shape index: {}]   ;;  %s6604_s2 = inlined_call_operand.vmem [shape: f32[1,128], index: 2, kind: input, shape index: {}]   ;;  %s6605_s3 = inlined_call_operand.vmem [shape: f32[1,128], index: 3, kind: input, shape index: {}]   ;;  %s6606_s4 = inlined_call_operand.vmem [shape: f32[512,128], index: 4, kind: output, shape index: {}]  }
   0x1   :  { %s5129_s17 = smov 0  }
   0x2 LB: > { %s26_s18 = sadd.s32 1, %s5094_s16  ;;  %p4356_p0 = scmp.ge.s32.totalorder %s5098_s17, 1  ;;  %s5098_s17 = sphi %s5129_s17, %s14_s17   ;;  %s5094_s16 = sphi %s5127_s16, %s6619_s16   ;;  %s5090_s15 = sphi %s5125_s15, %s6618_s15  }
   0x3   : > { %p28_p1 = scmp.ge.s32.totalorder %s26_s18, 2  ;;  %p176_p2 = scmp.lt.s32.totalorder %s5098_s17, 3 }
   0x5   : > { %s6621_s18 = smov (%p28_p1, %s26_s18), 0  ;;  %p177_p3 = pnand %p4356_p0, %p176_p2 }
   0x7   : > { %180 = sbr.rel (%p177_p3) target bundleno = 762 (0x2fa), region = 36 }
   0xc   : > { %v4360_v0 = vld [vmem:[%s6603_s1 + $0x4] sm:$0xf]  ;;  %vm756_vm0 = vcmask 1043456   ;;  %p203_p4 = scmp.lt.s32.totalorder %s5090_s15, 1  ;;  %v4473_v2 = vld [vmem:[%s6603_s1 + $0x8] sm:$0xf] }
   0xd   : > { %v758_v1 = vsel %vm756_vm0, %v4360_v0, 0  ;;  %v1331_v3 = vsel %vm756_vm0, %v4473_v2, 0  ;;  %v4522_v4 = vld [vmem:[%s6603_s1 + $0xc] sm:$0xf]  ;;  %v253_v5 = vld [vmem:[%s6603_s1] sm:$0xf] }
   0xe   : > { %4994 = vmatpush.bf16.msra.mxu1 %v758_v1  ;;  %4995 = vmatpush.bf16.msra.mxu2 %v758_v1  ;;  %s204_s23 = scalar_select %p203_p4, %s5090_s15, 1  ;;  %v4651_v6 = vld [vmem:[%s6603_s1 + $0x10] sm:$0xf]  ;;  %v1621_v7 = vsel %vm756_vm0, %v4522_v4, 0  ;;  %v978_v8 = vsel %vm756_vm0, %v253_v5, 0  ;;  %vm707_vm4 = vcmask 64512  }
   0xf   : > { %4996 = vmatpush.bf16.msra.mxu3 %v758_v1  ;;  %767 = vmatpush.bf16.msra.mxu0 %v758_v1  ;;  %v2275_v9 = vsel %vm756_vm0, %v4651_v6, 0  ;;  %vm270_vm1 = vsmask.f32 3328  ;;  %vm271_vm2 = vsmask.f32 7440  ;;  %vm1117_vm5 = vcmask 1042432  }
  0x10   : > { %s4997_s30 = smul.u32 216, %s204_s23  ;;  %vm5182_vm3 = vmor %vm270_vm1, %vm271_vm2  ;;  %vm1118_vm6 = vcmask 1046532   ;;  %s4358_s20 = sshll.u32 %s5090_s15, 5 }
  0x11   : > { %vm5356_vm7 = vmor %vm1117_vm5, %vm1118_vm6  ;;  %p6203_p5 = scmp.lt.s32.totalorder %s4358_s20, 63 }
  0x12   : > { %1340 = vmatpush.bf16.msrb.mxu2 %v1331_v3  ;;  %987 = vmatpush.bf16.msrb.mxu1 %v978_v8  ;;  %s5170_s7 = scalar_lea.vmem %s6602_s0, %s4997_s30 }
  0x13   : > { %1630 = vmatpush.bf16.msrb.mxu3 %v1621_v7  ;;  %2284 = vmatpush.bf16.msrb.mxu0 %v2275_v9  ;;  %v229_v10 = vld [vmem:[%s5170_s7 + $0x30] sm:$0xf]  ;;  %v230_v11 = vld [vmem:[%s5170_s7 + $0x34] sm:$0xf]  ;;  %v258_v12 = vld [vmem:[%s5170_s7 + $0x38] sm:$0x1] }
  0x14   : > { %v370_v13 = vshrl.u32 %v229_v10, 16  ;;  %v373_v14 = vshll.u32 %v229_v10, 16  ;;  %v379_v15 = vshll.u32 %v230_v11, 16  ;;  %v383_v16 = vshrl.u32 %v230_v11, 16  ;;  %v237_v17 = vld [vmem:[%s5170_s7 + $0x60] sm:$0xf] }
  0x15   : > { %v389_v18 = vshll.u32 %v258_v12, 16  ;;  %v238_v19 = vld [vmem:[%s5170_s7 + $0x64] sm:$0xf]  ;;  %v262_v20 = vld [vmem:[%s5170_s7 + $0x68] sm:$0x1]  ;;  %v466_v21 = vshrl.u32 %v237_v17, 16 }
  0x16   : > { %v372_v22 = vrot.slane %v370_v13, 4  ;;  %v375_v23 = vrot.slane %v373_v14, 5  ;;  %v381_v24 = vrot.slane %v379_v15, 5  ;;  %v385_v25 = vrot.slane %v383_v16, 4  ;;  %v245_v26 = vld [vmem:[%s5170_s7 + $0x90] sm:$0xf] }
  0x17   : > { %v391_v27 = vrot.slane %v389_v18, 5  ;;  %v468_v28 = vrot.slane %v466_v21, 4  ;;  %v469_v29 = vshll.u32 %v237_v17, 16  ;;  %v475_v30 = vshll.u32 %v238_v19, 16  ;;  %v246_v35 = vld [vmem:[%s5170_s7 + $0x94] sm:$0xf] }
  0x18   : > { %v376_v31 = vor.u32 %v375_v23, %v372_v22  ;;  %v386_v32 = vor.u32 %v385_v25, %v381_v24  ;;  %v479_v33 = vshrl.u32 %v238_v19, 16  ;;  %v485_v34 = vshll.u32 %v262_v20, 16  ;;  %v266_v45 = vld [vmem:[%s5170_s7 + $0x98] sm:$0x1]  ;;  %v221_v61 = vld [vmem:[%s5170_s7] sm:$0xf] }
  0x19   : > { %v471_v37 = vrot.slane %v469_v29, 5  ;;  %v477_v38 = vrot.slane %v475_v30, 5  ;;  %v562_v39 = vshrl.u32 %v245_v26, 16  ;;  %v565_v47 = vshll.u32 %v245_v26, 16  ;;  %v5195_v1 = vld [vmem:[%s5170_s7 + $0x4] sm:$0xf] }
  0x1a   : > { %v377_v40 = vrot.slane %v376_v31, 4  ;;  %v387_v41 = vrot.slane %v386_v32, 4  ;;  %v481_v42 = vrot.slane %v479_v33, 4  ;;  %v487_v43 = vrot.slane %v485_v34, 5  ;;  %v5198_v2 = vld [vmem:[%s5170_s7 + $0x8] sm:$0x1] }
  0x1b   : > { %v472_v44 = vor.u32 %v471_v37, %v468_v28  ;;  %v564_v46 = vrot.slane %v562_v39, 4  ;;  %v571_v48 = vshll.u32 %v246_v35, 16  ;;  %v575_v52 = vshrl.u32 %v246_v35, 16  ;;  %v231_v19 = vld [vmem:[%s5170_s7 + $0x3c] sm:$0xf]  ;;  %s6623_s20 = smov (!%p6203_p5, %s4358_s20), 63 }
  0x1c   : > { %v382_v49 = vsel %vm5182_vm3, %v377_v40, %v381_v24  ;;  %v392_v50 = vsel %vm5182_vm3, %v387_v41, %v391_v27  ;;  %v482_v51 = vor.u32 %v481_v42, %v477_v38  ;;  %v567_v56 = vrot.slane %v565_v47, 5  ;;  %v5210_v20 = vld [vmem:[%s5170_s7 + $0x40] sm:$0xf]  ;;  %v5215_v25 = vld [vmem:[%s5170_s7 + $0x44] sm:$0x1]  ;;  %s4359_s25 = sshll.u32 %s6623_s20, 3 }
  0x1d   : > { %v667_v53 = vunpack.c.l.b16 %v382_v49  ;;  %v668_v54 = vunpack.c.l.b16 %v392_v50  ;;  %v473_v55 = vrot.slane %v472_v44, 4  ;;  %v573_v58 = vrot.slane %v571_v48, 5  ;;  %v239_v33 = vld [vmem:[%s5170_s7 + $0x6c] sm:$0xf]  ;;  %v263_v47 = vld [vmem:[%s5170_s7 + $0x74] sm:$0x1]  ;;  %s6254_s28 = scalar_lea.vmem %s6606_s4, %s4359_s25 }
  0x1e   : > { %v483_v57 = vrot.slane %v482_v51, 4  ;;  %v577_v59 = vrot.slane %v575_v52, 4  ;;  %v581_v60 = vshll.u32 %v266_v45, 16  ;;  %v568_v0 = vor.u32 %v567_v56, %v564_v46 }
  0x1f   : > { %v695_v62 = vpack.c.b16 %v668_v54, %v667_v53  ;;  %v478_v63 = vsel %vm5182_vm3, %v473_v55, %v477_v38  ;;  %v274_v9 = vshrl.u32 %v221_v61, 16  ;;  %v277_v10 = vshll.u32 %v221_v61, 16  ;;  %v247_v61 = vld [vmem:[%s5170_s7 + $0x9c] sm:$0xf] }
  0x20   : > { %v488_v3 = vsel %vm5182_vm3, %v483_v57, %v487_v43  ;;  %v675_v4 = vunpack.c.l.b16 %v478_v63  ;;  %v578_v5 = vor.u32 %v577_v59, %v573_v58  ;;  %v583_v6 = vrot.slane %v581_v60, 5  ;;  %v240_v43 = vld [vmem:[%s5170_s7 + $0x70] sm:$0xf] }
  0x21   : > { %4365 = vmatmul.msk.bf16.vlgmr.msra.gmra.mxu1 %vm707_vm4, %v695_v62  ;;  %v676_v7 = vunpack.c.l.b16 %v488_v3  ;;  %v569_v8 = vrot.slane %v568_v0, 4  ;;  %v283_v12 = vshll.u32 %v5195_v1, 16  ;;  %v287_v13 = vshrl.u32 %v5195_v1, 16  ;;  %v248_v3 = vld [vmem:[%s5170_s7 + $0xa0] sm:$0xf] }
  0x22   : > { %v579_v11 = vrot.slane %v578_v5, 4  ;;  %v293_v14 = vshll.u32 %v5198_v2, 16  ;;  %v276_v17 = vrot.slane %v274_v9, 4  ;;  %v279_v18 = vrot.slane %v277_v10, 5 }
  0x23   : > { %v699_v15 = vpack.c.b16 %v676_v7, %v675_v4  ;;  %v574_v16 = vsel %vm5182_vm3, %v569_v8, %v573_v58  ;;  %v285_v23 = vrot.slane %v283_v12, 5  ;;  %v289_v24 = vrot.slane %v287_v13, 4  ;;  %v267_v8 = vld [vmem:[%s5170_s7 + $0xa4] sm:$0x1] }
  0x24   : > { %v584_v21 = vsel %vm5182_vm3, %v579_v11, %v583_v6  ;;  %v683_v22 = vunpack.c.l.b16 %v574_v16  ;;  %v280_v27 = vor.u32 %v279_v18, %v276_v17  ;;  %v295_v28 = vrot.slane %v293_v14, 5 }
  0x25   : > { %4369 = vmatmul.msk.bf16.vlgmr.msra.gmra.mxu2 %vm707_vm4, %v699_v15  ;;  %v684_v26 = vunpack.c.l.b16 %v584_v21  ;;  %v290_v29 = vor.u32 %v289_v24, %v285_v23  ;;  %v394_v30 = vshrl.u32 %v231_v19, 16  ;;  %v397_v31 = vshll.u32 %v231_v19, 16 }
  0x26   : > { %v403_v32 = vshll.u32 %v5210_v20, 16  ;;  %v281_v35 = vrot.slane %v280_v27, 4  ;;  %v407_v37 = vshrl.u32 %v5210_v20, 16  ;;  %v413_v38 = vshll.u32 %v5215_v25, 16 }
  0x27   : > { %v703_v34 = vpack.c.b16 %v684_v26, %v683_v22  ;;  %v291_v39 = vrot.slane %v290_v29, 4  ;;  %v396_v40 = vrot.slane %v394_v30, 4  ;;  %v399_v41 = vrot.slane %v397_v31, 5  ;;  %v223_v22 = vld [vmem:[%s5170_s7 + $0xc] sm:$0xf] }
  0x28   : > { %v405_v42 = vrot.slane %v403_v32, 5  ;;  %v286_v44 = vsel %vm5182_vm3, %v281_v35, %v285_v23  ;;  %v409_v45 = vrot.slane %v407_v37, 4  ;;  %v415_v46 = vrot.slane %v413_v38, 5  ;;  %v5244_v32 = vld [vmem:[%s5170_s7 + $0x14] sm:$0x1] }
  0x29   : > { %4373 = vmatmul.msk.bf16.vlgmr.msra.gmra.mxu3 %vm707_vm4, %v703_v34  ;;  %v490_v48 = vshrl.u32 %v239_v33, 16  ;;  %v296_v49 = vsel %vm5182_vm3, %v291_v39, %v295_v28  ;;  %v659_v50 = vunpack.c.l.b16 %v286_v44  ;;  %v400_v51 = vor.u32 %v399_v41, %v396_v40  ;;  %v5241_v28 = vld [vmem:[%s5170_s7 + $0x10] sm:$0xf] }
  0x2a   : > { %v493_v52 = vshll.u32 %v239_v33, 16  ;;  %v660_v53 = vunpack.c.l.b16 %v296_v49  ;;  %v410_v54 = vor.u32 %v409_v45, %v405_v42  ;;  %v499_v56 = vshll.u32 %v240_v43, 16 }
  0x2b   : > { %v492_v55 = vrot.slane %v490_v48, 4  ;;  %v401_v57 = vrot.slane %v400_v51, 4  ;;  %v503_v59 = vshrl.u32 %v240_v43, 16  ;;  %v509_v60 = vshll.u32 %v263_v47, 16  ;;  %v5254_v47 = vld [vmem:[%s5170_s7 + $0x4c] sm:$0xf] }
  0x2c   : > { %v495_v58 = vrot.slane %v493_v52, 5  ;;  %v691_v62 = vpack.c.b16 %v660_v53, %v659_v50  ;;  %v411_v63 = vrot.slane %v410_v54, 4  ;;  %v501_v0 = vrot.slane %v499_v56, 5  ;;  %v5259_v56 = vld [vmem:[%s5170_s7 + $0x50] sm:$0x1] }
  0x2d   : > { %v406_v4 = vsel %vm5182_vm3, %v401_v57, %v405_v42  ;;  %v505_v6 = vrot.slane %v503_v59, 4  ;;  %v511_v7 = vrot.slane %v509_v60, 5  ;;  %v586_v11 = vshrl.u32 %v247_v61, 16  ;;  %v233_v42 = vld [vmem:[%s5170_s7 + $0x48] sm:$0xf] }
  0x2e   : > { %v496_v5 = vor.u32 %v495_v58, %v492_v55  ;;  %4361 = vmatmul.msk.bf16.vlgmr.msra.gmra.mxu0 %vm707_vm4, %v691_v62  ;;  %v416_v9 = vsel %vm5182_vm3, %v411_v63, %v415_v46  ;;  %v669_v10 = vunpack.c.l.b16 %v406_v4  ;;  %v589_v12 = vshll.u32 %v247_v61, 16 }
  0x2f   : > { %v670_v13 = vunpack.c.l.b16 %v416_v9  ;;  %v506_v15 = vor.u32 %v505_v6, %v501_v0  ;;  %v595_v16 = vshll.u32 %v248_v3, 16  ;;  %v588_v17 = vrot.slane %v586_v11, 4 }
  0x30   : > { %v497_v14 = vrot.slane %v496_v5, 4  ;;  %v591_v18 = vrot.slane %v589_v12, 5  ;;  %v599_v19 = vshrl.u32 %v248_v3, 16  ;;  %v605_v21 = vshll.u32 %v267_v8, 16  ;;  %v241_v3 = vld [vmem:[%s5170_s7 + $0x78] sm:$0xf] }
  0x31   : > { %v696_v23 = vpack.c.b16 %v670_v13, %v669_v10  ;;  %v507_v26 = vrot.slane %v506_v15, 4  ;;  %v597_v27 = vrot.slane %v595_v16, 5  ;;  %v298_v35 = vshrl.u32 %v223_v22, 16  ;;  %v242_v8 = vld [vmem:[%s5170_s7 + $0x7c] sm:$0xf] }
  0x32   : > { %v502_v24 = vsel %vm5182_vm3, %v497_v14, %v501_v0  ;;  %v592_v30 = vor.u32 %v591_v18, %v588_v17  ;;  %v601_v31 = vrot.slane %v599_v19, 4  ;;  %v607_v34 = vrot.slane %v605_v21, 5  ;;  %v264_v16 = vld [vmem:[%s5170_s7 + $0x80] sm:$0x1] }
  0x33   : > { %v677_v29 = vunpack.c.l.b16 %v502_v24  ;;  %4366 = vmatmul.msk.bf16.gmra.mxu1 %vm707_vm4, %v696_v23  ;;  %v512_v33 = vsel %vm5182_vm3, %v507_v26, %v511_v7  ;;  %v301_v37 = vshll.u32 %v223_v22, 16  ;;  %v307_v41 = vshll.u32 %v5241_v28, 16 }
  0x34   : > { %v678_v38 = vunpack.c.l.b16 %v512_v33  ;;  %v593_v39 = vrot.slane %v592_v30, 4  ;;  %v602_v40 = vor.u32 %v601_v31, %v597_v27  ;;  %v300_v43 = vrot.slane %v298_v35, 4 }
  0x35   : > { %v303_v44 = vrot.slane %v301_v37, 5  ;;  %v311_v45 = vshrl.u32 %v5241_v28, 16  ;;  %v317_v46 = vshll.u32 %v5244_v32, 16  ;;  %v309_v51 = vrot.slane %v307_v41, 5 }
  0x36   : > { %v700_v48 = vpack.c.b16 %v678_v38, %v677_v29  ;;  %v598_v49 = vsel %vm5182_vm3, %v593_v39, %v597_v27  ;;  %v603_v50 = vrot.slane %v602_v40, 4  ;;  %v418_v58 = vshrl.u32 %v233_v42, 16  ;;  %v250_v39 = vld [vmem:[%s5170_s7 + $0xac] sm:$0xf]  ;;  %v268_v40 = vld [vmem:[%s5170_s7 + $0xb0] sm:$0x1] }
  0x37   : > { %v685_v52 = vunpack.c.l.b16 %v598_v49  ;;  %v304_v53 = vor.u32 %v303_v44, %v300_v43  ;;  %v313_v54 = vrot.slane %v311_v45, 4  ;;  %v319_v55 = vrot.slane %v317_v46, 5 }
  0x38   : > { %4370 = vmatmul.msk.bf16.gmra.mxu2 %vm707_vm4, %v700_v48  ;;  %v608_v57 = vsel %vm5182_vm3, %v603_v50, %v607_v34  ;;  %v421_v59 = vshll.u32 %v233_v42, 16  ;;  %v427_v60 = vshll.u32 %v5254_v47, 16  ;;  %v431_v0 = vshrl.u32 %v5254_v47, 16  ;;  %v249_v34 = vld [vmem:[%s5170_s7 + $0xa8] sm:$0xf] }
  0x39   : > { %v686_v61 = vunpack.c.l.b16 %v608_v57  ;;  %v305_v62 = vrot.slane %v304_v53, 4  ;;  %v314_v63 = vor.u32 %v313_v54, %v309_v51  ;;  %v420_v4 = vrot.slane %v418_v58, 4 }
  0x3a   : > { %v423_v5 = vrot.slane %v421_v59, 5  ;;  %v429_v6 = vrot.slane %v427_v60, 5  ;;  %v437_v7 = vshll.u32 %v5259_v56, 16  ;;  %v433_v12 = vrot.slane %v431_v0, 4  ;;  %v225_v59 = vld [vmem:[%s5170_s7 + $0x18] sm:$0xf] }
  0x3b   : > { %v704_v9 = vpack.c.b16 %v686_v61, %v685_v52  ;;  %v310_v10 = vsel %vm5182_vm3, %v305_v62, %v309_v51  ;;  %v315_v11 = vrot.slane %v314_v63, 4  ;;  %v514_v17 = vshrl.u32 %v241_v3, 16  ;;  %v5287_v63 = vld [vmem:[%s5170_s7 + $0x1c] sm:$0xf]  ;;  %v5290_v0 = vld [vmem:[%s5170_s7 + $0x20] sm:$0x1] }
  0x3c   : > { %v661_v13 = vunpack.c.l.b16 %v310_v10  ;;  %v424_v14 = vor.u32 %v423_v5, %v420_v4  ;;  %v439_v15 = vrot.slane %v437_v7, 5  ;;  %v434_v19 = vor.u32 %v433_v12, %v429_v6 }
  0x3d   : > { %4374 = vmatmul.msk.bf16.gmra.mxu3 %vm707_vm4, %v704_v9  ;;  %v320_v18 = vsel %vm5182_vm3, %v315_v11, %v319_v55  ;;  %v517_v21 = vshll.u32 %v241_v3, 16  ;;  %v523_v22 = vshll.u32 %v242_v8, 16  ;;  %v516_v26 = vrot.slane %v514_v17, 4 }
  0x3e   : > { %v662_v23 = vunpack.c.l.b16 %v320_v18  ;;  %v425_v24 = vrot.slane %v424_v14, 4  ;;  %v527_v27 = vshrl.u32 %v242_v8, 16  ;;  %v435_v29 = vrot.slane %v434_v19, 4 }
  0x3f   : > { %v519_v30 = vrot.slane %v517_v21, 5  ;;  %v525_v31 = vrot.slane %v523_v22, 5  ;;  %v533_v33 = vshll.u32 %v264_v16, 16  ;;  %v610_v48 = vshrl.u32 %v249_v34, 16  ;;  %v5300_v21 = vld [vmem:[%s5170_s7 + $0x58] sm:$0xf] }
  0x40   : > { %v692_v35 = vpack.c.b16 %v662_v23, %v661_v13  ;;  %v430_v37 = vsel %vm5182_vm3, %v425_v24, %v429_v6  ;;  %v529_v38 = vrot.slane %v527_v27, 4  ;;  %v440_v41 = vsel %vm5182_vm3, %v435_v29, %v439_v15  ;;  %v235_v15 = vld [vmem:[%s5170_s7 + $0x54] sm:$0xf]  ;;  %v5305_v27 = vld [vmem:[%s5170_s7 + $0x5c] sm:$0x1] }
  0x41   : > { %v671_v42 = vunpack.c.l.b16 %v430_v37  ;;  %v520_v43 = vor.u32 %v519_v30, %v516_v26  ;;  %v535_v44 = vrot.slane %v533_v33, 5  ;;  %v672_v45 = vunpack.c.l.b16 %v440_v41 }
  0x42   : > { %4362 = vmatmul.msk.bf16.gmra.mxu0 %vm707_vm4, %v692_v35  ;;  %v530_v46 = vor.u32 %v529_v38, %v525_v31  ;;  %v613_v49 = vshll.u32 %v249_v34, 16  ;;  %v619_v51 = vshll.u32 %v250_v39, 16  ;;  %v623_v52 = vshrl.u32 %v250_v39, 16  ;;  %v243_v39 = vld [vmem:[%s5170_s7 + $0x84] sm:$0xf] }
  0x43   : > { %v521_v50 = vrot.slane %v520_v43, 4  ;;  %v629_v53 = vshll.u32 %v268_v40, 16  ;;  %v697_v54 = vpack.c.b16 %v672_v45, %v671_v42  ;;  %v612_v57 = vrot.slane %v610_v48, 4 }
  0x44   : > { %v531_v55 = vrot.slane %v530_v46, 4  ;;  %v615_v58 = vrot.slane %v613_v49, 5  ;;  %v621_v61 = vrot.slane %v619_v51, 5  ;;  %v625_v62 = vrot.slane %v623_v52, 4  ;;  %v244_v49 = vld [vmem:[%s5170_s7 + $0x88] sm:$0xf] }
  0x45   : > { %v526_v60 = vsel %vm5182_vm3, %v521_v50, %v525_v31  ;;  %4367 = vmatmul.msk.bf16.gmra.mxu1 %vm707_vm4, %v697_v54  ;;  %v631_v6 = vrot.slane %v629_v53, 5  ;;  %v322_v9 = vshrl.u32 %v225_v59, 16  ;;  %v325_v10 = vshll.u32 %v225_v59, 16  ;;  %v265_v53 = vld [vmem:[%s5170_s7 + $0x8c] sm:$0x1] }
  0x46   : > { %v536_v3 = vsel %vm5182_vm3, %v531_v55, %v535_v44  ;;  %v679_v4 = vunpack.c.l.b16 %v526_v60  ;;  %v616_v5 = vor.u32 %v615_v58, %v612_v57  ;;  %v626_v8 = vor.u32 %v625_v62, %v621_v61 }
  0x47   : > { %v680_v7 = vunpack.c.l.b16 %v536_v3  ;;  %v331_v12 = vshll.u32 %v5287_v63, 16  ;;  %v335_v13 = vshrl.u32 %v5287_v63, 16  ;;  %v341_v14 = vshll.u32 %v5290_v0, 16 }
  0x48   : > { %v617_v11 = vrot.slane %v616_v5, 4  ;;  %v627_v17 = vrot.slane %v626_v8, 4  ;;  %v324_v18 = vrot.slane %v322_v9, 4  ;;  %v327_v19 = vrot.slane %v325_v10, 5  ;;  %v251_v8 = vld [vmem:[%s5170_s7 + $0xb4] sm:$0xf] }
  0x49   : > { %v701_v16 = vpack.c.b16 %v680_v7, %v679_v4  ;;  %v333_v23 = vrot.slane %v331_v12, 5  ;;  %v337_v24 = vrot.slane %v335_v13, 4  ;;  %v343_v26 = vrot.slane %v341_v14, 5  ;;  %v252_v12 = vld [vmem:[%s5170_s7 + $0xb8] sm:$0xf] }
  0x4a   : > { %v622_v22 = vsel %vm5182_vm3, %v617_v11, %v621_v61  ;;  %v632_v29 = vsel %vm5182_vm3, %v627_v17, %v631_v6  ;;  %v328_v31 = vor.u32 %v327_v19, %v324_v18  ;;  %v442_v33 = vshrl.u32 %v235_v15, 16  ;;  %v269_v17 = vld [vmem:[%s5170_s7 + $0xbc] sm:$0x1] }
  0x4b   : > { %4371 = vmatmul.msk.bf16.gmra.mxu2 %vm707_vm4, %v701_v16  ;;  %v687_v30 = vunpack.c.l.b16 %v622_v22  ;;  %v688_v34 = vunpack.c.l.b16 %v632_v29  ;;  %v338_v35 = vor.u32 %v337_v24, %v333_v23  ;;  %v445_v37 = vshll.u32 %v235_v15, 16 }
  0x4c   : > { %v451_v38 = vshll.u32 %v5300_v21, 16  ;;  %v329_v40 = vrot.slane %v328_v31, 4  ;;  %v444_v41 = vrot.slane %v442_v33, 4  ;;  %v455_v42 = vshrl.u32 %v5300_v21, 16 }
  0x4d   : > { %v461_v43 = vshll.u32 %v5305_v27, 16  ;;  %v705_v44 = vpack.c.b16 %v688_v34, %v687_v30  ;;  %v339_v45 = vrot.slane %v338_v35, 4  ;;  %v447_v46 = vrot.slane %v445_v37, 5  ;;  %v227_v37 = vld [vmem:[%s5170_s7 + $0x24] sm:$0xf] }
  0x4e   : > { %v453_v48 = vrot.slane %v451_v38, 5  ;;  %v334_v50 = vsel %vm5182_vm3, %v329_v40, %v333_v23  ;;  %v457_v51 = vrot.slane %v455_v42, 4  ;;  %v538_v54 = vshrl.u32 %v243_v39, 16  ;;  %v5333_v42 = vld [vmem:[%s5170_s7 + $0x28] sm:$0xf] }
  0x4f   : > { %v463_v52 = vrot.slane %v461_v43, 5  ;;  %4375 = vmatmul.msk.bf16.gmra.mxu3 %vm707_vm4, %v705_v44  ;;  %v344_v55 = vsel %vm5182_vm3, %v339_v45, %v343_v26  ;;  %v663_v57 = vunpack.c.l.b16 %v334_v50  ;;  %v448_v58 = vor.u32 %v447_v46, %v444_v41 }
  0x50   : > { %v541_v59 = vshll.u32 %v243_v39, 16  ;;  %v664_v60 = vunpack.c.l.b16 %v344_v55  ;;  %v458_v61 = vor.u32 %v457_v51, %v453_v48  ;;  %v540_v62 = vrot.slane %v538_v54, 4 }
  0x51   : > { %v547_v3 = vshll.u32 %v244_v49, 16  ;;  %v449_v4 = vrot.slane %v448_v58, 4  ;;  %v551_v6 = vshrl.u32 %v244_v49, 16  ;;  %v557_v7 = vshll.u32 %v265_v53, 16 }
  0x52   : > { %v543_v5 = vrot.slane %v541_v59, 5  ;;  %v693_v9 = vpack.c.b16 %v664_v60, %v663_v57  ;;  %v459_v10 = vrot.slane %v458_v61, 4  ;;  %v634_v22 = vshrl.u32 %v251_v8, 16  ;;  %v1069_v61 = vld [vmem:[%s5170_s7] sm:$0xe] }
  0x53   : > { %v549_v11 = vrot.slane %v547_v3, 5  ;;  %v454_v13 = vsel %vm5182_vm3, %v449_v4, %v453_v48  ;;  %v553_v15 = vrot.slane %v551_v6, 4  ;;  %v559_v16 = vrot.slane %v557_v7, 5  ;;  %v5337_v48 = vld [vmem:[%s5170_s7 + $0x2c] sm:$0x1] }
  0x54   : > { %v544_v14 = vor.u32 %v543_v5, %v540_v62  ;;  %4363 = vmatmul.msk.bf16.gmra.mxu0 %vm707_vm4, %v693_v9  ;;  %v464_v18 = vsel %vm5182_vm3, %v459_v10, %v463_v52  ;;  %v673_v19 = vunpack.c.l.b16 %v454_v13  ;;  %v637_v23 = vshll.u32 %v251_v8, 16  ;;  %v4603_v6 = vld [vmem:[%s5170_s7 + $0xc] sm:$0xf] }
  0x55   : > { %v674_v24 = vunpack.c.l.b16 %v464_v18  ;;  %v554_v29 = vor.u32 %v553_v15, %v549_v11  ;;  %v643_v30 = vshll.u32 %v252_v12, 16  ;;  %v636_v31 = vrot.slane %v634_v22, 4 }
  0x56   : > { %v545_v26 = vrot.slane %v544_v14, 4  ;;  %v639_v33 = vrot.slane %v637_v23, 5  ;;  %v647_v34 = vshrl.u32 %v252_v12, 16  ;;  %v653_v35 = vshll.u32 %v269_v17, 16  ;;  %v4604_v12 = vld [vmem:[%s5170_s7 + $0x10] sm:$0xf] }
  0x57   : > { %v698_v38 = vpack.c.b16 %v674_v24, %v673_v19  ;;  %v555_v40 = vrot.slane %v554_v29, 4  ;;  %v645_v41 = vrot.slane %v643_v30, 5  ;;  %v1125_v43 = vrot.slane %v5198_v2, 5 }
  0x58   : > { %v550_v39 = vsel %vm5182_vm3, %v545_v26, %v549_v11  ;;  %v640_v45 = vor.u32 %v639_v33, %v636_v31  ;;  %v649_v46 = vrot.slane %v647_v34, 4  ;;  %v655_v50 = vrot.slane %v653_v35, 5  ;;  %v4749_v11 = vld [vmem:[%s6603_s1 + $0x18] sm:$0xf] }
  0x59   : > { %v681_v44 = vunpack.c.l.b16 %v550_v39  ;;  %4368 = vmatmul.msk.bf16.gmra.mxu1 %vm707_vm4, %v698_v38  ;;  %v560_v49 = vsel %vm5182_vm3, %v555_v40, %v559_v16  ;;  %v346_v51 = vshrl.u32 %v227_v37, 16  ;;  %v349_v52 = vshll.u32 %v227_v37, 16  ;;  %v4605_v38 = vld [vmem:[%s5170_s7 + $0x14] sm:$0x1] }
  0x5a   : > { %v682_v53 = vunpack.c.l.b16 %v560_v49  ;;  %v641_v54 = vrot.slane %v640_v45, 4  ;;  %v650_v55 = vor.u32 %v649_v46, %v645_v41  ;;  %v355_v2 = vshll.u32 %v5333_v42, 16  ;;  %v4878_v45 = vld [vmem:[%s6603_s1 + $0x1c] sm:$0xf] }
  0x5b   : > { %v348_v57 = vrot.slane %v346_v51, 4  ;;  %v351_v58 = vrot.slane %v349_v52, 5  ;;  %v359_v59 = vshrl.u32 %v5333_v42, 16  ;;  %v365_v60 = vshll.u32 %v5337_v48, 16  ;;  %v4946_v51 = vld [vmem:[%s5170_s7] sm:$0xff] }
  0x5c   : > { %v702_v62 = vpack.c.b16 %v682_v53, %v681_v44  ;;  %v646_v3 = vsel %vm5182_vm3, %v641_v54, %v645_v41  ;;  %v651_v4 = vrot.slane %v650_v55, 4  ;;  %v357_v5 = vrot.slane %v355_v2, 5  ;;  %v4927_v2 = vld [vmem:[%s6603_s1 + $0x20] sm:$0xf] }
  0x5d   : > { %v689_v7 = vunpack.c.l.b16 %v646_v3  ;;  %v352_v8 = vor.u32 %v351_v58, %v348_v57  ;;  %v361_v9 = vrot.slane %v359_v59, 4  ;;  %v367_v10 = vrot.slane %v365_v60, 5 }
  0x5e   : > { %4372 = vmatmul.msk.bf16.gmra.mxu2 %vm707_vm4, %v702_v62  ;;  %v656_v13 = vsel %vm5182_vm3, %v651_v4, %v655_v50  ;;  %v4457_v14 = vrot.slane %v1069_v61, 9  ;;  %v1122_v19 = vrot.slane %v5195_v1, 5  ;;  %v2963_v22 = vsel %vm756_vm0, %v4749_v11, 0  ;;  %v4700_v50 = vld [vmem:[%s6603_s1 + $0x14] sm:$0xf] }
  0x5f   : > { %v690_v15 = vunpack.c.l.b16 %v656_v13  ;;  %v353_v16 = vrot.slane %v352_v8, 4  ;;  %v362_v17 = vor.u32 %v361_v9, %v357_v5  ;;  %v1793_v23 = vshrl.u32 %v4603_v6, 16  ;;  %2972 = vmatpush.bf16.msra.mxu2 %v2963_v22  ;;  %v1070_v8 = vld [vmem:[%s5170_s7 + $0xc] sm:$0xe] }
  0x60   : > { %v1796_v24 = vshll.u32 %v4603_v6, 16  ;;  %v1802_v26 = vshll.u32 %v4604_v12, 16  ;;  %v1123_v33 = vsel %vm5356_vm7, %v4457_v14, %v1122_v19  ;;  %v1124_v35 = vrot.slane %v1122_v19, 4  ;;  %v4607_v6 = vld [vmem:[%s5170_s7 + $0x1c] sm:$0xf] }
  0x61   : > { %v706_v29 = vpack.c.b16 %v690_v15, %v689_v7  ;;  %v358_v30 = vsel %vm5182_vm3, %v353_v16, %v357_v5  ;;  %v363_v31 = vrot.slane %v362_v17, 4  ;;  %v1234_v37 = vunpack.c.l.b16 %v1123_v33  ;;  %v4606_v5 = vld [vmem:[%s5170_s7 + $0x18] sm:$0xf]  ;;  %v4962_v15 = vld [vmem:[%s5170_s7 + $0xc] sm:$0xff] }
  0x62   : > { %v665_v34 = vunpack.c.l.b16 %v358_v30  ;;  %v1795_v1 = vrot.slane %v1793_v23, 4  ;;  %v1798_v40 = vrot.slane %v1796_v24, 5  ;;  %v1804_v41 = vrot.slane %v1802_v26, 5  ;;  %v4608_v30 = vld [vmem:[%s5170_s7 + $0x20] sm:$0x1] }
  0x63   : > { %4376 = vmatmul.msk.bf16.gmra.mxu3 %vm707_vm4, %v706_v29  ;;  %v368_v39 = vsel %vm5182_vm3, %v363_v31, %v367_v10  ;;  %v1806_v44 = vshrl.u32 %v4604_v12, 16  ;;  %v1126_v49 = vsel %vm5356_vm7, %v1124_v35, %v1125_v43  ;;  %v1812_v55 = vshll.u32 %v4605_v38, 16  ;;  %v4947_v35 = vld [vmem:[%s5170_s7 + $0xc] sm:$0xff] }
  0x64   : > { %v666_v46 = vunpack.c.l.b16 %v368_v39  ;;  %v1235_v52 = vunpack.c.l.b16 %v1126_v49  ;;  %v1799_v53 = vor.u32 %v1798_v40, %v1795_v1  ;;  %v3617_v58 = vsel %vm756_vm0, %v4878_v45, 0 }
  0x65   : > { %v1808_v54 = vrot.slane %v1806_v44, 4  ;;  %3626 = vmatpush.bf16.msra.mxu3 %v3617_v58  ;;  %v2673_v60 = vsel %vm756_vm0, %v4700_v50, 0  ;;  %v4015_v61 = vsel %vm756_vm0, %v4927_v2, 0  ;;  %v1814_v4 = vrot.slane %v1812_v55, 5  ;;  %v1071_v50 = vld [vmem:[%s5170_s7 + $0x18] sm:$0xe] }
  0x66   : > { %v694_v57 = vpack.c.b16 %v666_v46, %v665_v34  ;;  %v1266_v43 = vpack.c.b16 %v1235_v52, %v1234_v37  ;;  %2682 = vmatpush.bf16.msra.mxu1 %v2673_v60  ;;  %v1800_v62 = vrot.slane %v1799_v53, 4  ;;  %4024 = vmatpush.bf16.msra.mxu0 %v4015_v61  ;;  %v1129_v7 = vrot.slane %v5241_v28, 5  ;;  %v4610_v46 = vld [vmem:[%s5170_s7 + $0x28] sm:$0xf] }
  0x67   : > { %v1809_v59 = vor.u32 %v1808_v54, %v1804_v41  ;;  %v1817_v9 = vshrl.u32 %v4606_v5, 16  ;;  %v1820_v10 = vshll.u32 %v4606_v5, 16  ;;  %v1826_v13 = vshll.u32 %v4607_v6, 16 }
  0x68   : > { %4364 = vmatmul.msk.bf16.gmra.mxu0 %vm707_vm4, %v694_v57  ;;  %v1805_v11 = vsel %vm5182_vm3, %v1800_v62, %v1804_v41  ;;  %v1830_v14 = vshrl.u32 %v4607_v6, 16  ;;  %v4458_v16 = vrot.slane %v1070_v8, 9  ;;  %v1131_v17 = vrot.slane %v1129_v7, 4  ;;  %v4609_v41 = vld [vmem:[%s5170_s7 + $0x24] sm:$0xf] }
  0x69   : > { %4441 = vmatmul.msk.bf16.vlgmr.msrb.gmra.mxu1 %vm707_vm4, %v4946_v51  ;;  %v1810_v3 = vrot.slane %v1809_v59, 4  ;;  %v1132_v28 = vrot.slane %v5244_v32, 5  ;;  %v2178_v19 = vunpack.c.l.b16 %v1805_v11  ;;  %v1819_v23 = vrot.slane %v1817_v9, 4  ;;  %v4611_v6 = vld [vmem:[%s5170_s7 + $0x2c] sm:$0x1] }
  0x6a   : > { %v1822_v24 = vrot.slane %v1820_v10, 5  ;;  %v1828_v26 = vrot.slane %v1826_v13, 5  ;;  %v1832_v29 = vrot.slane %v1830_v14, 4  ;;  %v1130_v31 = vsel %vm5356_vm7, %v4458_v16, %v1129_v7 }
  0x6b   : > { %v1815_v12 = vsel %vm5182_vm3, %v1810_v3, %v1814_v4  ;;  %v1133_v33 = vsel %vm5356_vm7, %v1131_v17, %v1132_v28  ;;  %v1836_v38 = vshll.u32 %v4608_v30, 16  ;;  %v1236_v1 = vunpack.c.l.b16 %v1130_v31 }
  0x6c   : > { %v2179_v22 = vunpack.c.l.b16 %v1815_v12  ;;  %v1823_v32 = vor.u32 %v1822_v24, %v1819_v23  ;;  %v1833_v37 = vor.u32 %v1832_v29, %v1828_v26  ;;  %v1237_v39 = vunpack.c.l.b16 %v1133_v33  ;;  %v4948_v12 = vld [vmem:[%s5170_s7 + $0x18] sm:$0xff]  ;;  %v1072_v29 = vld [vmem:[%s5170_s7 + $0x24] sm:$0xe] }
  0x6d   : > { %v1838_v45 = vrot.slane %v1836_v38, 5  ;;  %v1136_v51 = vrot.slane %v5287_v63, 5  ;;  %v1841_v52 = vshrl.u32 %v4609_v41, 16  ;;  %v1844_v54 = vshll.u32 %v4609_v41, 16 }
  0x6e   : > { %4474 = vmatmul.msk.bf16.vlgmr.msrb.gmra.mxu2 %vm707_vm4, %v1266_v43  ;;  %v2210_v34 = vpack.c.b16 %v2179_v22, %v2178_v19  ;;  %v1824_v40 = vrot.slane %v1823_v32, 4  ;;  %v1834_v44 = vrot.slane %v1833_v37, 4  ;;  %v1267_v49 = vpack.c.b16 %v1237_v39, %v1236_v1  ;;  %v4963_v43 = vld [vmem:[%s5170_s7 + $0x18] sm:$0xff]  ;;  %v4612_v19 = vld [vmem:[%s5170_s7 + $0x30] sm:$0xf]  ;;  %v4964_v32 = vld [vmem:[%s5170_s7 + $0x24] sm:$0xff] }
  0x6f   : > { %v1850_v55 = vshll.u32 %v4610_v46, 16  ;;  %v1854_v2 = vshrl.u32 %v4610_v46, 16  ;;  %v4459_v58 = vrot.slane %v1071_v50, 9  ;;  %v1138_v60 = vrot.slane %v1136_v51, 4  ;;  %v4613_v22 = vld [vmem:[%s5170_s7 + $0x34] sm:$0xf] }
  0x70   : > { %v1829_v53 = vsel %vm5182_vm3, %v1824_v40, %v1828_v26  ;;  %v1839_v57 = vsel %vm5182_vm3, %v1834_v44, %v1838_v45  ;;  %v1139_v63 = vrot.slane %v5290_v0, 5  ;;  %v1843_v61 = vrot.slane %v1841_v52, 4  ;;  %v4614_v45 = vld [vmem:[%s5170_s7 + $0x38] sm:$0x1] }
  0x71   : > { %v2180_v59 = vunpack.c.l.b16 %v1829_v53  ;;  %v2181_v62 = vunpack.c.l.b16 %v1839_v57  ;;  %v1846_v3 = vrot.slane %v1844_v54, 5  ;;  %v1852_v4 = vrot.slane %v1850_v55, 5  ;;  %v4616_v57 = vld [vmem:[%s5170_s7 + $0x40] sm:$0xf] }
  0x72   : > { %v1856_v5 = vrot.slane %v1854_v2, 4  ;;  %v1137_v7 = vsel %vm5356_vm7, %v4459_v58, %v1136_v51  ;;  %v1140_v8 = vsel %vm5356_vm7, %v1138_v60, %v1139_v63  ;;  %v1860_v0 = vshll.u32 %v4611_v6, 16  ;;  %v4615_v2 = vld [vmem:[%s5170_s7 + $0x3c] sm:$0xf]  ;;  %v5024_v63 = vld [vmem:[%s5170_s7 + $0x34] sm:$0xf] }
  0x73   : > { %4587 = vmatmul.msk.bf16.vlgmr.msrb.gmra.mxu3 %vm707_vm4, %v4962_v15  ;;  %v2211_v9 = vpack.c.b16 %v2181_v62, %v2180_v59  ;;  %v1847_v10 = vor.u32 %v1846_v3, %v1843_v61  ;;  %v1238_v13 = vunpack.c.l.b16 %v1137_v7  ;;  %v1239_v14 = vunpack.c.l.b16 %v1140_v8  ;;  %v1073_v62 = vld [vmem:[%s5170_s7 + $0x30] sm:$0xe] }
  0x74   : > { %v1857_v11 = vor.u32 %v1856_v5, %v1852_v4  ;;  %v1862_v17 = vrot.slane %v1860_v0, 5  ;;  %v1143_v23 = vrot.slane %v5333_v42, 5  ;;  %v1865_v30 = vshrl.u32 %v4612_v19, 16  ;;  %v5025_v0 = vld [vmem:[%s5170_s7 + $0x38] sm:$0x1] }
  0x75   : > { %v1848_v15 = vrot.slane %v1847_v10, 4  ;;  %v1268_v28 = vpack.c.b16 %v1239_v14, %v1238_v13  ;;  %v1868_v31 = vshll.u32 %v4612_v19, 16  ;;  %v1874_v33 = vshll.u32 %v4613_v22, 16  ;;  %v4965_v13 = vld [vmem:[%s5170_s7 + $0x30] sm:$0xff] }
  0x76   : > { %v1858_v16 = vrot.slane %v1857_v11, 4  ;;  %v1145_v37 = vrot.slane %v1143_v23, 4  ;;  %v1146_v42 = vrot.slane %v5337_v48, 5  ;;  %v1867_v39 = vrot.slane %v1865_v30, 4  ;;  %v4949_v48 = vld [vmem:[%s5170_s7 + $0x24] sm:$0xff] }
  0x77   : > { %v1853_v24 = vsel %vm5182_vm3, %v1848_v15, %v1852_v4  ;;  %v1870_v40 = vrot.slane %v1868_v31, 5  ;;  %v1876_v41 = vrot.slane %v1874_v33, 5  ;;  %v1884_v53 = vshll.u32 %v4614_v45, 16  ;;  %v4950_v33 = vld [vmem:[%s5170_s7 + $0x30] sm:$0xff] }
  0x78   : > { %4652 = vmatmul.msk.bf16.vlgmr.msrb.gmra.mxu0 %vm707_vm4, %v2210_v34  ;;  %v1863_v26 = vsel %vm5182_vm3, %v1858_v16, %v1862_v17  ;;  %v1878_v34 = vshrl.u32 %v4613_v22, 16  ;;  %v2182_v38 = vunpack.c.l.b16 %v1853_v24  ;;  %v1150_v61 = vrot.slane %v5024_v63, 5  ;;  %v4617_v22 = vld [vmem:[%s5170_s7 + $0x44] sm:$0x1] }
  0x79   : > { %4442 = vmatmul.msk.bf16.gmra.mxu1 %vm707_vm4, %v4947_v35  ;;  %v4460_v35 = vrot.slane %v1072_v29, 9  ;;  %v2183_v1 = vunpack.c.l.b16 %v1863_v26  ;;  %v1871_v51 = vor.u32 %v1870_v40, %v1867_v39  ;;  %v1886_v59 = vrot.slane %v1884_v53, 5  ;;  %v4618_v39 = vld [vmem:[%s5170_s7 + $0x48] sm:$0xf]  ;;  %v4619_v40 = vld [vmem:[%s5170_s7 + $0x4c] sm:$0xf] }
  0x7a   : > { %v1880_v44 = vrot.slane %v1878_v34, 4  ;;  %v1889_v3 = vshrl.u32 %v4615_v2, 16  ;;  %v1892_v4 = vshll.u32 %v4615_v2, 16  ;;  %v1898_v5 = vshll.u32 %v4616_v57, 16  ;;  %v4966_v2 = vld [vmem:[%s5170_s7 + $0x3c] sm:$0xff] }
  0x7b   : > { %v1144_v46 = vsel %vm5356_vm7, %v4460_v35, %v1143_v23  ;;  %v2212_v50 = vpack.c.b16 %v2183_v1, %v2182_v38  ;;  %v1872_v58 = vrot.slane %v1871_v51, 4  ;;  %v1902_v6 = vshrl.u32 %v4616_v57, 16 }
  0x7c   : > { %v1881_v52 = vor.u32 %v1880_v44, %v1876_v41  ;;  %v1240_v54 = vunpack.c.l.b16 %v1144_v46  ;;  %v4461_v10 = vrot.slane %v1073_v62, 9  ;;  %v1152_v11 = vrot.slane %v1150_v61, 4 }
  0x7d   : > { %v1877_v8 = vsel %vm5182_vm3, %v1872_v58, %v1876_v41  ;;  %v1891_v14 = vrot.slane %v1889_v3, 4  ;;  %v1894_v15 = vrot.slane %v1892_v4, 5  ;;  %v1900_v16 = vrot.slane %v1898_v5, 5  ;;  %v4620_v4 = vld [vmem:[%s5170_s7 + $0x50] sm:$0x1] }
  0x7e   : > { %4475 = vmatmul.msk.bf16.gmra.mxu2 %vm707_vm4, %v1267_v49  ;;  %v1147_v49 = vsel %vm5356_vm7, %v1145_v37, %v1146_v42  ;;  %v1904_v17 = vrot.slane %v1902_v6, 4  ;;  %v1151_v23 = vsel %vm5356_vm7, %v4461_v10, %v1150_v61  ;;  %v1908_v30 = vshll.u32 %v4617_v22, 16 }
  0x7f   : > { %v1241_v55 = vunpack.c.l.b16 %v1147_v49  ;;  %v1895_v26 = vor.u32 %v1894_v15, %v1891_v14  ;;  %v1913_v51 = vshrl.u32 %v4618_v39, 16  ;;  %v1922_v53 = vshll.u32 %v4619_v40, 16 }
  0x80   : > { %v1905_v29 = vor.u32 %v1904_v17, %v1900_v16  ;;  %v1910_v1 = vrot.slane %v1908_v30, 5 }
  0x81   : > { %v1269_v60 = vpack.c.b16 %v1241_v55, %v1240_v54  ;;  %v1896_v42 = vrot.slane %v1895_v26, 4  ;;  %v1926_v54 = vshrl.u32 %v4619_v40, 16  ;;  %v1924_v62 = vrot.slane %v1922_v53, 5 }
  0x82   : > { %v1906_v38 = vrot.slane %v1905_v29, 4  ;;  %v1164_v26 = vrot.slane %v5254_v47, 5 }
  0x83   : > { %4588 = vmatmul.msk.bf16.gmra.mxu3 %vm707_vm4, %v4963_v43  ;;  %v1882_v43 = vrot.slane %v1881_v52, 4  ;;  %v1901_v45 = vsel %vm5182_vm3, %v1896_v42, %v1900_v16  ;;  %v1916_v52 = vshll.u32 %v4618_v39, 16  ;;  %v1928_v3 = vrot.slane %v1926_v54, 4  ;;  %v4623_v54 = vld [vmem:[%s5170_s7 + $0x5c] sm:$0x1] }
  0x84   : > { %v1911_v46 = vsel %vm5182_vm3, %v1906_v38, %v1910_v1  ;;  %v2186_v55 = vunpack.c.l.b16 %v1901_v45  ;;  %v4967_v1 = vld [vmem:[%s5170_s7 + $0x48] sm:$0xff]  ;;  %v1166_v40 = vrot.slane %v1164_v26, 4 }
  0x85   : > { %v2187_v57 = vunpack.c.l.b16 %v1911_v46  ;;  %v1918_v61 = vrot.slane %v1916_v52, 5  ;;  %v1929_v10 = vor.u32 %v1928_v3, %v1924_v62 }
  0x87   : > { %v1930_v16 = vrot.slane %v1929_v10, 4 }
  0x88   : > { %4653 = vmatmul.msk.bf16.gmra.mxu0 %vm707_vm4, %v2211_v9  ;;  %v1887_v9 = vsel %vm5182_vm3, %v1882_v43, %v1886_v59 }
  0x89   : > { %4443 = vmatmul.msk.bf16.gmra.mxu1 %vm707_vm4, %v4948_v12  ;;  %v1153_v12 = vrot.slane %v5025_v0, 5  ;;  %v2185_v19 = vunpack.c.l.b16 %v1887_v9 }
  0x8b   : > { %v1154_v24 = vsel %vm5356_vm7, %v1152_v11, %v1153_v12  ;;  %v1932_v11 = vshll.u32 %v4620_v4, 16  ;;  %v4951_v12 = vld [vmem:[%s5170_s7 + $0x3c] sm:$0xff] }
  0x8c   : > { %v1243_v35 = vunpack.c.l.b16 %v1154_v24  ;;  %v4622_v24 = vld [vmem:[%s5170_s7 + $0x58] sm:$0xf]  ;;  %v4624_v4 = vld [vmem:[%s5170_s7 + $0x60] sm:$0xf] }
  0x8d   : > { %v1934_v17 = vrot.slane %v1932_v11, 5  ;;  %v1950_v42 = vshrl.u32 %v4622_v24, 16 }
  0x8e   : > { %4476 = vmatmul.msk.bf16.gmra.mxu2 %vm707_vm4, %v1268_v28  ;;  %v2184_v28 = vunpack.c.l.b16 %v1877_v8  ;;  %v2214_v8 = vpack.c.b16 %v2187_v57, %v2186_v55 }
  0x8f   : > { %v1935_v30 = vsel %vm5182_vm3, %v1930_v16, %v1934_v17  ;;  %v1952_v52 = vrot.slane %v1950_v42, 4 }
  0x90   : > { %v2213_v31 = vpack.c.b16 %v2185_v19, %v2184_v28  ;;  %v2189_v46 = vunpack.c.l.b16 %v1935_v30 }
  0x93   : > { %4589 = vmatmul.msk.bf16.gmra.mxu3 %vm707_vm4, %v4964_v32  ;;  %v1242_v32 = vunpack.c.l.b16 %v1151_v23  ;;  %v4621_v23 = vld [vmem:[%s5170_s7 + $0x54] sm:$0xf] }
  0x95   : > { %v1270_v44 = vpack.c.b16 %v1243_v35, %v1242_v32  ;;  %v1940_v32 = vshll.u32 %v4621_v23, 16  ;;  %v1946_v35 = vshll.u32 %v4622_v24, 16 }
  0x98   : > { %4654 = vmatmul.msk.bf16.gmra.mxu0 %vm707_vm4, %v2212_v50  ;;  %v1157_v50 = vrot.slane %v5210_v20, 5  ;;  %v1915_v20 = vrot.slane %v1913_v51, 4  ;;  %v1948_v51 = vrot.slane %v1946_v35, 5  ;;  %v1174_v35 = vrot.slane %v5305_v27, 5 }
  0x99   : > { %4444 = vmatmul.msk.bf16.gmra.mxu1 %vm707_vm4, %v4949_v48  ;;  %v1074_v48 = vld [vmem:[%s5170_s7 + $0x3c] sm:$0xe] }
  0x9a   : > { %v4462_v43 = vrot.slane %v1074_v48, 9  ;;  %v1159_v59 = vrot.slane %v1157_v50, 4  ;;  %v1942_v48 = vrot.slane %v1940_v32, 5 }
  0x9c   : > { %v1158_v5 = vsel %vm5356_vm7, %v4462_v43, %v1157_v50  ;;  %v4952_v43 = vld [vmem:[%s5170_s7 + $0x48] sm:$0xff] }
  0x9e   : > { %v5451_v7 = vpop.f32.mrf.mxu1  ;;  %4477 = vmatmul.msk.bf16.gmra.mxu2 %vm707_vm4, %v1269_v60  ;;  %v1160_v60 = vrot.slane %v5215_v25, 5  ;;  %v1919_v25 = vor.u32 %v1918_v61, %v1915_v20  ;;  %v1956_v20 = vshll.u32 %v4623_v54, 16  ;;  %v4953_v54 = vld [vmem:[%s5170_s7 + $0x54] sm:$0xff] }
  0xa0   : > { %v1161_v6 = vsel %vm5356_vm7, %v1159_v59, %v1160_v60  ;;  %v1920_v15 = vrot.slane %v1919_v25, 4  ;;  %v1953_v60 = vor.u32 %v1952_v52, %v1948_v51  ;;  %v1958_v10 = vrot.slane %v1956_v20, 5 }
  0xa1   : > { %v1245_v14 = vunpack.c.l.b16 %v1161_v6 }
  0xa2   : > { %v1925_v29 = vsel %vm5182_vm3, %v1920_v15, %v1924_v62  ;;  %v1954_v25 = vrot.slane %v1953_v60, 4  ;;  %v1171_v15 = vrot.slane %v5300_v21, 5 }
  0xa3   : > { %4590 = vmatmul.msk.bf16.gmra.mxu3 %vm707_vm4, %v4965_v13  ;;  %v1244_v13 = vunpack.c.l.b16 %v1158_v5  ;;  %v2188_v45 = vunpack.c.l.b16 %v1925_v29  ;;  %v4625_v5 = vld [vmem:[%s5170_s7 + $0x64] sm:$0xf] }
  0xa4   : > { %v1974_v16 = vshrl.u32 %v4625_v5, 16  ;;  %v1959_v24 = vsel %vm5182_vm3, %v1954_v25, %v1958_v10  ;;  %v1173_v32 = vrot.slane %v1171_v15, 4  ;;  %v5026_v10 = vld [vmem:[%s5170_s7 + $0x64] sm:$0xf] }
  0xa5   : > { %v1271_v19 = vpack.c.b16 %v1245_v14, %v1244_v13  ;;  %v2215_v57 = vpack.c.b16 %v2189_v46, %v2188_v45  ;;  %v1964_v13 = vshll.u32 %v4624_v4, 16  ;;  %v1970_v14 = vshll.u32 %v4625_v5, 16 }
  0xa6   : > { %v5467_v34 = vpop.f32.mrf.mxu1  ;;  %v1976_v42 = vrot.slane %v1974_v16, 4 }
  0xa7   : > { %v1966_v30 = vrot.slane %v1964_v13, 5  ;;  %v1077_v13 = vld [vmem:[%s5170_s7 + $0x60] sm:$0xe] }
  0xa8   : > { %v5469_v37 = vpop.f32.mrf.mxu2  ;;  %4655 = vmatmul.msk.bf16.gmra.mxu0 %vm707_vm4, %v2213_v31  ;;  %v1075_v31 = vld [vmem:[%s5170_s7 + $0x48] sm:$0xe] }
  0xa9   : > { %4445 = vmatmul.msk.bf16.gmra.mxu1 %vm707_vm4, %v4950_v33  ;;  %v1937_v33 = vshrl.u32 %v4621_v23, 16  ;;  %v4463_v47 = vrot.slane %v1075_v31, 9  ;;  %v1972_v31 = vrot.slane %v1970_v14, 5 }
  0xab   : > { %v5475_v41 = vpop.f32.mrf.mxu0  ;;  %v1939_v50 = vrot.slane %v1937_v33, 4  ;;  %v4968_v33 = vld [vmem:[%s5170_s7 + $0x54] sm:$0xff]  ;;  %v1977_v27 = vor.u32 %v1976_v42, %v1972_v31 }
  0xac   : > { %v5481_v49 = vpop.f32.mrf.mxu3 }
  0xad   : > { %v1943_v59 = vor.u32 %v1942_v48, %v1939_v50  ;;  %v1175_v48 = vsel %vm5356_vm7, %v1173_v32, %v1174_v35  ;;  %v1978_v60 = vrot.slane %v1977_v27, 4 }
  0xae   : > { %4478 = vmatmul.msk.bf16.gmra.mxu2 %vm707_vm4, %v1270_v44  ;;  %v1167_v44 = vrot.slane %v5259_v56, 5 }
  0xb0   : > { %v5487_v58 = vpop.f32.mrf.mxu1  ;;  %v5490_v63 = vpop.f32.mrf.mxu2  ;;  %v1168_v56 = vsel %vm5356_vm7, %v1166_v40, %v1167_v44  ;;  %v4626_v40 = vld [vmem:[%s5170_s7 + $0x68] sm:$0x1] }
  0xb1   : > { %v1247_v62 = vunpack.c.l.b16 %v1168_v56 }
  0xb3   : > { %4591 = vmatmul.msk.bf16.gmra.mxu3 %vm707_vm4, %v4966_v2  ;;  %v5498_v9 = vpop.f32.mrf.mxu0  ;;  %v1165_v2 = vsel %vm5356_vm7, %v4463_v47, %v1164_v26  ;;  %v2191_v47 = vunpack.c.l.b16 %v1959_v24 }
  0xb4   : > { %v5500_v0 = vpop.f32.mrf.mxu3  ;;  %v1246_v61 = vunpack.c.l.b16 %v1165_v2 }
  0xb6   : > { %v1272_v11 = vpack.c.b16 %v1247_v62, %v1246_v61  ;;  %v4627_v61 = vld [vmem:[%s5170_s7 + $0x6c] sm:$0xf]  ;;  %v4628_v62 = vld [vmem:[%s5170_s7 + $0x70] sm:$0xf] }
  0xb7   : > { %v1985_v14 = vshrl.u32 %v4627_v61, 16  ;;  %v1994_v16 = vshll.u32 %v4628_v62, 16 }
  0xb8   : > { %4656 = vmatmul.msk.bf16.gmra.mxu0 %vm707_vm4, %v2214_v8  ;;  %v5504_v28 = vpop.f32.mrf.mxu1  ;;  %v1944_v8 = vrot.slane %v1943_v59, 4 }
  0xb9   : > { %4446 = vmatmul.msk.bf16.gmra.mxu1 %vm707_vm4, %v4951_v12  ;;  %v1961_v12 = vshrl.u32 %v4624_v4, 16  ;;  %v1987_v35 = vrot.slane %v1985_v14, 4  ;;  %v4631_v14 = vld [vmem:[%s5170_s7 + $0x7c] sm:$0xf] }
  0xba   : > { %v1949_v23 = vsel %vm5182_vm3, %v1944_v8, %v1948_v51  ;;  %v1980_v51 = vshll.u32 %v4626_v40, 16 }
  0xbb   : > { %v5507_v22 = vpop.f32.mrf.mxu2  ;;  %v1963_v29 = vrot.slane %v1961_v12, 4 }
  0xbc   : > { %v1982_v20 = vrot.slane %v1980_v51, 5 }
  0xbd   : > { %v1967_v46 = vor.u32 %v1966_v30, %v1963_v29  ;;  %v4969_v30 = vld [vmem:[%s5170_s7 + $0x60] sm:$0xff] }
  0xbe   : > { %4479 = vmatmul.msk.bf16.gmra.mxu2 %vm707_vm4, %v1271_v19  ;;  %v1076_v19 = vld [vmem:[%s5170_s7 + $0x54] sm:$0xe]  ;;  %v1983_v25 = vsel %vm5182_vm3, %v1978_v60, %v1982_v20 }
  0xbf   : > { %v5517_v38 = vpop.f32.mrf.mxu0  ;;  %v4464_v21 = vrot.slane %v1076_v19, 9  ;;  %v1968_v59 = vrot.slane %v1967_v46, 4  ;;  %v1998_v19 = vshrl.u32 %v4628_v62, 16  ;;  %v4629_v46 = vld [vmem:[%s5170_s7 + $0x74] sm:$0x1] }
  0xc0   : > { %v5521_v39 = vpop.f32.mrf.mxu3 }
  0xc1   : > { %v1172_v50 = vsel %vm5356_vm7, %v4464_v21, %v1171_v15  ;;  %v1973_v8 = vsel %vm5182_vm3, %v1968_v59, %v1972_v31  ;;  %v1988_v15 = vshll.u32 %v4627_v61, 16  ;;  %v4465_v21 = vrot.slane %v1077_v13, 9  ;;  %v4630_v13 = vld [vmem:[%s5170_s7 + $0x78] sm:$0xf] }
  0xc2   : > { %v5524_v53 = vpop.f32.mrf.mxu1  ;;  %v1248_v56 = vunpack.c.l.b16 %v1172_v50  ;;  %v2192_v31 = vunpack.c.l.b16 %v1973_v8 }
  0xc3   : > { %4592 = vmatmul.msk.bf16.gmra.mxu3 %vm707_vm4, %v4967_v1  ;;  %v5528_v55 = vpop.f32.mrf.mxu2  ;;  %v2190_v1 = vunpack.c.l.b16 %v1949_v23  ;;  %v5027_v23 = vld [vmem:[%s5170_s7 + $0x68] sm:$0x1]  ;;  %v1990_v42 = vrot.slane %v1988_v15, 5  ;;  %v5028_v15 = vld [vmem:[%s5170_s7 + $0x70] sm:$0xf] }
  0xc4   : > { %v1181_v24 = vrot.slane %v5027_v23, 5  ;;  %v1078_v23 = vld [vmem:[%s5170_s7 + $0x6c] sm:$0xe] }
  0xc5   : > { %v2216_v52 = vpack.c.b16 %v2191_v47, %v2190_v1  ;;  %v1996_v1 = vrot.slane %v1994_v16, 5  ;;  %v2000_v47 = vrot.slane %v1998_v19, 4  ;;  %v1991_v51 = vor.u32 %v1990_v42, %v1987_v35  ;;  %v5029_v42 = vld [vmem:[%s5170_s7 + $0x74] sm:$0x1] }
  0xc6   : > { %v1185_v16 = vrot.slane %v5028_v15, 5 }
  0xc7   : > { %v5535_v3 = vpop.f32.mrf.mxu0 }
  0xc8   : > { %4657 = vmatmul.msk.bf16.gmra.mxu0 %vm707_vm4, %v2215_v57  ;;  %v5540_v6 = vpop.f32.mrf.mxu3  ;;  %v1249_v57 = vunpack.c.l.b16 %v1175_v48 }
  0xc9   : > { %4447 = vmatmul.msk.bf16.gmra.mxu1 %vm707_vm4, %v4952_v43 }
  0xca   : > { %v5544_v17 = vpop.f32.mrf.mxu1  ;;  %v1273_v4 = vpack.c.b16 %v1249_v57, %v1248_v56  ;;  %v4954_v57 = vld [vmem:[%s5170_s7 + $0x60] sm:$0xff] }
  0xce   : > { %v5551_v26 = vpop.f32.mrf.mxu2  ;;  %4480 = vmatmul.msk.bf16.gmra.mxu2 %vm707_vm4, %v1272_v11  ;;  %v1178_v11 = vrot.slane %v5026_v10, 5 }
  0xd0   : > { %v1180_v32 = vrot.slane %v1178_v11, 4  ;;  %v1179_v50 = vsel %vm5356_vm7, %v4465_v21, %v1178_v11  ;;  %v2022_v21 = vshrl.u32 %v4631_v14, 16 }
  0xd1   : > { %v5557_v44 = vpop.f32.mrf.mxu0  ;;  %v1250_v20 = vunpack.c.l.b16 %v1179_v50  ;;  %v4466_v50 = vrot.slane %v1078_v23, 9 }
  0xd2   : > { %v5559_v45 = vpop.f32.mrf.mxu3  ;;  %v1182_v48 = vsel %vm5356_vm7, %v1180_v32, %v1181_v24 }
  0xd3   : > { %4593 = vmatmul.msk.bf16.gmra.mxu3 %vm707_vm4, %v4968_v33  ;;  %v2193_v33 = vunpack.c.l.b16 %v1983_v25  ;;  %v1251_v61 = vunpack.c.l.b16 %v1182_v48  ;;  %v1187_v48 = vrot.slane %v1185_v16, 4 }
  0xd5   : > { %v2217_v27 = vpack.c.b16 %v2193_v33, %v2192_v31  ;;  %v1274_v11 = vpack.c.b16 %v1251_v61, %v1250_v20  ;;  %v2012_v31 = vshll.u32 %v4630_v13, 16  ;;  %v2018_v33 = vshll.u32 %v4631_v14, 16 }
  0xd6   : > { %v5567_v2 = vpop.f32.mrf.mxu1  ;;  %v5569_v43 = vpop.f32.mrf.mxu2  ;;  %v2024_v20 = vrot.slane %v2022_v21, 4 }
  0xd8   : > { %4658 = vmatmul.msk.bf16.gmra.mxu0 %vm707_vm4, %v2216_v52  ;;  %v2001_v52 = vor.u32 %v2000_v47, %v1996_v1  ;;  %v1188_v47 = vrot.slane %v5029_v42, 5 }
  0xd9   : > { %4448 = vmatmul.msk.bf16.gmra.mxu1 %vm707_vm4, %v4953_v54  ;;  %v5575_v5 = vpop.f32.mrf.mxu0  ;;  %v2004_v54 = vshll.u32 %v4629_v46, 16  ;;  %v4970_v46 = vld [vmem:[%s5170_s7 + $0x6c] sm:$0xff] }
  0xda   : > { %v5582_v12 = vpop.f32.mrf.mxu3  ;;  %v2002_v8 = vrot.slane %v2001_v52, 4 }
  0xdb   : > { %v2006_v25 = vrot.slane %v2004_v54, 5 }
  0xde   : > { %4481 = vmatmul.msk.bf16.gmra.mxu2 %vm707_vm4, %v1273_v4  ;;  %v5587_v29 = vpop.f32.mrf.mxu1  ;;  %v1992_v4 = vrot.slane %v1991_v51, 4 }
  0xe0   : > { %v1997_v19 = vsel %vm5182_vm3, %v1992_v4, %v1996_v1  ;;  %v4632_v4 = vld [vmem:[%s5170_s7 + $0x80] sm:$0x1] }
  0xe1   : > { %v5590_v40 = vpop.f32.mrf.mxu2 }
  0xe3   : > { %4594 = vmatmul.msk.bf16.gmra.mxu3 %vm707_vm4, %v4969_v30  ;;  %v2009_v30 = vshrl.u32 %v4630_v13, 16  ;;  %v4955_v13 = vld [vmem:[%s5170_s7 + $0x6c] sm:$0xff] }
  0xe5   : > { %v5598_v56 = vpop.f32.mrf.mxu0  ;;  %v2011_v54 = vrot.slane %v2009_v30, 4 }
  0xe6   : > { %v5601_v59 = vpop.f32.mrf.mxu3  ;;  %v989_v60 = vpop.f32.mrf.mxu1 }
  0xe7   : > { %v990_v62 = vadd.f32 %v989_v60, %v5475_v41  ;;  %v2007_v41 = vsel %vm5182_vm3, %v2002_v8, %v2006_v25  ;;  %v2020_v60 = vrot.slane %v2018_v33, 5  ;;  %v1186_v8 = vsel %vm5356_vm7, %v4466_v50, %v1185_v16 }
  0xe8   : > { %4659 = vmatmul.msk.bf16.gmra.mxu0 %vm707_vm4, %v2217_v27  ;;  %v2194_v27 = vunpack.c.l.b16 %v1997_v19  ;;  %v2195_v51 = vunpack.c.l.b16 %v2007_v41  ;;  %v2028_v19 = vshll.u32 %v4632_v4, 16 }
  0xe9   : > { %v5605_v10 = vpop.f32.mrf.mxu2  ;;  %4449 = vmatmul.msk.bf16.gmra.mxu1 %vm707_vm4, %v4954_v57  ;;  %v2014_v57 = vrot.slane %v2012_v31, 5  ;;  %v2025_v15 = vor.u32 %v2024_v20, %v2020_v60 }
  0xea   : > { %v2218_v25 = vpack.c.b16 %v2195_v51, %v2194_v27  ;;  %v2030_v42 = vrot.slane %v2028_v19, 5  ;;  %v4634_v27 = vld [vmem:[%s5170_s7 + $0x88] sm:$0xf]  ;;  %v5030_v51 = vld [vmem:[%s5170_s7 + $0x7c] sm:$0xf] }
  0xeb   : > { %v2015_v14 = vor.u32 %v2014_v57, %v2011_v54  ;;  %v1079_v54 = vld [vmem:[%s5170_s7 + $0x78] sm:$0xe] }
  0xed   : > { %v5616_v24 = vpop.f32.mrf.mxu0  ;;  %v2016_v21 = vrot.slane %v2015_v14, 4 }
  0xee   : > { %v5618_v32 = vpop.f32.mrf.mxu3  ;;  %4482 = vmatmul.msk.bf16.gmra.mxu2 %vm707_vm4, %v1274_v11  ;;  %v991_v35 = vpop.f32.mrf.mxu1 }
  0xef   : > { %v992_v1 = vadd.f32 %v991_v35, %v5498_v9  ;;  %v1189_v9 = vsel %vm5356_vm7, %v1187_v48, %v1188_v47  ;;  %v2026_v35 = vrot.slane %v2025_v15, 4  ;;  %v4633_v47 = vld [vmem:[%s5170_s7 + $0x84] sm:$0xf]  ;;  %v4971_v15 = vld [vmem:[%s5170_s7 + $0x78] sm:$0xff] }
  0xf0   : > { %v1253_v30 = vunpack.c.l.b16 %v1189_v9  ;;  %v2036_v57 = vshll.u32 %v4633_v47, 16  ;;  %v2046_v9 = vshrl.u32 %v4634_v27, 16 }
  0xf1   : > { %v1342_v52 = vpop.f32.mrf.mxu2  ;;  %v2031_v4 = vsel %vm5182_vm3, %v2026_v35, %v2030_v42 }
  0xf2   : > { %v1422_v61 = vadd.f32 %v1342_v52, %v990_v62  ;;  %v1252_v62 = vunpack.c.l.b16 %v1186_v8  ;;  %v1192_v52 = vrot.slane %v5030_v51, 5  ;;  %v2042_v8 = vshll.u32 %v4634_v27, 16 }
  0xf3   : > { %4595 = vmatmul.msk.bf16.gmra.mxu3 %vm707_vm4, %v4970_v46  ;;  %v2048_v35 = vrot.slane %v2046_v9, 4 }
  0xf4   : > { %v1275_v48 = vpack.c.b16 %v1253_v30, %v1252_v62 }
  0xf5   : > { %v2286_v11 = vpop.f32.mrf.mxu0 }
  0xf6   : > { %v1632_v41 = vpop.f32.mrf.mxu3  ;;  %v994_v23 = vpop.f32.mrf.mxu1 }
  0xf7   : > { %v1712_v31 = vadd.f32 %v1632_v41, %v1422_v61  ;;  %v995_v16 = vadd.f32 %v994_v23, %v5517_v38  ;;  %v2033_v38 = vshrl.u32 %v4633_v47, 16  ;;  %v2021_v61 = vsel %vm5182_vm3, %v2016_v21, %v2020_v60 }
  0xf8   : > { %4660 = vmatmul.msk.bf16.gmra.mxu0 %vm707_vm4, %v2218_v25  ;;  %v5031_v25 = vld [vmem:[%s5170_s7 + $0x80] sm:$0x1]  ;;  %v4467_v41 = vrot.slane %v1079_v54, 9  ;;  %v1194_v23 = vrot.slane %v1192_v52, 4  ;;  %v2196_v62 = vunpack.c.l.b16 %v2021_v61  ;;  %v2197_v60 = vunpack.c.l.b16 %v2031_v4 }
  0xf9   : > { %v1344_v33 = vpop.f32.mrf.mxu2  ;;  %4450 = vmatmul.msk.bf16.gmra.mxu1 %vm707_vm4, %v4955_v13  ;;  %v5635_v46 = vadd.f32 %v2286_v11, %v1712_v31  ;;  %v1195_v11 = vrot.slane %v5031_v25, 5  ;;  %v2035_v30 = vrot.slane %v2033_v38, 4  ;;  %v2038_v31 = vrot.slane %v2036_v57, 5  ;;  %v4956_v38 = vld [vmem:[%s5170_s7 + $0x78] sm:$0xff] }
  0xfa   : > { %v1423_v50 = vadd.f32 %v1344_v33, %v992_v1  ;;  %v2044_v21 = vrot.slane %v2042_v8, 5  ;;  %v2219_v27 = vpack.c.b16 %v2197_v60, %v2196_v62  ;;  %v4637_v62 = vld [vmem:[%s5170_s7 + $0x94] sm:$0xf]  ;;  %v5032_v60 = vld [vmem:[%s5170_s7 + $0x88] sm:$0xf] }
  0xfb   : > { %v2039_v51 = vor.u32 %v2038_v31, %v2035_v30  ;;  %v1199_v30 = vrot.slane %v5032_v60, 5  ;;  %v1080_v31 = vld [vmem:[%s5170_s7 + $0x84] sm:$0xe] }
  0xfc   : > { %v2049_v57 = vor.u32 %v2048_v35, %v2044_v21 }
  0xfd   : > { %v2288_v20 = vpop.f32.mrf.mxu0  ;;  %v2040_v25 = vrot.slane %v2039_v51, 4 }
  0xfe   : > { %v1634_v1 = vpop.f32.mrf.mxu3  ;;  %4483 = vmatmul.msk.bf16.gmra.mxu2 %vm707_vm4, %v1275_v48  ;;  %v996_v13 = vpop.f32.mrf.mxu1  ;;  %v4635_v48 = vld [vmem:[%s5170_s7 + $0x8c] sm:$0x1] }
  0xff   : > { %v1713_v14 = vadd.f32 %v1634_v1, %v1423_v50  ;;  %v997_v19 = vadd.f32 %v996_v13, %v5535_v3  ;;  %v1193_v50 = vsel %vm5356_vm7, %v4467_v41, %v1192_v52  ;;  %v1196_v3 = vsel %vm5356_vm7, %v1194_v23, %v1195_v11 }
 0x100   : > { %v2052_v61 = vshll.u32 %v4635_v48, 16  ;;  %v1255_v8 = vunpack.c.l.b16 %v1196_v3  ;;  %v2050_v1 = vrot.slane %v2049_v57, 4  ;;  %v2070_v3 = vshrl.u32 %v4637_v62, 16  ;;  %v4972_v57 = vld [vmem:[%s5170_s7 + $0x84] sm:$0xff] }
 0x101   : > { %v1347_v33 = vpop.f32.mrf.mxu2  ;;  %v5648_v42 = vadd.f32 %v2288_v20, %v1713_v14  ;;  %v4636_v14 = vld [vmem:[%s5170_s7 + $0x90] sm:$0xf] }
 0x102   : > { %v1424_v47 = vadd.f32 %v1347_v33, %v995_v16  ;;  %v1254_v16 = vunpack.c.l.b16 %v1193_v50  ;;  %v2054_v13 = vrot.slane %v2052_v61, 5  ;;  %v2057_v33 = vshrl.u32 %v4636_v14, 16 }
 0x103   : > { %4596 = vmatmul.msk.bf16.gmra.mxu3 %vm707_vm4, %v4971_v15  ;;  %v2060_v48 = vshll.u32 %v4636_v14, 16  ;;  %v2066_v50 = vshll.u32 %v4637_v62, 16  ;;  %v4468_v61 = vrot.slane %v1080_v31, 9 }
 0x104   : > { %v1276_v23 = vpack.c.b16 %v1255_v8, %v1254_v16  ;;  %v2059_v8 = vrot.slane %v2057_v33, 4 }
 0x105   : > { %v2291_v54 = vpop.f32.mrf.mxu0 }
 0x106   : > { %v1637_v4 = vpop.f32.mrf.mxu3  ;;  %v999_v20 = vpop.f32.mrf.mxu1 }
 0x107   : > { %v1714_v9 = vadd.f32 %v1637_v4, %v1424_v47  ;;  %v1000_v52 = vadd.f32 %v999_v20, %v5557_v44  ;;  %v2045_v44 = vsel %vm5182_vm3, %v2040_v25, %v2044_v21  ;;  %v2055_v47 = vsel %vm5182_vm3, %v2050_v1, %v2054_v13 }
 0x108   : > { %4661 = vmatmul.msk.bf16.gmra.mxu0 %vm707_vm4, %v2219_v27  ;;  %v5033_v27 = vld [vmem:[%s5170_s7 + $0x8c] sm:$0x1]  ;;  %v1201_v4 = vrot.slane %v1199_v30, 4  ;;  %v2198_v20 = vunpack.c.l.b16 %v2045_v44  ;;  %v2199_v16 = vunpack.c.l.b16 %v2055_v47  ;;  %v2062_v25 = vrot.slane %v2060_v48, 5  ;;  %v4957_v44 = vld [vmem:[%s5170_s7 + $0x84] sm:$0xff] }
 0x109   : > { %v1349_v11 = vpop.f32.mrf.mxu2  ;;  %4451 = vmatmul.msk.bf16.gmra.mxu1 %vm707_vm4, %v4956_v38  ;;  %v5661_v15 = vadd.f32 %v2291_v54, %v1714_v9  ;;  %v1202_v51 = vrot.slane %v5033_v27, 5  ;;  %v2072_v1 = vrot.slane %v2070_v3, 4 }
 0x10a   : > { %v1425_v41 = vadd.f32 %v1349_v11, %v997_v19  ;;  %v2068_v11 = vrot.slane %v2066_v50, 5  ;;  %v2220_v62 = vpack.c.b16 %v2199_v16, %v2198_v20  ;;  %v2063_v31 = vor.u32 %v2062_v25, %v2059_v8  ;;  %v4640_v20 = vld [vmem:[%s5170_s7 + $0xa0] sm:$0xf]  ;;  %v5034_v16 = vld [vmem:[%s5170_s7 + $0x94] sm:$0xf] }
 0x10b   : > { %v1206_v8 = vrot.slane %v5034_v16, 5 }
 0x10c   : > { %v2073_v33 = vor.u32 %v2072_v1, %v2068_v11 }
 0x10d   : > { %v2293_v35 = vpop.f32.mrf.mxu0 }
 0x10e   : > { %v1639_v19 = vpop.f32.mrf.mxu3  ;;  %4484 = vmatmul.msk.bf16.gmra.mxu2 %vm707_vm4, %v1276_v23  ;;  %v1001_v54 = vpop.f32.mrf.mxu1  ;;  %v4638_v23 = vld [vmem:[%s5170_s7 + $0x98] sm:$0x1] }
 0x10f   : > { %v1715_v38 = vadd.f32 %v1639_v19, %v1425_v41  ;;  %v1002_v21 = vadd.f32 %v1001_v54, %v5575_v5  ;;  %v1200_v41 = vsel %vm5356_vm7, %v4468_v61, %v1199_v30  ;;  %v1203_v5 = vsel %vm5356_vm7, %v1201_v4, %v1202_v51 }
 0x110   : > { %v2076_v47 = vshll.u32 %v4638_v23, 16  ;;  %v1257_v50 = vunpack.c.l.b16 %v1203_v5  ;;  %v2064_v51 = vrot.slane %v2063_v31, 4  ;;  %v2074_v19 = vrot.slane %v2073_v33, 4  ;;  %v4973_v33 = vld [vmem:[%s5170_s7 + $0x90] sm:$0xff] }
 0x111   : > { %v1352_v9 = vpop.f32.mrf.mxu2  ;;  %v5674_v13 = vadd.f32 %v2293_v35, %v1715_v38  ;;  %v4639_v38 = vld [vmem:[%s5170_s7 + $0x9c] sm:$0xf]  ;;  %v2094_v5 = vshrl.u32 %v4640_v20, 16 }
 0x112   : > { %v1426_v14 = vadd.f32 %v1352_v9, %v1000_v52  ;;  %v1256_v52 = vunpack.c.l.b16 %v1200_v41  ;;  %v2078_v54 = vrot.slane %v2076_v47, 5  ;;  %v1081_v9 = vld [vmem:[%s5170_s7 + $0x90] sm:$0xe]  ;;  %v2084_v25 = vshll.u32 %v4639_v38, 16 }
 0x113   : > { %4597 = vmatmul.msk.bf16.gmra.mxu3 %vm707_vm4, %v4972_v57  ;;  %v2090_v41 = vshll.u32 %v4640_v20, 16 }
 0x114   : > { %v1277_v4 = vpack.c.b16 %v1257_v50, %v1256_v52  ;;  %v2079_v23 = vsel %vm5182_vm3, %v2074_v19, %v2078_v54  ;;  %v2096_v19 = vrot.slane %v2094_v5, 4 }
 0x115   : > { %v2296_v60 = vpop.f32.mrf.mxu0 }
 0x116   : > { %v1642_v48 = vpop.f32.mrf.mxu3  ;;  %v1004_v35 = vpop.f32.mrf.mxu1 }
 0x117   : > { %v1716_v3 = vadd.f32 %v1642_v48, %v1426_v14  ;;  %v1005_v30 = vadd.f32 %v1004_v35, %v5598_v56  ;;  %v2081_v56 = vshrl.u32 %v4639_v38, 16  ;;  %v2069_v14 = vsel %vm5182_vm3, %v2064_v51, %v2068_v11 }
 0x118   : > { %4662 = vmatmul.msk.bf16.gmra.mxu0 %vm707_vm4, %v2220_v62  ;;  %v5035_v62 = vld [vmem:[%s5170_s7 + $0x98] sm:$0x1]  ;;  %v4469_v48 = vrot.slane %v1081_v9, 9  ;;  %v1208_v35 = vrot.slane %v1206_v8, 4  ;;  %v2200_v52 = vunpack.c.l.b16 %v2069_v14  ;;  %v2201_v11 = vunpack.c.l.b16 %v2079_v23 }
 0x119   : > { %v1354_v27 = vpop.f32.mrf.mxu2  ;;  %4452 = vmatmul.msk.bf16.gmra.mxu1 %vm707_vm4, %v4957_v44  ;;  %v5687_v57 = vadd.f32 %v2296_v60, %v1716_v3  ;;  %v1209_v60 = vrot.slane %v5035_v62, 5  ;;  %v2083_v50 = vrot.slane %v2081_v56, 4  ;;  %v2086_v3 = vrot.slane %v2084_v25, 5  ;;  %v4958_v56 = vld [vmem:[%s5170_s7 + $0x90] sm:$0xff] }
 0x11a   : > { %v1427_v61 = vadd.f32 %v1354_v27, %v1002_v21  ;;  %v2092_v51 = vrot.slane %v2090_v41, 5  ;;  %v2221_v20 = vpack.c.b16 %v2201_v11, %v2200_v52  ;;  %v4643_v11 = vld [vmem:[%s5170_s7 + $0xac] sm:$0xf] }
 0x11b   : > { %v2087_v16 = vor.u32 %v2086_v3, %v2083_v50  ;;  %v1082_v50 = vld [vmem:[%s5170_s7 + $0x9c] sm:$0xe] }
 0x11c   : > { %v2097_v25 = vor.u32 %v2096_v19, %v2092_v51 }
 0x11d   : > { %v2298_v1 = vpop.f32.mrf.mxu0 }
 0x11e   : > { %v1644_v21 = vpop.f32.mrf.mxu3  ;;  %4485 = vmatmul.msk.bf16.gmra.mxu2 %vm707_vm4, %v1277_v4  ;;  %v1006_v44 = vpop.f32.mrf.mxu1  ;;  %v4641_v4 = vld [vmem:[%s5170_s7 + $0xa4] sm:$0x1] }
 0x11f   : > { %v1717_v31 = vadd.f32 %v1644_v21, %v1427_v61  ;;  %v1007_v47 = vadd.f32 %v1006_v44, %v5616_v24  ;;  %v1207_v61 = vsel %vm5356_vm7, %v4469_v48, %v1206_v8  ;;  %v1210_v24 = vsel %vm5356_vm7, %v1208_v35, %v1209_v60  ;;  %v4642_v44 = vld [vmem:[%s5170_s7 + $0xa8] sm:$0xf]  ;;  %v5036_v35 = vld [vmem:[%s5170_s7 + $0xa0] sm:$0xf] }
 0x120   : > { %v2100_v14 = vshll.u32 %v4641_v4, 16  ;;  %v1259_v41 = vunpack.c.l.b16 %v1210_v24  ;;  %v2088_v8 = vrot.slane %v2087_v16, 4  ;;  %v2098_v60 = vrot.slane %v2097_v25, 4 }
 0x121   : > { %v1357_v27 = vpop.f32.mrf.mxu2  ;;  %v5700_v54 = vadd.f32 %v2298_v1, %v1717_v31  ;;  %v1213_v52 = vrot.slane %v5036_v35, 5  ;;  %v2108_v19 = vshll.u32 %v4642_v44, 16  ;;  %v2118_v24 = vshrl.u32 %v4643_v11, 16 }
 0x122   : > { %v1428_v38 = vadd.f32 %v1357_v27, %v1005_v30  ;;  %v1258_v30 = vunpack.c.l.b16 %v1207_v61  ;;  %v2102_v21 = vrot.slane %v2100_v14, 5  ;;  %v2093_v3 = vsel %vm5182_vm3, %v2088_v8, %v2092_v51 }
 0x123   : > { %4598 = vmatmul.msk.bf16.gmra.mxu3 %vm707_vm4, %v4973_v33  ;;  %v2105_v27 = vshrl.u32 %v4642_v44, 16  ;;  %v2114_v61 = vshll.u32 %v4643_v11, 16  ;;  %v1215_v25 = vrot.slane %v1213_v52, 4  ;;  %v2202_v51 = vunpack.c.l.b16 %v2093_v3  ;;  %v4644_v11 = vld [vmem:[%s5170_s7 + $0xb0] sm:$0x1]  ;;  %v4959_v3 = vld [vmem:[%s5170_s7 + $0x9c] sm:$0xff] }
 0x124   : > { %v1278_v48 = vpack.c.b16 %v1259_v41, %v1258_v30  ;;  %v2103_v4 = vsel %vm5182_vm3, %v2098_v60, %v2102_v21  ;;  %v2110_v8 = vrot.slane %v2108_v19, 5  ;;  %v2120_v21 = vrot.slane %v2118_v24, 4 }
 0x125   : > { %v2301_v9 = vpop.f32.mrf.mxu0  ;;  %v2203_v41 = vunpack.c.l.b16 %v2103_v4  ;;  %v2116_v60 = vrot.slane %v2114_v61, 5  ;;  %v2124_v4 = vshll.u32 %v4644_v11, 16 }
 0x126   : > { %v1647_v1 = vpop.f32.mrf.mxu3  ;;  %v1009_v23 = vpop.f32.mrf.mxu1 }
 0x127   : > { %v1718_v5 = vadd.f32 %v1647_v1, %v1428_v38  ;;  %v4974_v1 = vld [vmem:[%s5170_s7 + $0x9c] sm:$0xff]  ;;  %v1010_v30 = vadd.f32 %v1009_v23, %v5451_v7  ;;  %v2222_v7 = vpack.c.b16 %v2203_v41, %v2202_v51  ;;  %v2126_v51 = vrot.slane %v2124_v4, 5 }
 0x128   : > { %4663 = vmatmul.msk.bf16.gmra.mxu0 %vm707_vm4, %v2221_v20  ;;  %v5037_v20 = vld [vmem:[%s5170_s7 + $0xa4] sm:$0x1] }
 0x129   : > { %v1359_v62 = vpop.f32.mrf.mxu2  ;;  %4453 = vmatmul.msk.bf16.gmra.mxu1 %vm707_vm4, %v4958_v56  ;;  %v5712_v31 = vadd.f32 %v2301_v9, %v1718_v5  ;;  %v1216_v16 = vrot.slane %v5037_v20, 5  ;;  %v4470_v56 = vrot.slane %v1082_v50, 9  ;;  %v2107_v5 = vrot.slane %v2105_v27, 4 }
 0x12a   : > { %v1429_v33 = vadd.f32 %v1359_v62, %v1007_v47 }
 0x12b   : > { %v2111_v23 = vor.u32 %v2110_v8, %v2107_v5 }
 0x12d   : > { %v2303_v38 = vpop.f32.mrf.mxu0 }
 0x12e   : > { %v1649_v47 = vpop.f32.mrf.mxu3  ;;  %4486 = vmatmul.msk.bf16.gmra.mxu2 %vm707_vm4, %v1278_v48  ;;  %v1011_v9 = vpop.f32.mrf.mxu1  ;;  %v1214_v48 = vsel %vm5356_vm7, %v4470_v56, %v1213_v52  ;;  %v4645_v52 = vld [vmem:[%s5170_s7 + $0xb4] sm:$0xf]  ;;  %v2112_v56 = vrot.slane %v2111_v23, 4 }
 0x12f   : > { %v1719_v14 = vadd.f32 %v1649_v47, %v1429_v33  ;;  %v1217_v33 = vsel %vm5356_vm7, %v1215_v25, %v1216_v16  ;;  %v1260_v27 = vunpack.c.l.b16 %v1214_v48  ;;  %v4646_v47 = vld [vmem:[%s5170_s7 + $0xb8] sm:$0xf]  ;;  %v1012_v16 = vadd.f32 %v1011_v9, %v5467_v34 }
 0x130   : > { %v1261_v19 = vunpack.c.l.b16 %v1217_v33  ;;  %v2129_v5 = vshrl.u32 %v4645_v52, 16  ;;  %v2132_v8 = vshll.u32 %v4645_v52, 16  ;;  %v2142_v48 = vshrl.u32 %v4646_v47, 16  ;;  %v1083_v33 = vld [vmem:[%s5170_s7 + $0xa8] sm:$0xe] }
 0x131   : > { %v1362_v62 = vpop.f32.mrf.mxu2  ;;  %v5725_v44 = vadd.f32 %v2303_v38, %v1719_v14  ;;  %v2121_v38 = vor.u32 %v2120_v21, %v2116_v60  ;;  %v5038_v21 = vld [vmem:[%s5170_s7 + $0xac] sm:$0xf]  ;;  %v2117_v9 = vsel %vm5182_vm3, %v2112_v56, %v2116_v60 }
 0x132   : > { %v1430_v35 = vadd.f32 %v1362_v62, %v1010_v30  ;;  %v1279_v14 = vpack.c.b16 %v1261_v19, %v1260_v27  ;;  %v2138_v62 = vshll.u32 %v4646_v47, 16  ;;  %v2131_v27 = vrot.slane %v2129_v5, 4 }
 0x133   : > { %4599 = vmatmul.msk.bf16.gmra.mxu3 %vm707_vm4, %v4974_v1  ;;  %v2122_v1 = vrot.slane %v2121_v38, 4  ;;  %v2134_v19 = vrot.slane %v2132_v8, 5  ;;  %v2144_v47 = vrot.slane %v2142_v48, 4  ;;  %v4960_v48 = vld [vmem:[%s5170_s7 + $0xa8] sm:$0xff] }
 0x134   : > { %v2140_v38 = vrot.slane %v2138_v62, 5 }
 0x135   : > { %v2306_v50 = vpop.f32.mrf.mxu0  ;;  %v2127_v11 = vsel %vm5182_vm3, %v2122_v1, %v2126_v51 }
 0x136   : > { %v1652_v61 = vpop.f32.mrf.mxu3  ;;  %v1014_v24 = vpop.f32.mrf.mxu1  ;;  %v2205_v56 = vunpack.c.l.b16 %v2127_v11  ;;  %v2145_v8 = vor.u32 %v2144_v47, %v2140_v38 }
 0x137   : > { %v1720_v20 = vadd.f32 %v1652_v61, %v1430_v35  ;;  %v1220_v35 = vrot.slane %v5038_v21, 5  ;;  %v4975_v61 = vld [vmem:[%s5170_s7 + $0xa8] sm:$0xff]  ;;  %v1015_v60 = vadd.f32 %v1014_v24, %v5487_v58 }
 0x138   : > { %4664 = vmatmul.msk.bf16.gmra.mxu0 %vm707_vm4, %v2222_v7  ;;  %v5039_v7 = vld [vmem:[%s5170_s7 + $0xb0] sm:$0x1] }
 0x139   : > { %v1364_v25 = vpop.f32.mrf.mxu2  ;;  %4454 = vmatmul.msk.bf16.gmra.mxu1 %vm707_vm4, %v4959_v3  ;;  %v5739_v30 = vadd.f32 %v2306_v50, %v1720_v20  ;;  %v1223_v23 = vrot.slane %v5039_v7, 5  ;;  %v4471_v20 = vrot.slane %v1083_v33, 9  ;;  %v1222_v52 = vrot.slane %v1220_v35, 4 }
 0x13a   : > { %v1431_v41 = vadd.f32 %v1364_v25, %v1012_v16  ;;  %v2204_v16 = vunpack.c.l.b16 %v2117_v9  ;;  %v4647_v25 = vld [vmem:[%s5170_s7 + $0xbc] sm:$0x1] }
 0x13b   : > { %v1224_v5 = vsel %vm5356_vm7, %v1222_v52, %v1223_v23  ;;  %v2148_v58 = vshll.u32 %v4647_v25, 16  ;;  %v4649_v52 = vld [vmem:[%s5170_s7 + $0xc4] sm:$0xf] }
 0x13c   : > { %v2223_v24 = vpack.c.b16 %v2205_v56, %v2204_v16  ;;  %v1263_v11 = vunpack.c.l.b16 %v1224_v5  ;;  %v1084_v16 = vld [vmem:[%s5170_s7 + $0xb4] sm:$0xe]  ;;  %v5041_v56 = vld [vmem:[%s5170_s7 + $0xb8] sm:$0xf]  ;;  %v2166_v5 = vshrl.u32 %v4649_v52, 16 }
 0x13d   : > { %v2308_v34 = vpop.f32.mrf.mxu0  ;;  %v1227_v25 = vrot.slane %v5041_v56, 5 }
 0x13e   : > { %v1654_v50 = vpop.f32.mrf.mxu3  ;;  %4487 = vmatmul.msk.bf16.gmra.mxu2 %vm707_vm4, %v1279_v14  ;;  %v1016_v3 = vpop.f32.mrf.mxu1  ;;  %v2135_v14 = vor.u32 %v2134_v19, %v2131_v27  ;;  %v2150_v27 = vrot.slane %v2148_v58, 5  ;;  %v4648_v19 = vld [vmem:[%s5170_s7 + $0xc0] sm:$0xf]  ;;  %v5042_v58 = vld [vmem:[%s5170_s7 + $0x14] sm:$0x1] }
 0x13f   : > { %v1721_v4 = vadd.f32 %v1654_v50, %v1431_v41  ;;  %v1221_v41 = vsel %vm5356_vm7, %v4471_v20, %v1220_v35  ;;  %v2146_v35 = vrot.slane %v2145_v8, 4  ;;  %v1017_v23 = vadd.f32 %v1016_v3, %v5504_v28 }
 0x140   : > { %v1262_v9 = vunpack.c.l.b16 %v1221_v41  ;;  %v2136_v50 = vrot.slane %v2135_v14, 4  ;;  %v2153_v3 = vshrl.u32 %v4648_v19, 16  ;;  %v2156_v14 = vshll.u32 %v4648_v19, 16  ;;  %v4976_v19 = vld [vmem:[%s5170_s7 + $0xb4] sm:$0xff] }
 0x141   : > { %v1367_v1 = vpop.f32.mrf.mxu2  ;;  %v5752_v51 = vadd.f32 %v2308_v34, %v1721_v4  ;;  %v5040_v4 = vld [vmem:[%s5170_s7 + $0x10] sm:$0xf]  ;;  %v2151_v28 = vsel %vm5182_vm3, %v2146_v35, %v2150_v27  ;;  %v2162_v41 = vshll.u32 %v4649_v52, 16  ;;  %v1229_v35 = vrot.slane %v1227_v25, 4  ;;  %v4668_v27 = vld [vmem:[%s5170_s7 + $0xc] sm:$0xe] }
 0x142   : > { %v1432_v21 = vadd.f32 %v1367_v1, %v1015_v60  ;;  %v1280_v60 = vpack.c.b16 %v1263_v11, %v1262_v9  ;;  %v5043_v9 = vld [vmem:[%s5170_s7 + $0xbc] sm:$0x1]  ;;  %v4684_v52 = vrot.slane %v4668_v27, 9 }
 0x143   : > { %4600 = vmatmul.msk.bf16.gmra.mxu3 %vm707_vm4, %v4975_v61  ;;  %v2464_v61 = vrot.slane %v5040_v4, 5  ;;  %v2155_v4 = vrot.slane %v2153_v3, 4 }
 0x145   : > { %v2311_v62 = vpop.f32.mrf.mxu0  ;;  %v2466_v8 = vrot.slane %v2464_v61, 4 }
 0x146   : > { %v1657_v33 = vpop.f32.mrf.mxu3  ;;  %v1019_v34 = vpop.f32.mrf.mxu1 }
 0x147   : > { %v1722_v7 = vadd.f32 %v1657_v33, %v1432_v21  ;;  %v2141_v21 = vsel %vm5182_vm3, %v2136_v50, %v2140_v38  ;;  %v4472_v33 = vrot.slane %v1084_v16, 9  ;;  %v1020_v56 = vadd.f32 %v1019_v34, %v5524_v53 }
 0x148   : > { %4665 = vmatmul.msk.bf16.gmra.mxu0 %vm707_vm4, %v2223_v24  ;;  %v2467_v24 = vrot.slane %v5042_v58, 5  ;;  %v2206_v38 = vunpack.c.l.b16 %v2141_v21  ;;  %v2164_v16 = vrot.slane %v2162_v41, 5  ;;  %v2168_v58 = vrot.slane %v2166_v5, 4  ;;  %v4650_v21 = vld [vmem:[%s5170_s7 + $0xc8] sm:$0x1] }
 0x149   : > { %v1369_v20 = vpop.f32.mrf.mxu2  ;;  %4455 = vmatmul.msk.bf16.gmra.mxu1 %vm707_vm4, %v4960_v48  ;;  %v5768_v1 = vadd.f32 %v2311_v62, %v1722_v7  ;;  %v1230_v62 = vrot.slane %v5043_v9, 5  ;;  %v2207_v7 = vunpack.c.l.b16 %v2151_v28  ;;  %v2465_v28 = vsel %vm5356_vm7, %v4684_v52, %v2464_v61  ;;  %v4830_v41 = vld [vmem:[%s5170_s7 + $0x18] sm:$0xf] }
 0x14a   : > { %v1433_v47 = vadd.f32 %v1369_v20, %v1017_v23  ;;  %v2158_v20 = vrot.slane %v2156_v14, 5  ;;  %v2576_v53 = vunpack.c.l.b16 %v2465_v28  ;;  %v2172_v27 = vshll.u32 %v4650_v21, 16 }
 0x14b   : > { %v1231_v14 = vsel %vm5356_vm7, %v1229_v35, %v1230_v62  ;;  %v2224_v5 = vpack.c.b16 %v2207_v7, %v2206_v38  ;;  %v3135_v62 = vshrl.u32 %v4830_v41, 16  ;;  %v3138_v35 = vshll.u32 %v4830_v41, 16 }
 0x14d   : > { %v2313_v48 = vpop.f32.mrf.mxu0  ;;  %v3137_v21 = vrot.slane %v3135_v62, 4 }
 0x14e   : > { %v1659_v11 = vpop.f32.mrf.mxu3  ;;  %4488 = vmatmul.msk.bf16.gmra.mxu2 %vm707_vm4, %v1280_v60  ;;  %v1021_v50 = vpop.f32.mrf.mxu1  ;;  %v1228_v60 = vsel %vm5356_vm7, %v4472_v33, %v1227_v25  ;;  %v5792_v25 = vld [vmem:[%s5170_s7 + $0x1c] sm:$0xf]  ;;  %v2169_v33 = vor.u32 %v2168_v58, %v2164_v16 }
 0x14f   : > { %v1723_v23 = vadd.f32 %v1659_v11, %v1433_v47  ;;  %v2468_v47 = vsel %vm5356_vm7, %v2466_v8, %v2467_v24  ;;  %v2159_v11 = vor.u32 %v2158_v20, %v2155_v4  ;;  %v4961_v24 = vld [vmem:[%s5170_s7 + $0xb4] sm:$0xff]  ;;  %v3148_v38 = vshrl.u32 %v5792_v25, 16 }
 0x150   : > { %v2577_v34 = vunpack.c.l.b16 %v2468_v47  ;;  %v1022_v4 = vadd.f32 %v1021_v50, %v5544_v17 }
 0x151   : > { %v1372_v9 = vpop.f32.mrf.mxu2  ;;  %v5796_v52 = vadd.f32 %v2313_v48, %v1723_v23  ;;  %v2160_v48 = vrot.slane %v2159_v11, 4  ;;  %v2170_v23 = vrot.slane %v2169_v33, 4  ;;  %v3150_v41 = vrot.slane %v3148_v38, 4 }
 0x152   : > { %v1434_v3 = vadd.f32 %v1372_v9, %v1020_v56  ;;  %v5794_v61 = vpack.c.b16 %v2577_v34, %v2576_v53  ;;  %v1264_v56 = vunpack.c.l.b16 %v1228_v60  ;;  %v1265_v9 = vunpack.c.l.b16 %v1231_v14 }
 0x153   : > { %4601 = vmatmul.msk.bf16.gmra.mxu3 %vm707_vm4, %v4976_v19  ;;  %6611 = vst [vmem:[#allocation2_spill] sm:$0xff] %v5796_v52  ;;  %v3144_v19 = vshll.u32 %v5792_v25, 16  ;;  %v2174_v60 = vrot.slane %v2172_v27, 5  ;;  %v3140_v14 = vrot.slane %v3138_v35, 5  ;;  %v2165_v17 = vsel %vm5182_vm3, %v2160_v48, %v2164_v16  ;;  %v4895_v48 = vld [vmem:[%s5170_s7 + $0x18] sm:$0xe] }
 0x154   : > { %v1281_v58 = vpack.c.b16 %v1265_v9, %v1264_v56  ;;  %v4977_v9 = vld [vmem:[%s5170_s7 + $0xc0] sm:$0xff]  ;;  %v2208_v16 = vunpack.c.l.b16 %v2165_v17 }
 0x155   : > { %v2316_v8 = vpop.f32.mrf.mxu0  ;;  %v3146_v34 = vrot.slane %v3144_v19, 5  ;;  %v2175_v50 = vsel %vm5182_vm3, %v2170_v23, %v2174_v60  ;;  %v3141_v27 = vor.u32 %v3140_v14, %v3137_v21  ;;  %v4833_v23 = vld [vmem:[%s5170_s7 + $0x24] sm:$0xf]  ;;  %v5822_v60 = vld [vmem:[%s5170_s7 + $0x28] sm:$0xf] }
 0x156   : > { %v1662_v28 = vpop.f32.mrf.mxu3  ;;  %v1024_v47 = vpop.f32.mrf.mxu1  ;;  %v2209_v35 = vunpack.c.l.b16 %v2175_v50 }
 0x157   : > { %v1724_v7 = vadd.f32 %v1662_v28, %v1434_v3  ;;  %v5807_v3 = vld [vmem:[%s5170_s7 + $0x20] sm:$0x1]  ;;  %v1025_v62 = vadd.f32 %v1024_v47, %v5567_v2  ;;  %v3142_v38 = vrot.slane %v3141_v27, 4  ;;  %v5044_v47 = vld [vmem:[%s5170_s7 + $0x1c] sm:$0xf] }
 0x158   : > { %4666 = vmatmul.msk.bf16.gmra.mxu0 %vm707_vm4, %v2224_v5  ;;  %v2471_v14 = vrot.slane %v5044_v47, 5  ;;  %v4669_v27 = vld [vmem:[%s5170_s7 + $0x18] sm:$0xe] }
 0x159   : > { %v1374_v20 = vpop.f32.mrf.mxu2  ;;  %4456 = vmatmul.msk.bf16.gmra.mxu1 %vm707_vm4, %v4961_v24  ;;  %v5804_v52 = vadd.f32 %v2316_v8, %v1724_v7  ;;  %v3151_v24 = vor.u32 %v3150_v41, %v3146_v34  ;;  %v3154_v8 = vshll.u32 %v5807_v3, 16  ;;  %v3147_v17 = vsel %vm5182_vm3, %v3142_v38, %v3146_v34 }
 0x15a   : > { %v1435_v53 = vadd.f32 %v1374_v20, %v1022_v4  ;;  %v2225_v20 = vpack.c.b16 %v2209_v35, %v2208_v16  ;;  %v3809_v34 = vrot.slane %v5807_v3, 5  ;;  %v5045_v16 = vld [vmem:[%s5170_s7 + $0x20] sm:$0x1]  ;;  %v4685_v38 = vrot.slane %v4669_v27, 9 }
 0x15b   : > { %v3152_v7 = vrot.slane %v3151_v24, 4  ;;  %v3156_v4 = vrot.slane %v3154_v8, 5  ;;  %v3159_v24 = vshrl.u32 %v4833_v23, 16  ;;  %v3162_v8 = vshll.u32 %v4833_v23, 16 }
 0x15c   : > { %v2474_v35 = vrot.slane %v5045_v16, 5  ;;  %v2472_v27 = vsel %vm5356_vm7, %v4685_v38, %v2471_v14  ;;  %v4836_v38 = vld [vmem:[%s5170_s7 + $0x30] sm:$0xf] }
 0x15d   : > { %v2318_v5 = vpop.f32.mrf.mxu0  ;;  %v3157_v50 = vsel %vm5182_vm3, %v3152_v7, %v3156_v4  ;;  %v2473_v7 = vrot.slane %v2471_v14, 4  ;;  %v3164_v3 = vrot.slane %v3162_v8, 5 }
 0x15e   : > { %v1664_v11 = vpop.f32.mrf.mxu3  ;;  %4489 = vmatmul.msk.bf16.gmra.mxu2 %vm707_vm4, %v1281_v58  ;;  %v1026_v33 = vpop.f32.mrf.mxu1  ;;  %v3806_v58 = vrot.slane %v5792_v25, 5  ;;  %v3521_v23 = vunpack.c.l.b16 %v3157_v50 }
 0x15f   : > { %v1725_v56 = vadd.f32 %v1664_v11, %v1435_v53  ;;  %v4911_v11 = vrot.slane %v4895_v48, 9  ;;  %v4978_v48 = vld [vmem:[%s5170_s7 + $0x18] sm:$0xff]  ;;  %v2475_v50 = vsel %vm5356_vm7, %v2473_v7, %v2474_v35  ;;  %v5862_v7 = vld [vmem:[%s5170_s7 + $0x34] sm:$0xf] }
 0x161   : > { %v1377_v28 = vpop.f32.mrf.mxu2  ;;  %v5824_v21 = vadd.f32 %v2318_v5, %v1725_v56  ;;  %v3168_v5 = vshll.u32 %v5822_v60, 16  ;;  %v3172_v56 = vshrl.u32 %v5822_v60, 16 }
 0x162   : > { %v1436_v19 = vadd.f32 %v1377_v28, %v1025_v62  ;;  %v3808_v62 = vrot.slane %v3806_v58, 4 }
 0x163   : > { %4602 = vmatmul.msk.bf16.gmra.mxu3 %vm707_vm4, %v4977_v9  ;;  %v1027_v9 = vadd.f32 %v1026_v33, %v5587_v29  ;;  %v3161_v33 = vrot.slane %v3159_v24, 4  ;;  %v5845_v47 = vrot.slane %v3168_v5, 5 }
 0x165   : > { %v2321_v2 = vpop.f32.mrf.mxu0  ;;  %v3165_v5 = vor.u32 %v3164_v3, %v3161_v33  ;;  %v4896_v33 = vld [vmem:[%s5170_s7 + $0x24] sm:$0xe] }
 0x166   : > { %v1667_v53 = vpop.f32.mrf.mxu3  ;;  %v1029_v41 = vpop.f32.mrf.mxu1 }
 0x167   : > { %v1726_v25 = vadd.f32 %v1667_v53, %v1436_v19  ;;  %v3520_v19 = vunpack.c.l.b16 %v3147_v17  ;;  %v3174_v53 = vrot.slane %v3172_v56, 4  ;;  %v1030_v14 = vadd.f32 %v1029_v41, %v5469_v37 }
 0x168   : > { %4667 = vmatmul.msk.bf16.gmra.mxu0 %vm707_vm4, %v2225_v20  ;;  %v3807_v20 = vsel %vm5356_vm7, %v4911_v11, %v3806_v58  ;;  %v3813_v37 = vrot.slane %v5822_v60, 5 }
 0x169   : > { %v1379_v28 = vpop.f32.mrf.mxu2  ;;  %4701 = vmatmul.msk.bf16.vlgmr.msra.gmra.mxu1 %vm707_vm4, %v5794_v61  ;;  %v5843_v29 = vadd.f32 %v2321_v2, %v1726_v25  ;;  %v3810_v61 = vsel %vm5356_vm7, %v3808_v62, %v3809_v34  ;;  %v3552_v2 = vpack.c.b16 %v3521_v23, %v3520_v19  ;;  %v3918_v11 = vunpack.c.l.b16 %v3807_v20 }
 0x16a   : > { %v1437_v4 = vadd.f32 %v1379_v28, %v1027_v9  ;;  %v5854_v9 = vld [vmem:[%s5170_s7 + $0x2c] sm:$0x1]  ;;  %v3919_v8 = vunpack.c.l.b16 %v3810_v61  ;;  %v3175_v56 = vor.u32 %v3174_v53, %v5845_v47  ;;  %v2578_v62 = vunpack.c.l.b16 %v2472_v27 }
 0x16b   : > { %v2579_v34 = vunpack.c.l.b16 %v2475_v50  ;;  %v3178_v16 = vshll.u32 %v5854_v9, 16  ;;  %v3183_v53 = vshrl.u32 %v4836_v38, 16  ;;  %v3186_v61 = vshll.u32 %v4836_v38, 16 }
 0x16c   : > { %v3950_v19 = vpack.c.b16 %v3919_v8, %v3918_v11  ;;  %v3192_v27 = vshll.u32 %v5862_v7, 16  ;;  %v3196_v50 = vshrl.u32 %v5862_v7, 16  ;;  %v5046_v11 = vld [vmem:[%s5170_s7 + $0x28] sm:$0xf]  ;;  %v3816_v60 = vrot.slane %v5854_v9, 5 }
 0x16d   : > { %v2323_v17 = vpop.f32.mrf.mxu0  ;;  %v2609_v23 = vpack.c.b16 %v2579_v34, %v2578_v62  ;;  %v3180_v20 = vrot.slane %v3178_v16, 5  ;;  %v2478_v8 = vrot.slane %v5046_v11, 5  ;;  %v4912_v62 = vrot.slane %v4896_v33, 9  ;;  %v4979_v11 = vld [vmem:[%s5170_s7 + $0x24] sm:$0xff] }
 0x16e   : > { %v1669_v58 = vpop.f32.mrf.mxu3  ;;  %4814 = vmatmul.msk.bf16.vlgmr.msra.gmra.mxu2 %vm707_vm4, %v4978_v48  ;;  %v1031_v24 = vpop.f32.mrf.mxu1  ;;  %v3176_v48 = vrot.slane %v3175_v56, 4  ;;  %v3188_v33 = vrot.slane %v3186_v61, 5  ;;  %v5883_v9 = vrot.slane %v3192_v27, 5 }
 0x16f   : > { %v1727_v25 = vadd.f32 %v1669_v58, %v1437_v4  ;;  %v3166_v4 = vrot.slane %v3165_v5, 4  ;;  %v5047_v5 = vld [vmem:[%s5170_s7 + $0x2c] sm:$0x1] }
 0x170   : > { %v2481_v56 = vrot.slane %v5047_v5, 5  ;;  %v3181_v16 = vsel %vm5182_vm3, %v3176_v48, %v3180_v20  ;;  %v3814_v20 = vsel %vm5356_vm7, %v4912_v62, %v3813_v37 }
 0x171   : > { %v1382_v35 = vpop.f32.mrf.mxu2  ;;  %v5867_v41 = vadd.f32 %v2323_v17, %v1727_v25  ;;  %v4670_v17 = vld [vmem:[%s5170_s7 + $0x24] sm:$0xe]  ;;  %v1032_v25 = vadd.f32 %v1031_v24, %v5490_v63  ;;  %v3171_v34 = vsel %vm5182_vm3, %v3166_v4, %v5845_v47  ;;  %v2480_v24 = vrot.slane %v2478_v8, 4 }
 0x172   : > { %v1438_v28 = vadd.f32 %v1382_v35, %v1030_v14  ;;  %v3815_v35 = vrot.slane %v3813_v37, 4  ;;  %v4686_v63 = vrot.slane %v4670_v17, 9  ;;  %v3522_v47 = vunpack.c.l.b16 %v3171_v34 }
 0x173   : > { %4879 = vmatmul.msk.bf16.vlgmr.msra.gmra.mxu3 %vm707_vm4, %v3552_v2  ;;  %6612 = vst [vmem:[#allocation3_spill] sm:$0xff] %v5867_v41  ;;  %v3523_v4 = vunpack.c.l.b16 %v3181_v16  ;;  %v5889_v41 = vld [vmem:[%s5170_s7 + $0x38] sm:$0x1] }
 0x174   : > { %v3202_v37 = vshll.u32 %v5889_v41, 16 }
 0x175   : > { %v2326_v3 = vpop.f32.mrf.mxu0  ;;  %v3553_v17 = vpack.c.b16 %v3523_v4, %v3522_v47  ;;  %v5048_v4 = vld [vmem:[%s5170_s7 + $0x34] sm:$0xf] }
 0x176   : > { %v1672_v58 = vpop.f32.mrf.mxu3  ;;  %v1034_v2 = vpop.f32.mrf.mxu1 }
 0x177   : > { %v1728_v14 = vadd.f32 %v1672_v58, %v1438_v28  ;;  %v3185_v28 = vrot.slane %v3183_v53, 4  ;;  %v3198_v58 = vrot.slane %v3196_v50, 4  ;;  %v2482_v50 = vsel %vm5356_vm7, %v2480_v24, %v2481_v56  ;;  %v5908_v24 = vld [vmem:[%s5170_s7 + $0x40] sm:$0xf] }
 0x178   : > { %4928 = vmatmul.msk.bf16.vlgmr.msra.gmra.mxu0 %vm707_vm4, %v3950_v19 }
 0x179   : > { %v1384_v38 = vpop.f32.mrf.mxu2  ;;  %4702 = vmatmul.msk.bf16.gmra.mxu1 %vm707_vm4, %v2609_v23  ;;  %v5886_v5 = vadd.f32 %v2326_v3, %v1728_v14  ;;  %v3817_v23 = vsel %vm5356_vm7, %v3815_v35, %v3816_v60  ;;  %v3189_v53 = vor.u32 %v3188_v33, %v3185_v28  ;;  %v2479_v3 = vsel %vm5356_vm7, %v4686_v63, %v2478_v8 }
 0x17a   : > { %v1439_v19 = vadd.f32 %v1384_v38, %v1032_v25  ;;  %v3199_v14 = vor.u32 %v3198_v58, %v5883_v9  ;;  %v1035_v60 = vadd.f32 %v1034_v2, %v5507_v22  ;;  %v3920_v25 = vunpack.c.l.b16 %v3814_v20  ;;  %v4897_v58 = vld [vmem:[%s5170_s7 + $0x30] sm:$0xe] }
 0x17b   : > { %v3921_v34 = vunpack.c.l.b16 %v3817_v23  ;;  %v2580_v35 = vunpack.c.l.b16 %v2479_v3  ;;  %v2581_v8 = vunpack.c.l.b16 %v2482_v50  ;;  %v3190_v28 = vrot.slane %v3189_v53, 4 }
 0x17c   : > { %v3200_v56 = vrot.slane %v3199_v14, 4  ;;  %v3204_v33 = vrot.slane %v3202_v37, 5  ;;  %v3820_v63 = vrot.slane %v5862_v7, 5  ;;  %v2485_v20 = vrot.slane %v5048_v4, 5  ;;  %v4671_v7 = vld [vmem:[%s5170_s7 + $0x30] sm:$0xe] }
 0x17d   : > { %v2328_v48 = vpop.f32.mrf.mxu0  ;;  %v2610_v47 = vpack.c.b16 %v2581_v8, %v2580_v35  ;;  %v4913_v50 = vrot.slane %v4897_v58, 9 }
 0x17e   : > { %v1674_v61 = vpop.f32.mrf.mxu3  ;;  %4815 = vmatmul.msk.bf16.gmra.mxu2 %vm707_vm4, %v4979_v11  ;;  %v1036_v27 = vpop.f32.mrf.mxu1  ;;  %v4839_v11 = vld [vmem:[%s5170_s7 + $0x3c] sm:$0xf]  ;;  %v3205_v3 = vsel %vm5182_vm3, %v3200_v56, %v3204_v33  ;;  %v4980_v33 = vld [vmem:[%s5170_s7 + $0x30] sm:$0xff] }
 0x17f   : > { %v1729_v62 = vadd.f32 %v1674_v61, %v1439_v19  ;;  %v3951_v19 = vpack.c.b16 %v3921_v34, %v3920_v25  ;;  %v3195_v61 = vsel %vm5182_vm3, %v3190_v28, %v5883_v9  ;;  %v3207_v14 = vshrl.u32 %v4839_v11, 16  ;;  %v5049_v34 = vld [vmem:[%s5170_s7 + $0x38] sm:$0x1] }
 0x180   : > { %v3822_v25 = vrot.slane %v3820_v63, 4  ;;  %v3823_v9 = vrot.slane %v5889_v41, 5  ;;  %v3524_v8 = vunpack.c.l.b16 %v3195_v61  ;;  %v2487_v28 = vrot.slane %v2485_v20, 4 }
 0x181   : > { %v1387_v16 = vpop.f32.mrf.mxu2  ;;  %v5910_v22 = vadd.f32 %v2328_v48, %v1729_v62  ;;  %v3210_v48 = vshll.u32 %v4839_v11, 16  ;;  %v3216_v62 = vshll.u32 %v5908_v24, 16  ;;  %v3525_v58 = vunpack.c.l.b16 %v3205_v3 }
 0x182   : > { %v1440_v38 = vadd.f32 %v1387_v16, %v1035_v60  ;;  %v1037_v60 = vadd.f32 %v1036_v27, %v5528_v55  ;;  %v2488_v16 = vrot.slane %v5049_v34, 5  ;;  %v3821_v11 = vsel %vm5356_vm7, %v4913_v50, %v3820_v63 }
 0x183   : > { %4880 = vmatmul.msk.bf16.gmra.mxu3 %vm707_vm4, %v3553_v17  ;;  %v3220_v17 = vshrl.u32 %v5908_v24, 16  ;;  %v3209_v55 = vrot.slane %v3207_v14, 4  ;;  %v3212_v27 = vrot.slane %v3210_v48, 5  ;;  %v5931_v41 = vrot.slane %v3216_v62, 5 }
 0x184   : > { %v2489_v3 = vsel %vm5356_vm7, %v2487_v28, %v2488_v16  ;;  %v3922_v50 = vunpack.c.l.b16 %v3821_v11  ;;  %v4898_v11 = vld [vmem:[%s5170_s7 + $0x3c] sm:$0xe] }
 0x185   : > { %v2331_v2 = vpop.f32.mrf.mxu0  ;;  %v3222_v4 = vrot.slane %v3220_v17, 4  ;;  %v3213_v62 = vor.u32 %v3212_v27, %v3209_v55 }
 0x186   : > { %v1677_v23 = vpop.f32.mrf.mxu3  ;;  %v1039_v53 = vpop.f32.mrf.mxu1 }
 0x187   : > { %v1730_v37 = vadd.f32 %v1677_v23, %v1440_v38  ;;  %v4687_v38 = vrot.slane %v4671_v7, 9  ;;  %v5940_v7 = vld [vmem:[%s5170_s7 + $0x44] sm:$0x1]  ;;  %v3223_v17 = vor.u32 %v3222_v4, %v5931_v41  ;;  %v3214_v28 = vrot.slane %v3213_v62, 4 }
 0x188   : > { %4929 = vmatmul.msk.bf16.gmra.mxu0 %vm707_vm4, %v3951_v19 }
 0x189   : > { %v1389_v35 = vpop.f32.mrf.mxu2  ;;  %4703 = vmatmul.msk.bf16.gmra.mxu1 %vm707_vm4, %v2610_v47  ;;  %v5929_v19 = vadd.f32 %v2331_v2, %v1730_v37  ;;  %v3824_v47 = vsel %vm5356_vm7, %v3822_v25, %v3823_v9  ;;  %v2486_v61 = vsel %vm5356_vm7, %v4687_v38, %v2485_v20  ;;  %v3554_v2 = vpack.c.b16 %v3525_v58, %v3524_v8  ;;  %v5948_v38 = vld [vmem:[%s5170_s7 + $0x4c] sm:$0xf] }
 0x18a   : > { %v1441_v56 = vadd.f32 %v1389_v35, %v1037_v60  ;;  %v3923_v48 = vunpack.c.l.b16 %v3824_v47  ;;  %v1040_v20 = vadd.f32 %v1039_v53, %v5551_v26  ;;  %v2582_v60 = vunpack.c.l.b16 %v2486_v61  ;;  %v4842_v35 = vld [vmem:[%s5170_s7 + $0x48] sm:$0xf] }
 0x18b   : > { %v2583_v25 = vunpack.c.l.b16 %v2489_v3  ;;  %v3226_v9 = vshll.u32 %v5940_v7, 16  ;;  %v3827_v26 = vrot.slane %v5908_v24, 5  ;;  %v3231_v27 = vshrl.u32 %v4842_v35, 16 }
 0x18c   : > { %v3952_v8 = vpack.c.b16 %v3923_v48, %v3922_v50  ;;  %v3234_v4 = vshll.u32 %v4842_v35, 16  ;;  %v3240_v47 = vshll.u32 %v5948_v38, 16  ;;  %v3244_v61 = vshrl.u32 %v5948_v38, 16  ;;  %v5051_v48 = vld [vmem:[%s5170_s7 + $0x44] sm:$0x1] }
 0x18d   : > { %v2333_v23 = vpop.f32.mrf.mxu0  ;;  %v3228_v58 = vrot.slane %v3226_v9, 5  ;;  %v2495_v62 = vrot.slane %v5051_v48, 5  ;;  %v3830_v24 = vrot.slane %v5940_v7, 5  ;;  %v3829_v9 = vrot.slane %v3827_v26, 4  ;;  %v5975_v48 = vld [vmem:[%s5170_s7 + $0x50] sm:$0x1] }
 0x18e   : > { %v1679_v63 = vpop.f32.mrf.mxu3  ;;  %4816 = vmatmul.msk.bf16.gmra.mxu2 %vm707_vm4, %v4980_v33  ;;  %v1041_v14 = vpop.f32.mrf.mxu1  ;;  %v2611_v33 = vpack.c.b16 %v2583_v25, %v2582_v60  ;;  %v3219_v60 = vsel %vm5182_vm3, %v3214_v28, %v5931_v41  ;;  %v3236_v35 = vrot.slane %v3234_v4, 5  ;;  %v5969_v7 = vrot.slane %v3240_v47, 5 }
 0x18f   : > { %v1731_v37 = vadd.f32 %v1679_v63, %v1441_v56  ;;  %v3224_v56 = vrot.slane %v3223_v17, 4  ;;  %v3526_v41 = vunpack.c.l.b16 %v3219_v60 }
 0x191   : > { %v1392_v34 = vpop.f32.mrf.mxu2  ;;  %v5953_v53 = vadd.f32 %v2333_v23, %v1731_v37  ;;  %v4672_v23 = vld [vmem:[%s5170_s7 + $0x3c] sm:$0xe]  ;;  %v1042_v37 = vadd.f32 %v1041_v14, %v5569_v43  ;;  %v3229_v25 = vsel %vm5182_vm3, %v3224_v56, %v3228_v58 }
 0x192   : > { %v1442_v16 = vadd.f32 %v1392_v34, %v1040_v20  ;;  %v4914_v20 = vrot.slane %v4898_v11, 9  ;;  %v3246_v11 = vrot.slane %v3244_v61, 4  ;;  %v4688_v43 = vrot.slane %v4672_v23, 9 }
 0x193   : > { %4881 = vmatmul.msk.bf16.gmra.mxu3 %vm707_vm4, %v3554_v2  ;;  %v5050_v2 = vld [vmem:[%s5170_s7 + $0x40] sm:$0xf]  ;;  %v3527_v28 = vunpack.c.l.b16 %v3229_v25 }
 0x194   : > { %v2492_v50 = vrot.slane %v5050_v2, 5  ;;  %v3828_v58 = vsel %vm5356_vm7, %v4914_v20, %v3827_v26  ;;  %v3250_v26 = vshll.u32 %v5975_v48, 16 }
 0x195   : > { %v2336_v55 = vpop.f32.mrf.mxu0  ;;  %v3555_v23 = vpack.c.b16 %v3527_v28, %v3526_v41  ;;  %v5052_v28 = vld [vmem:[%s5170_s7 + $0x4c] sm:$0xf] }
 0x196   : > { %v1682_v3 = vpop.f32.mrf.mxu3  ;;  %v1044_v63 = vpop.f32.mrf.mxu1  ;;  %v2494_v14 = vrot.slane %v2492_v50, 4 }
 0x197   : > { %v1732_v17 = vadd.f32 %v1682_v3, %v1442_v16  ;;  %v3233_v16 = vrot.slane %v3231_v27, 4  ;;  %v4981_v3 = vld [vmem:[%s5170_s7 + $0x3c] sm:$0xff] }
 0x198   : > { %4930 = vmatmul.msk.bf16.gmra.mxu0 %vm707_vm4, %v3952_v8  ;;  %v2496_v61 = vsel %vm5356_vm7, %v2494_v14, %v2495_v62  ;;  %v5994_v14 = vld [vmem:[%s5170_s7 + $0x58] sm:$0xf] }
 0x199   : > { %v1394_v34 = vpop.f32.mrf.mxu2  ;;  %4704 = vmatmul.msk.bf16.gmra.mxu1 %vm707_vm4, %v2611_v33  ;;  %v5972_v2 = vadd.f32 %v2336_v55, %v1732_v17  ;;  %v3831_v33 = vsel %vm5356_vm7, %v3829_v9, %v3830_v24  ;;  %v3237_v27 = vor.u32 %v3236_v35, %v3233_v16  ;;  %v2493_v55 = vsel %vm5356_vm7, %v4688_v43, %v2492_v50 }
 0x19a   : > { %v1443_v8 = vadd.f32 %v1394_v34, %v1042_v37  ;;  %v3247_v17 = vor.u32 %v3246_v11, %v5969_v7  ;;  %v1045_v24 = vadd.f32 %v1044_v63, %v5590_v40  ;;  %v3924_v37 = vunpack.c.l.b16 %v3828_v58  ;;  %v4899_v11 = vld [vmem:[%s5170_s7 + $0x48] sm:$0xe] }
 0x19b   : > { %v3925_v60 = vunpack.c.l.b16 %v3831_v33  ;;  %v2584_v9 = vunpack.c.l.b16 %v2493_v55  ;;  %v2585_v50 = vunpack.c.l.b16 %v2496_v61  ;;  %v3238_v16 = vrot.slane %v3237_v27, 4 }
 0x19c   : > { %v3248_v62 = vrot.slane %v3247_v17, 4  ;;  %v3252_v35 = vrot.slane %v3250_v26, 5  ;;  %v3834_v43 = vrot.slane %v5948_v38, 5  ;;  %v2499_v58 = vrot.slane %v5052_v28, 5  ;;  %v4673_v38 = vld [vmem:[%s5170_s7 + $0x48] sm:$0xe] }
 0x19d   : > { %v2338_v56 = vpop.f32.mrf.mxu0  ;;  %v2612_v41 = vpack.c.b16 %v2585_v50, %v2584_v9  ;;  %v4915_v61 = vrot.slane %v4899_v11, 9 }
 0x19e   : > { %v1684_v4 = vpop.f32.mrf.mxu3  ;;  %4817 = vmatmul.msk.bf16.gmra.mxu2 %vm707_vm4, %v4981_v3  ;;  %v1046_v47 = vpop.f32.mrf.mxu1  ;;  %v4845_v3 = vld [vmem:[%s5170_s7 + $0x54] sm:$0xf]  ;;  %v3253_v55 = vsel %vm5182_vm3, %v3248_v62, %v3252_v35  ;;  %v4982_v35 = vld [vmem:[%s5170_s7 + $0x48] sm:$0xff] }
 0x19f   : > { %v1733_v20 = vadd.f32 %v1684_v4, %v1443_v8  ;;  %v3953_v8 = vpack.c.b16 %v3925_v60, %v3924_v37  ;;  %v3243_v4 = vsel %vm5182_vm3, %v3238_v16, %v5969_v7  ;;  %v3255_v17 = vshrl.u32 %v4845_v3, 16  ;;  %v5053_v60 = vld [vmem:[%s5170_s7 + $0x50] sm:$0x1] }
 0x1a0   : > { %v3836_v37 = vrot.slane %v3834_v43, 4  ;;  %v3837_v7 = vrot.slane %v5975_v48, 5  ;;  %v3528_v50 = vunpack.c.l.b16 %v3243_v4  ;;  %v2501_v16 = vrot.slane %v2499_v58, 4 }
 0x1a1   : > { %v1397_v25 = vpop.f32.mrf.mxu2  ;;  %v5996_v40 = vadd.f32 %v2338_v56, %v1733_v20  ;;  %v3258_v56 = vshll.u32 %v4845_v3, 16  ;;  %v3264_v20 = vshll.u32 %v5994_v14, 16  ;;  %v3529_v11 = vunpack.c.l.b16 %v3253_v55 }
 0x1a2   : > { %v1444_v34 = vadd.f32 %v1397_v25, %v1045_v24  ;;  %v1047_v24 = vadd.f32 %v1046_v47, %v5605_v10  ;;  %v2502_v25 = vrot.slane %v5053_v60, 5  ;;  %v3835_v3 = vsel %vm5356_vm7, %v4915_v61, %v3834_v43 }
 0x1a3   : > { %4882 = vmatmul.msk.bf16.gmra.mxu3 %vm707_vm4, %v3555_v23  ;;  %v3268_v23 = vshrl.u32 %v5994_v14, 16  ;;  %v3257_v10 = vrot.slane %v3255_v17, 4  ;;  %v3260_v47 = vrot.slane %v3258_v56, 5  ;;  %v6017_v48 = vrot.slane %v3264_v20, 5 }
 0x1a4   : > { %v2503_v55 = vsel %vm5356_vm7, %v2501_v16, %v2502_v25  ;;  %v3926_v61 = vunpack.c.l.b16 %v3835_v3  ;;  %v4900_v3 = vld [vmem:[%s5170_s7 + $0x54] sm:$0xe] }
 0x1a5   : > { %v2341_v63 = vpop.f32.mrf.mxu0  ;;  %v3270_v28 = vrot.slane %v3268_v23, 4  ;;  %v3261_v20 = vor.u32 %v3260_v47, %v3257_v10 }
 0x1a6   : > { %v1687_v33 = vpop.f32.mrf.mxu3  ;;  %v1049_v27 = vpop.f32.mrf.mxu1 }
 0x1a7   : > { %v1734_v26 = vadd.f32 %v1687_v33, %v1444_v34  ;;  %v4689_v34 = vrot.slane %v4673_v38, 9  ;;  %v6026_v38 = vld [vmem:[%s5170_s7 + $0x5c] sm:$0x1]  ;;  %v3271_v23 = vor.u32 %v3270_v28, %v6017_v48  ;;  %v3262_v16 = vrot.slane %v3261_v20, 4 }
 0x1a8   : > { %4931 = vmatmul.msk.bf16.gmra.mxu0 %vm707_vm4, %v3953_v8 }
 0x1a9   : > { %v1399_v9 = vpop.f32.mrf.mxu2  ;;  %4705 = vmatmul.msk.bf16.gmra.mxu1 %vm707_vm4, %v2612_v41  ;;  %v6015_v8 = vadd.f32 %v2341_v63, %v1734_v26  ;;  %v3838_v41 = vsel %vm5356_vm7, %v3836_v37, %v3837_v7  ;;  %v2500_v4 = vsel %vm5356_vm7, %v4689_v34, %v2499_v58  ;;  %v3556_v63 = vpack.c.b16 %v3529_v11, %v3528_v50  ;;  %v6034_v34 = vld [vmem:[%s5170_s7 + $0x64] sm:$0xf] }
 0x1aa   : > { %v1445_v62 = vadd.f32 %v1399_v9, %v1047_v24  ;;  %v3927_v56 = vunpack.c.l.b16 %v3838_v41  ;;  %v1050_v58 = vadd.f32 %v1049_v27, %v5481_v49  ;;  %v2586_v24 = vunpack.c.l.b16 %v2500_v4  ;;  %v4848_v9 = vld [vmem:[%s5170_s7 + $0x60] sm:$0xf] }
 0x1ab   : > { %v2587_v37 = vunpack.c.l.b16 %v2503_v55  ;;  %v3274_v7 = vshll.u32 %v6026_v38, 16  ;;  %v3841_v49 = vrot.slane %v5994_v14, 5  ;;  %v3279_v47 = vshrl.u32 %v4848_v9, 16 }
 0x1ac   : > { %v3954_v50 = vpack.c.b16 %v3927_v56, %v3926_v61  ;;  %v3282_v28 = vshll.u32 %v4848_v9, 16  ;;  %v3288_v41 = vshll.u32 %v6034_v34, 16  ;;  %v3292_v4 = vshrl.u32 %v6034_v34, 16  ;;  %v5055_v56 = vld [vmem:[%s5170_s7 + $0x5c] sm:$0x1] }
 0x1ad   : > { %v2343_v33 = vpop.f32.mrf.mxu0  ;;  %v3276_v11 = vrot.slane %v3274_v7, 5  ;;  %v2509_v20 = vrot.slane %v5055_v56, 5  ;;  %v3844_v14 = vrot.slane %v6026_v38, 5  ;;  %v3843_v7 = vrot.slane %v3841_v49, 4 }
 0x1ae   : > { %v1689_v43 = vpop.f32.mrf.mxu3  ;;  %4818 = vmatmul.msk.bf16.gmra.mxu2 %vm707_vm4, %v4982_v35  ;;  %v1051_v17 = vpop.f32.mrf.mxu1  ;;  %v2613_v35 = vpack.c.b16 %v2587_v37, %v2586_v24  ;;  %v3267_v24 = vsel %vm5182_vm3, %v3262_v16, %v6017_v48  ;;  %v3284_v9 = vrot.slane %v3282_v28, 5  ;;  %v3290_v38 = vrot.slane %v3288_v41, 5  ;;  %v6059_v16 = vld [vmem:[%s5170_s7 + $0x68] sm:$0x1] }
 0x1af   : > { %v1735_v26 = vadd.f32 %v1689_v43, %v1445_v62  ;;  %v3272_v62 = vrot.slane %v3271_v23, 4  ;;  %v3530_v56 = vunpack.c.l.b16 %v3267_v24 }
 0x1b1   : > { %v1402_v60 = vpop.f32.mrf.mxu2  ;;  %v6039_v27 = vadd.f32 %v2343_v33, %v1735_v26  ;;  %v4674_v33 = vld [vmem:[%s5170_s7 + $0x54] sm:$0xe]  ;;  %v1052_v26 = vadd.f32 %v1051_v17, %v5500_v0  ;;  %v3277_v37 = vsel %vm5182_vm3, %v3272_v62, %v3276_v11 }
 0x1b2   : > { %v1446_v25 = vadd.f32 %v1402_v60, %v1050_v58  ;;  %v4916_v58 = vrot.slane %v4900_v3, 9  ;;  %v3294_v3 = vrot.slane %v3292_v4, 4  ;;  %v3531_v48 = vunpack.c.l.b16 %v3277_v37 }
 0x1b3   : > { %4883 = vmatmul.msk.bf16.gmra.mxu3 %vm707_vm4, %v3556_v63  ;;  %6613 = vst [vmem:[#allocation4_spill] sm:$0xff] %v6039_v27  ;;  %v5054_v63 = vld [vmem:[%s5170_s7 + $0x58] sm:$0xf] }
 0x1b4   : > { %v2506_v61 = vrot.slane %v5054_v63, 5  ;;  %v4690_v63 = vrot.slane %v4674_v33, 9  ;;  %v3842_v62 = vsel %vm5356_vm7, %v4916_v58, %v3841_v49  ;;  %v3295_v4 = vor.u32 %v3294_v3, %v3290_v38 }
 0x1b5   : > { %v2346_v10 = vpop.f32.mrf.mxu0  ;;  %v3557_v58 = vpack.c.b16 %v3531_v48, %v3530_v56  ;;  %v3928_v33 = vunpack.c.l.b16 %v3842_v62 }
 0x1b6   : > { %v1692_v55 = vpop.f32.mrf.mxu3  ;;  %v1054_v43 = vpop.f32.mrf.mxu1  ;;  %v2508_v0 = vrot.slane %v2506_v61, 4 }
 0x1b7   : > { %v1736_v23 = vadd.f32 %v1692_v55, %v1446_v25  ;;  %v3281_v25 = vrot.slane %v3279_v47, 4 }
 0x1b8   : > { %4932 = vmatmul.msk.bf16.gmra.mxu0 %vm707_vm4, %v3954_v50  ;;  %v4983_v50 = vld [vmem:[%s5170_s7 + $0x54] sm:$0xff]  ;;  %v2510_v41 = vsel %vm5356_vm7, %v2508_v0, %v2509_v20  ;;  %v3848_v0 = vrot.slane %v6034_v34, 5  ;;  %v5057_v34 = vld [vmem:[%s5170_s7 + $0x68] sm:$0x1] }
 0x1b9   : > { %v1404_v60 = vpop.f32.mrf.mxu2  ;;  %4706 = vmatmul.msk.bf16.gmra.mxu1 %vm707_vm4, %v2613_v35  ;;  %v6056_v17 = vadd.f32 %v2346_v10, %v1736_v23  ;;  %v3845_v35 = vsel %vm5356_vm7, %v3843_v7, %v3844_v14  ;;  %v3285_v11 = vor.u32 %v3284_v9, %v3281_v25  ;;  %v2507_v10 = vsel %vm5356_vm7, %v4690_v63, %v2506_v61  ;;  %v4851_v9 = vld [vmem:[%s5170_s7 + $0x6c] sm:$0xf]  ;;  %v4901_v63 = vld [vmem:[%s5170_s7 + $0x60] sm:$0xe] }
 0x1ba   : > { %v1447_v55 = vadd.f32 %v1404_v60, %v1052_v26  ;;  %v3298_v23 = vshll.u32 %v6059_v16, 16  ;;  %v1055_v14 = vadd.f32 %v1054_v43, %v5521_v39  ;;  %v3929_v26 = vunpack.c.l.b16 %v3845_v35 }
 0x1bb   : > { %v2588_v37 = vunpack.c.l.b16 %v2507_v10  ;;  %v2589_v7 = vunpack.c.l.b16 %v2510_v41  ;;  %v3286_v61 = vrot.slane %v3285_v11, 4  ;;  %v3296_v25 = vrot.slane %v3295_v4, 4  ;;  %v5056_v11 = vld [vmem:[%s5170_s7 + $0x64] sm:$0xf] }
 0x1bc   : > { %v3300_v20 = vrot.slane %v3298_v23, 5  ;;  %v3955_v3 = vpack.c.b16 %v3929_v26, %v3928_v33  ;;  %v3303_v10 = vshrl.u32 %v4851_v9, 16  ;;  %v3306_v4 = vshll.u32 %v4851_v9, 16 }
 0x1bd   : > { %v2348_v27 = vpop.f32.mrf.mxu0  ;;  %v2614_v43 = vpack.c.b16 %v2589_v7, %v2588_v37  ;;  %v3291_v62 = vsel %vm5182_vm3, %v3286_v61, %v3290_v38  ;;  %v3850_v37 = vrot.slane %v3848_v0, 4  ;;  %v3851_v7 = vrot.slane %v6059_v16, 5  ;;  %v4984_v61 = vld [vmem:[%s5170_s7 + $0x60] sm:$0xff] }
 0x1be   : > { %v1694_v47 = vpop.f32.mrf.mxu3  ;;  %4819 = vmatmul.msk.bf16.gmra.mxu2 %vm707_vm4, %v4983_v50  ;;  %v1056_v28 = vpop.f32.mrf.mxu1  ;;  %v3301_v35 = vsel %vm5182_vm3, %v3296_v25, %v3300_v20  ;;  %v3532_v26 = vunpack.c.l.b16 %v3291_v62 }
 0x1bf   : > { %v1737_v49 = vadd.f32 %v1694_v47, %v1447_v55  ;;  %v6075_v55 = vld [vmem:[%s5170_s7 + $0x70] sm:$0xf]  ;;  %v2513_v47 = vrot.slane %v5056_v11, 5  ;;  %v1057_v38 = vadd.f32 %v1056_v28, %v5540_v6  ;;  %v6100_v28 = vld [vmem:[%s5170_s7 + $0x74] sm:$0x1]  ;;  %v3852_v16 = vsel %vm5356_vm7, %v3850_v37, %v3851_v7 }
 0x1c0   : > { %v3312_v23 = vshll.u32 %v6075_v55, 16 }
 0x1c1   : > { %v1407_v24 = vpop.f32.mrf.mxu2  ;;  %v6077_v50 = vadd.f32 %v2348_v27, %v1737_v49  ;;  %v4675_v27 = vld [vmem:[%s5170_s7 + $0x60] sm:$0xe]  ;;  %v3316_v49 = vshrl.u32 %v6075_v55, 16  ;;  %v2515_v20 = vrot.slane %v2513_v47, 4 }
 0x1c2   : > { %v1448_v60 = vadd.f32 %v1407_v24, %v1055_v14  ;;  %v4917_v14 = vrot.slane %v4901_v63, 9  ;;  %v3533_v24 = vunpack.c.l.b16 %v3301_v35  ;;  %v4691_v25 = vrot.slane %v4675_v27, 9 }
 0x1c3   : > { %4884 = vmatmul.msk.bf16.gmra.mxu3 %vm707_vm4, %v3557_v58  ;;  %v2516_v58 = vrot.slane %v5057_v34, 5  ;;  %v6097_v11 = vrot.slane %v3312_v23, 5  ;;  %v3318_v6 = vrot.slane %v3316_v49, 4  ;;  %v3322_v23 = vshll.u32 %v6100_v28, 16 }
 0x1c5   : > { %v2351_v39 = vpop.f32.mrf.mxu0  ;;  %v3324_v7 = vrot.slane %v3322_v23, 5 }
 0x1c6   : > { %v1697_v56 = vpop.f32.mrf.mxu3  ;;  %v1059_v48 = vpop.f32.mrf.mxu1 }
 0x1c7   : > { %v1738_v41 = vadd.f32 %v1697_v56, %v1448_v60  ;;  %v3305_v56 = vrot.slane %v3303_v10, 4  ;;  %v2514_v10 = vsel %vm5356_vm7, %v4691_v25, %v2513_v47  ;;  %v1060_v49 = vadd.f32 %v1059_v48, %v5559_v45  ;;  %v4854_v47 = vld [vmem:[%s5170_s7 + $0x78] sm:$0xf] }
 0x1c8   : > { %4933 = vmatmul.msk.bf16.gmra.mxu0 %vm707_vm4, %v3955_v3  ;;  %v3308_v3 = vrot.slane %v3306_v4, 5  ;;  %v3855_v25 = vrot.slane %v6075_v55, 5 }
 0x1c9   : > { %v1409_v33 = vpop.f32.mrf.mxu2  ;;  %4707 = vmatmul.msk.bf16.gmra.mxu1 %vm707_vm4, %v2614_v43  ;;  %v6095_v9 = vadd.f32 %v2351_v39, %v1738_v41  ;;  %v3849_v43 = vsel %vm5356_vm7, %v4917_v14, %v3848_v0  ;;  %v3558_v39 = vpack.c.b16 %v3533_v24, %v3532_v26  ;;  %v2517_v41 = vsel %vm5356_vm7, %v2515_v20, %v2516_v58 }
 0x1ca   : > { %v1449_v60 = vadd.f32 %v1409_v33, %v1057_v38  ;;  %v3309_v4 = vor.u32 %v3308_v3, %v3305_v56  ;;  %v3319_v0 = vor.u32 %v3318_v6, %v6097_v11  ;;  %v3930_v34 = vunpack.c.l.b16 %v3849_v43  ;;  %v6121_v56 = vld [vmem:[%s5170_s7 + $0x7c] sm:$0xf] }
 0x1cb   : > { %v3931_v38 = vunpack.c.l.b16 %v3852_v16  ;;  %v2590_v33 = vunpack.c.l.b16 %v2514_v10  ;;  %v2591_v26 = vunpack.c.l.b16 %v2517_v41  ;;  %v3327_v3 = vshrl.u32 %v4854_v47, 16  ;;  %v5058_v10 = vld [vmem:[%s5170_s7 + $0x70] sm:$0xf] }
 0x1cc   : > { %v3310_v58 = vrot.slane %v3309_v4, 4  ;;  %v3320_v37 = vrot.slane %v3319_v0, 4  ;;  %v3330_v6 = vshll.u32 %v4854_v47, 16  ;;  %v2520_v41 = vrot.slane %v5058_v10, 5 }
 0x1cd   : > { %v2353_v63 = vpop.f32.mrf.mxu0  ;;  %v2615_v20 = vpack.c.b16 %v2591_v26, %v2590_v33  ;;  %v3857_v23 = vrot.slane %v3855_v25, 4 }
 0x1ce   : > { %v1699_v62 = vpop.f32.mrf.mxu3  ;;  %4820 = vmatmul.msk.bf16.gmra.mxu2 %vm707_vm4, %v4984_v61  ;;  %v1061_v35 = vpop.f32.mrf.mxu1  ;;  %v3956_v61 = vpack.c.b16 %v3931_v38, %v3930_v34  ;;  %v3315_v55 = vsel %vm5182_vm3, %v3310_v58, %v6097_v11  ;;  %v3340_v34 = vshrl.u32 %v6121_v56, 16  ;;  %v3329_v11 = vrot.slane %v3327_v3, 4  ;;  %v6145_v3 = vld [vmem:[%s5170_s7 + $0x80] sm:$0x1] }
 0x1cf   : > { %v1739_v27 = vadd.f32 %v1699_v62, %v1449_v60  ;;  %v4902_v60 = vld [vmem:[%s5170_s7 + $0x6c] sm:$0xe]  ;;  %v1062_v0 = vadd.f32 %v1061_v35, %v5582_v12  ;;  %v3332_v33 = vrot.slane %v3330_v6, 5  ;;  %v2522_v47 = vrot.slane %v2520_v41, 4 }
 0x1d0   : > { %v4918_v62 = vrot.slane %v4902_v60, 9  ;;  %v3534_v12 = vunpack.c.l.b16 %v3315_v55 }
 0x1d1   : > { %v1412_v14 = vpop.f32.mrf.mxu2  ;;  %v6118_v45 = vadd.f32 %v2353_v63, %v1739_v27  ;;  %v3325_v63 = vsel %vm5182_vm3, %v3320_v37, %v3324_v7  ;;  %v3858_v27 = vrot.slane %v6100_v28, 5  ;;  %v5059_v28 = vld [vmem:[%s5170_s7 + $0x74] sm:$0x1]  ;;  %v3333_v6 = vor.u32 %v3332_v33, %v3329_v11  ;;  %v4903_v33 = vld [vmem:[%s5170_s7 + $0x78] sm:$0xe] }
 0x1d2   : > { %v1450_v24 = vadd.f32 %v1412_v14, %v1060_v49  ;;  %v3336_v49 = vshll.u32 %v6121_v56, 16  ;;  %v2523_v58 = vrot.slane %v5059_v28, 5  ;;  %v3535_v35 = vunpack.c.l.b16 %v3325_v63  ;;  %v6159_v28 = vld [vmem:[%s5170_s7 + $0x88] sm:$0xf] }
 0x1d3   : > { %4885 = vmatmul.msk.bf16.gmra.mxu3 %vm707_vm4, %v3558_v39  ;;  %v4676_v39 = vld [vmem:[%s5170_s7 + $0x6c] sm:$0xe]  ;;  %v3856_v7 = vsel %vm5356_vm7, %v4918_v62, %v3855_v25  ;;  %v3859_v60 = vsel %vm5356_vm7, %v3857_v23, %v3858_v27  ;;  %v3346_v23 = vshll.u32 %v6145_v3, 16  ;;  %v3334_v11 = vrot.slane %v3333_v6, 4 }
 0x1d4   : > { %v4692_v14 = vrot.slane %v4676_v39, 9  ;;  %v2524_v25 = vsel %vm5356_vm7, %v2522_v47, %v2523_v58  ;;  %v3932_v55 = vunpack.c.l.b16 %v3856_v7  ;;  %v3933_v63 = vunpack.c.l.b16 %v3859_v60 }
 0x1d5   : > { %v2356_v48 = vpop.f32.mrf.mxu0 }
 0x1d6   : > { %v1702_v43 = vpop.f32.mrf.mxu3  ;;  %v1064_v16 = vpop.f32.mrf.mxu1  ;;  %v2521_v10 = vsel %vm5356_vm7, %v4692_v14, %v2520_v41  ;;  %v4857_v41 = vld [vmem:[%s5170_s7 + $0x84] sm:$0xf]  ;;  %v3957_v14 = vpack.c.b16 %v3933_v63, %v3932_v55 }
 0x1d7   : > { %v1740_v4 = vadd.f32 %v1702_v43, %v1450_v24  ;;  %v4985_v24 = vld [vmem:[%s5170_s7 + $0x6c] sm:$0xff]  ;;  %v1065_v27 = vadd.f32 %v1064_v16, %v5601_v59  ;;  %v3348_v59 = vrot.slane %v3346_v23, 5  ;;  %v4919_v16 = vrot.slane %v4903_v33, 9  ;;  %v4986_v33 = vld [vmem:[%s5170_s7 + $0x78] sm:$0xff] }
 0x1d8   : > { %4934 = vmatmul.msk.bf16.gmra.mxu0 %vm707_vm4, %v3956_v61  ;;  %v3338_v61 = vrot.slane %v3336_v49, 5  ;;  %v3351_v60 = vshrl.u32 %v4857_v41, 16 }
 0x1d9   : > { %v1414_v38 = vpop.f32.mrf.mxu2  ;;  %4708 = vmatmul.msk.bf16.gmra.mxu1 %vm707_vm4, %v2615_v20  ;;  %v6138_v37 = vadd.f32 %v2356_v48, %v1740_v4  ;;  %v3342_v20 = vrot.slane %v3340_v34, 4  ;;  %v3559_v4 = vpack.c.b16 %v3535_v35, %v3534_v12  ;;  %v2592_v34 = vunpack.c.l.b16 %v2521_v10 }
 0x1da   : > { %v1451_v26 = vadd.f32 %v1414_v38, %v1062_v0  ;;  %v2593_v38 = vunpack.c.l.b16 %v2524_v25  ;;  %v3339_v7 = vsel %vm5182_vm3, %v3334_v11, %v3338_v61  ;;  %v3865_v10 = vrot.slane %v6145_v3, 5  ;;  %v4677_v25 = vld [vmem:[%s5170_s7 + $0x78] sm:$0xe] }
 0x1db   : > { %v3343_v0 = vor.u32 %v3342_v20, %v3338_v61  ;;  %v3354_v20 = vshll.u32 %v4857_v41, 16  ;;  %v5061_v41 = vld [vmem:[%s5170_s7 + $0x80] sm:$0x1] }
 0x1dc   : > { %v2616_v35 = vpack.c.b16 %v2593_v38, %v2592_v34  ;;  %v3353_v34 = vrot.slane %v3351_v60, 4 }
 0x1dd   : > { %v2358_v43 = vpop.f32.mrf.mxu0  ;;  %v3344_v47 = vrot.slane %v3343_v0, 4  ;;  %v3536_v0 = vunpack.c.l.b16 %v3339_v7  ;;  %v3356_v38 = vrot.slane %v3354_v20, 5 }
 0x1de   : > { %v1704_v39 = vpop.f32.mrf.mxu3  ;;  %4821 = vmatmul.msk.bf16.gmra.mxu2 %vm707_vm4, %v4985_v24  ;;  %v1066_v48 = vpop.f32.mrf.mxu1 }
 0x1df   : > { %v1741_v62 = vadd.f32 %v1704_v39, %v1451_v26  ;;  %v3862_v26 = vrot.slane %v6121_v56, 5  ;;  %v5060_v56 = vld [vmem:[%s5170_s7 + $0x7c] sm:$0xf]  ;;  %v1067_v61 = vadd.f32 %v1066_v48, %v5618_v32 }
 0x1e1   : > { %v1417_v49 = vpop.f32.mrf.mxu2  ;;  %v6161_v58 = vadd.f32 %v2358_v43, %v1741_v62  ;;  %v3864_v63 = vrot.slane %v3862_v26, 4  ;;  %v3360_v43 = vshll.u32 %v6159_v28, 16  ;;  %v3364_v62 = vshrl.u32 %v6159_v28, 16 }
 0x1e2   : > { %v1452_v24 = vadd.f32 %v1417_v49, %v1065_v27  ;;  %v3349_v27 = vsel %vm5182_vm3, %v3344_v47, %v3348_v59  ;;  %v3863_v23 = vsel %vm5356_vm7, %v4919_v16, %v3862_v26  ;;  %v4693_v49 = vrot.slane %v4677_v25, 9  ;;  %v4859_v26 = vld [vmem:[%s5170_s7 + $0x8c] sm:$0x1] }
 0x1e3   : > { %4886 = vmatmul.msk.bf16.gmra.mxu3 %vm707_vm4, %v3559_v4  ;;  %v2527_v4 = vrot.slane %v5060_v56, 5  ;;  %v3537_v48 = vunpack.c.l.b16 %v3349_v27  ;;  %v3866_v47 = vsel %vm5356_vm7, %v3864_v63, %v3865_v10  ;;  %v6183_v59 = vrot.slane %v3360_v43, 5 }
 0x1e4   : > { %v3934_v7 = vunpack.c.l.b16 %v3863_v23  ;;  %v3935_v20 = vunpack.c.l.b16 %v3866_v47  ;;  %v3357_v25 = vor.u32 %v3356_v38, %v3353_v34  ;;  %v3370_v43 = vshll.u32 %v4859_v26, 16 }
 0x1e5   : > { %v2361_v12 = vpop.f32.mrf.mxu0  ;;  %v3872_v38 = vrot.slane %v4859_v26, 5 }
 0x1e6   : > { %v1707_v6 = vpop.f32.mrf.mxu3  ;;  %v2684_v39 = vpop.f32.mrf.mxu1 }
 0x1e7   : > { %v1742_v55 = vadd.f32 %v1707_v6, %v1452_v24  ;;  %v2529_v24 = vrot.slane %v2527_v4, 4  ;;  %v2764_v27 = vadd.f32 %v2684_v39, %v5635_v46  ;;  %v3372_v46 = vrot.slane %v3370_v43, 5 }
 0x1e8   : > { %4935 = vmatmul.msk.bf16.gmra.mxu0 %vm707_vm4, %v3957_v14  ;;  %v2530_v14 = vrot.slane %v5061_v41, 5  ;;  %v6198_v41 = vld [vmem:[%s5170_s7 + $0x94] sm:$0xf] }
 0x1e9   : > { %v1419_v3 = vpop.f32.mrf.mxu2  ;;  %4709 = vmatmul.msk.bf16.gmra.mxu1 %vm707_vm4, %v2616_v35  ;;  %v6179_v32 = vadd.f32 %v2361_v12, %v1742_v55  ;;  %v3366_v35 = vrot.slane %v3364_v62, 4  ;;  %v2528_v12 = vsel %vm5356_vm7, %v4693_v49, %v2527_v4  ;;  %v3560_v55 = vpack.c.b16 %v3537_v48, %v3536_v0  ;;  %v4904_v62 = vld [vmem:[%s5170_s7 + $0x84] sm:$0xe]  ;;  %v4860_v49 = vld [vmem:[%s5170_s7 + $0x90] sm:$0xf] }
 0x1ea   : > { %v1453_v11 = vadd.f32 %v1419_v3, %v1067_v61  ;;  %v2531_v10 = vsel %vm5356_vm7, %v2529_v24, %v2530_v14  ;;  %v3869_v61 = vrot.slane %v6159_v28, 5  ;;  %v2594_v23 = vunpack.c.l.b16 %v2528_v12  ;;  %v5062_v12 = vld [vmem:[%s5170_s7 + $0x88] sm:$0xf] }
 0x1eb   : > { %v3367_v63 = vor.u32 %v3366_v35, %v6183_v59  ;;  %v2595_v4 = vunpack.c.l.b16 %v2531_v10  ;;  %v3358_v24 = vrot.slane %v3357_v25, 4  ;;  %v4920_v39 = vrot.slane %v4904_v62, 9 }
 0x1ec   : > { %v3871_v34 = vrot.slane %v3869_v61, 4  ;;  %v3378_v35 = vshll.u32 %v4860_v49, 16  ;;  %v2534_v10 = vrot.slane %v5062_v12, 5  ;;  %v3388_v25 = vshrl.u32 %v6198_v41, 16 }
 0x1ed   : > { %v2363_v16 = vpop.f32.mrf.mxu0  ;;  %v3368_v28 = vrot.slane %v3367_v63, 4  ;;  %v2617_v47 = vpack.c.b16 %v2595_v4, %v2594_v23  ;;  %v3870_v43 = vsel %vm5356_vm7, %v4920_v39, %v3869_v61  ;;  %v4987_v61 = vld [vmem:[%s5170_s7 + $0x84] sm:$0xff] }
 0x1ee   : > { %v1709_v60 = vpop.f32.mrf.mxu3  ;;  %4822 = vmatmul.msk.bf16.gmra.mxu2 %vm707_vm4, %v4986_v33  ;;  %v2686_v6 = vpop.f32.mrf.mxu1  ;;  %v3958_v33 = vpack.c.b16 %v3935_v20, %v3934_v7  ;;  %v3384_v7 = vshll.u32 %v6198_v41, 16  ;;  %v3873_v62 = vsel %vm5356_vm7, %v3871_v34, %v3872_v38  ;;  %v3390_v39 = vrot.slane %v3388_v25, 4 }
 0x1ef   : > { %v1743_v56 = vadd.f32 %v1709_v60, %v1453_v11  ;;  %v3375_v11 = vshrl.u32 %v4860_v49, 16  ;;  %v3373_v63 = vsel %vm5182_vm3, %v3368_v28, %v3372_v46  ;;  %v2765_v23 = vadd.f32 %v2686_v6, %v5648_v42  ;;  %v5063_v28 = vld [vmem:[%s5170_s7 + $0x8c] sm:$0x1]  ;;  %v6248_v42 = vld [vmem:[%s5170_s7 + $0x98] sm:$0x1] }
 0x1f0   : > { %v3380_v49 = vrot.slane %v3378_v35, 5  ;;  %v2537_v46 = vrot.slane %v5063_v28, 5  ;;  %v3936_v35 = vunpack.c.l.b16 %v3870_v43 }
 0x1f1   : > { %v2974_v3 = vpop.f32.mrf.mxu2  ;;  %v6207_v14 = vadd.f32 %v2363_v16, %v1743_v56  ;;  %v6221_v16 = vld [vmem:[%s6604_s2] ss:$0 sm:$0xff]  ;;  %v3363_v56 = vsel %vm5182_vm3, %v3358_v24, %v6183_v59 }
 0x1f2   : > { %v3054_v0 = vadd.f32 %v2974_v3, %v2764_v27  ;;  %v3377_v27 = vrot.slane %v3375_v11, 4  ;;  %v6237_v59 = vld [vmem:[%s6605_s3] ss:$0 sm:$0xff]  ;;  %v3538_v11 = vunpack.c.l.b16 %v3363_v56 }
 0x1f3   : > { %4887 = vmatmul.msk.bf16.gmra.mxu3 %vm707_vm4, %v3560_v55  ;;  %v4678_v55 = vld [vmem:[%s5170_s7 + $0x84] sm:$0xe] }
 0x1f4   : > { %v4694_v24 = vrot.slane %v4678_v55, 9  ;;  %v3381_v56 = vor.u32 %v3380_v49, %v3377_v27 }
 0x1f5   : > { %v4026_v48 = vpop.f32.mrf.mxu0 }
 0x1f6   : > { %v3628_v60 = vpop.f32.mrf.mxu3  ;;  %v2689_v20 = vpop.f32.mrf.mxu1  ;;  %v2535_v25 = vsel %vm5356_vm7, %v4694_v24, %v2534_v10  ;;  %v6267_v24 = vld [vmem:[%s5170_s7 + $0xa0] sm:$0xf]  ;;  %v3382_v27 = vrot.slane %v3381_v56, 4 }
 0x1f7   : > { %v3708_v26 = vadd.f32 %v3628_v60, %v3054_v0  ;;  %v2536_v0 = vrot.slane %v2534_v10, 4  ;;  %v2596_v28 = vunpack.c.l.b16 %v2535_v25  ;;  %v4863_v10 = vld [vmem:[%s5170_s7 + $0x9c] sm:$0xf] }
 0x1f8   : > { %4936 = vmatmul.msk.bf16.gmra.mxu0 %vm707_vm4, %v3958_v33  ;;  %v6241_v33 = vrot.slane %v3384_v7, 5  ;;  %v3937_v7 = vunpack.c.l.b16 %v3873_v62 }
 0x1f9   : > { %v4106_v3 = vadd.f32 %v4026_v48, %v3708_v26  ;;  %v2976_v4 = vpop.f32.mrf.mxu2  ;;  %4710 = vmatmul.msk.bf16.gmra.mxu1 %vm707_vm4, %v2617_v47  ;;  %v3539_v48 = vunpack.c.l.b16 %v3373_v63  ;;  %v2538_v26 = vsel %vm5356_vm7, %v2536_v0, %v2537_v46 }
 0x1fa   : > { %v3055_v38 = vadd.f32 %v2976_v4, %v2765_v23  ;;  %v3391_v55 = vor.u32 %v3390_v39, %v6241_v33  ;;  %v2766_v4 = vadd.f32 %v2689_v20, %v5661_v15  ;;  %v3959_v0 = vpack.c.b16 %v3937_v7, %v3936_v35 }
 0x1fb   : > { %v4142_v34 = vmul.f32 %v6221_v16, %v4106_v3  ;;  %v3561_v62 = vpack.c.b16 %v3539_v48, %v3538_v11  ;;  %v3394_v3 = vshll.u32 %v6248_v42, 16  ;;  %v4905_v11 = vld [vmem:[%s5170_s7 + $0x90] sm:$0xe]  ;;  %v3876_v15 = vrot.slane %v6198_v41, 5 }
 0x1fc   : > { %v3392_v49 = vrot.slane %v3391_v55, 4  ;;  %v3399_v20 = vshrl.u32 %v4863_v10, 16  ;;  %v3402_v48 = vshll.u32 %v4863_v10, 16  ;;  %v3387_v56 = vsel %vm5182_vm3, %v3382_v27, %v6241_v33 }
 0x1fd   : > { %v4178_v6 = vadd.f32 %v6237_v59, %v4142_v34  ;;  %v4028_v47 = vpop.f32.mrf.mxu0  ;;  %v2597_v34 = vunpack.c.l.b16 %v2538_v26  ;;  %v4921_v55 = vrot.slane %v4905_v11, 9  ;;  %v3879_v41 = vrot.slane %v6248_v42, 5  ;;  %v6291_v11 = vld [vmem:[%s5170_s7 + $0xa4] sm:$0x1] }
 0x1fe   : > { %v3630_v60 = vpop.f32.mrf.mxu3  ;;  %4823 = vmatmul.msk.bf16.gmra.mxu2 %vm707_vm4, %v4987_v61  ;;  %v2691_v12 = vpop.f32.mrf.mxu1 }
 0x1ff   : > { %v4210_v63 = vmax.f32 %v4178_v6, 0.0  ;;  %v3709_v43 = vadd.f32 %v3630_v60, %v3055_v38  ;;  %v3396_v38 = vrot.slane %v3394_v3, 5  ;;  %v3408_v6 = vshll.u32 %v6267_v24, 16 }
 0x200   : > { %v2618_v60 = vpack.c.b16 %v2597_v34, %v2596_v28  ;;  %v3401_v28 = vrot.slane %v3399_v20, 4  ;;  %v3404_v34 = vrot.slane %v3402_v48, 5  ;;  %v2767_v27 = vadd.f32 %v2691_v12, %v5674_v13 }
 0x201   : > { %4242 = vst [vmem:[%s6254_s28] sm:$0xff] %v4210_v63  ;;  %v4107_v23 = vadd.f32 %v4028_v47, %v3709_v43  ;;  %v2979_v61 = vpop.f32.mrf.mxu2  ;;  %v3412_v47 = vshrl.u32 %v6267_v24, 16  ;;  %v4679_v63 = vld [vmem:[%s5170_s7 + $0x90] sm:$0xe]  ;;  %v5064_v43 = vld [vmem:[%s5170_s7 + $0x94] sm:$0xf]  ;;  %v6285_v33 = vrot.slane %v3408_v6, 5 }
 0x202   : > { %v3056_v39 = vadd.f32 %v2979_v61, %v2766_v4  ;;  %v3397_v4 = vsel %vm5182_vm3, %v3392_v49, %v3396_v38  ;;  %v3878_v61 = vrot.slane %v3876_v15, 4  ;;  %v4988_v49 = vld [vmem:[%s5170_s7 + $0x90] sm:$0xff]  ;;  %v3540_v38 = vunpack.c.l.b16 %v3387_v56 }
 0x203   : > { %v4143_v46 = vmul.f32 %v6221_v16, %v4107_v23  ;;  %4888 = vmatmul.msk.bf16.gmra.mxu3 %vm707_vm4, %v3561_v62  ;;  %v2541_v62 = vrot.slane %v5064_v43, 5  ;;  %v3414_v10 = vrot.slane %v3412_v47, 4  ;;  %v3541_v6 = vunpack.c.l.b16 %v3397_v4 }
 0x204   : > { %v3877_v47 = vsel %vm5356_vm7, %v4921_v55, %v3876_v15  ;;  %v3880_v13 = vsel %vm5356_vm7, %v3878_v61, %v3879_v41  ;;  %v3405_v12 = vor.u32 %v3404_v34, %v3401_v28 }
 0x205   : > { %v4179_v35 = vadd.f32 %v6237_v59, %v4143_v46  ;;  %v4031_v7 = vpop.f32.mrf.mxu0  ;;  %v3562_v61 = vpack.c.b16 %v3541_v6, %v3540_v38  ;;  %v3939_v28 = vunpack.c.l.b16 %v3880_v13 }
 0x206   : > { %v3633_v25 = vpop.f32.mrf.mxu3  ;;  %v2694_v26 = vpop.f32.mrf.mxu1 }
 0x207   : > { %v4211_v3 = vmax.f32 %v4179_v35, 0.0  ;;  %v3710_v23 = vadd.f32 %v3633_v25, %v3056_v39  ;;  %v4695_v39 = vrot.slane %v4679_v63, 9  ;;  %v2543_v35 = vrot.slane %v2541_v62, 4  ;;  %v5065_v25 = vld [vmem:[%s5170_s7 + $0x98] sm:$0x1] }
 0x208   : > { %4937 = vmatmul.msk.bf16.gmra.mxu0 %vm707_vm4, %v3959_v0  ;;  %v2544_v0 = vrot.slane %v5065_v25, 5  ;;  %v4906_v25 = vld [vmem:[%s5170_s7 + $0x9c] sm:$0xe] }
 0x209   : > { %4243 = vst [vmem:[%s6254_s28 + $0x8] sm:$0xff] %v4211_v3  ;;  %v4108_v42 = vadd.f32 %v4031_v7, %v3710_v23  ;;  %v2981_v46 = vpop.f32.mrf.mxu2  ;;  %4711 = vmatmul.msk.bf16.gmra.mxu1 %vm707_vm4, %v2618_v60  ;;  %v3415_v7 = vor.u32 %v3414_v10, %v6285_v33  ;;  %v3418_v60 = vshll.u32 %v6291_v11, 16  ;;  %v2542_v43 = vsel %vm5356_vm7, %v4695_v39, %v2541_v62 }
 0x20a   : > { %v3057_v48 = vadd.f32 %v2981_v46, %v2767_v27  ;;  %v3938_v23 = vunpack.c.l.b16 %v3877_v47  ;;  %v2545_v55 = vsel %vm5356_vm7, %v2543_v35, %v2544_v0  ;;  %v2598_v34 = vunpack.c.l.b16 %v2542_v43  ;;  %v4866_v35 = vld [vmem:[%s5170_s7 + $0xa8] sm:$0xf] }
 0x20b   : > { %v4144_v20 = vmul.f32 %v6221_v16, %v4108_v42  ;;  %v3406_v10 = vrot.slane %v3405_v12, 4  ;;  %v3416_v42 = vrot.slane %v3415_v7, 4  ;;  %v3420_v27 = vrot.slane %v3418_v60, 5 }
 0x20c   : > { %v2768_v46 = vadd.f32 %v2694_v26, %v5687_v57  ;;  %v3960_v38 = vpack.c.b16 %v3939_v28, %v3938_v23  ;;  %v4922_v26 = vrot.slane %v4906_v25, 9  ;;  %v3886_v47 = vrot.slane %v6291_v11, 5 }
 0x20d   : > { %v4180_v56 = vadd.f32 %v6237_v59, %v4144_v20  ;;  %v4033_v63 = vpop.f32.mrf.mxu0  ;;  %v3883_v20 = vrot.slane %v6267_v24, 5  ;;  %v3411_v6 = vsel %vm5182_vm3, %v3406_v10, %v6285_v33  ;;  %v3421_v57 = vsel %vm5182_vm3, %v3416_v42, %v3420_v27  ;;  %v6322_v24 = vld [vmem:[%s5170_s7 + $0xac] sm:$0xf] }
 0x20e   : > { %v3635_v3 = vpop.f32.mrf.mxu3  ;;  %4824 = vmatmul.msk.bf16.gmra.mxu2 %vm707_vm4, %v4988_v49  ;;  %v2696_v15 = vpop.f32.mrf.mxu1  ;;  %v2599_v49 = vunpack.c.l.b16 %v2545_v55  ;;  %v3426_v23 = vshll.u32 %v4866_v35, 16  ;;  %v3432_v11 = vshll.u32 %v6322_v24, 16  ;;  %v3542_v28 = vunpack.c.l.b16 %v3411_v6 }
 0x20f   : > { %v4212_v41 = vmax.f32 %v4180_v56, 0.0  ;;  %v3711_v4 = vadd.f32 %v3635_v3, %v3057_v48  ;;  %v3885_v60 = vrot.slane %v3883_v20, 4  ;;  %v3423_v56 = vshrl.u32 %v4866_v35, 16  ;;  %v5066_v3 = vld [vmem:[%s5170_s7 + $0xa0] sm:$0xf] }
 0x210   : > { %v2619_v7 = vpack.c.b16 %v2599_v49, %v2598_v34  ;;  %v2548_v33 = vrot.slane %v5066_v3, 5  ;;  %v3543_v34 = vunpack.c.l.b16 %v3421_v57  ;;  %v3884_v10 = vsel %vm5356_vm7, %v4922_v26, %v3883_v20  ;;  %v4989_v49 = vld [vmem:[%s5170_s7 + $0x9c] sm:$0xff] }
 0x211   : > { %4244 = vst [vmem:[%s6254_s28 + $0x10] sm:$0xff] %v4212_v41  ;;  %v4109_v62 = vadd.f32 %v4033_v63, %v3711_v4  ;;  %v2984_v39 = vpop.f32.mrf.mxu2  ;;  %v4680_v4 = vld [vmem:[%s5170_s7 + $0x9c] sm:$0xe]  ;;  %v2769_v27 = vadd.f32 %v2696_v15, %v5700_v54  ;;  %v6340_v57 = vrot.slane %v3432_v11, 5  ;;  %v6343_v54 = vld [vmem:[%s5170_s7 + $0xb0] sm:$0x1] }
 0x212   : > { %v3058_v48 = vadd.f32 %v2984_v39, %v2768_v46  ;;  %v3887_v46 = vsel %vm5356_vm7, %v3885_v60, %v3886_v47  ;;  %v3425_v39 = vrot.slane %v3423_v56, 4  ;;  %v4696_v25 = vrot.slane %v4680_v4, 9 }
 0x213   : > { %v4145_v0 = vmul.f32 %v6221_v16, %v4109_v62  ;;  %4889 = vmatmul.msk.bf16.gmra.mxu3 %vm707_vm4, %v3562_v61  ;;  %v3436_v61 = vshrl.u32 %v6322_v24, 16  ;;  %v2550_v35 = vrot.slane %v2548_v33, 4  ;;  %v3563_v47 = vpack.c.b16 %v3543_v34, %v3542_v28 }
 0x214   : > { %v3941_v60 = vunpack.c.l.b16 %v3887_v46  ;;  %v3442_v11 = vshll.u32 %v6343_v54, 16 }
 0x215   : > { %v4181_v13 = vadd.f32 %v6237_v59, %v4145_v0  ;;  %v4036_v12 = vpop.f32.mrf.mxu0  ;;  %v5067_v0 = vld [vmem:[%s5170_s7 + $0xa4] sm:$0x1]  ;;  %v3438_v26 = vrot.slane %v3436_v61, 4 }
 0x216   : > { %v3638_v63 = vpop.f32.mrf.mxu3  ;;  %v2699_v43 = vpop.f32.mrf.mxu1 }
 0x217   : > { %v4213_v55 = vmax.f32 %v4181_v13, 0.0  ;;  %v3712_v41 = vadd.f32 %v3638_v63, %v3058_v48  ;;  %v3428_v48 = vrot.slane %v3426_v23, 5  ;;  %v2549_v63 = vsel %vm5356_vm7, %v4696_v25, %v2548_v33  ;;  %v6357_v33 = vld [vmem:[%s5170_s7 + $0xb8] sm:$0xf] }
 0x218   : > { %4938 = vmatmul.msk.bf16.gmra.mxu0 %vm707_vm4, %v3960_v38  ;;  %v2551_v38 = vrot.slane %v5067_v0, 5  ;;  %v3439_v4 = vor.u32 %v3438_v26, %v6340_v57  ;;  %v2770_v28 = vadd.f32 %v2699_v43, %v5712_v31  ;;  %v4907_v0 = vld [vmem:[%s5170_s7 + $0xa8] sm:$0xe]  ;;  %v3456_v31 = vshll.u32 %v6357_v33, 16 }
 0x219   : > { %4245 = vst [vmem:[%s6254_s28 + $0x18] sm:$0xff] %v4213_v55  ;;  %v4110_v42 = vadd.f32 %v4036_v12, %v3712_v41  ;;  %v2986_v62 = vpop.f32.mrf.mxu2  ;;  %4712 = vmatmul.msk.bf16.gmra.mxu1 %vm707_vm4, %v2619_v7  ;;  %v3940_v12 = vunpack.c.l.b16 %v3884_v10  ;;  %v3429_v23 = vor.u32 %v3428_v48, %v3425_v39  ;;  %v2600_v10 = vunpack.c.l.b16 %v2549_v63 }
 0x21a   : > { %v3059_v6 = vadd.f32 %v2986_v62, %v2769_v27  ;;  %v2552_v3 = vsel %vm5356_vm7, %v2550_v35, %v2551_v38  ;;  %v4869_v27 = vld [vmem:[%s5170_s7 + $0xb4] sm:$0xf]  ;;  %v3440_v25 = vrot.slane %v3439_v4, 4  ;;  %v3444_v35 = vrot.slane %v3442_v11, 5 }
 0x21b   : > { %v4146_v20 = vmul.f32 %v6221_v16, %v4110_v42  ;;  %v2601_v42 = vunpack.c.l.b16 %v2552_v3  ;;  %v3961_v62 = vpack.c.b16 %v3941_v60, %v3940_v12  ;;  %v3430_v46 = vrot.slane %v3429_v23, 4 }
 0x21c   : > { %v3447_v38 = vshrl.u32 %v4869_v27, 16  ;;  %v3450_v48 = vshll.u32 %v4869_v27, 16  ;;  %v3460_v43 = vshrl.u32 %v6357_v33, 16  ;;  %v4923_v12 = vrot.slane %v4907_v0, 9  ;;  %v6381_v27 = vld [vmem:[%s5170_s7 + $0xbc] sm:$0x1] }
 0x21d   : > { %v4182_v15 = vadd.f32 %v6237_v59, %v4146_v20  ;;  %v4038_v13 = vpop.f32.mrf.mxu0  ;;  %v2620_v26 = vpack.c.b16 %v2601_v42, %v2600_v10  ;;  %v3435_v23 = vsel %vm5182_vm3, %v3430_v46, %v6340_v57  ;;  %v6374_v11 = vrot.slane %v3456_v31, 5  ;;  %v4990_v46 = vld [vmem:[%s5170_s7 + $0xa8] sm:$0xff] }
 0x21e   : > { %v3640_v7 = vpop.f32.mrf.mxu3  ;;  %4825 = vmatmul.msk.bf16.gmra.mxu2 %vm707_vm4, %v4989_v49  ;;  %v2701_v56 = vpop.f32.mrf.mxu1  ;;  %v3452_v4 = vrot.slane %v3450_v48, 5  ;;  %v3893_v42 = vrot.slane %v6343_v54, 5  ;;  %v3466_v54 = vshll.u32 %v6381_v27, 16 }
 0x21f   : > { %v4214_v55 = vmax.f32 %v4182_v15, 0.0  ;;  %v3713_v41 = vadd.f32 %v3640_v7, %v3059_v6  ;;  %v3890_v15 = vrot.slane %v6322_v24, 5  ;;  %v5068_v7 = vld [vmem:[%s5170_s7 + $0xac] sm:$0xf]  ;;  %v3449_v24 = vrot.slane %v3447_v38, 4 }
 0x220   : > { %v2555_v60 = vrot.slane %v5068_v7, 5  ;;  %v3544_v38 = vunpack.c.l.b16 %v3435_v23 }
 0x221   : > { %4246 = vst [vmem:[%s6254_s28 + $0x20] sm:$0xff] %v4214_v55  ;;  %v4111_v61 = vadd.f32 %v4038_v13, %v3713_v41  ;;  %v2989_v34 = vpop.f32.mrf.mxu2  ;;  %v3445_v55 = vsel %vm5182_vm3, %v3440_v25, %v3444_v35  ;;  %v4681_v41 = vld [vmem:[%s5170_s7 + $0xa8] sm:$0xe]  ;;  %v3892_v57 = vrot.slane %v3890_v15, 4 }
 0x222   : > { %v3060_v49 = vadd.f32 %v2989_v34, %v2770_v28  ;;  %v2771_v34 = vadd.f32 %v2701_v56, %v5725_v44  ;;  %v3545_v48 = vunpack.c.l.b16 %v3445_v55  ;;  %v3891_v44 = vsel %vm5356_vm7, %v4923_v12, %v3890_v15 }
 0x223   : > { %v4147_v39 = vmul.f32 %v6221_v16, %v4111_v61  ;;  %4890 = vmatmul.msk.bf16.gmra.mxu3 %vm707_vm4, %v3563_v47  ;;  %v3462_v61 = vrot.slane %v3460_v43, 4  ;;  %v3453_v56 = vor.u32 %v3452_v4, %v3449_v24  ;;  %v3942_v23 = vunpack.c.l.b16 %v3891_v44 }
 0x224   : > { %v3468_v4 = vrot.slane %v3466_v54, 5 }
 0x225   : > { %v4183_v20 = vadd.f32 %v6237_v59, %v4147_v39  ;;  %v4041_v6 = vpop.f32.mrf.mxu0  ;;  %v2557_v39 = vrot.slane %v2555_v60, 4  ;;  %v3463_v31 = vor.u32 %v3462_v61, %v6374_v11 }
 0x226   : > { %v3643_v13 = vpop.f32.mrf.mxu3  ;;  %v2704_v47 = vpop.f32.mrf.mxu1 }
 0x227   : > { %v4215_v63 = vmax.f32 %v4183_v20, 0.0  ;;  %v3714_v3 = vadd.f32 %v3643_v13, %v3060_v49  ;;  %v5069_v49 = vld [vmem:[%s5170_s7 + $0xb0] sm:$0x1]  ;;  %v3464_v24 = vrot.slane %v3463_v31, 4  ;;  %v5070_v31 = vld [vmem:[%s5170_s7 + $0xb8] sm:$0xf] }
 0x228   : > { %4939 = vmatmul.msk.bf16.gmra.mxu0 %vm707_vm4, %v3961_v62  ;;  %v4697_v62 = vrot.slane %v4681_v41, 9  ;;  %v2558_v25 = vrot.slane %v5069_v49, 5  ;;  %v3454_v41 = vrot.slane %v3453_v56, 4  ;;  %v2562_v54 = vrot.slane %v5070_v31, 5 }
 0x229   : > { %4247 = vst [vmem:[%s6254_s28 + $0x28] sm:$0xff] %v4215_v63  ;;  %v4112_v28 = vadd.f32 %v4041_v6, %v3714_v3  ;;  %v2991_v10 = vpop.f32.mrf.mxu2  ;;  %4713 = vmatmul.msk.bf16.gmra.mxu1 %vm707_vm4, %v2620_v26  ;;  %v3894_v6 = vsel %vm5356_vm7, %v3892_v57, %v3893_v42  ;;  %v3564_v3 = vpack.c.b16 %v3545_v48, %v3544_v38  ;;  %v4872_v57 = vld [vmem:[%s5170_s7 + $0xc0] sm:$0xf]  ;;  %v3897_v38 = vrot.slane %v6357_v33, 5 }
 0x22a   : > { %v3061_v0 = vadd.f32 %v2991_v10, %v2771_v34  ;;  %v2556_v7 = vsel %vm5356_vm7, %v4697_v62, %v2555_v60  ;;  %v2559_v15 = vsel %vm5356_vm7, %v2557_v39, %v2558_v25  ;;  %v3943_v55 = vunpack.c.l.b16 %v3894_v6  ;;  %v4682_v6 = vld [vmem:[%s5170_s7 + $0xb4] sm:$0xe] }
 0x22b   : > { %v4148_v35 = vmul.f32 %v6221_v16, %v4112_v28  ;;  %v2772_v28 = vadd.f32 %v2704_v47, %v5739_v30  ;;  %v2602_v60 = vunpack.c.l.b16 %v2556_v7  ;;  %v2603_v10 = vunpack.c.l.b16 %v2559_v15  ;;  %v6409_v30 = vld [vmem:[%s5170_s7 + $0xc4] sm:$0xf] }
 0x22c   : > { %v3962_v62 = vpack.c.b16 %v3943_v55, %v3942_v23  ;;  %v3459_v39 = vsel %vm5182_vm3, %v3454_v41, %v6374_v11  ;;  %v3469_v49 = vsel %vm5182_vm3, %v3464_v24, %v3468_v4  ;;  %v3471_v48 = vshrl.u32 %v4872_v57, 16  ;;  %v4991_v4 = vld [vmem:[%s5170_s7 + $0xb4] sm:$0xff] }
 0x22d   : > { %v4184_v43 = vadd.f32 %v6237_v59, %v4148_v35  ;;  %v4043_v20 = vpop.f32.mrf.mxu0  ;;  %v2621_v35 = vpack.c.b16 %v2603_v10, %v2602_v60  ;;  %v3474_v11 = vshll.u32 %v4872_v57, 16  ;;  %v3484_v7 = vshrl.u32 %v6409_v30, 16 }
 0x22e   : > { %v3645_v26 = vpop.f32.mrf.mxu3  ;;  %4826 = vmatmul.msk.bf16.gmra.mxu2 %vm707_vm4, %v4990_v46  ;;  %v2706_v13 = vpop.f32.mrf.mxu1  ;;  %v3546_v15 = vunpack.c.l.b16 %v3459_v39  ;;  %v3547_v33 = vunpack.c.l.b16 %v3469_v49  ;;  %v3899_v41 = vrot.slane %v3897_v38, 4  ;;  %v3473_v24 = vrot.slane %v3471_v48, 4 }
 0x22f   : > { %v4216_v12 = vmax.f32 %v4184_v43, 0.0  ;;  %v3715_v63 = vadd.f32 %v3645_v26, %v3061_v0  ;;  %v4908_v0 = vld [vmem:[%s5170_s7 + $0xb4] sm:$0xe]  ;;  %v3480_v26 = vshll.u32 %v6409_v30, 16  ;;  %v2773_v23 = vadd.f32 %v2706_v13, %v5752_v51 }
 0x230   : > { %v3476_v10 = vrot.slane %v3474_v11, 5 }
 0x231   : > { %4248 = vst [vmem:[%s6254_s28 + $0x30] sm:$0xff] %v4216_v12  ;;  %v4113_v61 = vadd.f32 %v4043_v20, %v3715_v63  ;;  %v2994_v34 = vpop.f32.mrf.mxu2  ;;  %v4924_v12 = vrot.slane %v4908_v0, 9  ;;  %v3900_v63 = vrot.slane %v6381_v27, 5  ;;  %v6426_v27 = vrot.slane %v3480_v26, 5 }
 0x232   : > { %v3062_v46 = vadd.f32 %v2994_v34, %v2772_v28  ;;  %v2564_v28 = vrot.slane %v2562_v54, 4  ;;  %v5071_v34 = vld [vmem:[%s5170_s7 + $0xbc] sm:$0x1] }
 0x233   : > { %v4149_v42 = vmul.f32 %v6221_v16, %v4113_v61  ;;  %4891 = vmatmul.msk.bf16.gmra.mxu3 %vm707_vm4, %v3564_v3  ;;  %v4698_v61 = vrot.slane %v4682_v6, 9  ;;  %v2565_v60 = vrot.slane %v5071_v34, 5  ;;  %v3898_v39 = vsel %vm5356_vm7, %v4924_v12, %v3897_v38  ;;  %v6452_v34 = vld [vmem:[%s5170_s7 + $0xd0] sm:$0xf] }
 0x234   : > { %v3901_v49 = vsel %vm5356_vm7, %v3899_v41, %v3900_v63  ;;  %v4909_v41 = vld [vmem:[%s5170_s7 + $0xc0] sm:$0xe] }
 0x235   : > { %v4185_v47 = vadd.f32 %v6237_v59, %v4149_v42  ;;  %v4046_v25 = vpop.f32.mrf.mxu0  ;;  %v2563_v0 = vsel %vm5356_vm7, %v4698_v61, %v2562_v54  ;;  %v2566_v48 = vsel %vm5356_vm7, %v2564_v28, %v2565_v60  ;;  %v3945_v6 = vunpack.c.l.b16 %v3901_v49  ;;  %v4875_v28 = vld [vmem:[%s5170_s7 + $0xcc] sm:$0xf] }
 0x236   : > { %v3648_v44 = vpop.f32.mrf.mxu3  ;;  %v2709_v56 = vpop.f32.mrf.mxu1  ;;  %v2604_v54 = vunpack.c.l.b16 %v2563_v0  ;;  %v3904_v61 = vrot.slane %v6409_v30, 5  ;;  %v4683_v30 = vld [vmem:[%s5170_s7 + $0xc0] sm:$0xe]  ;;  %v3504_v0 = vshll.u32 %v6452_v34, 16 }
 0x237   : > { %v4217_v43 = vmax.f32 %v4185_v47, 0.0  ;;  %v3716_v20 = vadd.f32 %v3648_v44, %v3062_v46  ;;  %v3486_v46 = vrot.slane %v3484_v7, 4  ;;  %v3477_v44 = vor.u32 %v3476_v10, %v3473_v24 }
 0x238   : > { %4940 = vmatmul.msk.bf16.gmra.mxu0 %vm707_vm4, %v3962_v62  ;;  %v6429_v62 = vld [vmem:[%s5170_s7 + $0xc8] sm:$0x1]  ;;  %v2774_v7 = vadd.f32 %v2709_v56, %v5768_v1 }
 0x239   : > { %4249 = vst [vmem:[%s6254_s28 + $0x38] sm:$0xff] %v4217_v43  ;;  %v4114_v3 = vadd.f32 %v4046_v25, %v3716_v20  ;;  %v2996_v55 = vpop.f32.mrf.mxu2  ;;  %4714 = vmatmul.msk.bf16.gmra.mxu1 %vm707_vm4, %v2621_v35  ;;  %v3565_v25 = vpack.c.b16 %v3547_v33, %v3546_v15  ;;  %v3487_v43 = vor.u32 %v3486_v46, %v6426_v27  ;;  %v3490_v38 = vshll.u32 %v6429_v62, 16 }
 0x23a   : > { %v3063_v42 = vadd.f32 %v2996_v55, %v2773_v23  ;;  %v3944_v20 = vunpack.c.l.b16 %v3898_v39  ;;  %v2605_v33 = vunpack.c.l.b16 %v2566_v48  ;;  %v3478_v12 = vrot.slane %v3477_v44, 4 }
 0x23b   : > { %v4150_v57 = vmul.f32 %v6221_v16, %v4114_v3  ;;  %v3488_v23 = vrot.slane %v3487_v43, 4  ;;  %v3492_v55 = vrot.slane %v3490_v38, 5  ;;  %v3508_v48 = vshrl.u32 %v6452_v34, 16 }
 0x23c   : > { %v3963_v24 = vpack.c.b16 %v3945_v6, %v3944_v20  ;;  %v2622_v56 = vpack.c.b16 %v2605_v33, %v2604_v54  ;;  %v3483_v39 = vsel %vm5182_vm3, %v3478_v12, %v6426_v27  ;;  %v3906_v27 = vrot.slane %v3904_v61, 4  ;;  %v4992_v20 = vld [vmem:[%s5170_s7 + $0xc0] sm:$0xff] }
 0x23d   : > { %v4186_v51 = vadd.f32 %v6237_v59, %v4150_v57  ;;  %v4048_v13 = vpop.f32.mrf.mxu0  ;;  %v4925_v57 = vrot.slane %v4909_v41, 9  ;;  %v3493_v49 = vsel %vm5182_vm3, %v3488_v23, %v3492_v55  ;;  %v3907_v38 = vrot.slane %v6429_v62, 5 }
 0x23e   : > { %v3650_v47 = vpop.f32.mrf.mxu3  ;;  %4827 = vmatmul.msk.bf16.gmra.mxu2 %vm707_vm4, %v4991_v4  ;;  %v2711_v35 = vpop.f32.mrf.mxu1  ;;  %v3548_v6 = vunpack.c.l.b16 %v3483_v39  ;;  %v3506_v55 = vrot.slane %v3504_v0, 5  ;;  %v3510_v41 = vrot.slane %v3508_v48, 4 }
 0x23f   : > { %v4218_v31 = vmax.f32 %v4186_v51, 0.0  ;;  %v3717_v11 = vadd.f32 %v3650_v47, %v3063_v42  ;;  %v5072_v42 = vld [vmem:[%s5170_s7 + $0xc4] sm:$0xf]  ;;  %v3495_v47 = vshrl.u32 %v4875_v28, 16 }
 0x240   : > { %v2569_v46 = vrot.slane %v5072_v42, 5 }
 0x241   : > { %4250 = vst [vmem:[%s6254_s28 + $0x40] sm:$0xff] %v4218_v31  ;;  %v4115_v26 = vadd.f32 %v4048_v13, %v3717_v11  ;;  %v2999_v15 = vpop.f32.mrf.mxu2  ;;  %v6615_v31 = vld [vmem:[#allocation2_spill] sm:$0xff] }
 0x242   : > { %v3064_v3 = vadd.f32 %v2999_v15, %v2774_v7  ;;  %v2775_v11 = vadd.f32 %v2711_v35, %v6615_v31  ;;  %v2571_v7 = vrot.slane %v2569_v46, 4  ;;  %v5073_v15 = vld [vmem:[%s5170_s7 + $0xc8] sm:$0x1]  ;;  %v3905_v35 = vsel %vm5356_vm7, %v4925_v57, %v3904_v61 }
 0x243   : > { %v4151_v63 = vmul.f32 %v6221_v16, %v4115_v26  ;;  %4892 = vmatmul.msk.bf16.gmra.mxu3 %vm707_vm4, %v3565_v25  ;;  %v3498_v25 = vshll.u32 %v4875_v28, 16  ;;  %v4699_v26 = vrot.slane %v4683_v30, 9  ;;  %v2572_v54 = vrot.slane %v5073_v15, 5  ;;  %v4910_v15 = vld [vmem:[%s5170_s7 + $0xcc] sm:$0xe] }
 0x244   : > { %v3511_v30 = vor.u32 %v3510_v41, %v3506_v55 }
 0x245   : > { %v4187_v4 = vadd.f32 %v6237_v59, %v4151_v63  ;;  %v4051_v1 = vpop.f32.mrf.mxu0  ;;  %v3549_v63 = vunpack.c.l.b16 %v3493_v49  ;;  %v3500_v23 = vrot.slane %v3498_v25, 5  ;;  %v2573_v61 = vsel %vm5356_vm7, %v2571_v7, %v2572_v54 }
 0x246   : > { %v3653_v60 = vpop.f32.mrf.mxu3  ;;  %v2714_v10 = vpop.f32.mrf.mxu1  ;;  %v2607_v31 = vunpack.c.l.b16 %v2573_v61 }
 0x247   : > { %v4219_v51 = vmax.f32 %v4187_v4, 0.0  ;;  %v3718_v13 = vadd.f32 %v3653_v60, %v3064_v3  ;;  %v3497_v3 = vrot.slane %v3495_v47, 4  ;;  %v3908_v4 = vsel %vm5356_vm7, %v3906_v27, %v3907_v38 }
 0x248   : > { %4941 = vmatmul.msk.bf16.gmra.mxu0 %vm707_vm4, %v3963_v24  ;;  %v2570_v60 = vsel %vm5356_vm7, %v4699_v26, %v2569_v46  ;;  %v3947_v39 = vunpack.c.l.b16 %v3908_v4  ;;  %v2776_v0 = vadd.f32 %v2714_v10, %v5804_v52  ;;  %v3512_v38 = vrot.slane %v3511_v30, 4  ;;  %v4993_v4 = vld [vmem:[%s5170_s7 + $0xcc] sm:$0xff] }
 0x249   : > { %4251 = vst [vmem:[%s6254_s28 + $0x48] sm:$0xff] %v4219_v51  ;;  %v4116_v44 = vadd.f32 %v4051_v1, %v3718_v13  ;;  %v3001_v43 = vpop.f32.mrf.mxu2  ;;  %4715 = vmatmul.msk.bf16.gmra.mxu1 %vm707_vm4, %v2622_v56  ;;  %v4877_v1 = vld [vmem:[%s5170_s7 + $0xd4] sm:$0x1]  ;;  %v3566_v51 = vpack.c.b16 %v3549_v63, %v3548_v6  ;;  %v3946_v13 = vunpack.c.l.b16 %v3905_v35  ;;  %v3501_v49 = vor.u32 %v3500_v23, %v3497_v3 }
 0x24a   : > { %v3065_v12 = vadd.f32 %v3001_v43, %v2775_v11  ;;  %v3514_v47 = vshll.u32 %v4877_v1, 16  ;;  %v3911_v52 = vrot.slane %v6452_v34, 5  ;;  %v4926_v3 = vrot.slane %v4910_v15, 9 }
 0x24b   : > { %v4152_v33 = vmul.f32 %v6221_v16, %v4116_v44  ;;  %v2606_v44 = vunpack.c.l.b16 %v2570_v60  ;;  %v3964_v43 = vpack.c.b16 %v3947_v39, %v3946_v13  ;;  %v3502_v27 = vrot.slane %v3501_v49, 4 }
 0x24c   : > { %v3913_v34 = vrot.slane %v3911_v52, 4 }
 0x24d   : > { %v4188_v62 = vadd.f32 %v6237_v59, %v4152_v33  ;;  %v4053_v24 = vpop.f32.mrf.mxu0  ;;  %v2623_v7 = vpack.c.b16 %v2607_v31, %v2606_v44  ;;  %v3507_v63 = vsel %vm5182_vm3, %v3502_v27, %v3506_v55 }
 0x24e   : > { %v3655_v56 = vpop.f32.mrf.mxu3  ;;  %4828 = vmatmul.msk.bf16.gmra.mxu2 %vm707_vm4, %v4992_v20  ;;  %v2716_v28 = vpop.f32.mrf.mxu1  ;;  %v3516_v20 = vrot.slane %v3514_v47, 5  ;;  %v3550_v61 = vunpack.c.l.b16 %v3507_v63 }
 0x24f   : > { %v4220_v57 = vmax.f32 %v4188_v62, 0.0  ;;  %v3719_v42 = vadd.f32 %v3655_v56, %v3065_v12  ;;  %v2777_v41 = vadd.f32 %v2716_v28, %v5824_v21 }
 0x250   : > { %v3517_v35 = vsel %vm5182_vm3, %v3512_v38, %v3516_v20 }
 0x251   : > { %4252 = vst [vmem:[%s6254_s28 + $0x50] sm:$0xff] %v4220_v57  ;;  %v4117_v25 = vadd.f32 %v4053_v24, %v3719_v42  ;;  %v3004_v48 = vpop.f32.mrf.mxu2  ;;  %v3914_v24 = vrot.slane %v4877_v1, 5  ;;  %v3551_v55 = vunpack.c.l.b16 %v3517_v35  ;;  %v3912_v42 = vsel %vm5356_vm7, %v4926_v3, %v3911_v52 }
 0x252   : > { %v3066_v11 = vadd.f32 %v3004_v48, %v2776_v0  ;;  %v3948_v49 = vunpack.c.l.b16 %v3912_v42 }
 0x253   : > { %v4153_v46 = vmul.f32 %v6221_v16, %v4117_v25  ;;  %4893 = vmatmul.msk.bf16.gmra.mxu3 %vm707_vm4, %v3566_v51  ;;  %v3915_v21 = vsel %vm5356_vm7, %v3913_v34, %v3914_v24  ;;  %v3567_v39 = vpack.c.b16 %v3551_v55, %v3550_v61 }
 0x254   : > { %v3949_v30 = vunpack.c.l.b16 %v3915_v21 }
 0x255   : > { %v4189_v6 = vadd.f32 %v6237_v59, %v4153_v46  ;;  %v4056_v26 = vpop.f32.mrf.mxu0 }
 0x256   : > { %v3658_v10 = vpop.f32.mrf.mxu3  ;;  %v2719_v54 = vpop.f32.mrf.mxu1  ;;  %v3965_v44 = vpack.c.b16 %v3949_v30, %v3948_v49 }
 0x257   : > { %v4221_v33 = vmax.f32 %v4189_v6, 0.0  ;;  %v3720_v12 = vadd.f32 %v3658_v10, %v3066_v11  ;;  %v2778_v25 = vadd.f32 %v2719_v54, %v5843_v29  ;;  %v6616_v29 = vld [vmem:[#allocation3_spill] sm:$0xff] }
 0x258   : > { %4942 = vmatmul.msk.bf16.gmra.mxu0 %vm707_vm4, %v3964_v43 }
 0x259   : > { %4253 = vst [vmem:[%s6254_s28 + $0x58] sm:$0xff] %v4221_v33  ;;  %v4118_v23 = vadd.f32 %v4056_v26, %v3720_v12  ;;  %v3006_v62 = vpop.f32.mrf.mxu2  ;;  %4716 = vmatmul.msk.bf16.gmra.mxu1 %vm707_vm4, %v2623_v7 }
 0x25a   : > { %v3067_v60 = vadd.f32 %v3006_v62, %v2777_v41 }
 0x25b   : > { %v4154_v56 = vmul.f32 %v6221_v16, %v4118_v23 }
 0x25d   : > { %v4190_v36 = vadd.f32 %v6237_v59, %v4154_v56  ;;  %v4058_v57 = vpop.f32.mrf.mxu0 }
 0x25e   : > { %v3660_v28 = vpop.f32.mrf.mxu3  ;;  %4829 = vmatmul.msk.bf16.gmra.mxu2 %vm707_vm4, %v4993_v4  ;;  %v2721_v1 = vpop.f32.mrf.mxu1 }
 0x25f   : > { %v4222_v51 = vmax.f32 %v4190_v36, 0.0  ;;  %v3721_v13 = vadd.f32 %v3660_v28, %v3067_v60  ;;  %v2779_v6 = vadd.f32 %v2721_v1, %v6616_v29 }
 0x261   : > { %4254 = vst [vmem:[%s6254_s28 + $0x60] sm:$0xff] %v4222_v51  ;;  %v4119_v47 = vadd.f32 %v4058_v57, %v3721_v13  ;;  %v3009_v0 = vpop.f32.mrf.mxu2 }
 0x262   : > { %v3068_v18 = vadd.f32 %v3009_v0, %v2778_v25 }
 0x263   : > { %v4155_v48 = vmul.f32 %v6221_v16, %v4119_v47  ;;  %4894 = vmatmul.msk.bf16.gmra.mxu3 %vm707_vm4, %v3567_v39 }
 0x265   : > { %v4191_v31 = vadd.f32 %v6237_v59, %v4155_v48  ;;  %v4061_v46 = vpop.f32.mrf.mxu0 }
 0x266   : > { %v3663_v11 = vpop.f32.mrf.mxu3  ;;  %v2724_v43 = vpop.f32.mrf.mxu1 }
 0x267   : > { %v4223_v27 = vmax.f32 %v4191_v31, 0.0  ;;  %v3722_v38 = vadd.f32 %v3663_v11, %v3068_v18  ;;  %v2780_v3 = vadd.f32 %v2724_v43, %v5886_v5 }
 0x268   : > { %4943 = vmatmul.msk.bf16.gmra.mxu0 %vm707_vm4, %v3965_v44 }
 0x269   : > { %4255 = vst [vmem:[%s6254_s28 + $0x68] sm:$0xff] %v4223_v27  ;;  %v4120_v20 = vadd.f32 %v4061_v46, %v3722_v38  ;;  %v3011_v26 = vpop.f32.mrf.mxu2 }
 0x26a   : > { %v3069_v15 = vadd.f32 %v3011_v26, %v2779_v6 }
 0x26b   : > { %v4156_v7 = vmul.f32 %v6221_v16, %v4120_v20 }
 0x26d   : > { %v4192_v52 = vadd.f32 %v6237_v59, %v4156_v7  ;;  %v4063_v10 = vpop.f32.mrf.mxu0 }
 0x26e   : > { %v3665_v54 = vpop.f32.mrf.mxu3  ;;  %v2726_v33 = vpop.f32.mrf.mxu1 }
 0x26f   : > { %v4224_v12 = vmax.f32 %v4192_v52, 0.0  ;;  %v3723_v63 = vadd.f32 %v3665_v54, %v3069_v15  ;;  %v2781_v36 = vadd.f32 %v2726_v33, %v5910_v22 }
 0x271   : > { %4256 = vst [vmem:[%s6254_s28 + $0x70] sm:$0xff] %v4224_v12  ;;  %v4121_v35 = vadd.f32 %v4063_v10, %v3723_v63  ;;  %v3014_v23 = vpop.f32.mrf.mxu2  ;;  %v6542_v12 = vld [vmem:[%s6605_s3] ss:$0 sm:$0xff] }
 0x272   : > { %v3070_v62 = vadd.f32 %v3014_v23, %v2780_v3 }
 0x273   : > { %v4157_v41 = vmul.f32 %v6221_v16, %v4121_v35 }
 0x275   : > { %v4193_v34 = vadd.f32 %v6237_v59, %v4157_v41  ;;  %v4066_v24 = vpop.f32.mrf.mxu0 }
 0x276   : > { %v3668_v4 = vpop.f32.mrf.mxu3  ;;  %v2729_v56 = vpop.f32.mrf.mxu1 }
 0x277   : > { %v4225_v60 = vmax.f32 %v4193_v34, 0.0  ;;  %v3724_v61 = vadd.f32 %v3668_v4, %v3070_v62  ;;  %v2782_v30 = vadd.f32 %v2729_v56, %v5929_v19  ;;  %v6532_v19 = vld [vmem:[%s6604_s2] ss:$0 sm:$0xff] }
 0x279   : > { %4257 = vst [vmem:[%s6254_s28 + $0x78] sm:$0xff] %v4225_v60  ;;  %v4122_v55 = vadd.f32 %v4066_v24, %v3724_v61  ;;  %v3016_v57 = vpop.f32.mrf.mxu2 }
 0x27a   : > { %v3071_v5 = vadd.f32 %v3016_v57, %v2781_v36 }
 0x27b   : > { %v4158_v42 = vmul.f32 %v6221_v16, %v4122_v55 }
 0x27d   : > { %v4194_v21 = vadd.f32 %v6237_v59, %v4158_v42  ;;  %v4068_v28 = vpop.f32.mrf.mxu0 }
 0x27e   : > { %v3670_v1 = vpop.f32.mrf.mxu3  ;;  %v2731_v51 = vpop.f32.mrf.mxu1 }
 0x27f   : > { %v4226_v13 = vmax.f32 %v4194_v21, 0.0  ;;  %v3725_v39 = vadd.f32 %v3670_v1, %v3071_v5  ;;  %v2783_v43 = vadd.f32 %v2731_v51, %v5953_v53 }
 0x281   : > { %4258 = vst [vmem:[%s6254_s28 + $0x80] sm:$0xff] %v4226_v13  ;;  %v4123_v49 = vadd.f32 %v4068_v28, %v3725_v39  ;;  %v3019_v47 = vpop.f32.mrf.mxu2 }
 0x282   : > { %v3072_v22 = vadd.f32 %v3019_v47, %v2782_v30 }
 0x283   : > { %v4159_v25 = vmul.f32 %v6221_v16, %v4123_v49 }
 0x285   : > { %v4195_v0 = vadd.f32 %v6237_v59, %v4159_v25  ;;  %v4071_v48 = vpop.f32.mrf.mxu0  ;;  %v6617_v25 = vld [vmem:[#allocation4_spill] sm:$0xff] }
 0x286   : > { %v3673_v18 = vpop.f32.mrf.mxu3  ;;  %v2734_v44 = vpop.f32.mrf.mxu1 }
 0x287   : > { %v4227_v31 = vmax.f32 %v4195_v0, 0.0  ;;  %v3726_v46 = vadd.f32 %v3673_v18, %v3072_v22  ;;  %v2784_v53 = vadd.f32 %v2734_v44, %v5972_v2 }
 0x289   : > { %4259 = vst [vmem:[%s6254_s28 + $0x88] sm:$0xff] %v4227_v31  ;;  %v4124_v11 = vadd.f32 %v4071_v48, %v3726_v46  ;;  %v3021_v27 = vpop.f32.mrf.mxu2 }
 0x28a   : > { %v3073_v38 = vadd.f32 %v3021_v27, %v2783_v43 }
 0x28b   : > { %v4160_v16 = vmul.f32 %v6532_v19, %v4124_v11 }
 0x28d   : > { %v4196_v20 = vadd.f32 %v6237_v59, %v4160_v16  ;;  %v4073_v29 = vpop.f32.mrf.mxu0 }
 0x28e   : > { %v3675_v6 = vpop.f32.mrf.mxu3  ;;  %v2736_v26 = vpop.f32.mrf.mxu1 }
 0x28f   : > { %v4228_v7 = vmax.f32 %v4196_v20, 0.0  ;;  %v3727_v15 = vadd.f32 %v3675_v6, %v3073_v38  ;;  %v2785_v2 = vadd.f32 %v2736_v26, %v5996_v40 }
 0x291   : > { %4260 = vst [vmem:[%s6254_s28 + $0x90] sm:$0xff] %v4228_v7  ;;  %v4125_v52 = vadd.f32 %v4073_v29, %v3727_v15  ;;  %v3024_v10 = vpop.f32.mrf.mxu2 }
 0x292   : > { %v3074_v33 = vadd.f32 %v3024_v10, %v2784_v53 }
 0x293   : > { %v4161_v54 = vmul.f32 %v6532_v19, %v4125_v52 }
 0x295   : > { %v4197_v59 = vadd.f32 %v6542_v12, %v4161_v54  ;;  %v4076_v63 = vpop.f32.mrf.mxu0 }
 0x296   : > { %v3678_v35 = vpop.f32.mrf.mxu3  ;;  %v2739_v3 = vpop.f32.mrf.mxu1 }
 0x297   : > { %v4229_v23 = vmax.f32 %v4197_v59, 0.0  ;;  %v3728_v41 = vadd.f32 %v3678_v35, %v3074_v33  ;;  %v2786_v5 = vadd.f32 %v2739_v3, %v6015_v8 }
 0x299   : > { %4261 = vst [vmem:[%s6254_s28 + $0x98] sm:$0xff] %v4229_v23  ;;  %v4126_v62 = vadd.f32 %v4076_v63, %v3728_v41  ;;  %v3026_v34 = vpop.f32.mrf.mxu2 }
 0x29a   : > { %v3075_v4 = vadd.f32 %v3026_v34, %v2785_v2 }
 0x29b   : > { %v4162_v24 = vmul.f32 %v6532_v19, %v4126_v62 }
 0x29d   : > { %v4198_v56 = vadd.f32 %v6542_v12, %v4162_v24  ;;  %v4078_v60 = vpop.f32.mrf.mxu0 }
 0x29e   : > { %v3680_v61 = vpop.f32.mrf.mxu3  ;;  %v2741_v55 = vpop.f32.mrf.mxu1 }
 0x29f   : > { %v4230_v36 = vmax.f32 %v4198_v56, 0.0  ;;  %v3729_v57 = vadd.f32 %v3680_v61, %v3075_v4  ;;  %v2787_v22 = vadd.f32 %v2741_v55, %v6617_v25 }
 0x2a1   : > { %4262 = vst [vmem:[%s6254_s28 + $0xa0] sm:$0xff] %v4230_v36  ;;  %v4127_v42 = vadd.f32 %v4078_v60, %v3729_v57  ;;  %v3029_v21 = vpop.f32.mrf.mxu2 }
 0x2a2   : > { %v3076_v40 = vadd.f32 %v3029_v21, %v2786_v5 }
 0x2a3   : > { %v4163_v28 = vmul.f32 %v6532_v19, %v4127_v42 }
 0x2a5   : > { %v4199_v1 = vadd.f32 %v6542_v12, %v4163_v28  ;;  %v4081_v51 = vpop.f32.mrf.mxu0 }
 0x2a6   : > { %v3683_v13 = vpop.f32.mrf.mxu3  ;;  %v2744_v39 = vpop.f32.mrf.mxu1 }
 0x2a7   : > { %v4231_v49 = vmax.f32 %v4199_v1, 0.0  ;;  %v3730_v30 = vadd.f32 %v3683_v13, %v3076_v40  ;;  %v2788_v16 = vadd.f32 %v2744_v39, %v6056_v17 }
 0x2a9   : > { %4263 = vst [vmem:[%s6254_s28 + $0xa8] sm:$0xff] %v4231_v49  ;;  %v4128_v47 = vadd.f32 %v4081_v51, %v3730_v30  ;;  %v3031_v0 = vpop.f32.mrf.mxu2 }
 0x2aa   : > { %v3077_v8 = vadd.f32 %v3031_v0, %v2787_v22 }
 0x2ab   : > { %v4164_v48 = vmul.f32 %v6532_v19, %v4128_v47 }
 0x2ad   : > { %v4200_v18 = vadd.f32 %v6542_v12, %v4164_v48  ;;  %v4083_v44 = vpop.f32.mrf.mxu0 }
 0x2ae   : > { %v3685_v31 = vpop.f32.mrf.mxu3  ;;  %v2746_v46 = vpop.f32.mrf.mxu1 }
 0x2af   : > { %v4232_v11 = vmax.f32 %v4200_v18, 0.0  ;;  %v3731_v43 = vadd.f32 %v3685_v31, %v3077_v8  ;;  %v2789_v54 = vadd.f32 %v2746_v46, %v6077_v50 }
 0x2b1   : > { %4264 = vst [vmem:[%s6254_s28 + $0xb0] sm:$0xff] %v4232_v11  ;;  %v4129_v27 = vadd.f32 %v4083_v44, %v3731_v43  ;;  %v3034_v38 = vpop.f32.mrf.mxu2 }
 0x2b2   : > { %v3078_v29 = vadd.f32 %v3034_v38, %v2788_v16 }
 0x2b3   : > { %v4165_v20 = vmul.f32 %v6532_v19, %v4129_v27 }
 0x2b5   : > { %v4201_v6 = vadd.f32 %v6542_v12, %v4165_v20  ;;  %v4086_v26 = vpop.f32.mrf.mxu0 }
 0x2b6   : > { %v3688_v7 = vpop.f32.mrf.mxu3  ;;  %v2749_v15 = vpop.f32.mrf.mxu1 }
 0x2b7   : > { %v4233_v52 = vmax.f32 %v4201_v6, 0.0  ;;  %v3732_v53 = vadd.f32 %v3688_v7, %v3078_v29  ;;  %v2790_v34 = vadd.f32 %v2749_v15, %v6095_v9 }
 0x2b9   : > { %4265 = vst [vmem:[%s6254_s28 + $0xb8] sm:$0xff] %v4233_v52  ;;  %v4130_v10 = vadd.f32 %v4086_v26, %v3732_v53  ;;  %v3036_v33 = vpop.f32.mrf.mxu2 }
 0x2ba   : > { %v3079_v17 = vadd.f32 %v3036_v33, %v2789_v54 }
 0x2bb   : > { %v4166_v59 = vmul.f32 %v6532_v19, %v4130_v10 }
 0x2bd   : > { %v4202_v63 = vadd.f32 %v6542_v12, %v4166_v59  ;;  %v4088_v35 = vpop.f32.mrf.mxu0 }
 0x2be   : > { %v3690_v3 = vpop.f32.mrf.mxu3  ;;  %v2751_v23 = vpop.f32.mrf.mxu1 }
 0x2bf   : > { %v4234_v41 = vmax.f32 %v4202_v63, 0.0  ;;  %v3733_v62 = vadd.f32 %v3690_v3, %v3079_v17  ;;  %v2791_v5 = vadd.f32 %v2751_v23, %v6118_v45 }
 0x2c1   : > { %4266 = vst [vmem:[%s6254_s28 + $0xc0] sm:$0xff] %v4234_v41  ;;  %v4131_v2 = vadd.f32 %v4088_v35, %v3733_v62  ;;  %v3039_v24 = vpop.f32.mrf.mxu2 }
 0x2c2   : > { %v3080_v50 = vadd.f32 %v3039_v24, %v2790_v34 }
 0x2c3   : > { %v4167_v4 = vmul.f32 %v6532_v19, %v4131_v2 }
 0x2c5   : > { %v4203_v56 = vadd.f32 %v6542_v12, %v4167_v4  ;;  %v4091_v60 = vpop.f32.mrf.mxu0 }
 0x2c6   : > { %v3693_v61 = vpop.f32.mrf.mxu3  ;;  %v2754_v57 = vpop.f32.mrf.mxu1 }
 0x2c7   : > { %v4235_v55 = vmax.f32 %v4203_v56, 0.0  ;;  %v3734_v36 = vadd.f32 %v3693_v61, %v3080_v50  ;;  %v2792_v30 = vadd.f32 %v2754_v57, %v6138_v37 }
 0x2c9   : > { %4267 = vst [vmem:[%s6254_s28 + $0xc8] sm:$0xff] %v4235_v55  ;;  %v4132_v42 = vadd.f32 %v4091_v60, %v3734_v36  ;;  %v3041_v21 = vpop.f32.mrf.mxu2 }
 0x2ca   : > { %v3081_v9 = vadd.f32 %v3041_v21, %v2791_v5 }
 0x2cb   : > { %v4168_v28 = vmul.f32 %v6532_v19, %v4132_v42 }
 0x2cd   : > { %v4204_v40 = vadd.f32 %v6542_v12, %v4168_v28  ;;  %v4093_v1 = vpop.f32.mrf.mxu0 }
 0x2ce   : > { %v3695_v51 = vpop.f32.mrf.mxu3  ;;  %v2756_v25 = vpop.f32.mrf.mxu1 }
 0x2cf   : > { %v4236_v13 = vmax.f32 %v4204_v40, 0.0  ;;  %v3735_v39 = vadd.f32 %v3695_v51, %v3081_v9  ;;  %v2793_v46 = vadd.f32 %v2756_v25, %v6161_v58 }
 0x2d1   : > { %4268 = vst [vmem:[%s6254_s28 + $0xd0] sm:$0xff] %v4236_v13  ;;  %v4133_v49 = vadd.f32 %v4093_v1, %v3735_v39  ;;  %v3044_v47 = vpop.f32.mrf.mxu2 }
 0x2d2   : > { %v3082_v45 = vadd.f32 %v3044_v47, %v2792_v30 }
 0x2d3   : > { %v4169_v22 = vmul.f32 %v6532_v19, %v4133_v49 }
 0x2d5   : > { %v4205_v0 = vadd.f32 %v6542_v12, %v4169_v22  ;;  %v4096_v48 = vpop.f32.mrf.mxu0 }
 0x2d6   : > { %v3698_v8 = vpop.f32.mrf.mxu3  ;;  %v2759_v27 = vpop.f32.mrf.mxu1 }
 0x2d7   : > { %v4237_v18 = vmax.f32 %v4205_v0, 0.0  ;;  %v3736_v44 = vadd.f32 %v3698_v8, %v3082_v45  ;;  %v2794_v7 = vadd.f32 %v2759_v27, %v6179_v32 }
 0x2d9   : > { %4269 = vst [vmem:[%s6254_s28 + $0xd8] sm:$0xff] %v4237_v18  ;;  %v4134_v31 = vadd.f32 %v4096_v48, %v3736_v44  ;;  %v3046_v11 = vpop.f32.mrf.mxu2 }
 0x2da   : > { %v3083_v37 = vadd.f32 %v3046_v11, %v2793_v46 }
 0x2db   : > { %v4170_v43 = vmul.f32 %v6532_v19, %v4134_v31 }
 0x2dd   : > { %v4206_v16 = vadd.f32 %v6542_v12, %v4170_v43  ;;  %v4098_v38 = vpop.f32.mrf.mxu0 }
 0x2de   : > { %v3700_v20 = vpop.f32.mrf.mxu3  ;;  %v2761_v10 = vpop.f32.mrf.mxu1 }
 0x2df   : > { %v4238_v29 = vmax.f32 %v4206_v16, 0.0  ;;  %v3737_v6 = vadd.f32 %v3700_v20, %v3083_v37  ;;  %v2795_v35 = vadd.f32 %v2761_v10, %v6207_v14 }
 0x2e1   : > { %4270 = vst [vmem:[%s6254_s28 + $0xe0] sm:$0xff] %v4238_v29  ;;  %v4135_v26 = vadd.f32 %v4098_v38, %v3737_v6  ;;  %v3049_v15 = vpop.f32.mrf.mxu2 }
 0x2e2   : > { %v3084_v58 = vadd.f32 %v3049_v15, %v2794_v7 }
 0x2e3   : > { %v4171_v52 = vmul.f32 %v6532_v19, %v4135_v26 }
 0x2e5   : > { %v4207_v53 = vadd.f32 %v6542_v12, %v4171_v52  ;;  %v4101_v54 = vpop.f32.mrf.mxu0 }
 0x2e6   : > { %v3703_v33 = vpop.f32.mrf.mxu3 }
 0x2e7   : > { %v4239_v59 = vmax.f32 %v4207_v53, 0.0  ;;  %v3738_v17 = vadd.f32 %v3703_v33, %v3084_v58 }
 0x2e9   : > { %4271 = vst [vmem:[%s6254_s28 + $0xe8] sm:$0xff] %v4239_v59  ;;  %v4136_v63 = vadd.f32 %v4101_v54, %v3738_v17  ;;  %v3051_v3 = vpop.f32.mrf.mxu2 }
 0x2ea   : > { %v3085_v23 = vadd.f32 %v3051_v3, %v2795_v35 }
 0x2eb   : > { %v4172_v32 = vmul.f32 %v6532_v19, %v4136_v63 }
 0x2ed   : > { %v4208_v41 = vadd.f32 %v6542_v12, %v4172_v32  ;;  %v4103_v24 = vpop.f32.mrf.mxu0 }
 0x2ee   : > { %v3705_v62 = vpop.f32.mrf.mxu3 }
 0x2ef   : > { %v4240_v2 = vmax.f32 %v4208_v41, 0.0  ;;  %v3739_v34 = vadd.f32 %v3705_v62, %v3085_v23 }
 0x2f1   : > { %4272 = vst [vmem:[%s6254_s28 + $0xf0] sm:$0xff] %v4240_v2  ;;  %v4137_v4 = vadd.f32 %v4103_v24, %v3739_v34 }
 0x2f3   : > { %v4173_v50 = vmul.f32 %v6532_v19, %v4137_v4 }
 0x2f5   : > { %v4209_v56 = vadd.f32 %v6542_v12, %v4173_v50 }
 0x2f7   : > { %v4241_v60 = vmax.f32 %v4209_v56, 0.0 }
 0x2f9   : > { %4273 = vst [vmem:[%s6254_s28 + $0xf8] sm:$0xff] %v4241_v60 }
 0x2fa PF: > { %s14_s17 = sadd.s32 1, %s5098_s17   ;;  %s6618_s15 = smov %s5094_s16 }
 0x2fb   : > { %p11_p6 = scmp.ge.s32.totalorder %s14_s17, 4   ;;  %s6619_s16 = smov %s6621_s18 }
 0x2fd   :  { %13 = sbr.rel (!%p11_p6) target bundleno = 2 (0x2), region = 77 }

</bundles_post_ra>
